<compile_context>
chip_gen: v7x
topology: tpu7x:2x2x1
jax: 0.10.0
libtpu: 0.0.40
codegen_flags: <defaults>
</compile_context>

<pallas_src>
import math
from functools import partial

import jax
import jax.numpy as jnp
from jax import lax
from jax.experimental import pallas as pl
from jax.experimental.pallas import tpu as pltpu

BN_EPS = 1e-5
LANES = 128
ACC_BUDGET_BYTES = 192 * 1024   # keep the per-tile f32 accumulator ~vreg-sized


def _round_up(x, m):
    return (x + m - 1) // m * m


def _pick_tile_rows(hout, wout, coutp, acc_budget=ACC_BUDGET_BYTES):
    """Output-row tile height.  Picks the largest divisor of hout whose f32
    accumulator (tr*wout, coutp) fits the budget; flattened tiles must be
    sublane-aligned (tr*wout % 8 == 0) unless the tile spans the whole image."""
    legal = [hout]
    for tr in range(1, hout):
        if hout % tr == 0 and (tr * wout) % 8 == 0:
            legal.append(tr)
    within = [tr for tr in legal if tr * wout * coutp * 4 <= acc_budget]
    return max(within) if within else min(legal)


def _vmem_limit_bytes(needed_bytes):
    """Per-call VMEM limit from actual block sizes, capped at ~3/4 of the
    detected physical VMEM (handles v7x's 64 MiB vs v5e/v6e's 128 MiB)."""
    cap = 128 << 20
    try:
        info = pltpu.get_tpu_info()
        for attr in ("vmem_capacity_bytes", "vmem_size_bytes", "vmem_bytes"):
            v = getattr(info, attr, None)
            if v:
                cap = int(v)
                break
    except Exception:
        pass
    budget = (cap * 3) // 4
    limit = max(needed_bytes + (4 << 20), 16 << 20)
    limit = min(limit, budget)
    limit = max(limit, needed_bytes + (2 << 20))   # never clamp below working set
    return int(limit)


# ---------------------------------------------------------------------------
# Pallas kernel: fused conv (single large-K MXU dot) + folded BN bias
#                (+ residual) (+ ReLU), dense (m, coutp) store
# ---------------------------------------------------------------------------
def _fused_conv_kernel(*refs, k, stride, tile_rows, wout, relu, has_residual):
    if has_residual:
        ph_ref, w_ref, b_ref, r_ref, o_ref = refs
    else:
        ph_ref, w_ref, b_ref, o_ref = refs
        r_ref = None

    kkcin, coutp = w_ref.shape
    cin = kkcin // (k * k)
    m = tile_rows * wout
    row0 = pl.multiple_of(pl.program_id(1) * tile_rows, tile_rows)

    # Fused im2col: gather the k*k taps of this row tile from the VMEM-resident
    # stride-phase slab and stack them along the contraction axis.  cin is
    # lane-aligned (multiple of 128), so the concat is an aligned lane concat
    # and the whole tile becomes ONE MXU dot with K = k*k*cin.
    taps = []
    for kh in range(k):
        for kw in range(k):
            p_idx = (kh % stride) * stride + (kw % stride)   # stride-phase slab
            dh, dw = kh // stride, kw // stride              # in-phase offset
            t = ph_ref[p_idx, pl.ds(row0 + dh, tile_rows), pl.ds(dw, wout), :]
            taps.append(t.reshape(m, cin))
    patch = taps[0] if len(taps) == 1 else jnp.concatenate(taps, axis=-1)

    acc = jnp.dot(patch, w_ref[...], preferred_element_type=jnp.float32)

    # f32 epilogue on the VPU: BN shift (scale folded into weights already),
    # optional residual add (bf16 in HBM, f32 in-register), optional ReLU.
    acc = acc + b_ref[...]
    if has_residual:
        acc = acc + r_ref[0].astype(jnp.float32)
    if relu:
        acc = jnp.maximum(acc, 0.0)

    # Lane/sublane-dense (m, coutp) store; NHWC reshape happens in the wrapper.
    o_ref[0] = acc.astype(o_ref.dtype)


# ---------------------------------------------------------------------------
# Wrapper-side layout helpers (pure JAX glue: pads / slices only, ~1x bytes)
# ---------------------------------------------------------------------------
def make_phases(x_nhwc, k, stride, pad):
    """Rearrange the padded NHWC input into stride-phase slabs so that every
    conv tap is a contiguous slice inside the kernel (no strided / im2col reads
    in HBM).  The slab width is padded to a sublane multiple (8)."""
    n, h, w, c = x_nhwc.shape
    hout = (h + 2 * pad - k) // stride + 1
    wout = (w + 2 * pad - k) // stride + 1
    xp = jnp.pad(x_nhwc, ((0, 0), (pad, pad), (pad, pad), (0, 0)))
    hn = hout + (k - 1) // stride
    wn = _round_up(wout + (k - 1) // stride, 8)
    phs = []
    for ph in range(stride):
        for pw in range(stride):
            sub = xp[:, ph::stride, pw::stride, :][:, :hn, :wn, :]
            dh, dw = hn - sub.shape[1], wn - sub.shape[2]
            if dh or dw:
                sub = jnp.pad(sub, ((0, 0), (0, dh), (0, dw), (0, 0)))
            phs.append(sub)
    phases = jnp.stack(phs, axis=1)          # (N, s*s, hn, wn, C)
    return phases, hout, wout


def conv_w_folded(w_oihw, scale, cinp, coutp):
    """(Cout,Cin,KH,KW) -> (KH*KW*Cin_pad, Cout_pad) bf16 with the BN scale
    folded in; row order matches the kernel's (kh, kw, cin) tap concatenation."""
    cout, cin, kh, kw = w_oihw.shape
    w = jnp.transpose(w_oihw, (2, 3, 1, 0)) * scale[None, None, None, :]
    w = jnp.pad(w, ((0, 0), (0, 0), (0, cinp - cin), (0, coutp - cout)))
    return w.reshape(kh * kw * cinp, coutp).astype(jnp.bfloat16)


def fused_conv_bn(x_nhwc, w_oihw, bn, *, stride, pad, residual=None, relu=False,
                  out_dtype=jnp.bfloat16):
    """conv + folded BatchNorm (+ residual) (+ ReLU) as one Pallas kernel.

    x_nhwc must have its channel dim padded to a multiple of 128 (lane-dense).
    Returns ((N, Hout*Wout, Cout_pad) array, (Hout, Wout)); padded channels
    are exact zeros.  `residual`, if given, must be (N, Hout*Wout, Cout_pad)."""
    cout, _, k, _ = w_oihw.shape

    # 1x1 strided conv: the stride is just a spatial subsample -> no halo.
    if k == 1 and stride > 1:
        x_nhwc = x_nhwc[:, ::stride, ::stride, :]
        stride = 1

    gamma, beta, mean, var = bn
    scale = gamma / jnp.sqrt(var + BN_EPS)
    bias = beta - mean * scale

    n, h, w, cinp = x_nhwc.shape
    assert cinp % LANES == 0, "input channels must be lane-padded"
    coutp = _round_up(cout, LANES)
    kkcin = k * k * cinp

    w_flat = conv_w_folded(w_oihw, scale, cinp, coutp)                 # bf16
    bias_p = jnp.pad(bias, (0, coutp - cout)).reshape(1, coutp).astype(jnp.float32)

    phases, hout, wout = make_phases(x_nhwc.astype(jnp.bfloat16), k, stride, pad)
    _, n_ph, hn, wn, _ = phases.shape
    phases = phases.reshape(n * n_ph, hn, wn, cinp)                    # 4D blocks

    tr = _pick_tile_rows(hout, wout, coutp)
    m_tile = tr * wout
    num_row_tiles = hout // tr

    ph_spec = pl.BlockSpec((n_ph, hn, wn, cinp), lambda i, j: (i, 0, 0, 0))
    w_spec = pl.BlockSpec((kkcin, coutp), lambda i, j: (0, 0))
    b_spec = pl.BlockSpec((1, coutp), lambda i, j: (0, 0))
    o_spec = pl.BlockSpec((1, m_tile, coutp), lambda i, j: (i, j, 0))

    in_specs = [ph_spec, w_spec, b_spec]
    args = [phases, w_flat, bias_p]
    has_res = residual is not None
    if has_res:
        assert residual.shape == (n, hout * wout, coutp), residual.shape
        residual = residual.astype(jnp.bfloat16)   # halve residual HBM bytes
        in_specs.append(pl.BlockSpec((1, m_tile, coutp), lambda i, j: (i, j, 0)))
        args.append(residual)

    kernel = partial(_fused_conv_kernel, k=k, stride=stride, tile_rows=tr,
                     wout=wout, relu=relu, has_residual=has_res)

    out_isz = jnp.dtype(out_dtype).itemsize
    # VMEM needed by the double-buffered pipeline + in-kernel working set.
    needed = (2 * n_ph * hn * wn * cinp * 2          # phase slab (bf16) x2
              + 2 * kkcin * coutp * 2                # weights (bf16) x2
              + 2 * coutp * 4                        # bias x2
              + 2 * m_tile * coutp * out_isz         # out block x2
              + (2 * m_tile * coutp * 2 if has_res else 0)
              + m_tile * kkcin * 2                   # concatenated patch
              + 2 * m_tile * coutp * 4)              # f32 accumulator headroom

    flops = 2 * n * hout * wout * kkcin * coutp
    bytes_accessed = (phases.size * 2 + w_flat.size * 2 + bias_p.size * 4
                      + (residual.size * 2 if has_res else 0)
                      + n * hout * wout * coutp * out_isz)

    out = pl.pallas_call(
        kernel,
        out_shape=jax.ShapeDtypeStruct((n, hout * wout, coutp), out_dtype),
        grid_spec=pltpu.PrefetchScalarGridSpec(
            num_scalar_prefetch=0,
            grid=(n, num_row_tiles),
            in_specs=in_specs,
            out_specs=o_spec,
        ),
        compiler_params=pltpu.CompilerParams(
            # On v7x, pltpu.CORE_PARALLEL on the batch axis would shard the
            # grid across the 2 TensorCores; plain "parallel" is portable.
            dimension_semantics=("parallel", "parallel"),
            vmem_limit_bytes=_vmem_limit_bytes(needed),
        ),
        cost_estimate=pl.CostEstimate(
            flops=int(flops), transcendentals=0,
            bytes_accessed=int(bytes_accessed)),
    )(*args)
    return out, (hout, wout)


# ---------------------------------------------------------------------------
# Parameter init (deterministic, inference-mode BN stats)
# ---------------------------------------------------------------------------
def init_basic_block(key, in_planes, planes, stride):
    ks = jax.random.split(key, 9)

    def conv_init(k, cout, cin, ksz):
        fan_in = cin * ksz * ksz
        return jax.random.normal(k, (cout, cin, ksz, ksz),
                                 jnp.float32) * math.sqrt(2.0 / fan_in)

    def bn_init(k1, k2, c):
        gamma = 1.0 + 0.1 * jax.random.normal(k1, (c,), jnp.float32)
        beta = 0.1 * jax.random.normal(k2, (c,), jnp.float32)
        mean = 0.05 * jnp.arange(c, dtype=jnp.float32)
        var = 1.0 + 0.01 * jnp.arange(c, dtype=jnp.float32)
        return gamma, beta, mean, var

    params = {
        "conv1": conv_init(ks[0], planes, in_planes, 3),
        "bn1": bn_init(ks[1], ks[2], planes),
        "conv2": conv_init(ks[3], planes, planes, 3),
        "bn2": bn_init(ks[4], ks[5], planes),
        "stride": stride,
        "in_planes": in_planes,
        "planes": planes,
    }
    if stride != 1 or in_planes != planes:
        params["conv_sc"] = conv_init(ks[6], planes, in_planes, 1)
        params["bn_sc"] = bn_init(ks[7], ks[8], planes)
    return params


# ---------------------------------------------------------------------------
# BasicBlock forward (wrappers around the Pallas kernels)
# ---------------------------------------------------------------------------
def basic_block_apply(x_nhwc, params, out_dtype=jnp.bfloat16):
    """Chain-friendly form: NHWC in, channel-padded NHWC out (padded channels
    are zeros).  Inter-stage activations stay bf16 / lane-padded."""
    n, h, w, cin = x_nhwc.shape
    stride = params["stride"]
    in_planes, planes = params["in_planes"], params["planes"]
    cinp = _round_up(in_planes, LANES)
    coutp = _round_up(planes, LANES)

    # Channel-pad the block input once (chained blocks already arrive padded).
    if cin < cinp:
        x_nhwc = jnp.pad(x_nhwc, ((0, 0), (0, 0), (0, 0), (0, cinp - cin)))
    x_bf16 = x_nhwc.astype(jnp.bfloat16)

    # out1 = relu(bn1(conv1(x)))  -- bf16, lane-padded, feeds conv2 directly
    out1_flat, (h1, w1) = fused_conv_bn(x_bf16, params["conv1"], params["bn1"],
                                        stride=stride, pad=1, relu=True,
                                        out_dtype=jnp.bfloat16)
    out1 = out1_flat.reshape(n, h1, w1, coutp)       # free metadata reshape

    # shortcut(x): 1x1 projection conv + BN (bf16), or the identity input
    # itself (no padded-f32 HBM round trip -- just a free flat reshape).
    if "conv_sc" in params:
        sc_flat, _ = fused_conv_bn(x_bf16, params["conv_sc"], params["bn_sc"],
                                   stride=stride, pad=0, relu=False,
                                   out_dtype=jnp.bfloat16)
    else:
        sc_flat = x_bf16.reshape(n, h * w, cinp)     # cinp == coutp here

    # out = relu(bn2(conv2(out1)) + shortcut)   -- residual fused into kernel
    out2_flat, (h2, w2) = fused_conv_bn(out1, params["conv2"], params["bn2"],
                                        stride=1, pad=1, residual=sc_flat,
                                        relu=True, out_dtype=out_dtype)
    return out2_flat.reshape(n, h2, w2, coutp)


def basic_block_forward(x_nchw, params):
    """PyTorch-interface form: NCHW f32 in/out (conversion at the boundary)."""
    x = jnp.transpose(x_nchw, (0, 2, 3, 1)).astype(jnp.float32)
    out = basic_block_apply(x, params, out_dtype=jnp.float32)
    out = out[..., :params["planes"]]              # drop lane-padding channels
    return jnp.transpose(out, (0, 3, 1, 2))        # back to NCHW


# ---------------------------------------------------------------------------
# Reference with matching numerics (bf16 MXU inputs, f32 accumulate/epilogue,
# bf16 inter-stage hand-offs and bf16 residual)
# ---------------------------------------------------------------------------
def reference_forward(x_nchw, params):
    def conv_bn(x, w_oihw, bn, stride, pad):
        gamma, beta, mean, var = bn
        scale = gamma / jnp.sqrt(var + BN_EPS)
        bias = beta - mean * scale
        w = (jnp.transpose(w_oihw, (2, 3, 1, 0)) * scale).astype(jnp.bfloat16)
        y = lax.conv_general_dilated(
            x.astype(jnp.bfloat16), w, (stride, stride),
            ((pad, pad), (pad, pad)),
            dimension_numbers=("NHWC", "HWIO", "NHWC"),
            preferred_element_type=jnp.float32)
        return y + bias

    x = jnp.transpose(x_nchw, (0, 2, 3, 1)).astype(jnp.float32)
    out1 = jax.nn.relu(conv_bn(x, params["conv1"], params["bn1"],
                               params["stride"], 1))
    out1 = out1.astype(jnp.bfloat16)               # matches kernel bf16 hand-off
    out2 = conv_bn(out1, params["conv2"], params["bn2"], 1, 1)
    if "conv_sc" in params:
        sc = conv_bn(x, params["conv_sc"], params["bn_sc"], params["stride"], 0)
    else:
        sc = x
    sc = sc.astype(jnp.bfloat16).astype(jnp.float32)   # kernel residual is bf16
    return jnp.transpose(jax.nn.relu(out2 + sc), (0, 3, 1, 2))


if __name__ == "__main__":
    key = jax.random.PRNGKey(0)
    kx, kp1, kp2 = jax.random.split(key, 3)
    x = jax.random.normal(kx, (2, 4, 16, 16), jnp.float32)   # NCHW like PyTorch

    # Identity-shortcut block: BasicBlock(in_planes=4, planes=4, stride=1)
    params_id = init_basic_block(kp1, 4, 4, 1)
    fwd_id = jax.jit(lambda xx: basic_block_forward(xx, params_id))
    y_id = jax.block_until_ready(fwd_id(x))

    # Projection-shortcut block: BasicBlock(in_planes=4, planes=8, stride=2)
    params_pr = init_basic_block(kp2, 4, 8, 2)
    fwd_pr = jax.jit(lambda xx: basic_block_forward(xx, params_pr))
    y_pr = jax.block_until_ready(fwd_pr(x))

    assert y_id.shape == (2, 4, 16, 16), y_id.shape
    assert y_pr.shape == (2, 8, 8, 8), y_pr.shape

    ref_id = reference_forward(x, params_id)
    ref_pr = reference_forward(x, params_pr)
    assert jnp.allclose(y_id, ref_id, rtol=1e-2, atol=1e-2)
    assert jnp.allclose(y_pr, ref_pr, rtol=1e-2, atol=1e-2)

    print("KERNEL_OK")
</pallas_src>

<mosaic_0001>
module attributes {stable_mosaic.version = 11 : i64} {
  func.func @_fused_conv_kernel(%arg0: i32, %arg1: i32, %arg2: memref<1x18x24x128xbf16, #tpu.memory_space<vmem>>, %arg3: memref<1152x128xbf16, #tpu.memory_space<vmem>>, %arg4: memref<1x128xf32, #tpu.memory_space<vmem>>, %arg5: memref<1x256x128xbf16, #tpu.memory_space<vmem>>, %arg6: memref<1x256x128xf32, #tpu.memory_space<vmem>>) attributes {dimension_semantics = [#tpu.dimension_semantics<parallel>, #tpu.dimension_semantics<parallel>], iteration_bounds = array<i64: 2, 1>, scalar_prefetch = 0 : i64, scratch_operands = 0 : i64, tpu.core_type = #tpu.core_type<tc>, window_params = [{transform_indices = @transform_0, window_bounds = array<i64: 1, 18, 24, 128>}, {pipeline_mode = #tpu.pipeline_mode<synchronous>, transform_indices = @transform_1, window_bounds = array<i64: 1152, 128>}, {pipeline_mode = #tpu.pipeline_mode<synchronous>, transform_indices = @transform_2, window_bounds = array<i64: 1, 128>}, {transform_indices = @transform_3, window_bounds = array<i64: 1, 256, 128>}, {transform_indices = @transform_4, window_bounds = array<i64: 1, 256, 128>}]} {
    %c16_i32 = arith.constant 16 : i32
    %0 = arith.muli %arg1, %c16_i32 : i32
    %1 = tpu.assume_multiple %0, 16 : i32
    %c0_i32 = arith.constant 0 : i32
    %2 = arith.addi %1, %c0_i32 : i32
    %c0 = arith.constant 0 : index
    %3 = arith.index_cast %2 : i32 to index
    %c0_0 = arith.constant 0 : index
    %c0_1 = arith.constant 0 : index
    %4 = vector.load %arg2[%c0, %3, %c0_0, %c0_1] : memref<1x18x24x128xbf16, #tpu.memory_space<vmem>>, vector<1x16x16x128xbf16>
    %5 = vector.shape_cast %4 : vector<1x16x16x128xbf16> to vector<16x16x128xbf16>
    %6 = vector.shape_cast %5 : vector<16x16x128xbf16> to vector<256x128xbf16>
    %c0_i32_2 = arith.constant 0 : i32
    %7 = arith.addi %1, %c0_i32_2 : i32
    %c0_3 = arith.constant 0 : index
    %8 = arith.index_cast %7 : i32 to index
    %c1 = arith.constant 1 : index
    %c0_4 = arith.constant 0 : index
    %9 = vector.load %arg2[%c0_3, %8, %c1, %c0_4] : memref<1x18x24x128xbf16, #tpu.memory_space<vmem>>, vector<1x16x16x128xbf16>
    %10 = vector.shape_cast %9 : vector<1x16x16x128xbf16> to vector<16x16x128xbf16>
    %11 = vector.shape_cast %10 : vector<16x16x128xbf16> to vector<256x128xbf16>
    %c0_i32_5 = arith.constant 0 : i32
    %12 = arith.addi %1, %c0_i32_5 : i32
    %c0_6 = arith.constant 0 : index
    %13 = arith.index_cast %12 : i32 to index
    %c2 = arith.constant 2 : index
    %c0_7 = arith.constant 0 : index
    %14 = vector.load %arg2[%c0_6, %13, %c2, %c0_7] : memref<1x18x24x128xbf16, #tpu.memory_space<vmem>>, vector<1x16x16x128xbf16>
    %15 = vector.shape_cast %14 : vector<1x16x16x128xbf16> to vector<16x16x128xbf16>
    %16 = vector.shape_cast %15 : vector<16x16x128xbf16> to vector<256x128xbf16>
    %c1_i32 = arith.constant 1 : i32
    %17 = arith.addi %1, %c1_i32 : i32
    %c0_8 = arith.constant 0 : index
    %18 = arith.index_cast %17 : i32 to index
    %c0_9 = arith.constant 0 : index
    %c0_10 = arith.constant 0 : index
    %19 = vector.load %arg2[%c0_8, %18, %c0_9, %c0_10] : memref<1x18x24x128xbf16, #tpu.memory_space<vmem>>, vector<1x16x16x128xbf16>
    %20 = vector.shape_cast %19 : vector<1x16x16x128xbf16> to vector<16x16x128xbf16>
    %21 = vector.shape_cast %20 : vector<16x16x128xbf16> to vector<256x128xbf16>
    %c1_i32_11 = arith.constant 1 : i32
    %22 = arith.addi %1, %c1_i32_11 : i32
    %c0_12 = arith.constant 0 : index
    %23 = arith.index_cast %22 : i32 to index
    %c1_13 = arith.constant 1 : index
    %c0_14 = arith.constant 0 : index
    %24 = vector.load %arg2[%c0_12, %23, %c1_13, %c0_14] : memref<1x18x24x128xbf16, #tpu.memory_space<vmem>>, vector<1x16x16x128xbf16>
    %25 = vector.shape_cast %24 : vector<1x16x16x128xbf16> to vector<16x16x128xbf16>
    %26 = vector.shape_cast %25 : vector<16x16x128xbf16> to vector<256x128xbf16>
    %c1_i32_15 = arith.constant 1 : i32
    %27 = arith.addi %1, %c1_i32_15 : i32
    %c0_16 = arith.constant 0 : index
    %28 = arith.index_cast %27 : i32 to index
    %c2_17 = arith.constant 2 : index
    %c0_18 = arith.constant 0 : index
    %29 = vector.load %arg2[%c0_16, %28, %c2_17, %c0_18] : memref<1x18x24x128xbf16, #tpu.memory_space<vmem>>, vector<1x16x16x128xbf16>
    %30 = vector.shape_cast %29 : vector<1x16x16x128xbf16> to vector<16x16x128xbf16>
    %31 = vector.shape_cast %30 : vector<16x16x128xbf16> to vector<256x128xbf16>
    %c2_i32 = arith.constant 2 : i32
    %32 = arith.addi %1, %c2_i32 : i32
    %c0_19 = arith.constant 0 : index
    %33 = arith.index_cast %32 : i32 to index
    %c0_20 = arith.constant 0 : index
    %c0_21 = arith.constant 0 : index
    %34 = vector.load %arg2[%c0_19, %33, %c0_20, %c0_21] : memref<1x18x24x128xbf16, #tpu.memory_space<vmem>>, vector<1x16x16x128xbf16>
    %35 = vector.shape_cast %34 : vector<1x16x16x128xbf16> to vector<16x16x128xbf16>
    %36 = vector.shape_cast %35 : vector<16x16x128xbf16> to vector<256x128xbf16>
    %c2_i32_22 = arith.constant 2 : i32
    %37 = arith.addi %1, %c2_i32_22 : i32
    %c0_23 = arith.constant 0 : index
    %38 = arith.index_cast %37 : i32 to index
    %c1_24 = arith.constant 1 : index
    %c0_25 = arith.constant 0 : index
    %39 = vector.load %arg2[%c0_23, %38, %c1_24, %c0_25] : memref<1x18x24x128xbf16, #tpu.memory_space<vmem>>, vector<1x16x16x128xbf16>
    %40 = vector.shape_cast %39 : vector<1x16x16x128xbf16> to vector<16x16x128xbf16>
    %41 = vector.shape_cast %40 : vector<16x16x128xbf16> to vector<256x128xbf16>
    %c2_i32_26 = arith.constant 2 : i32
    %42 = arith.addi %1, %c2_i32_26 : i32
    %c0_27 = arith.constant 0 : index
    %43 = arith.index_cast %42 : i32 to index
    %c2_28 = arith.constant 2 : index
    %c0_29 = arith.constant 0 : index
    %44 = vector.load %arg2[%c0_27, %43, %c2_28, %c0_29] : memref<1x18x24x128xbf16, #tpu.memory_space<vmem>>, vector<1x16x16x128xbf16>
    %45 = vector.shape_cast %44 : vector<1x16x16x128xbf16> to vector<16x16x128xbf16>
    %46 = vector.shape_cast %45 : vector<16x16x128xbf16> to vector<256x128xbf16>
    %47 = tpu.concatenate %6, %11, %16, %21, %26, %31, %36, %41, %46 in 1 : vector<256x128xbf16>, vector<256x128xbf16>, vector<256x128xbf16>, vector<256x128xbf16>, vector<256x128xbf16>, vector<256x128xbf16>, vector<256x128xbf16>, vector<256x128xbf16>, vector<256x128xbf16> -> vector<256x1152xbf16>
    %c0_30 = arith.constant 0 : index
    %c0_31 = arith.constant 0 : index
    %48 = vector.load %arg3[%c0_30, %c0_31] : memref<1152x128xbf16, #tpu.memory_space<vmem>>, vector<1152x128xbf16>
    %cst = arith.constant dense<0.000000e+00> : vector<256x128xf32>
    %49 = tpu.matmul %47, %48, %cst {dimension_numbers = #tpu.dot_dimension_numbers<[1], [0], [0], [1], [0, 0, 1, 1], [], []>} : vector<256x1152xbf16>, vector<1152x128xbf16>, vector<256x128xf32> -> vector<256x128xf32>
    %c0_32 = arith.constant 0 : index
    %c0_33 = arith.constant 0 : index
    %50 = vector.load %arg4[%c0_32, %c0_33] : memref<1x128xf32, #tpu.memory_space<vmem>>, vector<1x128xf32>
    %51 = vector.broadcast %50 : vector<1x128xf32> to vector<256x128xf32>
    %52 = arith.addf %49, %51 : vector<256x128xf32>
    %c0_34 = arith.constant 0 : index
    %c0_35 = arith.constant 0 : index
    %c0_36 = arith.constant 0 : index
    %53 = vector.load %arg5[%c0_34, %c0_35, %c0_36] : memref<1x256x128xbf16, #tpu.memory_space<vmem>>, vector<1x256x128xbf16>
    %54 = vector.shape_cast %53 : vector<1x256x128xbf16> to vector<256x128xbf16>
    %55 = arith.extf %54 : vector<256x128xbf16> to vector<256x128xf32>
    %56 = arith.addf %52, %55 : vector<256x128xf32>
    %cst_37 = arith.constant 0.000000e+00 : f32
    %57 = vector.broadcast %cst_37 : f32 to vector<256x128xf32>
    %58 = arith.maximumf %56, %57 : vector<256x128xf32>
    %c0_38 = arith.constant 0 : index
    %c0_39 = arith.constant 0 : index
    %c0_40 = arith.constant 0 : index
    %59 = vector.load %arg6[%c0_38, %c0_39, %c0_40] : memref<1x256x128xf32, #tpu.memory_space<vmem>>, vector<1x256x128xf32>
    %60 = vector.shape_cast %59 : vector<1x256x128xf32> to vector<256x128xf32>
    %61 = vector.shape_cast %58 : vector<256x128xf32> to vector<1x256x128xf32>
    tpu.vector_store %arg6[%c0_38, %c0_39, %c0_40], %61 {strides = array<i32>} : memref<1x256x128xf32, #tpu.memory_space<vmem>>, vector<1x256x128xf32>,
    return
  }
  func.func @transform_0(%arg0: i32, %arg1: i32) -> (i32, i32, i32, i32) {
    %c0_i32 = arith.constant 0 : i32
    %c0_i32_0 = arith.constant 0 : i32
    %c0_i32_1 = arith.constant 0 : i32
    %c0_i32_2 = arith.constant 0 : i32
    return %arg0, %c0_i32, %c0_i32_0, %c0_i32_1 : i32, i32, i32, i32
  }
  func.func @transform_1(%arg0: i32, %arg1: i32) -> (i32, i32) {
    %c0_i32 = arith.constant 0 : i32
    %c0_i32_0 = arith.constant 0 : i32
    %c0_i32_1 = arith.constant 0 : i32
    return %c0_i32, %c0_i32_0 : i32, i32
  }
  func.func @transform_2(%arg0: i32, %arg1: i32) -> (i32, i32) {
    %c0_i32 = arith.constant 0 : i32
    %c0_i32_0 = arith.constant 0 : i32
    %c0_i32_1 = arith.constant 0 : i32
    return %c0_i32, %c0_i32_0 : i32, i32
  }
  func.func @transform_3(%arg0: i32, %arg1: i32) -> (i32, i32, i32) {
    %c0_i32 = arith.constant 0 : i32
    %c0_i32_0 = arith.constant 0 : i32
    return %arg0, %arg1, %c0_i32 : i32, i32, i32
  }
  func.func @transform_4(%arg0: i32, %arg1: i32) -> (i32, i32, i32) {
    %c0_i32 = arith.constant 0 : i32
    %c0_i32_0 = arith.constant 0 : i32
    return %arg0, %arg1, %c0_i32 : i32, i32, i32
  }
}

module attributes {stable_mosaic.version = 11 : i64} {
  func.func @_fused_conv_kernel(%arg0: i32, %arg1: i32, %arg2: memref<1x18x24x128xbf16, #tpu.memory_space<vmem>>, %arg3: memref<1152x128xbf16, #tpu.memory_space<vmem>>, %arg4: memref<1x128xf32, #tpu.memory_space<vmem>>, %arg5: memref<1x256x128xbf16, #tpu.memory_space<vmem>>) attributes {dimension_semantics = [#tpu.dimension_semantics<parallel>, #tpu.dimension_semantics<parallel>], iteration_bounds = array<i64: 2, 1>, scalar_prefetch = 0 : i64, scratch_operands = 0 : i64, tpu.core_type = #tpu.core_type<tc>, window_params = [{transform_indices = @transform_0, window_bounds = array<i64: 1, 18, 24, 128>}, {pipeline_mode = #tpu.pipeline_mode<synchronous>, transform_indices = @transform_1, window_bounds = array<i64: 1152, 128>}, {pipeline_mode = #tpu.pipeline_mode<synchronous>, transform_indices = @transform_2, window_bounds = array<i64: 1, 128>}, {transform_indices = @transform_3, window_bounds = array<i64: 1, 256, 128>}]} {
    %c16_i32 = arith.constant 16 : i32
    %0 = arith.muli %arg1, %c16_i32 : i32
    %1 = tpu.assume_multiple %0, 16 : i32
    %c0_i32 = arith.constant 0 : i32
    %2 = arith.addi %1, %c0_i32 : i32
    %c0 = arith.constant 0 : index
    %3 = arith.index_cast %2 : i32 to index
    %c0_0 = arith.constant 0 : index
    %c0_1 = arith.constant 0 : index
    %4 = vector.load %arg2[%c0, %3, %c0_0, %c0_1] : memref<1x18x24x128xbf16, #tpu.memory_space<vmem>>, vector<1x16x16x128xbf16>
    %5 = vector.shape_cast %4 : vector<1x16x16x128xbf16> to vector<16x16x128xbf16>
    %6 = vector.shape_cast %5 : vector<16x16x128xbf16> to vector<256x128xbf16>
    %c0_i32_2 = arith.constant 0 : i32
    %7 = arith.addi %1, %c0_i32_2 : i32
    %c0_3 = arith.constant 0 : index
    %8 = arith.index_cast %7 : i32 to index
    %c1 = arith.constant 1 : index
    %c0_4 = arith.constant 0 : index
    %9 = vector.load %arg2[%c0_3, %8, %c1, %c0_4] : memref<1x18x24x128xbf16, #tpu.memory_space<vmem>>, vector<1x16x16x128xbf16>
    %10 = vector.shape_cast %9 : vector<1x16x16x128xbf16> to vector<16x16x128xbf16>
    %11 = vector.shape_cast %10 : vector<16x16x128xbf16> to vector<256x128xbf16>
    %c0_i32_5 = arith.constant 0 : i32
    %12 = arith.addi %1, %c0_i32_5 : i32
    %c0_6 = arith.constant 0 : index
    %13 = arith.index_cast %12 : i32 to index
    %c2 = arith.constant 2 : index
    %c0_7 = arith.constant 0 : index
    %14 = vector.load %arg2[%c0_6, %13, %c2, %c0_7] : memref<1x18x24x128xbf16, #tpu.memory_space<vmem>>, vector<1x16x16x128xbf16>
    %15 = vector.shape_cast %14 : vector<1x16x16x128xbf16> to vector<16x16x128xbf16>
    %16 = vector.shape_cast %15 : vector<16x16x128xbf16> to vector<256x128xbf16>
    %c1_i32 = arith.constant 1 : i32
    %17 = arith.addi %1, %c1_i32 : i32
    %c0_8 = arith.constant 0 : index
    %18 = arith.index_cast %17 : i32 to index
    %c0_9 = arith.constant 0 : index
    %c0_10 = arith.constant 0 : index
    %19 = vector.load %arg2[%c0_8, %18, %c0_9, %c0_10] : memref<1x18x24x128xbf16, #tpu.memory_space<vmem>>, vector<1x16x16x128xbf16>
    %20 = vector.shape_cast %19 : vector<1x16x16x128xbf16> to vector<16x16x128xbf16>
    %21 = vector.shape_cast %20 : vector<16x16x128xbf16> to vector<256x128xbf16>
    %c1_i32_11 = arith.constant 1 : i32
    %22 = arith.addi %1, %c1_i32_11 : i32
    %c0_12 = arith.constant 0 : index
    %23 = arith.index_cast %22 : i32 to index
    %c1_13 = arith.constant 1 : index
    %c0_14 = arith.constant 0 : index
    %24 = vector.load %arg2[%c0_12, %23, %c1_13, %c0_14] : memref<1x18x24x128xbf16, #tpu.memory_space<vmem>>, vector<1x16x16x128xbf16>
    %25 = vector.shape_cast %24 : vector<1x16x16x128xbf16> to vector<16x16x128xbf16>
    %26 = vector.shape_cast %25 : vector<16x16x128xbf16> to vector<256x128xbf16>
    %c1_i32_15 = arith.constant 1 : i32
    %27 = arith.addi %1, %c1_i32_15 : i32
    %c0_16 = arith.constant 0 : index
    %28 = arith.index_cast %27 : i32 to index
    %c2_17 = arith.constant 2 : index
    %c0_18 = arith.constant 0 : index
    %29 = vector.load %arg2[%c0_16, %28, %c2_17, %c0_18] : memref<1x18x24x128xbf16, #tpu.memory_space<vmem>>, vector<1x16x16x128xbf16>
    %30 = vector.shape_cast %29 : vector<1x16x16x128xbf16> to vector<16x16x128xbf16>
    %31 = vector.shape_cast %30 : vector<16x16x128xbf16> to vector<256x128xbf16>
    %c2_i32 = arith.constant 2 : i32
    %32 = arith.addi %1, %c2_i32 : i32
    %c0_19 = arith.constant 0 : index
    %33 = arith.index_cast %32 : i32 to index
    %c0_20 = arith.constant 0 : index
    %c0_21 = arith.constant 0 : index
    %34 = vector.load %arg2[%c0_19, %33, %c0_20, %c0_21] : memref<1x18x24x128xbf16, #tpu.memory_space<vmem>>, vector<1x16x16x128xbf16>
    %35 = vector.shape_cast %34 : vector<1x16x16x128xbf16> to vector<16x16x128xbf16>
    %36 = vector.shape_cast %35 : vector<16x16x128xbf16> to vector<256x128xbf16>
    %c2_i32_22 = arith.constant 2 : i32
    %37 = arith.addi %1, %c2_i32_22 : i32
    %c0_23 = arith.constant 0 : index
    %38 = arith.index_cast %37 : i32 to index
    %c1_24 = arith.constant 1 : index
    %c0_25 = arith.constant 0 : index
    %39 = vector.load %arg2[%c0_23, %38, %c1_24, %c0_25] : memref<1x18x24x128xbf16, #tpu.memory_space<vmem>>, vector<1x16x16x128xbf16>
    %40 = vector.shape_cast %39 : vector<1x16x16x128xbf16> to vector<16x16x128xbf16>
    %41 = vector.shape_cast %40 : vector<16x16x128xbf16> to vector<256x128xbf16>
    %c2_i32_26 = arith.constant 2 : i32
    %42 = arith.addi %1, %c2_i32_26 : i32
    %c0_27 = arith.constant 0 : index
    %43 = arith.index_cast %42 : i32 to index
    %c2_28 = arith.constant 2 : index
    %c0_29 = arith.constant 0 : index
    %44 = vector.load %arg2[%c0_27, %43, %c2_28, %c0_29] : memref<1x18x24x128xbf16, #tpu.memory_space<vmem>>, vector<1x16x16x128xbf16>
    %45 = vector.shape_cast %44 : vector<1x16x16x128xbf16> to vector<16x16x128xbf16>
    %46 = vector.shape_cast %45 : vector<16x16x128xbf16> to vector<256x128xbf16>
    %47 = tpu.concatenate %6, %11, %16, %21, %26, %31, %36, %41, %46 in 1 : vector<256x128xbf16>, vector<256x128xbf16>, vector<256x128xbf16>, vector<256x128xbf16>, vector<256x128xbf16>, vector<256x128xbf16>, vector<256x128xbf16>, vector<256x128xbf16>, vector<256x128xbf16> -> vector<256x1152xbf16>
    %c0_30 = arith.constant 0 : index
    %c0_31 = arith.constant 0 : index
    %48 = vector.load %arg3[%c0_30, %c0_31] : memref<1152x128xbf16, #tpu.memory_space<vmem>>, vector<1152x128xbf16>
    %cst = arith.constant dense<0.000000e+00> : vector<256x128xf32>
    %49 = tpu.matmul %47, %48, %cst {dimension_numbers = #tpu.dot_dimension_numbers<[1], [0], [0], [1], [0, 0, 1, 1], [], []>} : vector<256x1152xbf16>, vector<1152x128xbf16>, vector<256x128xf32> -> vector<256x128xf32>
    %c0_32 = arith.constant 0 : index
    %c0_33 = arith.constant 0 : index
    %50 = vector.load %arg4[%c0_32, %c0_33] : memref<1x128xf32, #tpu.memory_space<vmem>>, vector<1x128xf32>
    %51 = vector.broadcast %50 : vector<1x128xf32> to vector<256x128xf32>
    %52 = arith.addf %49, %51 : vector<256x128xf32>
    %cst_34 = arith.constant 0.000000e+00 : f32
    %53 = vector.broadcast %cst_34 : f32 to vector<256x128xf32>
    %54 = arith.maximumf %52, %53 : vector<256x128xf32>
    %55 = arith.truncf %54 : vector<256x128xf32> to vector<256x128xbf16>
    %c0_35 = arith.constant 0 : index
    %c0_36 = arith.constant 0 : index
    %c0_37 = arith.constant 0 : index
    %56 = vector.load %arg5[%c0_35, %c0_36, %c0_37] : memref<1x256x128xbf16, #tpu.memory_space<vmem>>, vector<1x256x128xbf16>
    %57 = vector.shape_cast %56 : vector<1x256x128xbf16> to vector<256x128xbf16>
    %58 = vector.shape_cast %55 : vector<256x128xbf16> to vector<1x256x128xbf16>
    tpu.vector_store %arg5[%c0_35, %c0_36, %c0_37], %58 {strides = array<i32>} : memref<1x256x128xbf16, #tpu.memory_space<vmem>>, vector<1x256x128xbf16>,
    return
  }
  func.func @transform_0(%arg0: i32, %arg1: i32) -> (i32, i32, i32, i32) {
    %c0_i32 = arith.constant 0 : i32
    %c0_i32_0 = arith.constant 0 : i32
    %c0_i32_1 = arith.constant 0 : i32
    %c0_i32_2 = arith.constant 0 : i32
    return %arg0, %c0_i32, %c0_i32_0, %c0_i32_1 : i32, i32, i32, i32
  }
  func.func @transform_1(%arg0: i32, %arg1: i32) -> (i32, i32) {
    %c0_i32 = arith.constant 0 : i32
    %c0_i32_0 = arith.constant 0 : i32
    %c0_i32_1 = arith.constant 0 : i32
    return %c0_i32, %c0_i32_0 : i32, i32
  }
  func.func @transform_2(%arg0: i32, %arg1: i32) -> (i32, i32) {
    %c0_i32 = arith.constant 0 : i32
    %c0_i32_0 = arith.constant 0 : i32
    %c0_i32_1 = arith.constant 0 : i32
    return %c0_i32, %c0_i32_0 : i32, i32
  }
  func.func @transform_3(%arg0: i32, %arg1: i32) -> (i32, i32, i32) {
    %c0_i32 = arith.constant 0 : i32
    %c0_i32_0 = arith.constant 0 : i32
    return %arg0, %arg1, %c0_i32 : i32, i32, i32
  }
}

</mosaic_0001>

<bundles_post_ra>
// kernel: _lambda_.3
= control target key start
LH: loop header
LB: loop body
LE: loop exit
PB: predicated region body
PF: predicated region fallthrough
CT: control target
= control target key end

     0   :  { %s5605_s15 = smov 0   ;;  %s5607_s16 = smov 0   ;;  %s7776_s0 = inlined_call_operand.vmem [shape: bf16[2,18,24,128], index: 0, kind: input, shape index: {}]   ;;  %s7777_s1 = inlined_call_operand.vmem [shape: bf16[1152,128], index: 1, kind: input, shape index: {}]   ;;  %s7778_s2 = inlined_call_operand.vmem [shape: f32[1,128], index: 2, kind: input, shape index: {}]   ;;  %s7779_s3 = inlined_call_operand.vmem [shape: bf16[2,256,128], index: 3, kind: input, shape index: {}]   ;;  %s7780_s4 = inlined_call_operand.vmem [shape: f32[2,256,128], index: 4, kind: output, shape index: {}]  }
   0x1   :  { %s5609_s17 = smov 0  }
   0x2 LB: > { %s26_s18 = sadd.s32 1, %s5574_s16  ;;  %p4385_p0 = scmp.ge.s32.totalorder %s5578_s17, 1  ;;  %s5578_s17 = sphi %s5609_s17, %s14_s17   ;;  %s5574_s16 = sphi %s5607_s16, %s7804_s16   ;;  %s5570_s15 = sphi %s5605_s15, %s7803_s15  }
   0x3   : > { %p28_p1 = scmp.ge.s32.totalorder %s26_s18, 2  ;;  %p193_p2 = scmp.lt.s32.totalorder %s5578_s17, 3 }
   0x5   : > { %s7806_s18 = smov (%p28_p1, %s26_s18), 0  ;;  %p194_p3 = pnand %p4385_p0, %p193_p2 }
   0x7   : > { %197 = sbr.rel (%p194_p3) target bundleno = 574 (0x23e), region = 36 }
   0xe   : > { %v5428_v0 = vld [vmem:[%s7777_s1 + $0x40] sm:$0xff]   ;;  %p232_p4 = scmp.lt.s32.totalorder %s5570_s15, 1  ;;  %v5430_v2 = vld [vmem:[%s7777_s1 + $0x48] sm:$0xff]   ;;  %v5432_v4 = vld [vmem:[%s7777_s1 + $0x50] sm:$0xff]   ;;  %vm310_vm0 = vsmask.f32 3328 }
   0xf   : > { %v5429_v1 = vld [vmem:[%s7777_s1] sm:$0xff]   ;;  %4867 = vmatprep.subr.bf16.mxu0 %v5428_v0  ;;  %5387 = vmatprep.subr.bf16.mxu1 %v5428_v0  ;;  %v5431_v3 = vld [vmem:[%s7777_s1 + $0x8] sm:$0xff]   ;;  %v5433_v5 = vld [vmem:[%s7777_s1 + $0x10] sm:$0xff]   ;;  %vm311_vm1 = vsmask.f32 7440  ;;  %vm761_vm3 = vcmask 1042432  }
  0x10   : > { %4868 = vmatpush3.bf16.msra.mxu0 %v5429_v1  ;;  %5395 = vmatpush3.bf16.msra.mxu1 %v5429_v1  ;;  %s7808_s15 = smov (!%p232_p4, %s5570_s15), 1  ;;  %v5434_v6 = vld [vmem:[%s7777_s1 + $0x58] sm:$0xff]   ;;  %v5436_v8 = vld [vmem:[%s7777_s1 + $0x60] sm:$0xff]   ;;  %v5438_v10 = vld [vmem:[%s7777_s1 + $0x68] sm:$0xff]   ;;  %vm762_vm4 = vcmask 1046532  }
  0x11   : > { %4869 = vmatprep.subr.bf16.mxu0 %v5430_v2  ;;  %5388 = vmatprep.subr.bf16.mxu1 %v5430_v2  ;;  %s5403_s7 = smul.u32 216, %s7808_s15  ;;  %v5435_v7 = vld [vmem:[%s7777_s1 + $0x18] sm:$0xff]   ;;  %v5437_v9 = vld [vmem:[%s7777_s1 + $0x20] sm:$0xff]   ;;  %v5439_v20 = vld [vmem:[%s7777_s1 + $0x28] sm:$0xff]   ;;  %s4786_s22 = sshll.u32 %s7808_s15, 7 }
  0x12   : > { %v5440_v25 = vld [vmem:[%s7777_s1 + $0x70] sm:$0xff]   ;;  %vm5698_vm2 = vmor %vm310_vm0, %vm311_vm1  ;;  %v5442_v42 = vld [vmem:[%s7777_s1 + $0x78] sm:$0xff]   ;;  %s7649_s25 = scalar_lea.vmem %s7779_s3, %s4786_s22  ;;  %s4787_s26 = sshll.u32 %s7808_s15, 8 }
  0x13   : > { %s5656_s14 = scalar_lea.vmem %s7776_s0, %s5403_s7  ;;  %v5441_v38 = vld [vmem:[%s7777_s1 + $0x30] sm:$0xff]   ;;  %v5443_v45 = vld [vmem:[%s7777_s1 + $0x38] sm:$0xff]   ;;  %v5446_v55 = vld [vmem:[%s7777_s1 + $0xc0] sm:$0xff]   ;;  %s7672_s28 = scalar_lea.vmem %s7780_s4, %s4787_s26 }
  0x14   : > { %4870 = vmatpush3.bf16.msra.mxu0 %v5431_v3  ;;  %5396 = vmatpush3.bf16.msra.mxu1 %v5431_v3  ;;  %v5665_v11 = vld [vmem:[%s5656_s14] sm:$0xf]  ;;  %v5668_v12 = vld [vmem:[%s5656_s14 + $0x4] sm:$0xf]  ;;  %v5671_v13 = vld [vmem:[%s5656_s14 + $0x8] sm:$0x1] }
  0x15   : > { %4871 = vmatprep.subr.bf16.mxu0 %v5432_v4  ;;  %5389 = vmatprep.subr.bf16.mxu1 %v5432_v4  ;;  %v314_v14 = vshrl.u32 %v5665_v11, 16  ;;  %v317_v15 = vshll.u32 %v5665_v11, 16  ;;  %v323_v16 = vshll.u32 %v5668_v12, 16  ;;  %v327_v17 = vshrl.u32 %v5668_v12, 16  ;;  %v5679_v19 = vld [vmem:[%s5656_s14 + $0x90] sm:$0xf]  ;;  %vm5892_vm5 = vmor %vm761_vm3, %vm762_vm4 }
  0x16   : > { %v333_v18 = vshll.u32 %v5671_v13, 16  ;;  %v5685_v23 = vld [vmem:[%s5656_s14 + $0x94] sm:$0xf]  ;;  %v602_v24 = vshrl.u32 %v5679_v19, 16  ;;  %v5692_v29 = vld [vmem:[%s5656_s14 + $0x98] sm:$0x1]  ;;  %v4567_v57 = vcombine.low %v5665_v11, %v5668_v12 }
  0x17   : > { %v316_v21 = vrot.slane %v314_v14, 4  ;;  %v319_v22 = vrot.slane %v317_v15, 5  ;;  %v325_v26 = vrot.slane %v323_v16, 5  ;;  %v329_v27 = vrot.slane %v327_v17, 4  ;;  %v5449_v58 = vld [vmem:[%s7777_s1 + $0x140] sm:$0xff]   ;;  %v5448_v4 = vld [vmem:[%s7777_s1 + $0xc8] sm:$0xff]  }
  0x18   : > { %4872 = vmatpush3.bf16.msra.mxu0 %v5433_v5  ;;  %5397 = vmatpush3.bf16.msra.mxu1 %v5433_v5  ;;  %v335_v28 = vrot.slane %v333_v18, 5  ;;  %v604_v31 = vrot.slane %v602_v24, 4  ;;  %v605_v32 = vshll.u32 %v5679_v19, 16  ;;  %v611_v33 = vshll.u32 %v5685_v23, 16  ;;  %v5728_v59 = vld [vmem:[%s5656_s14 + $0xc] sm:$0xf] }
  0x19   : > { %4873 = vmatprep.subr.bf16.mxu0 %v5434_v6  ;;  %5390 = vmatprep.subr.bf16.mxu1 %v5434_v6  ;;  %v320_v30 = vor.u32 %v319_v22, %v316_v21  ;;  %v330_v35 = vor.u32 %v329_v27, %v325_v26  ;;  %v615_v36 = vshrl.u32 %v5685_v23, 16  ;;  %v621_v37 = vshll.u32 %v5692_v29, 16  ;;  %v5447_v62 = vld [vmem:[%s7777_s1 + $0x80] sm:$0xff]   ;;  %v5738_v63 = vld [vmem:[%s5656_s14 + $0x10] sm:$0xf]  ;;  %v5450_v21 = vld [vmem:[%s7777_s1 + $0x88] sm:$0xff]  }
  0x1a   : > { %v607_v40 = vrot.slane %v605_v32, 5  ;;  %v613_v41 = vrot.slane %v611_v33, 5  ;;  %v766_v47 = vrot.slane %v5668_v12, 5  ;;  %v769_v50 = vrot.slane %v5671_v13, 5  ;;  %v5741_v0 = vld [vmem:[%s5656_s14 + $0x14] sm:$0x1] }
  0x1b   : > { %v321_v39 = vrot.slane %v320_v30, 4  ;;  %v331_v43 = vrot.slane %v330_v35, 4  ;;  %v617_v44 = vrot.slane %v615_v36, 4  ;;  %v623_v52 = vrot.slane %v621_v37, 5  ;;  %v5451_v5 = vld [vmem:[%s7777_s1 + $0x100] sm:$0xff]  }
  0x1c   : > { %4874 = vmatpush3.bf16.msra.mxu0 %v5435_v7  ;;  %5398 = vmatpush3.bf16.msra.mxu1 %v5435_v7  ;;  %v608_v48 = vor.u32 %v607_v40, %v604_v31  ;;  %v4579_v61 = vcombine.low %v5679_v19, %v5685_v23  ;;  %v338_v1 = vshrl.u32 %v5728_v59, 16  ;;  %v341_v2 = vshll.u32 %v5728_v59, 16  ;;  %v5760_v15 = vld [vmem:[%s5656_s14 + $0xa0] sm:$0xf]  ;;  %v307_v16 = vld [vmem:[%s5656_s14 + $0xa4] sm:$0x1] }
  0x1d   : > { %4875 = vmatprep.subr.bf16.mxu0 %v5436_v8  ;;  %5391 = vmatprep.subr.bf16.mxu1 %v5436_v8  ;;  %v326_v46 = vsel %vm5698_vm2, %v321_v39, %v325_v26  ;;  %v336_v49 = vsel %vm5698_vm2, %v331_v43, %v335_v28  ;;  %v618_v51 = vor.u32 %v617_v44, %v613_v41  ;;  %v347_v6 = vshll.u32 %v5738_v63, 16  ;;  %v5455_v43 = vld [vmem:[%s7777_s1 + $0x90] sm:$0xff]   ;;  %v5785_v44 = vld [vmem:[%s5656_s14 + $0x18] sm:$0xf] }
  0x1e   : > { %v4583_v53 = vcombine.low %v326_v46, %v336_v49  ;;  %v609_v54 = vrot.slane %v608_v48, 4  ;;  %v351_v7 = vshrl.u32 %v5738_v63, 16  ;;  %v357_v8 = vshll.u32 %v5741_v0, 16  ;;  %v5792_v48 = vld [vmem:[%s5656_s14 + $0x1c] sm:$0xf] }
  0x1f   : > { %v619_v56 = vrot.slane %v618_v51, 4  ;;  %v340_v11 = vrot.slane %v338_v1, 4  ;;  %v343_v14 = vrot.slane %v341_v2, 5  ;;  %v349_v17 = vrot.slane %v347_v6, 5  ;;  %v5795_v49 = vld [vmem:[%s5656_s14 + $0x20] sm:$0x1] }
  0x20   : > { %4876 = vmatpush3.bf16.msra.mxu0 %v5437_v9  ;;  %5399 = vmatpush3.bf16.msra.mxu1 %v5437_v9  ;;  %v614_v60 = vsel %vm5698_vm2, %v609_v54, %v613_v41  ;;  %v5757_v9 = vld [vmem:[%s5656_s14 + $0x9c] sm:$0xf]  ;;  %v353_v18 = vrot.slane %v351_v7, 4  ;;  %v359_v19 = vrot.slane %v357_v8, 5  ;;  %v635_v24 = vshll.u32 %v5760_v15, 16 }
  0x21   : > { %4877 = vmatprep.subr.bf16.mxu0 %v5438_v10  ;;  %5392 = vmatprep.subr.bf16.mxu1 %v5438_v10  ;;  %v624_v3 = vsel %vm5698_vm2, %v619_v56, %v623_v52  ;;  %v344_v22 = vor.u32 %v343_v14, %v340_v11  ;;  %v629_v23 = vshll.u32 %v5757_v9, 16  ;;  %v645_v28 = vshll.u32 %v307_v16, 16  ;;  %v5456_v56 = vld [vmem:[%s7777_s1 + $0xd8] sm:$0xff]   ;;  %v5809_v1 = vld [vmem:[%s5656_s14 + $0xac] sm:$0xf]  ;;  %v5460_v11 = vld [vmem:[%s7777_s1 + $0xe0] sm:$0xff]  }
  0x22   : > { %3339 = vmatprep.mubr.bf16.mxu0 %v4583_v53  ;;  %v4595_v10 = vcombine.low %v614_v60, %v624_v3  ;;  %v354_v26 = vor.u32 %v353_v18, %v349_v17  ;;  %v637_v32 = vrot.slane %v635_v24, 5  ;;  %v5772_v35 = vrot.slane %v766_v47, 4  ;;  %v308_v6 = vld [vmem:[%s5656_s14 + $0xb0] sm:$0x1]  ;;  %v5924_v13 = vld [vmem:[%s5656_s14 + $0x34] sm:$0xf] }
  0x23   : > { %v345_v30 = vrot.slane %v344_v22, 4  ;;  %v631_v31 = vrot.slane %v629_v23, 5  ;;  %v647_v37 = vrot.slane %v645_v28, 5  ;;  %v4580_v46 = vcombine.low %v5757_v9, %v5760_v15  ;;  %v5461_v22 = vld [vmem:[%s7777_s1 + $0x148] sm:$0xff]  }
  0x24   : > { %4878 = vmatpush3.bf16.msra.mxu0 %v5439_v20  ;;  %5400 = vmatpush3.bf16.msra.mxu1 %v5439_v20  ;;  %v626_v20 = vshrl.u32 %v5757_v9, 16  ;;  %v355_v36 = vrot.slane %v354_v26, 4  ;;  %v362_v51 = vshrl.u32 %v5785_v44, 16  ;;  %v365_v52 = vshll.u32 %v5785_v44, 16  ;;  %v5463_v26 = vld [vmem:[%s7777_s1 + $0x108] sm:$0xff]  }
  0x25   : > { %4879 = vmatprep.subr.bf16.mxu0 %v5440_v25  ;;  %5393 = vmatprep.subr.bf16.mxu1 %v5440_v25  ;;  %v639_v25 = vshrl.u32 %v5760_v15, 16  ;;  %v350_v39 = vsel %vm5698_vm2, %v345_v30, %v349_v17  ;;  %v659_v16 = vshll.u32 %v5809_v1, 16  ;;  %v663_v17 = vshrl.u32 %v5809_v1, 16 }
  0x26   : > { %3435 = vmatprep.mubr.bf16.mxu1 %v4595_v10  ;;  %v628_v27 = vrot.slane %v626_v20, 4  ;;  %v367_v60 = vrot.slane %v365_v52, 5  ;;  %v5858_v52 = vld [vmem:[%s5656_s14 + $0x2c] sm:$0x1] }
  0x27   : > { %v641_v33 = vrot.slane %v639_v25, 4  ;;  %v661_v24 = vrot.slane %v659_v16, 5  ;;  %v665_v25 = vrot.slane %v663_v17, 4  ;;  %v5469_v17 = vld [vmem:[%s7777_s1 + $0xb0] sm:$0xff]  }
  0x28   : > { %4880 = vmatpush3.bf16.msra.mxu0 %v5441_v38  ;;  %5401 = vmatpush3.bf16.msra.mxu1 %v5441_v38  ;;  %v5454_v38 = vld [vmem:[%s7777_s1 + $0xd0] sm:$0xff]   ;;  %v632_v40 = vor.u32 %v631_v31, %v628_v27  ;;  %v703_v27 = vld [vmem:[%s5656_s14 + $0x48] sm:$0xe] }
  0x29   : > { %4881 = vmatprep.subr.bf16.mxu0 %v5442_v42  ;;  %5394 = vmatprep.subr.bf16.mxu1 %v5442_v42  ;;  %v642_v41 = vor.u32 %v641_v33, %v637_v32  ;;  %v4568_v42 = vcombine.low %v5728_v59, %v5738_v63  ;;  %v364_v59 = vrot.slane %v362_v51, 4  ;;  %v5852_v51 = vld [vmem:[%s5656_s14 + $0x28] sm:$0xf] }
  0x2a   : > { %v633_v54 = vrot.slane %v632_v40, 4  ;;  %v773_v40 = vrot.slane %v5738_v63, 5 }
  0x2b   : > { %v368_v9 = vor.u32 %v367_v60, %v364_v59  ;;  %v405_v59 = vshll.u32 %v5858_v52, 16  ;;  %v5870_v60 = vld [vmem:[%s5656_s14 + $0xb4] sm:$0xf] }
  0x2c   : > { %4882 = vmatpush3.bf16.msra.mxu0 %v5443_v45  ;;  %5402 = vmatpush3.bf16.msra.mxu1 %v5443_v45  ;;  %v360_v45 = vsel %vm5698_vm2, %v355_v36, %v359_v19  ;;  %v638_v2 = vsel %vm5698_vm2, %v633_v54, %v637_v32  ;;  %v666_v32 = vor.u32 %v665_v25, %v661_v24  ;;  %v5462_v36 = vld [vmem:[%s7777_s1 + $0xa0] sm:$0xff]  }
  0x2d   : > { %4979 = vmatprep.subr.bf16.mxu1 %v5446_v55  ;;  %5091 = vmatprep.subr.bf16.mxu0 %v5449_v58  ;;  %v4584_v53 = vcombine.low %v350_v39, %v360_v45  ;;  %v643_v55 = vrot.slane %v642_v41, 4  ;;  %v5804_v58 = vld [vmem:[%s5656_s14 + $0xa8] sm:$0xf]  ;;  %v369_v18 = vrot.slane %v368_v9, 4  ;;  %v674_v9 = vshrl.u32 %v5870_v60, 16 }
  0x2e   : > { %v650_v7 = vshrl.u32 %v5804_v58, 16  ;;  %v653_v15 = vshll.u32 %v5804_v58, 16  ;;  %v5464_v39 = vld [vmem:[%s7777_s1 + $0xe8] sm:$0xff]   ;;  %v4581_v45 = vcombine.low %v5804_v58, %v5809_v1 }
  0x2f   : > { %3340 = vmatmul.mubr.bf16.vlgmr.msra.gmra.mrb[0].mxu0 %v4567_v57  ;;  %3436 = vmatmul.mubr.bf16.vlgmr.msra.gmra.mrb[0].mxu1 %v4579_v61  ;;  %v371_v57 = vshll.u32 %v5792_v48, 16  ;;  %v375_v61 = vshrl.u32 %v5792_v48, 16  ;;  %v648_v3 = vsel %vm5698_vm2, %v643_v55, %v647_v37  ;;  %v395_v55 = vshll.u32 %v5852_v51, 16 }
  0x30   : > { %4980 = vmatpush3.bf16.msra.mxu1 %v5447_v62  ;;  %5092 = vmatpush3.bf16.msra.mxu0 %v5451_v5  ;;  %v381_v62 = vshll.u32 %v5795_v49, 16  ;;  %v4596_v8 = vcombine.low %v638_v2, %v648_v3  ;;  %v652_v14 = vrot.slane %v650_v7, 4  ;;  %v655_v23 = vrot.slane %v653_v15, 5 }
  0x31   : > { %4981 = vmatprep.subr.bf16.mxu1 %v5448_v4  ;;  %3347 = vmatprep.mubr.bf16.mxu0 %v4584_v53  ;;  %v5457_v4 = vld [vmem:[%s7777_s1 + $0x98] sm:$0xff]   ;;  %v373_v5 = vrot.slane %v371_v57, 5  ;;  %v377_v10 = vrot.slane %v375_v61, 4 }
  0x32   : > { %3443 = vmatprep.mubr.bf16.mxu1 %v4596_v8  ;;  %v383_v20 = vrot.slane %v381_v62, 5  ;;  %5093 = vmatprep.subr.bf16.mxu0 %v5461_v22  ;;  %v656_v31 = vor.u32 %v655_v23, %v652_v14  ;;  %v5873_v61 = vld [vmem:[%s5656_s14 + $0xb8] sm:$0xf]  ;;  %v776_v62 = vrot.slane %v5741_v0, 5  ;;  %v407_v8 = vrot.slane %v405_v59, 5 }
  0x33   : > { %v378_v19 = vor.u32 %v377_v10, %v373_v5  ;;  %v374_v28 = vsel %vm5698_vm2, %v369_v18, %v373_v5  ;;  %v309_v5 = vld [vmem:[%s5656_s14 + $0xbc] sm:$0x1]  ;;  %v677_v10 = vshll.u32 %v5870_v60, 16  ;;  %v683_v14 = vshll.u32 %v5873_v61, 16 }
  0x34   : > { %4982 = vmatpush3.bf16.msra.mxu1 %v5450_v21  ;;  %v669_v21 = vshll.u32 %v308_v6, 16  ;;  %5094 = vmatpush3.bf16.msra.mxu0 %v5463_v26  ;;  %v5468_v6 = vld [vmem:[%s7777_s1 + $0xf0] sm:$0xff]   ;;  %v687_v15 = vshrl.u32 %v5873_v61, 16  ;;  %v693_v16 = vshll.u32 %v309_v5, 16 }
  0x35   : > { %4983 = vmatprep.subr.bf16.mxu1 %v5454_v38  ;;  %v379_v30 = vrot.slane %v378_v19, 4  ;;  %v4569_v38 = vcombine.low %v5785_v44, %v5792_v48  ;;  %v5465_v44 = vld [vmem:[%s7777_s1 + $0xa8] sm:$0xff]   ;;  %v676_v19 = vrot.slane %v674_v9, 4 }
  0x36   : > { %v671_v33 = vrot.slane %v669_v21, 5  ;;  %v5470_v21 = vld [vmem:[%s7777_s1 + $0xf8] sm:$0xff]   ;;  %v689_v25 = vrot.slane %v687_v15, 4  ;;  %v695_v26 = vrot.slane %v693_v16, 5 }
  0x37   : > { %3348 = vmatmul.mubr.bf16.gmra.mrb[4].mxu0 %v4568_v42  ;;  %3444 = vmatmul.mubr.bf16.gmra.mrb[4].mxu1 %v4580_v46  ;;  %v384_v37 = vsel %vm5698_vm2, %v379_v30, %v383_v20  ;;  %v657_v42 = vrot.slane %v656_v31, 4  ;;  %v5849_v46 = vld [vmem:[%s5656_s14 + $0x24] sm:$0xf]  ;;  %v679_v20 = vrot.slane %v677_v10, 5  ;;  %v5471_v31 = vld [vmem:[%s7777_s1 + $0x150] sm:$0xff]  }
  0x38   : > { %4984 = vmatpush3.bf16.msra.mxu1 %v5455_v43  ;;  %v4585_v41 = vcombine.low %v374_v28, %v384_v37  ;;  %v667_v43 = vrot.slane %v666_v32, 4  ;;  %v386_v53 = vshrl.u32 %v5849_v46, 16  ;;  %v389_v54 = vshll.u32 %v5849_v46, 16  ;;  %5095 = vmatprep.subr.bf16.mxu0 %v5471_v31 }
  0x39   : > { %4985 = vmatprep.subr.bf16.mxu1 %v5456_v56  ;;  %v399_v56 = vshrl.u32 %v5852_v51, 16  ;;  %v662_v57 = vsel %vm5698_vm2, %v657_v42, %v661_v24  ;;  %v685_v24 = vrot.slane %v683_v14, 5  ;;  %v680_v30 = vor.u32 %v679_v20, %v676_v19 }
  0x3a   : > { %3355 = vmatprep.mubr.bf16.mxu0 %v4585_v41  ;;  %v672_v58 = vsel %vm5698_vm2, %v667_v43, %v671_v33  ;;  %v388_v2 = vrot.slane %v386_v53, 4  ;;  %v391_v3 = vrot.slane %v389_v54, 5  ;;  %v5913_v41 = vsel %vm5892_vm5, %v5772_v35, %v769_v50  ;;  %v5929_v35 = vld [vmem:[%s5656_s14 + $0x38] sm:$0x1] }
  0x3b   : > { %v4597_v1 = vcombine.low %v662_v57, %v672_v58  ;;  %v401_v7 = vrot.slane %v399_v56, 4  ;;  %v690_v33 = vor.u32 %v689_v25, %v685_v24  ;;  %v681_v37 = vrot.slane %v680_v30, 4  ;;  %v5476_v56 = vld [vmem:[%s7777_s1 + $0x1c0] sm:$0xff]  }
  0x3c   : > { %4986 = vmatpush3.bf16.msra.mxu1 %v5457_v4  ;;  %v397_v4 = vrot.slane %v395_v55, 5  ;;  %v419_v55 = vshll.u32 %v5924_v13, 16  ;;  %v423_v58 = vshrl.u32 %v5924_v13, 16  ;;  %v429_v59 = vshll.u32 %v5929_v35, 16 }
  0x3d   : > { %4987 = vmatprep.subr.bf16.mxu1 %v5460_v11  ;;  %3451 = vmatprep.mubr.bf16.mxu1 %v4597_v1  ;;  %v392_v11 = vor.u32 %v391_v3, %v388_v2  ;;  %v691_v43 = vrot.slane %v690_v33, 4  ;;  %v686_v50 = vsel %vm5698_vm2, %v681_v37, %v685_v24  ;;  %v5966_v33 = vld [vmem:[%s5656_s14 + $0x40] sm:$0xf] }
  0x3e   : > { %v402_v18 = vor.u32 %v401_v7, %v397_v4  ;;  %v421_v5 = vrot.slane %v419_v55, 5  ;;  %v425_v7 = vrot.slane %v423_v58, 4  ;;  %v698_v55 = vld [vmem:[%s5656_s14 + $0xc] sm:$0xe] }
  0x3f   : > { %3356 = vmatmul.mubr.bf16.gmra.mrb[8].mxu0 %v4569_v38  ;;  %3452 = vmatmul.mubr.bf16.gmra.mrb[8].mxu1 %v4581_v45  ;;  %v393_v23 = vrot.slane %v392_v11, 4  ;;  %v4570_v38 = vcombine.low %v5849_v46, %v5852_v51  ;;  %v4582_v45 = vcombine.low %v5870_v60, %v5873_v61  ;;  %v5473_v46 = vld [vmem:[%s7777_s1 + $0x110] sm:$0xff]   ;;  %v696_v57 = vsel %vm5698_vm2, %v691_v43, %v695_v26  ;;  %v4407_v60 = vld [vmem:[%s5656_s14 + $0xc] sm:$0xf]  ;;  %v5957_v26 = vld [vmem:[%s5656_s14 + $0x3c] sm:$0xf] }
  0x40   : > { %4988 = vmatpush3.bf16.msra.mxu1 %v5462_v36  ;;  %v403_v28 = vrot.slane %v402_v18, 4  ;;  %5096 = vmatpush3.bf16.msra.mxu0 %v5473_v46  ;;  %v5943_v61 = vld [vmem:[%s5656_s14 + $0x10] sm:$0xf]  ;;  %v4598_v2 = vcombine.low %v686_v50, %v696_v57  ;;  %v929_v9 = vshrl.u32 %v4407_v60, 16  ;;  %v932_v10 = vshll.u32 %v4407_v60, 16 }
  0x41   : > { %4989 = vmatprep.subr.bf16.mxu1 %v5464_v39  ;;  %v398_v32 = vsel %vm5698_vm2, %v393_v23, %v397_v4  ;;  %v5472_v39 = vld [vmem:[%s7777_s1 + $0xb8] sm:$0xff]   ;;  %v938_v14 = vshll.u32 %v5943_v61, 16  ;;  %v942_v15 = vshrl.u32 %v5943_v61, 16  ;;  %v4615_v16 = vcombine.low %v4407_v60, %v5943_v61  ;;  %v5484_v60 = vld [vmem:[%s7777_s1 + $0x1c8] sm:$0xff]  }
  0x42   : > { %v408_v36 = vsel %vm5698_vm2, %v403_v28, %v407_v8  ;;  %v431_v8 = vrot.slane %v429_v59, 5  ;;  %3459 = vmatprep.mubr.bf16.mxu1 %v4598_v2  ;;  %v931_v18 = vrot.slane %v929_v9, 4  ;;  %v934_v19 = vrot.slane %v932_v10, 5  ;;  %v4409_v43 = vld [vmem:[%s5656_s14 + $0x18] sm:$0xf]  ;;  %v5485_v10 = vld [vmem:[%s7777_s1 + $0x188] sm:$0xff]  }
  0x43   : > { %v4586_v42 = vcombine.low %v398_v32, %v408_v36  ;;  %v5954_v24 = vrot.slane %v938_v14, 5  ;;  %v944_v25 = vrot.slane %v942_v15, 4  ;;  %v775_v28 = vrot.slane %v773_v40, 4  ;;  %v5969_v36 = vld [vmem:[%s5656_s14 + $0x44] sm:$0x1] }
  0x44   : > { %4990 = vmatpush3.bf16.msra.mxu1 %v5465_v44  ;;  %v5921_v44 = vld [vmem:[%s5656_s14 + $0x30] sm:$0xf]  ;;  %v935_v31 = vor.u32 %v934_v19, %v931_v18  ;;  %v434_v37 = vshrl.u32 %v5957_v26, 16  ;;  %v437_v12 = vshll.u32 %v5957_v26, 16  ;;  %v447_v59 = vshrl.u32 %v5966_v33, 16  ;;  %v5486_v18 = vld [vmem:[%s7777_s1 + $0x160] sm:$0xff]  }
  0x45   : > { %4991 = vmatprep.subr.bf16.mxu1 %v5468_v6  ;;  %v410_v53 = vshrl.u32 %v5921_v44, 16  ;;  %v413_v54 = vshll.u32 %v5921_v44, 16  ;;  %3363 = vmatprep.mubr.bf16.mxu0 %v4586_v42  ;;  %v4571_v1 = vcombine.low %v5921_v44, %v5924_v13  ;;  %v697_v6 = vld [vmem:[%s5656_s14] sm:$0xe] }
  0x46   : > { %v4391_v20 = vrot.slane %v697_v6, 9  ;;  %v5986_v50 = vrot.slane %v935_v31, 4  ;;  %v439_v58 = vrot.slane %v437_v12, 5 }
  0x47   : > { %3364 = vmatmul.mubr.bf16.gmra.mrb[12].mxu0 %v4570_v38  ;;  %v412_v3 = vrot.slane %v410_v53, 4  ;;  %v415_v4 = vrot.slane %v413_v54, 5  ;;  %3460 = vmatmul.mubr.bf16.gmra.mrb[12].mxu1 %v4582_v45  ;;  %v5979_v45 = vld [vmem:[%s5656_s14 + $0x1c] sm:$0xf]  ;;  %v5477_v53 = vld [vmem:[%s7777_s1 + $0x180] sm:$0xff]   ;;  %v436_v54 = vrot.slane %v434_v37, 4 }
  0x48   : > { %4992 = vmatpush3.bf16.msra.mxu1 %v5469_v17  ;;  %v426_v17 = vor.u32 %v425_v7, %v421_v5  ;;  %3500 = vmatprep.mubr.bf16.mxu1 %v4615_v16  ;;  %v767_v32 = vsel %vm5892_vm5, %v4391_v20, %v766_v47  ;;  %v5481_v47 = vld [vmem:[%s7777_s1 + $0x118] sm:$0xff]   ;;  %v449_v7 = vrot.slane %v447_v59, 4  ;;  %v4616_v9 = vcombine.low %v4409_v43, %v5979_v45 }
  0x49   : > { %4993 = vmatprep.subr.bf16.mxu1 %v5470_v21  ;;  %v416_v11 = vor.u32 %v415_v4, %v412_v3  ;;  %v5480_v21 = vld [vmem:[%s7777_s1 + $0x158] sm:$0xff]   ;;  %v4599_v42 = vcombine.low %v767_v32, %v5913_v41  ;;  %v443_v41 = vshll.u32 %v5966_v33, 16  ;;  %v453_v3 = vshll.u32 %v5969_v36, 16  ;;  %v4411_v32 = vld [vmem:[%s5656_s14 + $0x24] sm:$0xf] }
  0x4a   : > { %v427_v30 = vrot.slane %v426_v17, 4  ;;  %5097 = vmatprep.subr.bf16.mxu0 %v5480_v21  ;;  %v953_v4 = vshrl.u32 %v4409_v43, 16  ;;  %v440_v6 = vor.u32 %v439_v58, %v436_v54  ;;  %v4572_v16 = vcombine.low %v5957_v26, %v5966_v33  ;;  %v6015_v17 = vld [vmem:[%s5656_s14 + $0x48] sm:$0xf]  ;;  %v6025_v21 = vld [vmem:[%s5656_s14 + $0x4c] sm:$0xf] }
  0x4b   : > { %v417_v23 = vrot.slane %v416_v11, 4  ;;  %5098 = vmatpush3.bf16.msra.mxu0 %v5481_v47  ;;  %v445_v2 = vrot.slane %v443_v41, 5  ;;  %v455_v11 = vrot.slane %v453_v3, 5  ;;  %v777_v20 = vsel %vm5892_vm5, %v775_v28, %v776_v62 }
  0x4c   : > { %4994 = vmatpush3.bf16.msra.mxu1 %v5472_v39  ;;  %v945_v39 = vor.u32 %v944_v25, %v5954_v24  ;;  %v432_v46 = vsel %vm5698_vm2, %v427_v30, %v431_v8  ;;  %v6008_v14 = vrot.slane %v953_v4, 4  ;;  %v441_v44 = vrot.slane %v440_v6, 4  ;;  %5099 = vmatprep.subr.bf16.mxu0 %v5486_v18  ;;  %v6068_v18 = vld [vmem:[%s5656_s14 + $0x54] sm:$0xf] }
  0x4d   : > { %5203 = vmatprep.subr.bf16.mxu1 %v5476_v56  ;;  %v422_v38 = vsel %vm5698_vm2, %v417_v23, %v421_v5  ;;  %v956_v5 = vshll.u32 %v4409_v43, 16  ;;  %v450_v19 = vor.u32 %v449_v7, %v445_v2  ;;  %v6028_v23 = vld [vmem:[%s5656_s14 + $0x50] sm:$0x1]  ;;  %v458_v25 = vshrl.u32 %v6015_v17, 16 }
  0x4e   : > { %v4587_v56 = vcombine.low %v422_v38, %v432_v46  ;;  %v5993_v57 = vrot.slane %v945_v39, 4  ;;  %v461_v26 = vshll.u32 %v6015_v17, 16  ;;  %v467_v30 = vshll.u32 %v6025_v21, 16  ;;  %v6043_v38 = vld [vmem:[%s5656_s14 + $0x28] sm:$0xf]  ;;  %v5487_v46 = vld [vmem:[%s7777_s1 + $0x120] sm:$0xff]  }
  0x4f   : > { %3501 = vmatmul.mubr.bf16.vlgmr.msra.gmra.mrb[16].mxu1 %v4599_v42  ;;  %v6010_v15 = vrot.slane %v956_v5, 5  ;;  %v471_v31 = vshrl.u32 %v6025_v21, 16  ;;  %v446_v0 = vsel %vm5698_vm2, %v441_v44, %v445_v2  ;;  %v451_v37 = vrot.slane %v450_v19, 4  ;;  %v699_v39 = vld [vmem:[%s5656_s14 + $0x18] sm:$0xe]  ;;  %5100 = vmatpush3.bf16.msra.mxu0 %v5487_v46  ;;  %v5493_v5 = vld [vmem:[%s7777_s1 + $0x1d0] sm:$0xff]  }
  0x50   : > { %3371 = vmatprep.mubr.bf16.mxu0 %v4587_v56  ;;  %5204 = vmatpush3.bf16.msra.mxu1 %v5477_v53  ;;  %v477_v28 = vshll.u32 %v6028_v23, 16  ;;  %v460_v12 = vrot.slane %v458_v25, 4  ;;  %v463_v43 = vrot.slane %v461_v26, 5  ;;  %v469_v47 = vrot.slane %v467_v30, 5  ;;  %v4439_v19 = vld [vmem:[%s5656_s14 + $0x14] sm:$0x1] }
  0x51   : > { %3372 = vmatmul.mubr.bf16.gmra.mrb[16].mxu0 %v4571_v1  ;;  %3508 = vmatprep.mubr.bf16.mxu1 %v4616_v9  ;;  %v4392_v1 = vrot.slane %v698_v55, 9  ;;  %v456_v53 = vsel %vm5698_vm2, %v451_v37, %v455_v11  ;;  %v473_v63 = vrot.slane %v471_v31, 4  ;;  %v977_v41 = vshrl.u32 %v4411_v32, 16  ;;  %v4455_v44 = vld [vmem:[%s5656_s14 + $0xc] sm:$0xe] }
  0x52   : > { %5205 = vmatprep.subr.bf16.mxu1 %v5484_v60  ;;  %v479_v54 = vrot.slane %v477_v28, 5  ;;  %v4588_v55 = vcombine.low %v446_v0, %v456_v53  ;;  %v464_v56 = vor.u32 %v463_v43, %v460_v12  ;;  %v980_v58 = vshll.u32 %v4411_v32, 16  ;;  %v5494_v0 = vld [vmem:[%s7777_s1 + $0x128] sm:$0xff]   ;;  %v6100_v12 = vld [vmem:[%s5656_s14 + $0x34] sm:$0xf] }
  0x53   : > { %v774_v62 = vsel %vm5892_vm5, %v4392_v1, %v773_v40  ;;  %v5492_v40 = vld [vmem:[%s7777_s1 + $0x168] sm:$0xff]   ;;  %v474_v60 = vor.u32 %v473_v63, %v469_v47  ;;  %v6055_v2 = vrot.slane %v977_v41, 4  ;;  %v4617_v3 = vcombine.low %v4411_v32, %v6043_v38  ;;  %v700_v63 = vld [vmem:[%s5656_s14 + $0x24] sm:$0xe] }
  0x54   : > { %v4600_v42 = vcombine.low %v774_v62, %v777_v20  ;;  %5206 = vmatpush3.bf16.msra.mxu1 %v5485_v10  ;;  %v4573_v4 = vcombine.low %v6015_v17, %v6025_v21  ;;  %5101 = vmatprep.subr.bf16.mxu0 %v5492_v40  ;;  %v465_v6 = vrot.slane %v464_v56, 4  ;;  %v6063_v7 = vrot.slane %v980_v58, 5  ;;  %v6084_v20 = vld [vmem:[%s5656_s14 + $0x5c] sm:$0x1]  ;;  %v6108_v58 = vld [vmem:[%s5656_s14 + $0x60] sm:$0xf] }
  0x55   : > { %3379 = vmatprep.mubr.bf16.mxu0 %v4588_v55  ;;  %v4393_v9 = vrot.slane %v699_v39, 9  ;;  %v780_v10 = vrot.slane %v5792_v48, 5  ;;  %v475_v11 = vrot.slane %v474_v60, 4  ;;  %v783_v17 = vrot.slane %v5795_v49, 5  ;;  %v6081_v49 = vld [vmem:[%s5656_s14 + $0x58] sm:$0xf]  ;;  %5207 = vmatprep.subr.bf16.mxu1 %v5493_v5 }
  0x56   : > { %v470_v1 = vsel %vm5698_vm2, %v465_v6, %v469_v47  ;;  %v482_v25 = vshrl.u32 %v6068_v18, 16  ;;  %v485_v30 = vshll.u32 %v6068_v18, 16  ;;  %v491_v31 = vshll.u32 %v6081_v49, 16  ;;  %5102 = vmatpush3.bf16.msra.mxu0 %v5494_v0  ;;  %v6241_v56 = vld [vmem:[%s5656_s14 + $0x84] sm:$0xf] }
  0x57   : > { %3509 = vmatmul.mubr.bf16.gmra.mrb[20].mxu1 %v4600_v42  ;;  %v781_v48 = vsel %vm5892_vm5, %v4393_v9, %v780_v10  ;;  %v480_v26 = vsel %vm5698_vm2, %v475_v11, %v479_v54  ;;  %v495_v32 = vshrl.u32 %v6081_v49, 16  ;;  %v501_v39 = vshll.u32 %v6084_v20, 16  ;;  %v4413_v42 = vld [vmem:[%s5656_s14 + $0x30] sm:$0xf]  ;;  %v6114_v9 = vld [vmem:[%s5656_s14 + $0x64] sm:$0xf] }
  0x58   : > { %3516 = vmatprep.mubr.bf16.mxu1 %v4617_v3  ;;  %v4589_v37 = vcombine.low %v470_v1, %v480_v26  ;;  %v484_v28 = vrot.slane %v482_v25, 4  ;;  %v487_v47 = vrot.slane %v485_v30, 5  ;;  %v493_v46 = vrot.slane %v491_v31, 5  ;;  %v5495_v54 = vld [vmem:[%s7777_s1 + $0x190] sm:$0xff]   ;;  %v4415_v30 = vld [vmem:[%s5656_s14 + $0x3c] sm:$0xf] }
  0x59   : > { %3380 = vmatmul.mubr.bf16.gmra.mrb[20].mxu0 %v4572_v16  ;;  %v782_v16 = vrot.slane %v780_v10, 4  ;;  %v497_v53 = vrot.slane %v495_v32, 4  ;;  %v503_v41 = vrot.slane %v501_v39, 5  ;;  %v1001_v40 = vshrl.u32 %v4413_v42, 16  ;;  %5208 = vmatpush3.bf16.msra.mxu1 %v5495_v54  ;;  %v6128_v31 = vld [vmem:[%s5656_s14 + $0x40] sm:$0xf] }
  0x5a   : > { %3387 = vmatprep.mubr.bf16.mxu0 %v4589_v37  ;;  %v1004_v55 = vshll.u32 %v4413_v42, 16  ;;  %v488_v60 = vor.u32 %v487_v47, %v484_v28  ;;  %v4618_v5 = vcombine.low %v4413_v42, %v6100_v12  ;;  %v4574_v6 = vcombine.low %v6068_v18, %v6081_v49  ;;  %v701_v42 = vld [vmem:[%s5656_s14 + $0x30] sm:$0xe] }
  0x5b   : > { %v784_v62 = vsel %vm5892_vm5, %v782_v16, %v783_v17  ;;  %v498_v3 = vor.u32 %v497_v53, %v493_v46  ;;  %v6116_v10 = vrot.slane %v1001_v40, 4  ;;  %v4394_v17 = vrot.slane %v700_v63, 9 }
  0x5c   : > { %v4601_v43 = vcombine.low %v781_v48, %v784_v62  ;;  %v6118_v11 = vrot.slane %v1004_v55, 5  ;;  %v787_v1 = vrot.slane %v5852_v51, 5  ;;  %v6122_v48 = vld [vmem:[%s5656_s14 + $0x68] sm:$0x1]  ;;  %v489_v16 = vrot.slane %v488_v60, 4 }
  0x5d   : > { %v499_v25 = vrot.slane %v498_v3, 4  ;;  %v790_v18 = vrot.slane %v5858_v52, 5  ;;  %v506_v26 = vshrl.u32 %v6108_v58, 16  ;;  %v509_v51 = vshll.u32 %v6108_v58, 16 }
  0x5e   : > { %v788_v32 = vsel %vm5892_vm5, %v4394_v17, %v787_v1  ;;  %v789_v0 = vrot.slane %v787_v1, 4  ;;  %v515_v37 = vshll.u32 %v6114_v9, 16  ;;  %v494_v52 = vsel %vm5698_vm2, %v489_v16, %v493_v46  ;;  %v6152_v1 = vld [vmem:[%s5656_s14 + $0x6c] sm:$0xf] }
  0x5f   : > { %3517 = vmatmul.mubr.bf16.gmra.mrb[24].mxu1 %v4601_v43  ;;  %v504_v62 = vsel %vm5698_vm2, %v499_v25, %v503_v41  ;;  %v508_v28 = vrot.slane %v506_v26, 4  ;;  %v519_v39 = vshrl.u32 %v6114_v9, 16  ;;  %v511_v53 = vrot.slane %v509_v51, 5  ;;  %v5499_v41 = vld [vmem:[%s7777_s1 + $0x130] sm:$0xff]  }
  0x60   : > { %3524 = vmatprep.mubr.bf16.mxu1 %v4618_v5  ;;  %v4590_v43 = vcombine.low %v494_v52, %v504_v62  ;;  %v791_v47 = vsel %vm5892_vm5, %v789_v0, %v790_v18  ;;  %v517_v63 = vrot.slane %v515_v37, 5  ;;  %v525_v46 = vshll.u32 %v6122_v48, 16 }
  0x61   : > { %3388 = vmatmul.mubr.bf16.gmra.mrb[24].mxu0 %v4573_v4  ;;  %v5498_v4 = vld [vmem:[%s7777_s1 + $0x170] sm:$0xff]   ;;  %v4602_v54 = vcombine.low %v788_v32, %v791_v47  ;;  %v521_v40 = vrot.slane %v519_v39, 4  ;;  %v1025_v55 = vshrl.u32 %v4415_v30, 16  ;;  %v512_v60 = vor.u32 %v511_v53, %v508_v28  ;;  %v4417_v39 = vld [vmem:[%s5656_s14 + $0x48] sm:$0xf] }
  0x62   : > { %5103 = vmatprep.subr.bf16.mxu0 %v5498_v4  ;;  %3395 = vmatprep.mubr.bf16.mxu0 %v4590_v43  ;;  %v1028_v3 = vshll.u32 %v4415_v30, 16  ;;  %v4619_v17 = vcombine.low %v4415_v30, %v6128_v31  ;;  %v527_v25 = vrot.slane %v525_v46, 5  ;;  %v4575_v26 = vcombine.low %v6108_v58, %v6114_v9  ;;  %v6159_v32 = vld [vmem:[%s5656_s14 + $0x70] sm:$0xf]  ;;  %v6165_v4 = vld [vmem:[%s5656_s14 + $0x74] sm:$0x1] }
  0x63   : > { %v522_v16 = vor.u32 %v521_v40, %v517_v63  ;;  %v6154_v18 = vrot.slane %v1025_v55, 4  ;;  %5104 = vmatpush3.bf16.msra.mxu0 %v5499_v41  ;;  %v513_v0 = vrot.slane %v512_v60, 4  ;;  %v4395_v37 = vrot.slane %v701_v42, 9 }
  0x64   : > { %v6161_v51 = vrot.slane %v1028_v3, 5  ;;  %v794_v30 = vrot.slane %v5924_v13, 5  ;;  %v797_v62 = vrot.slane %v5929_v35, 5  ;;  %v530_v58 = vshrl.u32 %v6152_v1, 16 }
  0x65   : > { %v523_v52 = vrot.slane %v522_v16, 4  ;;  %v533_v28 = vshll.u32 %v6152_v1, 16  ;;  %v518_v43 = vsel %vm5698_vm2, %v513_v0, %v517_v63  ;;  %v539_v13 = vshll.u32 %v6159_v32, 16  ;;  %v5502_v63 = vld [vmem:[%s7777_s1 + $0x1d8] sm:$0xff]  }
  0x66   : > { %v795_v42 = vsel %vm5892_vm5, %v4395_v37, %v794_v30  ;;  %v796_v47 = vrot.slane %v794_v30, 4  ;;  %v532_v53 = vrot.slane %v530_v58, 4  ;;  %v543_v40 = vshrl.u32 %v6159_v32, 16  ;;  %v702_v0 = vld [vmem:[%s5656_s14 + $0x3c] sm:$0xe]  ;;  %5209 = vmatprep.subr.bf16.mxu1 %v5502_v63 }
  0x67   : > { %3525 = vmatmul.mubr.bf16.gmra.mrb[28].mxu1 %v4602_v54  ;;  %v528_v35 = vsel %vm5698_vm2, %v523_v52, %v527_v25  ;;  %v535_v54 = vrot.slane %v533_v28, 5  ;;  %v541_v41 = vrot.slane %v539_v13, 5  ;;  %v549_v60 = vshll.u32 %v6165_v4, 16  ;;  %v6192_v28 = vld [vmem:[%s5656_s14 + $0x78] sm:$0xf] }
  0x68   : > { %3532 = vmatprep.mubr.bf16.mxu1 %v4619_v17  ;;  %v4591_v46 = vcombine.low %v518_v43, %v528_v35  ;;  %v798_v55 = vsel %vm5892_vm5, %v796_v47, %v797_v62  ;;  %v545_v16 = vrot.slane %v543_v40, 4  ;;  %v1049_v25 = vshrl.u32 %v4417_v39, 16  ;;  %v5503_v62 = vld [vmem:[%s7777_s1 + $0x198] sm:$0xff]   ;;  %v6209_v63 = vld [vmem:[%s5656_s14 + $0x80] sm:$0x1] }
  0x69   : > { %3396 = vmatmul.mubr.bf16.gmra.mrb[28].mxu0 %v4574_v6  ;;  %v6177_v6 = vld [vmem:[%s5656_s14 + $0x4c] sm:$0xf]  ;;  %v4603_v3 = vcombine.low %v795_v42, %v798_v55  ;;  %v536_v17 = vor.u32 %v535_v54, %v532_v53  ;;  %v551_v37 = vrot.slane %v549_v60, 5  ;;  %v1052_v30 = vshll.u32 %v4417_v39, 16  ;;  %v6202_v35 = vld [vmem:[%s5656_s14 + $0x7c] sm:$0xf]  ;;  %5210 = vmatpush3.bf16.msra.mxu1 %v5503_v62 }
  0x6a   : > { %3403 = vmatprep.mubr.bf16.mxu0 %v4591_v46  ;;  %v4620_v58 = vcombine.low %v4417_v39, %v6177_v6  ;;  %v546_v42 = vor.u32 %v545_v16, %v541_v41  ;;  %v6197_v47 = vrot.slane %v1049_v25, 4  ;;  %v4576_v13 = vcombine.low %v6152_v1, %v6159_v32  ;;  %v5507_v25 = vld [vmem:[%s7777_s1 + $0x138] sm:$0xff]  }
  0x6b   : > { %v537_v43 = vrot.slane %v536_v17, 4  ;;  %v6204_v53 = vrot.slane %v1052_v30, 5  ;;  %v4396_v39 = vrot.slane %v702_v0, 9  ;;  %v801_v54 = vrot.slane %v5966_v33, 5  ;;  %v6217_v17 = vld [vmem:[%s5656_s14 + $0x58] sm:$0xf] }
  0x6c   : > { %v804_v40 = vrot.slane %v5969_v36, 5  ;;  %v547_v55 = vrot.slane %v546_v42, 4  ;;  %v554_v1 = vshrl.u32 %v6192_v28, 16  ;;  %v557_v60 = vshll.u32 %v6192_v28, 16  ;;  %v5506_v33 = vld [vmem:[%s7777_s1 + $0x178] sm:$0xff]   ;;  %v5509_v42 = vld [vmem:[%s7777_s1 + $0x1e0] sm:$0xff]  }
  0x6d   : > { %v542_v46 = vsel %vm5698_vm2, %v537_v43, %v541_v41  ;;  %v802_v36 = vsel %vm5892_vm5, %v4396_v39, %v801_v54  ;;  %v563_v41 = vshll.u32 %v6202_v35, 16  ;;  %v567_v16 = vshrl.u32 %v6202_v35, 16  ;;  %5105 = vmatprep.subr.bf16.mxu0 %v5506_v33  ;;  %5211 = vmatprep.subr.bf16.mxu1 %v5509_v42 }
  0x6e   : > { %v552_v0 = vsel %vm5698_vm2, %v547_v55, %v551_v37  ;;  %v556_v30 = vrot.slane %v554_v1, 4  ;;  %v573_v43 = vshll.u32 %v6209_v63, 16  ;;  %5106 = vmatpush3.bf16.msra.mxu0 %v5507_v25  ;;  %v6251_v25 = vld [vmem:[%s5656_s14 + $0x8c] sm:$0x1] }
  0x6f   : > { %3533 = vmatmul.mubr.bf16.gmra.mrb[32].mxu1 %v4603_v3  ;;  %v4419_v3 = vld [vmem:[%s5656_s14 + $0x54] sm:$0xf]  ;;  %v4592_v39 = vcombine.low %v542_v46, %v552_v0  ;;  %v569_v52 = vrot.slane %v567_v16, 4  ;;  %v4397_v16 = vrot.slane %v703_v27, 9  ;;  %v578_v27 = vshrl.u32 %v6241_v56, 16 }
  0x70   : > { %3540 = vmatprep.mubr.bf16.mxu1 %v4620_v58  ;;  %v559_v58 = vrot.slane %v557_v60, 5  ;;  %v575_v1 = vrot.slane %v573_v43, 5  ;;  %v1073_v60 = vshrl.u32 %v4419_v3, 16  ;;  %v1076_v5 = vshll.u32 %v4419_v3, 16  ;;  %v6292_v46 = vld [vmem:[%s5656_s14 + $0x6c] sm:$0xf] }
  0x71   : > { %3404 = vmatmul.mubr.bf16.gmra.mrb[32].mxu0 %v4575_v26  ;;  %v803_v26 = vrot.slane %v801_v54, 4  ;;  %v565_v54 = vrot.slane %v563_v41, 5  ;;  %v4621_v0 = vcombine.low %v4419_v3, %v6217_v17  ;;  %v811_v43 = vrot.slane %v6028_v23, 5 }
  0x72   : > { %v560_v55 = vor.u32 %v559_v58, %v556_v30  ;;  %3411 = vmatprep.mubr.bf16.mxu0 %v4592_v39  ;;  %v6246_v41 = vrot.slane %v1073_v60, 4  ;;  %v6256_v30 = vrot.slane %v1076_v5, 5  ;;  %v808_v58 = vrot.slane %v6025_v21, 5  ;;  %v6269_v5 = vld [vmem:[%s7777_s1 + $0x200] sm:$0xff]  }
  0x73   : > { %v805_v62 = vsel %vm5892_vm5, %v803_v26, %v804_v40  ;;  %v570_v33 = vor.u32 %v569_v52, %v565_v54  ;;  %v6244_v40 = vld [vmem:[%s5656_s14 + $0x88] sm:$0xf]  ;;  %v5510_v52 = vld [vmem:[%s7777_s1 + $0x1a0] sm:$0xff]   ;;  %5339 = vmatprep.subr.bf16.mxu0 %v6269_v5 }
  0x74   : > { %v4604_v37 = vcombine.low %v802_v36, %v805_v62  ;;  %v561_v26 = vrot.slane %v560_v55, 4  ;;  %v4577_v36 = vcombine.low %v6192_v28, %v6202_v35  ;;  %v581_v28 = vshll.u32 %v6241_v56, 16  ;;  %v4421_v62 = vld [vmem:[%s5656_s14 + $0x60] sm:$0xf]  ;;  %5212 = vmatpush3.bf16.msra.mxu1 %v5510_v52 }
  0x75   : > { %v571_v3 = vrot.slane %v570_v33, 4  ;;  %v587_v39 = vshll.u32 %v6244_v40, 16  ;;  %v809_v23 = vsel %vm5892_vm5, %v4397_v16, %v808_v58  ;;  %v580_v55 = vrot.slane %v578_v27, 4 }
  0x76   : > { %v566_v42 = vsel %vm5698_vm2, %v561_v26, %v565_v54  ;;  %v591_v54 = vshrl.u32 %v6244_v40, 16  ;;  %v583_v60 = vrot.slane %v581_v28, 5  ;;  %v597_v52 = vshll.u32 %v6251_v25, 16 }
  0x77   : > { %3541 = vmatmul.mubr.bf16.gmra.mrb[36].mxu1 %v4604_v37  ;;  %v576_v21 = vsel %vm5698_vm2, %v571_v3, %v575_v1  ;;  %v589_v33 = vrot.slane %v587_v39, 5  ;;  %v5514_v1 = vld [vmem:[%s7777_s1 + $0x1e8] sm:$0xff]   ;;  %v1097_v3 = vshrl.u32 %v4421_v62, 16  ;;  %v1100_v39 = vshll.u32 %v4421_v62, 16 }
  0x78   : > { %3548 = vmatprep.mubr.bf16.mxu1 %v4621_v0  ;;  %v4593_v37 = vcombine.low %v566_v42, %v576_v21  ;;  %v6277_v0 = vld [vmem:[%s5656_s14 + $0x64] sm:$0xf]  ;;  %v593_v16 = vrot.slane %v591_v54, 4  ;;  %v5515_v42 = vld [vmem:[%s7777_s1 + $0x1a8] sm:$0xff]   ;;  %v584_v28 = vor.u32 %v583_v60, %v580_v55  ;;  %5213 = vmatprep.subr.bf16.mxu1 %v5514_v1  ;;  %v599_v54 = vrot.slane %v597_v52, 5 }
  0x79   : > { %3412 = vmatmul.mubr.bf16.gmra.mrb[36].mxu0 %v4576_v13  ;;  %v810_v13 = vrot.slane %v808_v58, 4  ;;  %v704_v58 = vld [vmem:[%s5656_s14 + $0x54] sm:$0xe]  ;;  %v6297_v59 = vrot.slane %v1097_v3, 4  ;;  %v4622_v8 = vcombine.low %v4421_v62, %v6277_v0  ;;  %5214 = vmatpush3.bf16.msra.mxu1 %v5515_v42  ;;  %v4578_v55 = vcombine.low %v6241_v56, %v6244_v40 }
  0x7a   : > { %3419 = vmatprep.mubr.bf16.mxu0 %v4593_v37  ;;  %v6302_v37 = vrot.slane %v1100_v39, 5  ;;  %v4398_v60 = vrot.slane %v704_v58, 9  ;;  %v815_v1 = vrot.slane %v6081_v49, 5  ;;  %v1121_v52 = vshrl.u32 %v6292_v46, 16  ;;  %v5519_v39 = vld [vmem:[%s7777_s1 + $0x1f0] sm:$0xff]  }
  0x7b   : > { %v812_v26 = vsel %vm5892_vm5, %v810_v13, %v811_v43  ;;  %v6295_v43 = vld [vmem:[%s5656_s14 + $0x70] sm:$0xf]  ;;  %v594_v13 = vor.u32 %v593_v16, %v589_v33  ;;  %v818_v16 = vrot.slane %v6084_v20, 5  ;;  %v1124_v3 = vshll.u32 %v6292_v46, 16  ;;  %5215 = vmatprep.subr.bf16.mxu1 %v5519_v39 }
  0x7c   : > { %v4605_v27 = vcombine.low %v809_v23, %v812_v26  ;;  %v585_v23 = vrot.slane %v584_v28, 4  ;;  %v705_v26 = vld [vmem:[%s5656_s14 + $0x60] sm:$0xe]  ;;  %v1134_v56 = vshrl.u32 %v6295_v43, 16  ;;  %v4623_v58 = vcombine.low %v6292_v46, %v6295_v43 }
  0x7d   : > { %v595_v21 = vrot.slane %v594_v13, 4  ;;  %v816_v20 = vsel %vm5892_vm5, %v4398_v60, %v815_v1  ;;  %v817_v42 = vrot.slane %v815_v1, 4  ;;  %v4471_v28 = vrot.slane %v4455_v44, 9  ;;  %v5520_v60 = vld [vmem:[%s7777_s1 + $0x1b0] sm:$0xff]  }
  0x7e   : > { %v590_v62 = vsel %vm5698_vm2, %v585_v23, %v589_v33  ;;  %v948_v33 = vshll.u32 %v4439_v19, 16  ;;  %v1381_v13 = vrot.slane %v4439_v19, 5  ;;  %v6331_v23 = vld [vmem:[%s5656_s14 + $0x78] sm:$0xf]  ;;  %5216 = vmatpush3.bf16.msra.mxu1 %v5520_v60 }
  0x7f   : > { %3549 = vmatmul.mubr.bf16.gmra.mrb[40].mxu1 %v4605_v27  ;;  %v600_v49 = vsel %vm5698_vm2, %v595_v21, %v599_v54  ;;  %v819_v46 = vsel %vm5892_vm5, %v817_v42, %v818_v16  ;;  %v1378_v21 = vrot.slane %v5943_v61, 5  ;;  %v4399_v54 = vrot.slane %v705_v26, 9 }
  0x80   : > { %3556 = vmatprep.mubr.bf16.mxu1 %v4622_v8  ;;  %v4594_v27 = vcombine.low %v590_v62, %v600_v49  ;;  %v6322_v8 = vrot.slane %v1124_v3, 5  ;;  %v4606_v44 = vcombine.low %v816_v20, %v819_v46  ;;  %v950_v1 = vrot.slane %v948_v33, 5  ;;  %v6339_v62 = vld [vmem:[%s5656_s14 + $0x7c] sm:$0xf]  ;;  %v4456_v49 = vld [vmem:[%s5656_s14 + $0x18] sm:$0xe] }
  0x81   : > { %3420 = vmatmul.mubr.bf16.gmra.mrb[40].mxu0 %v4577_v36  ;;  %v6320_v36 = vrot.slane %v1121_v52, 4  ;;  %v822_v52 = vrot.slane %v6114_v9, 5  ;;  %v825_v16 = vrot.slane %v6122_v48, 5  ;;  %v1379_v61 = vsel %vm5892_vm5, %v4471_v28, %v1378_v21  ;;  %v5524_v9 = vld [vmem:[%s7777_s1 + $0x1f8] sm:$0xff]   ;;  %v4440_v33 = vld [vmem:[%s5656_s14 + $0x20] sm:$0x1] }
  0x82   : > { %3427 = vmatprep.mubr.bf16.mxu0 %v4594_v27  ;;  %v1380_v19 = vrot.slane %v1378_v21, 4  ;;  %v1145_v26 = vshrl.u32 %v6331_v23, 16  ;;  %v1148_v3 = vshll.u32 %v6331_v23, 16  ;;  %v951_v42 = vsel %vm5698_vm2, %v5993_v57, %v950_v1  ;;  %v706_v28 = vld [vmem:[%s5656_s14 + $0x6c] sm:$0xe]  ;;  %5217 = vmatprep.subr.bf16.mxu1 %v5524_v9 }
  0x83   : > { %v823_v48 = vsel %vm5892_vm5, %v4399_v54, %v822_v52  ;;  %v824_v20 = vrot.slane %v822_v52, 4  ;;  %v1158_v27 = vshrl.u32 %v6339_v62, 16  ;;  %v7785_v46 = vsel %vm5698_vm2, %v5986_v50, %v5954_v24  ;;  %v5525_v24 = vld [vmem:[%s7777_s1 + $0x1b8] sm:$0xff]  }
  0x84   : > { %v1382_v39 = vsel %vm5892_vm5, %v1380_v19, %v1381_v13  ;;  %v4631_v21 = vcombine.low %v7785_v46, %v951_v42  ;;  %v6364_v54 = vrot.slane %v1145_v26, 4  ;;  %v6366_v60 = vrot.slane %v1148_v3, 5  ;;  %5218 = vmatpush3.bf16.msra.mxu1 %v5525_v24 }
  0x85   : > { %v4647_v57 = vcombine.low %v1379_v61, %v1382_v39  ;;  %v4624_v13 = vcombine.low %v6331_v23, %v6339_v62  ;;  %v4472_v1 = vrot.slane %v4456_v49, 9  ;;  %v1385_v52 = vrot.slane %v5979_v45, 5  ;;  %v6386_v49 = vld [vmem:[%s5656_s14 + $0x88] sm:$0xf] }
  0x86   : > { %v1388_v19 = vrot.slane %v4440_v33, 5  ;;  %v829_v61 = vrot.slane %v6159_v32, 5  ;;  %v7786_v23 = vor.u32 %v6010_v15, %v6008_v14  ;;  %v962_v3 = vshll.u32 %v5979_v45, 16 }
  0x87   : > { %3557 = vmatmul.mubr.bf16.gmra.mrb[44].mxu1 %v4606_v44  ;;  %v826_v44 = vsel %vm5892_vm5, %v824_v20, %v825_v16  ;;  %v832_v16 = vrot.slane %v6165_v4, 5  ;;  %v1386_v9 = vsel %vm5892_vm5, %v4472_v1, %v1385_v52  ;;  %v7787_v20 = vshrl.u32 %v5979_v45, 16  ;;  %v4441_v4 = vld [vmem:[%s5656_s14 + $0x2c] sm:$0x1]  ;;  %v4457_v1 = vld [vmem:[%s5656_s14 + $0x24] sm:$0xe] }
  0x88   : > { %3564 = vmatprep.mubr.bf16.mxu1 %v4623_v58  ;;  %v4607_v50 = vcombine.low %v823_v48, %v826_v44  ;;  %v6377_v58 = vld [vmem:[%s5656_s14 + $0x84] sm:$0xf]  ;;  %v960_v26 = vrot.slane %v7786_v23, 4  ;;  %v1387_v48 = vrot.slane %v1385_v52, 4  ;;  %v972_v42 = vshll.u32 %v4440_v33, 16 }
  0x89   : > { %3428 = vmatmul.mubr.bf16.gmra.mrb[44].mxu0 %v4578_v55  ;;  %v4400_v55 = vrot.slane %v706_v28, 9  ;;  %v968_v32 = vrot.slane %v7787_v20, 4  ;;  %v831_v15 = vrot.slane %v829_v61, 4  ;;  %v964_v28 = vrot.slane %v962_v3, 5  ;;  %v707_v23 = vld [vmem:[%s5656_s14 + $0x78] sm:$0xe] }
  0x8a   : > { %3661 = vmatprep.mubr.bf16.mxu0 %v4647_v57  ;;  %v1169_v39 = vshrl.u32 %v6377_v58, 16  ;;  %v1389_v46 = vsel %vm5892_vm5, %v1387_v48, %v1388_v19  ;;  %v974_v57 = vrot.slane %v972_v42, 5  ;;  %v1172_v44 = vshll.u32 %v6377_v58, 16 }
  0x8b   : > { %v830_v14 = vsel %vm5892_vm5, %v4400_v55, %v829_v61  ;;  %v4648_v24 = vcombine.low %v1386_v9, %v1389_v46  ;;  %v833_v45 = vsel %vm5892_vm5, %v831_v15, %v832_v16  ;;  %v969_v33 = vor.u32 %v968_v32, %v964_v28  ;;  %v5516_v55 = vld [vmem:[%s7777_s1 + $0x208] sm:$0xff]   ;;  %v6428_v15 = vld [vmem:[%s5656_s14 + $0x90] sm:$0xf]  ;;  %v4442_v46 = vld [vmem:[%s5656_s14 + $0x38] sm:$0x1] }
  0x8c   : > { %v1182_v52 = vshrl.u32 %v6386_v49, 16  ;;  %v4608_v61 = vcombine.low %v830_v14, %v833_v45  ;;  %v965_v19 = vsel %vm5698_vm2, %v960_v26, %v964_v28  ;;  %v6409_v3 = vrot.slane %v1169_v39, 4 }
  0x8d   : > { %v4625_v9 = vcombine.low %v6377_v58, %v6386_v49  ;;  %v970_v16 = vrot.slane %v969_v33, 4  ;;  %v4473_v48 = vrot.slane %v4457_v1, 9  ;;  %v1392_v20 = vrot.slane %v6043_v38, 5 }
  0x8e   : > { %v1395_v32 = vrot.slane %v4441_v4, 5  ;;  %v836_v26 = vrot.slane %v6202_v35, 5  ;;  %v839_v42 = vrot.slane %v6209_v63, 5  ;;  %v986_v35 = vshll.u32 %v6043_v38, 16  ;;  %v6431_v63 = vld [vmem:[%s5656_s14 + $0x94] sm:$0xf] }
  0x8f   : > { %3565 = vmatmul.mubr.bf16.gmra.mrb[48].mxu1 %v4607_v50  ;;  %v4401_v50 = vrot.slane %v707_v23, 9  ;;  %v975_v58 = vsel %vm5698_vm2, %v970_v16, %v974_v57  ;;  %v1394_v14 = vrot.slane %v1392_v20, 4  ;;  %v4458_v57 = vld [vmem:[%s5656_s14 + $0x30] sm:$0xe]  ;;  %v7788_v45 = vshrl.u32 %v6043_v38, 16 }
  0x90   : > { %3572 = vmatprep.mubr.bf16.mxu1 %v4624_v13  ;;  %v5521_v13 = vld [vmem:[%s7777_s1 + $0x210] sm:$0xff]   ;;  %v838_v28 = vrot.slane %v836_v26, 4  ;;  %v996_v23 = vshll.u32 %v4441_v4, 16  ;;  %v708_v16 = vld [vmem:[%s5656_s14 + $0x84] sm:$0xe]  ;;  %v1196_v38 = vshll.u32 %v6428_v15, 16 }
  0x91   : > { %3662 = vmatmul.mubr.bf16.vlgmr.msra.gmra.mrb[48].mxu0 %v4631_v21  ;;  %v983_v21 = vor.u32 %v6063_v7, %v6055_v2  ;;  %v4632_v2 = vcombine.low %v965_v19, %v975_v58  ;;  %v6435_v7 = vsel %vm5892_vm5, %v4401_v50, %v836_v26  ;;  %v1396_v1 = vsel %vm5892_vm5, %v1394_v14, %v1395_v32  ;;  %v5526_v19 = vld [vmem:[%s7777_s1 + $0x218] sm:$0xff]  }
  0x92   : > { %5340 = vmatpush3.bf16.msra.mxu0 %v6269_v5  ;;  %3669 = vmatprep.mubr.bf16.mxu0 %v4648_v24  ;;  %v1393_v5 = vsel %vm5892_vm5, %v4473_v48, %v1392_v20  ;;  %v988_v24 = vrot.slane %v986_v35, 5  ;;  %v992_v33 = vrot.slane %v7788_v45, 4  ;;  %v6447_v48 = vrot.slane %v1172_v44, 5 }
  0x93   : > { %5341 = vmatprep.subr.bf16.mxu0 %v5516_v55  ;;  %v984_v39 = vrot.slane %v983_v21, 4  ;;  %v4649_v20 = vcombine.low %v1393_v5, %v1396_v1  ;;  %v840_v50 = vsel %vm5892_vm5, %v838_v28, %v839_v42  ;;  %v1193_v26 = vshrl.u32 %v6428_v15, 16  ;;  %v6478_v1 = vld [vmem:[%s5656_s14 + $0x9c] sm:$0xf] }
  0x94   : > { %v993_v32 = vor.u32 %v992_v33, %v988_v24  ;;  %v998_v21 = vrot.slane %v996_v23, 5  ;;  %v4609_v4 = vcombine.low %v6435_v7, %v840_v50  ;;  %v4626_v5 = vcombine.low %v6428_v15, %v6431_v63  ;;  %v5532_v50 = vld [vmem:[%s7777_s1 + $0x228] sm:$0xff]  }
  0x95   : > { %v989_v58 = vsel %vm5698_vm2, %v984_v39, %v988_v24  ;;  %v6456_v44 = vrot.slane %v1193_v26, 4  ;;  %v4474_v42 = vrot.slane %v4458_v57, 9  ;;  %v1399_v14 = vrot.slane %v6100_v12, 5 }
  0x96   : > { %5342 = vmatpush3.bf16.msra.mxu0 %v5516_v55  ;;  %v994_v55 = vrot.slane %v993_v32, 4  ;;  %v1402_v35 = vrot.slane %v4442_v46, 5  ;;  %v843_v7 = vrot.slane %v6244_v40, 5  ;;  %v846_v28 = vrot.slane %v6251_v25, 5  ;;  %v5529_v40 = vld [vmem:[%s7777_s1 + $0x220] sm:$0xff]  }
  0x97   : > { %5343 = vmatprep.subr.bf16.mxu0 %v5521_v13  ;;  %3573 = vmatmul.mubr.bf16.gmra.mrb[52].mxu1 %v4608_v61  ;;  %v4402_v61 = vrot.slane %v708_v16, 9  ;;  %v1007_v39 = vor.u32 %v6118_v11, %v6116_v10  ;;  %v1400_v15 = vsel %vm5892_vm5, %v4474_v42, %v1399_v14  ;;  %v1010_v57 = vshll.u32 %v6100_v12, 16  ;;  %v709_v42 = vld [vmem:[%s5656_s14 + $0x90] sm:$0xe] }
  0x98   : > { %3580 = vmatprep.mubr.bf16.mxu1 %v4625_v9  ;;  %v999_v9 = vsel %vm5698_vm2, %v994_v55, %v998_v21  ;;  %v845_v11 = vrot.slane %v843_v7, 4  ;;  %v7789_v33 = vshrl.u32 %v6100_v12, 16  ;;  %v1020_v16 = vshll.u32 %v4442_v46, 16  ;;  %v4459_v55 = vld [vmem:[%s5656_s14 + $0x3c] sm:$0xe] }
  0x99   : > { %3670 = vmatmul.mubr.bf16.gmra.mrb[52].mxu0 %v4632_v2  ;;  %v1401_v2 = vrot.slane %v1399_v14, 4  ;;  %v4633_v25 = vcombine.low %v989_v58, %v999_v9  ;;  %v6475_v10 = vsel %vm5892_vm5, %v4402_v61, %v843_v7  ;;  %v1012_v45 = vrot.slane %v1010_v57, 5  ;;  %v6500_v61 = vld [vmem:[%s5656_s14 + $0xa0] sm:$0xf] }
  0x9a   : > { %3677 = vmatprep.mubr.bf16.mxu0 %v4649_v20  ;;  %5344 = vmatpush3.bf16.msra.mxu0 %v5521_v13  ;;  %v1008_v13 = vrot.slane %v1007_v39, 4  ;;  %v1016_v23 = vrot.slane %v7789_v33, 4  ;;  %v4443_v20 = vld [vmem:[%s5656_s14 + $0x44] sm:$0x1]  ;;  %v6488_v26 = vrot.slane %v1196_v38, 5  ;;  %v847_v21 = vsel %vm5892_vm5, %v845_v11, %v846_v28 }
  0x9b   : > { %5345 = vmatprep.subr.bf16.mxu0 %v5526_v19  ;;  %v1403_v24 = vsel %vm5892_vm5, %v1401_v2, %v1402_v35  ;;  %v1217_v58 = vshrl.u32 %v6478_v1, 16  ;;  %v1206_v12 = vshrl.u32 %v6431_v63, 16  ;;  %v1022_v14 = vrot.slane %v1020_v16, 5  ;;  %v5548_v2 = vld [vmem:[%s5656_s14 + $0x94] sm:$0xf] }
  0x9c   : > { %v4650_v32 = vcombine.low %v1400_v15, %v1403_v24  ;;  %v1017_v46 = vor.u32 %v1016_v23, %v1012_v45  ;;  %v4610_v35 = vcombine.low %v6475_v10, %v847_v21  ;;  %v1013_v38 = vsel %vm5698_vm2, %v1008_v13, %v1012_v45 }
  0x9d   : > { %v6502_v7 = vrot.slane %v1217_v58, 4  ;;  %v1220_v28 = vshll.u32 %v6478_v1, 16  ;;  %v4475_v39 = vrot.slane %v4459_v55, 9  ;;  %v1406_v9 = vrot.slane %v6128_v31, 5  ;;  %v6528_v58 = vld [vmem:[%s5656_s14 + $0xa8] sm:$0xf] }
  0x9e   : > { %5346 = vmatpush3.bf16.msra.mxu0 %v5526_v19  ;;  %v1018_v19 = vrot.slane %v1017_v46, 4  ;;  %v1409_v15 = vrot.slane %v4443_v20, 5  ;;  %v850_v57 = vrot.slane %v5548_v2, 5  ;;  %v1031_v10 = vor.u32 %v6161_v51, %v6154_v18  ;;  %v5535_v18 = vld [vmem:[%s7777_s1 + $0x230] sm:$0xff]   ;;  %v4460_v55 = vld [vmem:[%s5656_s14 + $0x48] sm:$0xe] }
  0x9f   : > { %5347 = vmatprep.subr.bf16.mxu0 %v5529_v40  ;;  %3581 = vmatmul.mubr.bf16.gmra.mrb[56].mxu1 %v4609_v4  ;;  %v4403_v4 = vrot.slane %v709_v42, 9  ;;  %v1034_v11 = vshll.u32 %v6128_v31, 16  ;;  %v1408_v13 = vrot.slane %v1406_v9, 4  ;;  %v7790_v24 = vshrl.u32 %v6128_v31, 16 }
  0xa0   : > { %3588 = vmatprep.mubr.bf16.mxu1 %v4626_v5  ;;  %v1023_v5 = vsel %vm5698_vm2, %v1018_v19, %v1022_v14  ;;  %v852_v33 = vrot.slane %v850_v57, 4  ;;  %v1032_v23 = vrot.slane %v1031_v10, 4  ;;  %v1044_v21 = vshll.u32 %v4443_v20, 16  ;;  %v4444_v19 = vld [vmem:[%s5656_s14 + $0x50] sm:$0x1] }
  0xa1   : > { %3678 = vmatmul.mubr.bf16.gmra.mrb[56].mxu0 %v4633_v25  ;;  %v1407_v25 = vsel %vm5892_vm5, %v4475_v39, %v1406_v9  ;;  %v1040_v45 = vrot.slane %v7790_v24, 4  ;;  %v4634_v51 = vcombine.low %v1013_v38, %v1023_v5  ;;  %v1410_v16 = vsel %vm5892_vm5, %v1408_v13, %v1409_v15  ;;  %v710_v39 = vld [vmem:[%s5656_s14 + $0x9c] sm:$0xe]  ;;  %v5549_v24 = vld [vmem:[%s5656_s14 + $0xa0] sm:$0xf] }
  0xa2   : > { %3685 = vmatprep.mubr.bf16.mxu0 %v4650_v32  ;;  %5348 = vmatpush3.bf16.msra.mxu0 %v5529_v40  ;;  %v4627_v40 = vcombine.low %v6478_v1, %v6500_v61  ;;  %v6525_v31 = vsel %vm5892_vm5, %v4403_v4, %v850_v57  ;;  %v1036_v32 = vrot.slane %v1034_v11, 5  ;;  %v6531_v42 = vrot.slane %v1220_v28, 5  ;;  %v6541_v4 = vld [vmem:[%s5656_s14 + $0xac] sm:$0xf] }
  0xa3   : > { %5349 = vmatprep.subr.bf16.mxu0 %v5532_v50  ;;  %v1230_v46 = vshrl.u32 %v6500_v61, 16  ;;  %v4651_v1 = vcombine.low %v1407_v25, %v1410_v16  ;;  %v7791_v14 = vrot.slane %v5692_v29, 5  ;;  %v1046_v15 = vrot.slane %v1044_v21, 5  ;;  %v5538_v29 = vld [vmem:[%s7777_s1 + $0x238] sm:$0xff]  }
  0xa4   : > { %v1041_v9 = vor.u32 %v1040_v45, %v1036_v32  ;;  %v1241_v20 = vshrl.u32 %v6528_v58, 16  ;;  %v1244_v28 = vshll.u32 %v6528_v58, 16  ;;  %v1254_v57 = vshrl.u32 %v6541_v4, 16 }
  0xa5   : > { %v854_v38 = vsel %vm5892_vm5, %v852_v33, %v7791_v14  ;;  %v4476_v10 = vrot.slane %v4460_v55, 9  ;;  %v1413_v5 = vrot.slane %v6177_v6, 5  ;;  %v1416_v25 = vrot.slane %v4444_v19, 5  ;;  %v5550_v33 = vld [vmem:[%s5656_s14 + $0xa4] sm:$0x1] }
  0xa6   : > { %5350 = vmatpush3.bf16.msra.mxu0 %v5532_v50  ;;  %v4611_v2 = vcombine.low %v6525_v31, %v854_v38  ;;  %v1037_v50 = vsel %vm5698_vm2, %v1032_v23, %v1036_v32  ;;  %v1042_v11 = vrot.slane %v1041_v9, 4  ;;  %v4404_v13 = vrot.slane %v710_v39, 9  ;;  %v4461_v9 = vld [vmem:[%s5656_s14 + $0x54] sm:$0xe] }
  0xa7   : > { %5351 = vmatprep.subr.bf16.mxu0 %v5535_v18  ;;  %3589 = vmatmul.mubr.bf16.gmra.mrb[60].mxu1 %v4610_v35  ;;  %v857_v45 = vrot.slane %v5549_v24, 5  ;;  %v860_v35 = vrot.slane %v5550_v33, 5  ;;  %v1055_v16 = vor.u32 %v6204_v53, %v6197_v47  ;;  %v1058_v23 = vshll.u32 %v6177_v6, 16 }
  0xa8   : > { %3596 = vmatprep.mubr.bf16.mxu1 %v4627_v40  ;;  %v1414_v40 = vsel %vm5892_vm5, %v4476_v10, %v1413_v5  ;;  %v1415_v31 = vrot.slane %v1413_v5, 4  ;;  %v7792_v32 = vshrl.u32 %v6177_v6, 16  ;;  %v4628_v47 = vcombine.low %v6528_v58, %v6541_v4  ;;  %v6571_v6 = vld [vmem:[%s5656_s14 + $0xb4] sm:$0xf]  ;;  %v711_v5 = vld [vmem:[%s5656_s14 + $0xa8] sm:$0xe] }
  0xa9   : > { %3686 = vmatmul.mubr.bf16.gmra.mrb[60].mxu0 %v4634_v51  ;;  %v1047_v51 = vsel %vm5698_vm2, %v1042_v11, %v1046_v15  ;;  %v859_v53 = vrot.slane %v857_v45, 4  ;;  %v858_v14 = vsel %vm5892_vm5, %v4404_v13, %v857_v45  ;;  %v1060_v38 = vrot.slane %v1058_v23, 5  ;;  %v4445_v11 = vld [vmem:[%s5656_s14 + $0x5c] sm:$0x1]  ;;  %v6583_v13 = vld [vmem:[%s5656_s14 + $0xb8] sm:$0xf] }
  0xaa   : > { %3693 = vmatprep.mubr.bf16.mxu0 %v4651_v1  ;;  %5352 = vmatpush3.bf16.msra.mxu0 %v5535_v18  ;;  %v1064_v21 = vrot.slane %v7792_v32, 4  ;;  %v4635_v55 = vcombine.low %v1037_v50, %v1047_v51  ;;  %v1056_v1 = vrot.slane %v1055_v16, 4  ;;  %v1417_v18 = vsel %vm5892_vm5, %v1415_v31, %v1416_v25  ;;  %v5552_v32 = vld [vmem:[%s5656_s14 + $0xb0] sm:$0x1] }
  0xab   : > { %5353 = vmatprep.subr.bf16.mxu0 %v5538_v29  ;;  %v1068_v39 = vshll.u32 %v4444_v19, 16  ;;  %v6574_v15 = vrot.slane %v1241_v20, 4  ;;  %v6576_v50 = vrot.slane %v1244_v28, 5  ;;  %v4652_v10 = vcombine.low %v1414_v40, %v1417_v18  ;;  %v5551_v40 = vld [vmem:[%s5656_s14 + $0xac] sm:$0xf] }
  0xac   : > { %v861_v58 = vsel %vm5892_vm5, %v859_v53, %v860_v35  ;;  %v1065_v25 = vor.u32 %v1064_v21, %v1060_v38  ;;  %v1265_v19 = vshrl.u32 %v6571_v6, 16  ;;  %v1268_v20 = vshll.u32 %v6571_v6, 16 }
  0xad   : > { %v1070_v24 = vrot.slane %v1068_v39, 5  ;;  %v4612_v28 = vcombine.low %v858_v14, %v861_v58  ;;  %v1061_v45 = vsel %vm5698_vm2, %v1056_v1, %v1060_v38  ;;  %v1278_v33 = vshrl.u32 %v6583_v13, 16 }
  0xae   : > { %5354 = vmatpush3.bf16.msra.mxu0 %v5538_v29  ;;  %v4477_v35 = vrot.slane %v4461_v9, 9  ;;  %v1066_v29 = vrot.slane %v1065_v25, 4  ;;  %v1420_v16 = vrot.slane %v6217_v17, 5  ;;  %v1423_v23 = vrot.slane %v4445_v11, 5  ;;  %v6609_v25 = vld [vmem:[%s5656_s14 + $0xc0] sm:$0xf] }
  0xaf   : > { %3597 = vmatmul.mubr.bf16.gmra.mrb[64].mxu1 %v4611_v2  ;;  %v4405_v51 = vrot.slane %v711_v5, 9  ;;  %v864_v31 = vrot.slane %v5551_v40, 5  ;;  %v867_v2 = vrot.slane %v5552_v32, 5  ;;  %v1079_v21 = vor.u32 %v6256_v30, %v6246_v41  ;;  %v6621_v32 = vld [vmem:[%s5656_s14 + $0xc4] sm:$0xf] }
  0xb0   : > { %3604 = vmatprep.mubr.bf16.mxu1 %v4628_v47  ;;  %v1082_v53 = vshll.u32 %v6217_v17, 16  ;;  %v1421_v47 = vsel %vm5892_vm5, %v4477_v35, %v1420_v16  ;;  %v1422_v1 = vrot.slane %v1420_v16, 4  ;;  %v7793_v18 = vshrl.u32 %v6217_v17, 16  ;;  %v4462_v17 = vld [vmem:[%s5656_s14 + $0x60] sm:$0xe] }
  0xb1   : > { %3694 = vmatmul.mubr.bf16.gmra.mrb[64].mxu0 %v4635_v55  ;;  %v1071_v55 = vsel %vm5698_vm2, %v1066_v29, %v1070_v24  ;;  %v4629_v39 = vcombine.low %v6571_v6, %v6583_v13  ;;  %v866_v9 = vrot.slane %v864_v31, 4  ;;  %v1080_v41 = vrot.slane %v1079_v21, 4  ;;  %v4446_v29 = vld [vmem:[%s5656_s14 + $0x68] sm:$0x1]  ;;  %v712_v16 = vld [vmem:[%s5656_s14 + $0xb4] sm:$0xe] }
  0xb2   : > { %3701 = vmatprep.mubr.bf16.mxu0 %v4652_v10  ;;  %v1088_v14 = vrot.slane %v7793_v18, 4  ;;  %v4636_v38 = vcombine.low %v1061_v45, %v1071_v55  ;;  %v1424_v30 = vsel %vm5892_vm5, %v1422_v1, %v1423_v23  ;;  %v865_v10 = vsel %vm5892_vm5, %v4405_v51, %v864_v31  ;;  %v4463_v1 = vld [vmem:[%s5656_s14 + $0x6c] sm:$0xe]  ;;  %v5553_v18 = vld [vmem:[%s5656_s14 + $0xb8] sm:$0xf] }
  0xb3   : > { %v1084_v58 = vrot.slane %v1082_v53, 5  ;;  %v1092_v5 = vshll.u32 %v4445_v11, 16  ;;  %v6612_v24 = vrot.slane %v1265_v19, 4  ;;  %v6614_v45 = vrot.slane %v1268_v20, 5  ;;  %v6680_v51 = vld [vmem:[%s5656_s14 + $0x80] sm:$0x1] }
  0xb4   : > { %v4653_v35 = vcombine.low %v1421_v47, %v1424_v30  ;;  %v868_v6 = vsel %vm5892_vm5, %v866_v9, %v867_v2  ;;  %v1289_v11 = vshrl.u32 %v6609_v25, 16  ;;  %v4478_v2 = vrot.slane %v4462_v17, 9  ;;  %v6642_v17 = vld [vmem:[%s5656_s14 + $0x74] sm:$0x1] }
  0xb5   : > { %v1089_v40 = vor.u32 %v1088_v14, %v1084_v58  ;;  %v1094_v23 = vrot.slane %v1092_v5, 5  ;;  %v4613_v19 = vcombine.low %v865_v10, %v868_v6  ;;  %v1085_v20 = vsel %vm5698_vm2, %v1080_v41, %v1084_v58 }
  0xb6   : > { %v1427_v53 = vrot.slane %v6277_v0, 5  ;;  %v1430_v55 = vrot.slane %v4446_v29, 5  ;;  %v4406_v47 = vrot.slane %v712_v16, 9  ;;  %v871_v14 = vrot.slane %v5553_v18, 5 }
  0xb7   : > { %3605 = vmatmul.mubr.bf16.gmra.mrb[68].mxu1 %v4612_v28  ;;  %v1090_v21 = vrot.slane %v1089_v40, 4  ;;  %v5554_v28 = vld [vmem:[%s5656_s14 + $0xbc] sm:$0x1]  ;;  %v1103_v41 = vor.u32 %v6302_v37, %v6297_v59  ;;  %v1106_v30 = vshll.u32 %v6277_v0, 16  ;;  %v7794_v58 = vshrl.u32 %v6277_v0, 16 }
  0xb8   : > { %3612 = vmatprep.mubr.bf16.mxu1 %v4629_v39  ;;  %v874_v9 = vrot.slane %v5554_v28, 5  ;;  %v1428_v39 = vsel %vm5892_vm5, %v4478_v2, %v1427_v53  ;;  %v1429_v10 = vrot.slane %v1427_v53, 4  ;;  %v4630_v59 = vcombine.low %v6609_v25, %v6621_v32  ;;  %v6656_v28 = vld [vmem:[%s5656_s14 + $0x1c] sm:$0xf] }
  0xb9   : > { %3702 = vmatmul.mubr.bf16.gmra.mrb[68].mxu0 %v4636_v38  ;;  %v1095_v38 = vsel %vm5698_vm2, %v1090_v21, %v1094_v23  ;;  %v1112_v5 = vrot.slane %v7794_v58, 4  ;;  %v873_v37 = vrot.slane %v871_v14, 4  ;;  %v1104_v6 = vrot.slane %v1103_v41, 4  ;;  %v6649_v21 = vld [vmem:[%s5656_s14 + $0x18] sm:$0xf] }
  0xba   : > { %3709 = vmatprep.mubr.bf16.mxu0 %v4653_v35  ;;  %v4637_v35 = vcombine.low %v1085_v20, %v1095_v38  ;;  %v1431_v16 = vsel %vm5892_vm5, %v1429_v10, %v1430_v55  ;;  %v1108_v40 = vrot.slane %v1106_v30, 5  ;;  %v1116_v23 = vshll.u32 %v4446_v29, 16  ;;  %v6659_v38 = vld [vmem:[%s5656_s14 + $0x20] sm:$0x1] }
  0xbb   : > { %v4479_v2 = vrot.slane %v4463_v1, 9  ;;  %v4654_v0 = vcombine.low %v1428_v39, %v1431_v16  ;;  %v872_v53 = vsel %vm5892_vm5, %v4406_v47, %v871_v14  ;;  %v1434_v18 = vrot.slane %v6295_v43, 5 }
  0xbc   : > { %v1437_v20 = vrot.slane %v6642_v17, 5  ;;  %v875_v55 = vsel %vm5892_vm5, %v873_v37, %v874_v9  ;;  %v1109_v29 = vsel %vm5698_vm2, %v1104_v6, %v1108_v40  ;;  %v1113_v1 = vor.u32 %v1112_v5, %v1108_v40 }
  0xbd   : > { %v1118_v41 = vrot.slane %v1116_v23, 5  ;;  %v1435_v47 = vsel %vm5892_vm5, %v4479_v2, %v1434_v18  ;;  %v1436_v14 = vrot.slane %v1434_v18, 4  ;;  %v1541_v30 = vshrl.u32 %v6649_v21, 16  ;;  %v4464_v2 = vld [vmem:[%s5656_s14 + $0x78] sm:$0xe] }
  0xbe   : > { %v1544_v39 = vshll.u32 %v6649_v21, 16  ;;  %v1114_v10 = vrot.slane %v1113_v1, 4  ;;  %v1550_v9 = vshll.u32 %v6656_v28, 16  ;;  %v1554_v58 = vshrl.u32 %v6656_v28, 16 }
  0xbf   : > { %3613 = vmatmul.mubr.bf16.gmra.mrb[72].mxu1 %v4613_v19  ;;  %v1560_v5 = vshll.u32 %v6659_v38, 16  ;;  %v1438_v19 = vsel %vm5892_vm5, %v1436_v14, %v1437_v20  ;;  %v1543_v37 = vrot.slane %v1541_v30, 4  ;;  %v1127_v16 = vor.u32 %v6322_v8, %v6320_v36 }
  0xc0   : > { %3620 = vmatprep.mubr.bf16.mxu1 %v4630_v59  ;;  %v1546_v6 = vrot.slane %v1544_v39, 5  ;;  %v1119_v59 = vsel %vm5698_vm2, %v1114_v10, %v1118_v41  ;;  %v1552_v40 = vrot.slane %v1550_v9, 5  ;;  %v1556_v23 = vrot.slane %v1554_v58, 4  ;;  %v6694_v58 = vld [vmem:[%s5656_s14 + $0x28] sm:$0xf] }
  0xc1   : > { %3710 = vmatmul.mubr.bf16.gmra.mrb[72].mxu0 %v4637_v35  ;;  %v4614_v35 = vcombine.low %v872_v53, %v875_v55  ;;  %v4638_v18 = vcombine.low %v1109_v29, %v1119_v59  ;;  %v4655_v1 = vcombine.low %v1435_v47, %v1438_v19  ;;  %v1130_v14 = vshll.u32 %v6295_v43, 16  ;;  %v6687_v53 = vld [vmem:[%s5656_s14 + $0x24] sm:$0xf] }
  0xc2   : > { %3717 = vmatprep.mubr.bf16.mxu0 %v4654_v0  ;;  %v1547_v31 = vor.u32 %v1546_v6, %v1543_v37  ;;  %v1562_v0 = vrot.slane %v1560_v5, 5  ;;  %v1557_v20 = vor.u32 %v1556_v23, %v1552_v40  ;;  %v1136_v36 = vrot.slane %v1134_v56, 4  ;;  %v6704_v37 = vld [vmem:[%s5656_s14 + $0x2c] sm:$0x1] }
  0xc3   : > { %v1140_v8 = vshll.u32 %v6642_v17, 16  ;;  %v1128_v41 = vrot.slane %v1127_v16, 4  ;;  %v4480_v30 = vrot.slane %v4464_v2, 9  ;;  %v1441_v29 = vrot.slane %v6339_v62, 5 }
  0xc4   : > { %v1548_v55 = vrot.slane %v1547_v31, 4  ;;  %v1558_v47 = vrot.slane %v1557_v20, 4  ;;  %v1132_v39 = vrot.slane %v1130_v14, 5  ;;  %v4663_v10 = vcombine.low %v6649_v21, %v6656_v28 }
  0xc5   : > { %v1444_v9 = vrot.slane %v6680_v51, 5  ;;  %v1142_v56 = vrot.slane %v1140_v8, 5  ;;  %v1443_v31 = vrot.slane %v1441_v29, 4  ;;  %v1565_v17 = vshrl.u32 %v6687_v53, 16 }
  0xc6   : > { %v1553_v43 = vsel %vm5698_vm2, %v1548_v55, %v1552_v40  ;;  %v1563_v5 = vsel %vm5698_vm2, %v1558_v47, %v1562_v0  ;;  %v1137_v19 = vor.u32 %v1136_v36, %v1132_v39  ;;  %v1442_v21 = vsel %vm5892_vm5, %v4480_v30, %v1441_v29  ;;  %v4449_v29 = vld [vmem:[%s5656_s14 + $0x8c] sm:$0x1]  ;;  %v4465_v47 = vld [vmem:[%s5656_s14 + $0x84] sm:$0xe] }
  0xc7   : > { %3621 = vmatmul.mubr.bf16.gmra.mrb[76].mxu1 %v4614_v35  ;;  %v1568_v6 = vshll.u32 %v6687_v53, 16  ;;  %v4679_v16 = vcombine.low %v1553_v43, %v1563_v5  ;;  %v1445_v35 = vsel %vm5892_vm5, %v1443_v31, %v1444_v9  ;;  %v1567_v59 = vrot.slane %v1565_v17, 4 }
  0xc8   : > { %v1574_v40 = vshll.u32 %v6694_v58, 16  ;;  %v1133_v23 = vsel %vm5698_vm2, %v1128_v41, %v1132_v39  ;;  %v1138_v2 = vrot.slane %v1137_v19, 4  ;;  %v1578_v0 = vshrl.u32 %v6694_v58, 16 }
  0xc9   : > { %3718 = vmatmul.mubr.bf16.gmra.mrb[76].mxu0 %v4638_v18  ;;  %v1570_v18 = vrot.slane %v1568_v6, 5  ;;  %3822 = vmatprep.mubr.bf16.mxu1 %v4679_v16  ;;  %v4656_v20 = vcombine.low %v1442_v21, %v1445_v35  ;;  %v1151_v36 = vor.u32 %v6366_v60, %v6364_v54  ;;  %v1154_v41 = vshll.u32 %v6339_v62, 16  ;;  %v6725_v60 = vld [vmem:[%s5656_s14 + $0x30] sm:$0xf]  ;;  %v6731_v35 = vld [vmem:[%s5656_s14 + $0x34] sm:$0xf] }
  0xca   : > { %3725 = vmatprep.mubr.bf16.mxu0 %v4655_v1  ;;  %v1576_v14 = vrot.slane %v1574_v40, 5  ;;  %v1584_v1 = vshll.u32 %v6704_v37, 16  ;;  %v1143_v8 = vsel %vm5698_vm2, %v1138_v2, %v1142_v56  ;;  %v1580_v30 = vrot.slane %v1578_v0, 4  ;;  %v6743_v0 = vld [vmem:[%s5656_s14 + $0x38] sm:$0x1] }
  0xcb   : > { %v1571_v55 = vor.u32 %v1570_v18, %v1567_v59  ;;  %v4639_v39 = vcombine.low %v1133_v23, %v1143_v8  ;;  %v1152_v43 = vrot.slane %v1151_v36, 4  ;;  %v1160_v31 = vrot.slane %v1158_v27, 4 }
  0xcc   : > { %v1586_v9 = vrot.slane %v1584_v1, 5  ;;  %v1581_v5 = vor.u32 %v1580_v30, %v1576_v14  ;;  %v1156_v19 = vrot.slane %v1154_v41, 5  ;;  %v1164_v54 = vshll.u32 %v6680_v51, 16 }
  0xcd   : > { %v1572_v17 = vrot.slane %v1571_v55, 4  ;;  %v4664_v56 = vcombine.low %v6687_v53, %v6694_v58  ;;  %v4481_v21 = vrot.slane %v4465_v47, 9  ;;  %v1448_v6 = vrot.slane %v6386_v49, 5 }
  0xce   : > { %v1451_v16 = vrot.slane %v4449_v29, 5  ;;  %v1582_v27 = vrot.slane %v1581_v5, 4  ;;  %v1157_v51 = vsel %vm5698_vm2, %v1152_v43, %v1156_v19  ;;  %v1161_v59 = vor.u32 %v1160_v31, %v1156_v19  ;;  %v6756_v5 = vld [vmem:[%s5656_s14 + $0x98] sm:$0x1]  ;;  %v4466_v19 = vld [vmem:[%s5656_s14 + $0x90] sm:$0xe] }
  0xcf   : > { %3823 = vmatmul.mubr.bf16.vlgmr.msra.gmra.mrb[80].mxu1 %v4663_v10  ;;  %v1577_v62 = vsel %vm5698_vm2, %v1572_v17, %v1576_v14  ;;  %v1166_v10 = vrot.slane %v1164_v54, 5  ;;  %v1449_v53 = vsel %vm5892_vm5, %v4481_v21, %v1448_v6  ;;  %v1450_v40 = vrot.slane %v1448_v6, 4 }
  0xd0   : > { %v1589_v23 = vshrl.u32 %v6725_v60, 16  ;;  %v1587_v2 = vsel %vm5698_vm2, %v1582_v27, %v1586_v9  ;;  %v1162_v18 = vrot.slane %v1161_v59, 4  ;;  %v1592_v14 = vshll.u32 %v6725_v60, 16 }
  0xd1   : > { %3726 = vmatmul.mubr.bf16.gmra.mrb[80].mxu0 %v4639_v39  ;;  %v1598_v1 = vshll.u32 %v6731_v35, 16  ;;  %v1452_v36 = vsel %vm5892_vm5, %v1450_v40, %v1451_v16  ;;  %v1602_v55 = vshrl.u32 %v6731_v35, 16  ;;  %v1608_v31 = vshll.u32 %v6743_v0, 16 }
  0xd2   : > { %3733 = vmatprep.mubr.bf16.mxu0 %v4656_v20  ;;  %v4680_v20 = vcombine.low %v1577_v62, %v1587_v2  ;;  %v1591_v8 = vrot.slane %v1589_v23, 4  ;;  %v1167_v30 = vsel %vm5698_vm2, %v1162_v18, %v1166_v10  ;;  %v4657_v41 = vcombine.low %v1449_v53, %v1452_v36  ;;  %v6763_v62 = vld [vmem:[%s5656_s14 + $0x3c] sm:$0xf]  ;;  %v6770_v23 = vld [vmem:[%s5656_s14 + $0x40] sm:$0xf] }
  0xd3   : > { %v1594_v47 = vrot.slane %v1592_v14, 5  ;;  %v1600_v39 = vrot.slane %v1598_v1, 5  ;;  %v4640_v9 = vcombine.low %v1157_v51, %v1167_v30  ;;  %v1604_v43 = vrot.slane %v1602_v55, 4  ;;  %v6778_v14 = vld [vmem:[%s5656_s14 + $0x44] sm:$0x1] }
  0xd4   : > { %3830 = vmatprep.mubr.bf16.mxu1 %v4680_v20  ;;  %v1175_v17 = vor.u32 %v6447_v48, %v6409_v3  ;;  %v1178_v21 = vshll.u32 %v6386_v49, 16  ;;  %v1184_v6 = vrot.slane %v1182_v52, 4  ;;  %v1188_v16 = vshll.u32 %v4449_v29, 16 }
  0xd5   : > { %v1595_v54 = vor.u32 %v1594_v47, %v1591_v8  ;;  %v1605_v27 = vor.u32 %v1604_v43, %v1600_v39  ;;  %v1610_v51 = vrot.slane %v1608_v31, 5  ;;  %v4665_v3 = vcombine.low %v6725_v60, %v6731_v35 }
  0xd6   : > { %v1176_v59 = vrot.slane %v1175_v17, 4  ;;  %v1180_v10 = vrot.slane %v1178_v21, 5  ;;  %v1190_v53 = vrot.slane %v1188_v16, 5  ;;  %v4482_v40 = vrot.slane %v4466_v19, 9  ;;  %v4467_v16 = vld [vmem:[%s5656_s14 + $0x9c] sm:$0xe] }
  0xd7   : > { %3831 = vmatmul.mubr.bf16.gmra.mrb[84].mxu1 %v4664_v56  ;;  %v1596_v48 = vrot.slane %v1595_v54, 4  ;;  %v1606_v49 = vrot.slane %v1605_v27, 4  ;;  %v1455_v52 = vrot.slane %v6431_v63, 5  ;;  %v1458_v29 = vrot.slane %v6756_v5, 5 }
  0xd8   : > { %v1613_v56 = vshrl.u32 %v6763_v62, 16  ;;  %v1181_v60 = vsel %vm5698_vm2, %v1176_v59, %v1180_v10  ;;  %v1185_v18 = vor.u32 %v1184_v6, %v1180_v10  ;;  %v1616_v1 = vshll.u32 %v6763_v62, 16  ;;  %v6796_v10 = vld [vmem:[%s5656_s14 + $0xa4] sm:$0x1] }
  0xd9   : > { %3734 = vmatmul.mubr.bf16.gmra.mrb[84].mxu0 %v4640_v9  ;;  %v1601_v2 = vsel %vm5698_vm2, %v1596_v48, %v1600_v39  ;;  %v1611_v20 = vsel %vm5698_vm2, %v1606_v49, %v1610_v51  ;;  %v1456_v36 = vsel %vm5892_vm5, %v4482_v40, %v1455_v52  ;;  %v1457_v8 = vrot.slane %v1455_v52, 4  ;;  %v6803_v49 = vld [vmem:[%s5656_s14 + $0x48] sm:$0xf] }
  0xda   : > { %3741 = vmatprep.mubr.bf16.mxu0 %v4657_v41  ;;  %v1615_v55 = vrot.slane %v1613_v56, 4  ;;  %v4681_v30 = vcombine.low %v1601_v2, %v1611_v20  ;;  %v1186_v41 = vrot.slane %v1185_v18, 4  ;;  %v1618_v47 = vrot.slane %v1616_v1, 5  ;;  %v6809_v2 = vld [vmem:[%s5656_s14 + $0x4c] sm:$0xf] }
  0xdb   : > { %v1622_v39 = vshll.u32 %v6770_v23, 16  ;;  %v1459_v9 = vsel %vm5892_vm5, %v1457_v8, %v1458_v29  ;;  %v1626_v43 = vshrl.u32 %v6770_v23, 16  ;;  %v1632_v31 = vshll.u32 %v6778_v14, 16 }
  0xdc   : > { %v1199_v17 = vor.u32 %v6488_v26, %v6456_v44  ;;  %3838 = vmatprep.mubr.bf16.mxu1 %v4681_v30  ;;  %v1191_v19 = vsel %vm5698_vm2, %v1186_v41, %v1190_v53  ;;  %v4658_v54 = vcombine.low %v1456_v36, %v1459_v9  ;;  %v1619_v21 = vor.u32 %v1618_v47, %v1615_v55  ;;  %v6820_v55 = vld [vmem:[%s5656_s14 + $0x50] sm:$0x1] }
  0xdd   : > { %v1624_v6 = vrot.slane %v1622_v39, 5  ;;  %v4641_v27 = vcombine.low %v1181_v60, %v1191_v19  ;;  %v1628_v51 = vrot.slane %v1626_v43, 4  ;;  %v1634_v59 = vrot.slane %v1632_v31, 5 }
  0xde   : > { %v1200_v48 = vrot.slane %v1199_v17, 4  ;;  %v1620_v40 = vrot.slane %v1619_v21, 4  ;;  %v1202_v44 = vshll.u32 %v6431_v63, 16  ;;  %v1208_v26 = vrot.slane %v1206_v12, 4 }
  0xdf   : > { %3839 = vmatmul.mubr.bf16.gmra.mrb[88].mxu1 %v4665_v3  ;;  %v1212_v53 = vshll.u32 %v6756_v5, 16  ;;  %v1629_v52 = vor.u32 %v1628_v51, %v1624_v6  ;;  %v4666_v3 = vcombine.low %v6763_v62, %v6770_v23  ;;  %v4483_v29 = vrot.slane %v4467_v16, 9 }
  0xe0   : > { %v1462_v56 = vrot.slane %v6500_v61, 5  ;;  %v1625_v63 = vsel %vm5698_vm2, %v1620_v40, %v1624_v6  ;;  %v1204_v12 = vrot.slane %v1202_v44, 5  ;;  %v1465_v5 = vrot.slane %v6796_v10, 5  ;;  %v4452_v44 = vld [vmem:[%s5656_s14 + $0xb0] sm:$0x1] }
  0xe1   : > { %3742 = vmatmul.mubr.bf16.gmra.mrb[88].mxu0 %v4641_v27  ;;  %v1214_v60 = vrot.slane %v1212_v53, 5  ;;  %v1630_v18 = vrot.slane %v1629_v52, 4  ;;  %v1637_v62 = vshrl.u32 %v6803_v49, 16  ;;  %v1640_v30 = vshll.u32 %v6803_v49, 16 }
  0xe2   : > { %3749 = vmatprep.mubr.bf16.mxu0 %v4658_v54  ;;  %v1463_v1 = vsel %vm5892_vm5, %v4483_v29, %v1462_v56  ;;  %v1464_v20 = vrot.slane %v1462_v56, 4  ;;  %v1205_v36 = vsel %vm5698_vm2, %v1200_v48, %v1204_v12  ;;  %v1209_v8 = vor.u32 %v1208_v26, %v1204_v12  ;;  %v4468_v26 = vld [vmem:[%s5656_s14 + $0xa8] sm:$0xe] }
  0xe3   : > { %v1646_v41 = vshll.u32 %v6809_v2, 16  ;;  %v1635_v47 = vsel %vm5698_vm2, %v1630_v18, %v1634_v59  ;;  %v1639_v9 = vrot.slane %v1637_v62, 4  ;;  %v1650_v43 = vshrl.u32 %v6809_v2, 16 }
  0xe4   : > { %v1466_v39 = vsel %vm5892_vm5, %v1464_v20, %v1465_v5  ;;  %v4682_v31 = vcombine.low %v1625_v63, %v1635_v47  ;;  %v1210_v17 = vrot.slane %v1209_v8, 4  ;;  %v1642_v54 = vrot.slane %v1640_v30, 5 }
  0xe5   : > { %v4659_v19 = vcombine.low %v1463_v1, %v1466_v39  ;;  %v1648_v21 = vrot.slane %v1646_v41, 5  ;;  %v1652_v6 = vrot.slane %v1650_v43, 4  ;;  %v1656_v16 = vshll.u32 %v6820_v55, 16 }
  0xe6   : > { %v1223_v27 = vor.u32 %v6531_v42, %v6502_v7  ;;  %3846 = vmatprep.mubr.bf16.mxu1 %v4682_v31  ;;  %v1215_v51 = vsel %vm5698_vm2, %v1210_v17, %v1214_v60  ;;  %v1643_v59 = vor.u32 %v1642_v54, %v1639_v9  ;;  %v1226_v48 = vshll.u32 %v6500_v61, 16  ;;  %v6843_v60 = vld [vmem:[%s5656_s14 + $0x54] sm:$0xf] }
  0xe7   : > { %v1232_v40 = vrot.slane %v1230_v46, 4  ;;  %v4642_v53 = vcombine.low %v1205_v36, %v1215_v51  ;;  %3847 = vmatmul.mubr.bf16.gmra.mrb[92].mxu1 %v4666_v3  ;;  %v1653_v52 = vor.u32 %v1652_v6, %v1648_v21  ;;  %v1658_v29 = vrot.slane %v1656_v16, 5  ;;  %v6847_v3 = vld [vmem:[%s5656_s14 + $0x58] sm:$0xf]  ;;  %v4469_v51 = vld [vmem:[%s5656_s14 + $0xb4] sm:$0xe] }
  0xe8   : > { %v1224_v56 = vrot.slane %v1223_v27, 4  ;;  %v1644_v7 = vrot.slane %v1643_v59, 4  ;;  %v1228_v42 = vrot.slane %v1226_v48, 5  ;;  %v1236_v63 = vshll.u32 %v6796_v10, 16 }
  0xe9   : > { %v4667_v12 = vcombine.low %v6803_v49, %v6809_v2  ;;  %3750 = vmatmul.mubr.bf16.gmra.mrb[92].mxu0 %v4642_v53  ;;  %v1654_v61 = vrot.slane %v1653_v52, 4  ;;  %v4484_v46 = vrot.slane %v4468_v26, 9  ;;  %v1469_v5 = vrot.slane %v6541_v4, 5  ;;  %v6854_v49 = vld [vmem:[%s5656_s14 + $0x5c] sm:$0x1] }
  0xea   : > { %v1472_v18 = vrot.slane %v4452_v44, 5  ;;  %3757 = vmatprep.mubr.bf16.mxu0 %v4659_v19  ;;  %v1649_v1 = vsel %vm5698_vm2, %v1644_v7, %v1648_v21  ;;  %v1229_v10 = vsel %vm5698_vm2, %v1224_v56, %v1228_v42  ;;  %v1233_v20 = vor.u32 %v1232_v40, %v1228_v42  ;;  %v6873_v53 = vld [vmem:[%s5656_s14 + $0xbc] sm:$0x1]  ;;  %v6879_v42 = vld [vmem:[%s5656_s14 + $0x60] sm:$0xf] }
  0xeb   : > { %v1238_v62 = vrot.slane %v1236_v63, 5  ;;  %v1659_v36 = vsel %vm5698_vm2, %v1654_v61, %v1658_v29  ;;  %v1470_v8 = vsel %vm5892_vm5, %v4484_v46, %v1469_v5  ;;  %v1471_v30 = vrot.slane %v1469_v5, 4 }
  0xec   : > { %v1661_v41 = vshrl.u32 %v6843_v60, 16  ;;  %v4683_v47 = vcombine.low %v1649_v1, %v1659_v36  ;;  %v1234_v39 = vrot.slane %v1233_v20, 4  ;;  %v1664_v9 = vshll.u32 %v6843_v60, 16 }
  0xed   : > { %v1670_v43 = vshll.u32 %v6847_v3, 16  ;;  %v1473_v31 = vsel %vm5892_vm5, %v1471_v30, %v1472_v18  ;;  %v1674_v19 = vshrl.u32 %v6847_v3, 16  ;;  %v1680_v54 = vshll.u32 %v6854_v49, 16 }
  0xee   : > { %v1663_v17 = vrot.slane %v1661_v41, 4  ;;  %3854 = vmatprep.mubr.bf16.mxu1 %v4683_v47  ;;  %v1239_v21 = vsel %vm5698_vm2, %v1234_v39, %v1238_v62  ;;  %v4660_v6 = vcombine.low %v1470_v8, %v1473_v31  ;;  %v1666_v16 = vrot.slane %v1664_v9, 5  ;;  %v6897_v8 = vld [vmem:[%s5656_s14 + $0x68] sm:$0x1] }
  0xef   : > { %v1672_v27 = vrot.slane %v1670_v43, 5  ;;  %v4643_v59 = vcombine.low %v1229_v10, %v1239_v21  ;;  %3855 = vmatmul.mubr.bf16.gmra.mrb[96].mxu1 %v4667_v12  ;;  %v1676_v48 = vrot.slane %v1674_v19, 4  ;;  %v1682_v40 = vrot.slane %v1680_v54, 5 }
  0xf0   : > { %v1247_v26 = vor.u32 %v6576_v50, %v6574_v15  ;;  %v1667_v52 = vor.u32 %v1666_v16, %v1663_v17  ;;  %v1250_v29 = vshll.u32 %v6541_v4, 16  ;;  %v1256_v56 = vrot.slane %v1254_v57, 4 }
  0xf1   : > { %v1260_v7 = vshll.u32 %v4452_v44, 16  ;;  %3758 = vmatmul.mubr.bf16.gmra.mrb[96].mxu0 %v4643_v59  ;;  %v1677_v63 = vor.u32 %v1676_v48, %v1672_v27  ;;  %v4668_v61 = vcombine.low %v6843_v60, %v6847_v3  ;;  %v4485_v15 = vrot.slane %v4469_v51, 9  ;;  %v6886_v44 = vld [vmem:[%s5656_s14 + $0x64] sm:$0xf] }
  0xf2   : > { %v1248_v12 = vrot.slane %v1247_v26, 4  ;;  %3765 = vmatprep.mubr.bf16.mxu0 %v4660_v6  ;;  %v1668_v50 = vrot.slane %v1667_v52, 4  ;;  %v1252_v46 = vrot.slane %v1250_v29, 5  ;;  %v1476_v18 = vrot.slane %v6583_v13, 5  ;;  %v4470_v26 = vld [vmem:[%s5656_s14 + $0xc0] sm:$0xe] }
  0xf3   : > { %v1262_v5 = vrot.slane %v1260_v7, 5  ;;  %v1678_v4 = vrot.slane %v1677_v63, 4  ;;  %v1479_v57 = vrot.slane %v6873_v53, 5  ;;  %v1685_v1 = vshrl.u32 %v6879_v42, 16 }
  0xf4   : > { %v1688_v10 = vshll.u32 %v6879_v42, 16  ;;  %v1673_v60 = vsel %vm5698_vm2, %v1668_v50, %v1672_v27  ;;  %v1253_v20 = vsel %vm5698_vm2, %v1248_v12, %v1252_v46  ;;  %v1257_v62 = vor.u32 %v1256_v56, %v1252_v46 }
  0xf5   : > { %v1477_v36 = vsel %vm5892_vm5, %v4485_v15, %v1476_v18  ;;  %v1683_v30 = vsel %vm5698_vm2, %v1678_v4, %v1682_v40  ;;  %v1478_v41 = vrot.slane %v1476_v18, 4  ;;  %v1687_v47 = vrot.slane %v1685_v1, 4 }
  0xf6   : > { %v1690_v39 = vrot.slane %v1688_v10, 5  ;;  %v4684_v9 = vcombine.low %v1673_v60, %v1683_v30  ;;  %v1258_v43 = vrot.slane %v1257_v62, 4  ;;  %v1694_v31 = vshll.u32 %v6886_v44, 16  ;;  %v6932_v30 = vld [vmem:[%s5656_s14 + $0x6c] sm:$0xf] }
  0xf7   : > { %v1698_v17 = vshrl.u32 %v6886_v44, 16  ;;  %v1480_v19 = vsel %vm5892_vm5, %v1478_v41, %v1479_v57  ;;  %v1704_v21 = vshll.u32 %v6897_v8, 16  ;;  %v1271_v6 = vor.u32 %v6614_v45, %v6612_v24  ;;  %v6935_v41 = vld [vmem:[%s5656_s14 + $0x70] sm:$0xf] }
  0xf8   : > { %v1691_v54 = vor.u32 %v1690_v39, %v1687_v47  ;;  %3862 = vmatprep.mubr.bf16.mxu1 %v4684_v9  ;;  %v1263_v16 = vsel %vm5698_vm2, %v1258_v43, %v1262_v5  ;;  %v4661_v27 = vcombine.low %v1477_v36, %v1480_v19  ;;  %v1696_v51 = vrot.slane %v1694_v31, 5  ;;  %v6942_v31 = vld [vmem:[%s5656_s14 + $0x74] sm:$0x1] }
  0xf9   : > { %v1700_v59 = vrot.slane %v1698_v17, 4  ;;  %v4644_v52 = vcombine.low %v1253_v20, %v1263_v16  ;;  %3863 = vmatmul.mubr.bf16.gmra.mrb[100].mxu1 %v4668_v61  ;;  %v1706_v56 = vrot.slane %v1704_v21, 5  ;;  %v1272_v7 = vrot.slane %v1271_v6, 4 }
  0xfa   : > { %v1692_v29 = vrot.slane %v1691_v54, 4  ;;  %v1274_v24 = vshll.u32 %v6583_v13, 16  ;;  %v1280_v45 = vrot.slane %v1278_v33, 4  ;;  %v1284_v50 = vshll.u32 %v6873_v53, 16 }
  0xfb   : > { %v1701_v15 = vor.u32 %v1700_v59, %v1696_v51  ;;  %v1291_v18 = vrot.slane %v1289_v11, 4  ;;  %v7795_v61 = vshll.u32 %v6609_v25, 16  ;;  %3766 = vmatmul.mubr.bf16.gmra.mrb[100].mxu0 %v4644_v52  ;;  %v4454_v25 = vld [vmem:[%s5656_s14 + $0xc8] sm:$0x1]  ;;  %v4669_v20 = vcombine.low %v6879_v42, %v6886_v44 }
  0xfc   : > { %3773 = vmatprep.mubr.bf16.mxu0 %v4661_v27  ;;  %v1697_v53 = vsel %vm5698_vm2, %v1692_v29, %v1696_v51  ;;  %v1276_v60 = vrot.slane %v1274_v24, 5  ;;  %v4486_v62 = vrot.slane %v4470_v26, 9  ;;  %v1483_v36 = vrot.slane %v6621_v32, 5 }
  0xfd   : > { %v1294_v4 = vrot.slane %v7795_v61, 5  ;;  %v1702_v10 = vrot.slane %v1701_v15, 4  ;;  %v1286_v43 = vrot.slane %v1284_v50, 5  ;;  %v1486_v54 = vrot.slane %v4454_v25, 5 }
  0xfe   : > { %v1277_v39 = vsel %vm5698_vm2, %v1272_v7, %v1276_v60  ;;  %v1281_v9 = vor.u32 %v1280_v45, %v1276_v60  ;;  %v1484_v42 = vsel %vm5892_vm5, %v4486_v62, %v1483_v36  ;;  %v1485_v19 = vrot.slane %v1483_v36, 4 }
  0xff   : > { %v1707_v47 = vsel %vm5698_vm2, %v1702_v10, %v1706_v56  ;;  %v1709_v6 = vshrl.u32 %v6932_v30, 16  ;;  %v1712_v16 = vshll.u32 %v6932_v30, 16  ;;  %v1718_v27 = vshll.u32 %v6935_v41, 16 }
 0x100   : > { %v4685_v17 = vcombine.low %v1697_v53, %v1707_v47  ;;  %v1282_v21 = vrot.slane %v1281_v9, 4  ;;  %v1487_v59 = vsel %vm5892_vm5, %v1485_v19, %v1486_v54  ;;  %v7796_v60 = vshrl.u32 %v6621_v32, 16 }
 0x101   : > { %v4662_v56 = vcombine.low %v1484_v42, %v1487_v59  ;;  %v1711_v7 = vrot.slane %v1709_v6, 4  ;;  %v1720_v24 = vrot.slane %v1718_v27, 5  ;;  %v1308_v62 = vshll.u32 %v4454_v25, 16  ;;  %v6977_v6 = vld [vmem:[%s5656_s14 + $0x80] sm:$0x1] }
 0x102   : > { %v4955_v48 = vpop.f32.mrb[0].mxu1  ;;  %v4883_v40 = vpop.f32.mrb[0].mxu0  ;;  %3870 = vmatprep.mubr.bf16.mxu1 %v4685_v17  ;;  %v1287_v29 = vsel %vm5698_vm2, %v1282_v21, %v1286_v43 }
 0x103   : > { %v4956_v63 = vpop.f32.mrb[1].mxu1  ;;  %v4884_v12 = vpop.f32.mrb[1].mxu0  ;;  %3871 = vmatmul.mubr.bf16.gmra.mrb[104].mxu1 %v4669_v20  ;;  %v4645_v15 = vcombine.low %v1277_v39, %v1287_v29  ;;  %v1304_v20 = vrot.slane %v7796_v60, 4  ;;  %v1310_v21 = vrot.slane %v1308_v62, 5  ;;  %v1993_v62 = vrot.slane %v6659_v38, 5 }
 0x104   : > { %v4958_v46 = vpop.f32.mrb[2].mxu1  ;;  %v4886_v5 = vpop.f32.mrb[2].mxu0  ;;  %v6919_v57 = vadd.f32 %v4956_v63, %v4955_v48  ;;  %v6921_v1 = vadd.f32 %v4884_v12, %v4883_v40  ;;  %v1722_v48 = vshrl.u32 %v6935_v41, 16  ;;  %v1728_v40 = vshll.u32 %v6942_v31, 16 }
 0x105   : > { %v4959_v13 = vpop.f32.mrb[3].mxu1  ;;  %v4887_v33 = vpop.f32.mrb[3].mxu0  ;;  %v1714_v63 = vrot.slane %v1712_v16, 5  ;;  %3774 = vmatmul.mubr.bf16.gmra.mrb[104].mxu0 %v4645_v15  ;;  %v4535_v16 = vld [vmem:[%s5656_s14 + $0x18] sm:$0xe] }
 0x106   : > { %v6925_v11 = vadd.f32 %v4959_v13, %v4958_v46  ;;  %v6953_v26 = vadd.f32 %v4887_v33, %v4886_v5  ;;  %v1724_v45 = vrot.slane %v1722_v48, 4  ;;  %v1295_v13 = vor.u32 %v1294_v4, %v1291_v18  ;;  %3781 = vmatprep.mubr.bf16.mxu0 %v4662_v56  ;;  %v6965_v4 = vld [vmem:[%s5656_s14 + $0x78] sm:$0xf] }
 0x107   : > { %v1715_v61 = vor.u32 %v1714_v63, %v1711_v7  ;;  %v1298_v5 = vshll.u32 %v6621_v32, 16  ;;  %v1730_v10 = vrot.slane %v1728_v40, 5  ;;  %v6972_v32 = vld [vmem:[%s5656_s14 + $0x7c] sm:$0xf]  ;;  %v1733_v48 = vshrl.u32 %v6965_v4, 16 }
 0x108   : > { %v1725_v53 = vor.u32 %v1724_v45, %v1720_v24  ;;  %v1296_v39 = vrot.slane %v1295_v13, 4  ;;  %v1736_v29 = vshll.u32 %v6965_v4, 16  ;;  %v1742_v56 = vshll.u32 %v6972_v32, 16 }
 0x109   : > { %v1716_v47 = vrot.slane %v1715_v61, 4  ;;  %v1300_v9 = vrot.slane %v1298_v5, 5  ;;  %v1735_v63 = vrot.slane %v1733_v48, 4  ;;  %v1746_v15 = vshrl.u32 %v6972_v32, 16  ;;  %v7008_v48 = vld [vmem:[%s5656_s14 + $0x84] sm:$0xf] }
 0x10a   : > { %v4889_v51 = vpop.f32.mrb[4].mxu0  ;;  %v4961_v50 = vpop.f32.mrb[4].mxu1  ;;  %v1726_v17 = vrot.slane %v1725_v53, 4  ;;  %v4551_v45 = vrot.slane %v4535_v16, 9  ;;  %v1738_v61 = vrot.slane %v1736_v29, 5  ;;  %v1744_v13 = vrot.slane %v1742_v56, 5 }
 0x10b   : > { %v4890_v52 = vpop.f32.mrb[5].mxu0  ;;  %v4962_v33 = vpop.f32.mrb[5].mxu1  ;;  %v1721_v25 = vsel %vm5698_vm2, %v1716_v47, %v1720_v24  ;;  %v1305_v54 = vor.u32 %v1304_v20, %v1300_v9  ;;  %v1301_v59 = vsel %vm5698_vm2, %v1296_v39, %v1300_v9  ;;  %v1752_v24 = vshll.u32 %v6977_v6, 16 }
 0x10c   : > { %v6957_v12 = vpop.f32.mrb[6].mxu0  ;;  %v4964_v36 = vpop.f32.mrb[6].mxu1  ;;  %v6962_v43 = vadd.f32 %v4962_v33, %v4961_v50  ;;  %v6967_v42 = vadd.f32 %v4890_v52, %v4889_v51  ;;  %v1731_v27 = vsel %vm5698_vm2, %v1726_v17, %v1730_v10  ;;  %v4670_v51 = vcombine.low %v6932_v30, %v6935_v41  ;;  %v4536_v33 = vld [vmem:[%s5656_s14 + $0x24] sm:$0xe] }
 0x10d   : > { %v4893_v46 = vpop.f32.mrb[7].mxu0  ;;  %v4965_v18 = vpop.f32.mrb[7].mxu1  ;;  %v4686_v40 = vcombine.low %v1721_v25, %v1731_v27  ;;  %v1306_v52 = vrot.slane %v1305_v54, 4  ;;  %v1990_v5 = vrot.slane %v6656_v28, 5  ;;  %v2000_v10 = vrot.slane %v6704_v37, 5 }
 0x10e   : > { %v6969_v19 = vadd.f32 %v4965_v18, %v4964_v36  ;;  %v1748_v20 = vrot.slane %v1746_v15, 4  ;;  %v1739_v39 = vor.u32 %v1738_v61, %v1735_v63  ;;  %v7000_v17 = vadd.f32 %v4893_v46, %v6957_v12  ;;  %v7021_v15 = vld [vmem:[%s5656_s14 + $0x88] sm:$0xf] }
 0x10f   : > { %3878 = vmatprep.mubr.bf16.mxu1 %v4686_v40  ;;  %v1311_v30 = vsel %vm5698_vm2, %v1306_v52, %v1310_v21  ;;  %v1991_v9 = vsel %vm5892_vm5, %v4551_v45, %v1990_v5  ;;  %v1992_v18 = vrot.slane %v1990_v5, 4  ;;  %v1754_v37 = vrot.slane %v1752_v24, 5  ;;  %v4538_v5 = vld [vmem:[%s5656_s14 + $0x3c] sm:$0xe] }
 0x110   : > { %v4646_v60 = vcombine.low %v1301_v59, %v1311_v30  ;;  %3879 = vmatmul.mubr.bf16.gmra.mrb[108].mxu1 %v4670_v51  ;;  %v1749_v25 = vor.u32 %v1748_v20, %v1744_v13  ;;  %v4552_v54 = vrot.slane %v4536_v33, 9  ;;  %v1997_v21 = vrot.slane %v6694_v58, 5  ;;  %v7028_v30 = vld [vmem:[%s5656_s14 + $0x8c] sm:$0x1] }
 0x111   : > { %v1740_v16 = vrot.slane %v1739_v39, 4  ;;  %v1994_v27 = vsel %vm5892_vm5, %v1992_v18, %v1993_v62  ;;  %v4671_v29 = vcombine.low %v6965_v4, %v6972_v32  ;;  %v1757_v61 = vshrl.u32 %v7008_v48, 16  ;;  %v4537_v4 = vld [vmem:[%s5656_s14 + $0x30] sm:$0xe] }
 0x112   : > { %v4895_v7 = vpop.f32.mrb[8].mxu0  ;;  %v4967_v36 = vpop.f32.mrb[8].mxu1  ;;  %3782 = vmatmul.mubr.bf16.gmra.mrb[108].mxu0 %v4646_v60  ;;  %v1750_v12 = vrot.slane %v1749_v25, 4  ;;  %v4695_v46 = vcombine.low %v1991_v9, %v1994_v27  ;;  %v1998_v40 = vsel %vm5892_vm5, %v4552_v54, %v1997_v21  ;;  %v1999_v52 = vrot.slane %v1997_v21, 4 }
 0x113   : > { %v4896_v50 = vpop.f32.mrb[9].mxu0  ;;  %v4968_v28 = vpop.f32.mrb[9].mxu1  ;;  %v1745_v58 = vsel %vm5698_vm2, %v1740_v16, %v1744_v13  ;;  %v1760_v13 = vshll.u32 %v7008_v48, 16  ;;  %v1759_v33 = vrot.slane %v1757_v61, 4  ;;  %v1766_v20 = vshll.u32 %v7021_v15, 16 }
 0x114   : > { %v4898_v53 = vpop.f32.mrb[10].mxu0  ;;  %v4970_v38 = vpop.f32.mrb[10].mxu1  ;;  %v7005_v59 = vadd.f32 %v4968_v28, %v4967_v36  ;;  %v7016_v56 = vadd.f32 %v4896_v50, %v4895_v7  ;;  %v1755_v24 = vsel %vm5698_vm2, %v1750_v12, %v1754_v37  ;;  %5355 = vmatprep.mubr.bf16.mxu0 %v4695_v46  ;;  %v2001_v45 = vsel %vm5892_vm5, %v1999_v52, %v2000_v10  ;;  %v7055_v61 = vld [vmem:[%s7778_s2] ss:$0 sm:$0xff] }
 0x115   : > { %v4899_v47 = vpop.f32.mrb[11].mxu0  ;;  %v4971_v51 = vpop.f32.mrb[11].mxu1  ;;  %v4687_v7 = vcombine.low %v1745_v58, %v1755_v24  ;;  %v4696_v50 = vcombine.low %v1998_v40, %v2001_v45  ;;  %v1762_v60 = vrot.slane %v1760_v13, 5  ;;  %v1770_v62 = vshrl.u32 %v7021_v15, 16  ;;  %v7050_v45 = vld [vmem:[%s5656_s14 + $0x90] sm:$0xf] }
 0x116   : > { %v7018_v63 = vadd.f32 %v4971_v51, %v4970_v38  ;;  %v1776_v10 = vshll.u32 %v7028_v30, 16  ;;  %v4553_v39 = vrot.slane %v4537_v4, 9  ;;  %v2004_v9 = vrot.slane %v6731_v35, 5 }
 0x117   : > { %3886 = vmatprep.mubr.bf16.mxu1 %v4687_v7  ;;  %v2007_v18 = vrot.slane %v6743_v0, 5  ;;  %v1763_v25 = vor.u32 %v1762_v60, %v1759_v33  ;;  %v1768_v37 = vrot.slane %v1766_v20, 5  ;;  %v1772_v54 = vrot.slane %v1770_v62, 4 }
 0x118   : > { %7797 = vst [vmem:[#allocation2_spill] sm:$0xff] %v7018_v63  ;;  %3887 = vmatmul.mubr.bf16.gmra.mrb[112].mxu1 %v4671_v29  ;;  %v7039_v21 = vadd.f32 %v4899_v47, %v4898_v53  ;;  %v2005_v16 = vsel %vm5892_vm5, %v4553_v39, %v2004_v9  ;;  %v2006_v27 = vrot.slane %v2004_v9, 4  ;;  %v1778_v0 = vrot.slane %v1776_v10, 5  ;;  %v7075_v10 = vld [vmem:[%s5656_s14 + $0x98] sm:$0x1] }
 0x119   : > { %v1764_v46 = vrot.slane %v1763_v25, 4  ;;  %v1773_v35 = vor.u32 %v1772_v54, %v1768_v37  ;;  %v4554_v40 = vrot.slane %v4538_v5, 9  ;;  %v2011_v53 = vrot.slane %v6770_v23, 5  ;;  %v4539_v9 = vld [vmem:[%s5656_s14 + $0x48] sm:$0xe] }
 0x11a   : > { %v4901_v36 = vpop.f32.mrb[12].mxu0  ;;  %5356 = vmatmul.mubr.bf16.vlgmr.msra.gmra.mrb[112].mxu0 %v4696_v50  ;;  %v4973_v51 = vpop.f32.mrb[12].mxu1  ;;  %v2008_v58 = vsel %vm5892_vm5, %v2006_v27, %v2007_v18  ;;  %v2014_v47 = vrot.slane %v6778_v14, 5  ;;  %v7062_v50 = vld [vmem:[%s5656_s14 + $0x94] sm:$0xf]  ;;  %v3342_v5 = vadd.f32 %v6921_v1, %v7055_v61  ;;  %v1781_v39 = vshrl.u32 %v7050_v45, 16 }
 0x11b   : > { %v4902_v28 = vpop.f32.mrb[13].mxu0  ;;  %v4974_v52 = vpop.f32.mrb[13].mxu1  ;;  %v1769_v13 = vsel %vm5698_vm2, %v1764_v46, %v1768_v37  ;;  %v1774_v4 = vrot.slane %v1773_v35, 4  ;;  %v4697_v7 = vcombine.low %v2005_v16, %v2008_v58  ;;  %v2012_v33 = vsel %vm5892_vm5, %v4554_v40, %v2011_v53 }
 0x11c   : > { %v4904_v38 = vpop.f32.mrb[14].mxu0  ;;  %v7047_v29 = vadd.f32 %v4974_v52, %v4973_v51  ;;  %v4976_v24 = vpop.f32.mrb[14].mxu1  ;;  %v7059_v23 = vadd.f32 %v4902_v28, %v4901_v36  ;;  %v2013_v60 = vrot.slane %v2011_v53, 4  ;;  %v4672_v36 = vcombine.low %v7008_v48, %v7021_v15  ;;  %v4540_v51 = vld [vmem:[%s5656_s14 + $0x54] sm:$0xe] }
 0x11d   : > { %v4905_v12 = vpop.f32.mrb[15].mxu0  ;;  %v4977_v14 = vpop.f32.mrb[15].mxu1  ;;  %v1779_v62 = vsel %vm5698_vm2, %v1774_v4, %v1778_v0  ;;  %5359 = vmatprep.mubr.bf16.mxu0 %v4697_v7  ;;  %v1784_v1 = vshll.u32 %v7050_v45, 16  ;;  %v3345_v18 = vadd.f32 %v6953_v26, %v7055_v61  ;;  %v1790_v37 = vshll.u32 %v7062_v50, 16 }
 0x11e   : > { %7798 = vst [vmem:[#allocation3_spill] sm:$0xff] %v7047_v29  ;;  %v7068_v20 = vadd.f32 %v4977_v14, %v4976_v24  ;;  %v4688_v28 = vcombine.low %v1769_v13, %v1779_v62  ;;  %v2015_v25 = vsel %vm5892_vm5, %v2013_v60, %v2014_v47  ;;  %v1783_v16 = vrot.slane %v1781_v39, 4 }
 0x11f   : > { %v4698_v54 = vcombine.low %v2012_v33, %v2015_v25  ;;  %v1786_v27 = vrot.slane %v1784_v1, 5  ;;  %v1794_v48 = vshrl.u32 %v7062_v50, 16  ;;  %v1792_v46 = vrot.slane %v1790_v37, 5  ;;  %v7107_v25 = vld [vmem:[%s5656_s14 + $0x9c] sm:$0xf] }
 0x120   : > { %7799 = vst [vmem:[#allocation4_spill] sm:$0xff] %v7068_v20  ;;  %3894 = vmatprep.mubr.bf16.mxu1 %v4688_v28  ;;  %v1800_v35 = vshll.u32 %v7075_v10, 16  ;;  %v4555_v0 = vrot.slane %v4539_v9, 9  ;;  %v2018_v40 = vrot.slane %v6809_v2, 5  ;;  %v2021_v47 = vrot.slane %v6820_v55, 5 }
 0x121   : > { %3895 = vmatmul.mubr.bf16.gmra.mrb[116].mxu1 %v4672_v36  ;;  %v1787_v58 = vor.u32 %v1786_v27, %v1783_v16  ;;  %v1796_v53 = vrot.slane %v1794_v48, 4  ;;  %v7090_v24 = vadd.f32 %v4905_v12, %v4904_v38  ;;  %v7094_v7 = vadd.f32 %v6967_v42, %v7055_v61  ;;  %v7114_v48 = vld [vmem:[%s5656_s14 + $0xa0] sm:$0xf] }
 0x122   : > { %v4995_v26 = vpop.f32.mrb[16].mxu1  ;;  %5360 = vmatmul.mubr.bf16.gmra.mrb[116].mxu0 %v4698_v54  ;;  %v7098_v2 = vadd.f32 %v7000_v17, %v7055_v61  ;;  %v2019_v14 = vsel %vm5892_vm5, %v4555_v0, %v2018_v40  ;;  %v2020_v33 = vrot.slane %v2018_v40, 4  ;;  %v1802_v12 = vrot.slane %v1800_v35, 5  ;;  %v7125_v40 = vld [vmem:[%s5656_s14 + $0xa4] sm:$0x1] }
 0x123   : > { %v4996_v13 = vpop.f32.mrb[17].mxu1  ;;  %v1788_v55 = vrot.slane %v1787_v58, 4  ;;  %v1797_v38 = vor.u32 %v1796_v53, %v1792_v46  ;;  %v4556_v36 = vrot.slane %v4540_v51, 9  ;;  %v2025_v9 = vrot.slane %v6847_v3, 5  ;;  %v4541_v58 = vld [vmem:[%s5656_s14 + $0x60] sm:$0xe] }
 0x124   : > { %v4907_v52 = vpop.f32.mrb[16].mxu0  ;;  %v4998_v60 = vpop.f32.mrb[18].mxu1  ;;  %v2022_v42 = vsel %vm5892_vm5, %v2020_v33, %v2021_v47  ;;  %v2028_v17 = vrot.slane %v6854_v49, 5  ;;  %v4997_v28 = vadd.f32 %v4996_v13, %v4995_v26  ;;  %v1805_v26 = vshrl.u32 %v7107_v25, 16 }
 0x125   : > { %v4908_v4 = vpop.f32.mrb[17].mxu0  ;;  %v4999_v39 = vpop.f32.mrb[19].mxu1  ;;  %v1793_v37 = vsel %vm5698_vm2, %v1788_v55, %v1792_v46  ;;  %v1798_v54 = vrot.slane %v1797_v38, 4  ;;  %v4699_v16 = vcombine.low %v2019_v14, %v2022_v42  ;;  %v2026_v3 = vsel %vm5892_vm5, %v4556_v36, %v2025_v9 }
 0x126   : > { %v4910_v62 = vpop.f32.mrb[18].mxu0  ;;  %v7111_v27 = vadd.f32 %v4908_v4, %v4907_v52  ;;  %v2027_v51 = vrot.slane %v2025_v9, 4  ;;  %v7118_v35 = vadd.f32 %v4997_v28, %v3342_v5  ;;  %v5000_v49 = vadd.f32 %v4999_v39, %v4998_v60  ;;  %v4542_v4 = vld [vmem:[%s5656_s14 + $0x6c] sm:$0xe] }
 0x127   : > { %v4911_v1 = vpop.f32.mrb[19].mxu0  ;;  %v1803_v0 = vsel %vm5698_vm2, %v1798_v54, %v1802_v12  ;;  %5363 = vmatprep.mubr.bf16.mxu0 %v4699_v16  ;;  %v4673_v46 = vcombine.low %v7050_v45, %v7062_v50  ;;  %v1808_v52 = vshll.u32 %v7107_v25, 16  ;;  %v1814_v13 = vshll.u32 %v7114_v48, 16 }
 0x128   : > { %v4689_v53 = vcombine.low %v1793_v37, %v1803_v0  ;;  %v2029_v5 = vsel %vm5892_vm5, %v2027_v51, %v2028_v17  ;;  %v7132_v47 = vadd.f32 %v5000_v49, %v3345_v18  ;;  %v1807_v60 = vrot.slane %v1805_v26, 4 }
 0x129   : > { %v4700_v33 = vcombine.low %v2026_v3, %v2029_v5  ;;  %v1810_v45 = vrot.slane %v1808_v52, 5  ;;  %v1818_v55 = vshrl.u32 %v7114_v48, 16  ;;  %v1816_v36 = vrot.slane %v1814_v13, 5  ;;  %v7157_v5 = vld [vmem:[%s5656_s14 + $0xa8] sm:$0xf] }
 0x12a   : > { %v5001_v14 = vpop.f32.mrb[20].mxu1  ;;  %3902 = vmatprep.mubr.bf16.mxu1 %v4689_v53  ;;  %v1824_v39 = vshll.u32 %v7125_v40, 16  ;;  %v4557_v42 = vrot.slane %v4541_v58, 9  ;;  %v2032_v9 = vrot.slane %v6886_v44, 5  ;;  %v2035_v54 = vrot.slane %v6897_v8, 5 }
 0x12b   : > { %v5002_v38 = vpop.f32.mrb[21].mxu1  ;;  %3903 = vmatmul.mubr.bf16.gmra.mrb[120].mxu1 %v4673_v46  ;;  %5364 = vmatmul.mubr.bf16.gmra.mrb[120].mxu0 %v4700_v33  ;;  %v1811_v28 = vor.u32 %v1810_v45, %v1807_v60  ;;  %v1820_v37 = vrot.slane %v1818_v55, 4  ;;  %v7140_v16 = vadd.f32 %v4911_v1, %v4910_v62  ;;  %v7144_v49 = vadd.f32 %v7016_v56, %v7055_v61  ;;  %v7164_v55 = vld [vmem:[%s5656_s14 + $0xac] sm:$0xf] }
 0x12c   : > { %v4913_v12 = vpop.f32.mrb[20].mxu0  ;;  %v5004_v18 = vpop.f32.mrb[22].mxu1  ;;  %v7148_v44 = vadd.f32 %v7039_v21, %v7055_v61  ;;  %v2033_v0 = vsel %vm5892_vm5, %v4557_v42, %v2032_v9  ;;  %v2034_v46 = vrot.slane %v2032_v9, 4  ;;  %v1826_v1 = vrot.slane %v1824_v39, 5 }
 0x12d   : > { %v4914_v17 = vpop.f32.mrb[21].mxu0  ;;  %v5005_v3 = vpop.f32.mrb[23].mxu1  ;;  %v1812_v8 = vrot.slane %v1811_v28, 4  ;;  %v1821_v62 = vor.u32 %v1820_v37, %v1816_v36  ;;  %v4558_v52 = vrot.slane %v4542_v4, 9  ;;  %v2039_v56 = vrot.slane %v6935_v41, 5 }
 0x12e   : > { %v4916_v51 = vpop.f32.mrb[22].mxu0  ;;  %v2036_v58 = vsel %vm5892_vm5, %v2034_v46, %v2035_v54  ;;  %v2042_v53 = vrot.slane %v6942_v31, 5  ;;  %v5003_v21 = vadd.f32 %v5002_v38, %v5001_v14  ;;  %v7161_v45 = vadd.f32 %v4914_v17, %v4913_v12  ;;  %v7172_v14 = vld [vmem:[%s5656_s14 + $0xb0] sm:$0x1]  ;;  %v4543_v17 = vld [vmem:[%s5656_s14 + $0x78] sm:$0xe] }
 0x12f   : > { %v4917_v26 = vpop.f32.mrb[23].mxu0  ;;  %v1817_v13 = vsel %vm5698_vm2, %v1812_v8, %v1816_v36  ;;  %v1822_v33 = vrot.slane %v1821_v62, 4  ;;  %v4701_v60 = vcombine.low %v2033_v0, %v2036_v58  ;;  %v2040_v4 = vsel %vm5892_vm5, %v4558_v52, %v2039_v56  ;;  %v4544_v0 = vld [vmem:[%s5656_s14 + $0x84] sm:$0xe] }
 0x130   : > { %v2041_v39 = vrot.slane %v2039_v56, 4  ;;  %v7169_v41 = vadd.f32 %v5003_v21, %v7094_v7  ;;  %v5006_v31 = vadd.f32 %v5005_v3, %v5004_v18  ;;  %v4674_v12 = vcombine.low %v7107_v25, %v7114_v48 }
 0x131   : > { %v1827_v36 = vsel %vm5698_vm2, %v1822_v33, %v1826_v1  ;;  %5367 = vmatprep.mubr.bf16.mxu0 %v4701_v60  ;;  %v1829_v42 = vshrl.u32 %v7157_v5, 16  ;;  %v1832_v9 = vshll.u32 %v7157_v5, 16  ;;  %v1838_v3 = vshll.u32 %v7164_v55, 16 }
 0x132   : > { %v5007_v38 = vpop.f32.mrb[24].mxu1  ;;  %v4690_v37 = vcombine.low %v1817_v13, %v1827_v36  ;;  %v2043_v18 = vsel %vm5892_vm5, %v2041_v39, %v2042_v53  ;;  %v7184_v54 = vadd.f32 %v5006_v31, %v7098_v2  ;;  %v1842_v52 = vshrl.u32 %v7164_v55, 16 }
 0x133   : > { %v5008_v28 = vpop.f32.mrb[25].mxu1  ;;  %v4702_v25 = vcombine.low %v2040_v4, %v2043_v18  ;;  %v1831_v62 = vrot.slane %v1829_v42, 4  ;;  %v1834_v1 = vrot.slane %v1832_v9, 5  ;;  %v1840_v21 = vrot.slane %v1838_v3, 5 }
 0x134   : > { %v4919_v7 = vpop.f32.mrb[24].mxu0  ;;  %v5010_v46 = vpop.f32.mrb[26].mxu1  ;;  %3910 = vmatprep.mubr.bf16.mxu1 %v4690_v37  ;;  %v1848_v53 = vshll.u32 %v7172_v14, 16  ;;  %v4559_v13 = vrot.slane %v4543_v17, 9  ;;  %v2046_v2 = vrot.slane %v6972_v32, 5  ;;  %v1844_v4 = vrot.slane %v1842_v52, 4 }
 0x135   : > { %v4920_v8 = vpop.f32.mrb[25].mxu0  ;;  %v5011_v58 = vpop.f32.mrb[27].mxu1  ;;  %3911 = vmatmul.mubr.bf16.gmra.mrb[124].mxu1 %v4674_v12  ;;  %5368 = vmatmul.mubr.bf16.gmra.mrb[124].mxu0 %v4702_v25  ;;  %v1835_v60 = vor.u32 %v1834_v1, %v1831_v62  ;;  %v2049_v39 = vrot.slane %v6977_v6, 5  ;;  %v7196_v31 = vadd.f32 %v4917_v26, %v4916_v51  ;;  %v7200_v36 = vadd.f32 %v7059_v23, %v7055_v61 }
 0x136   : > { %v7189_v56 = vpop.f32.mrb[26].mxu0  ;;  %v7204_v42 = vadd.f32 %v7090_v24, %v7055_v61  ;;  %v2047_v32 = vsel %vm5892_vm5, %v4559_v13, %v2046_v2  ;;  %v2048_v12 = vrot.slane %v2046_v2, 4  ;;  %v1845_v17 = vor.u32 %v1844_v4, %v1840_v21  ;;  %v7213_v24 = vld [vmem:[%s5656_s14 + $0xb4] sm:$0xf]  ;;  %v7228_v2 = vld [vmem:[%s5656_s14 + $0xbc] sm:$0x1] }
 0x137   : > { %v7193_v33 = vpop.f32.mrb[27].mxu0  ;;  %v1836_v9 = vrot.slane %v1835_v60, 4  ;;  %v1850_v37 = vrot.slane %v1848_v53, 5  ;;  %v4560_v18 = vrot.slane %v4544_v0, 9  ;;  %v2053_v51 = vrot.slane %v7021_v15, 5 }
 0x138   : > { %v2050_v6 = vsel %vm5892_vm5, %v2048_v12, %v2049_v39  ;;  %v2056_v23 = vrot.slane %v7028_v30, 5  ;;  %v5009_v26 = vadd.f32 %v5008_v28, %v5007_v38  ;;  %v1846_v62 = vrot.slane %v1845_v17, 4  ;;  %v7220_v0 = vld [vmem:[%s5656_s14 + $0xb8] sm:$0xf] }
 0x139   : > { %v1841_v25 = vsel %vm5698_vm2, %v1836_v9, %v1840_v21  ;;  %v4703_v1 = vcombine.low %v2047_v32, %v2050_v6  ;;  %v7217_v52 = vadd.f32 %v4920_v8, %v4919_v7  ;;  %v2054_v15 = vsel %vm5892_vm5, %v4560_v18, %v2053_v51  ;;  %v4545_v32 = vld [vmem:[%s5656_s14 + $0x90] sm:$0xe] }
 0x13a   : > { %v5013_v3 = vpop.f32.mrb[28].mxu1  ;;  %v2055_v30 = vrot.slane %v2053_v51, 4  ;;  %v7225_v38 = vadd.f32 %v5009_v26, %v7144_v49  ;;  %v5012_v28 = vadd.f32 %v5011_v58, %v5010_v46  ;;  %v1851_v7 = vsel %vm5698_vm2, %v1846_v62, %v1850_v37 }
 0x13b   : > { %v5014_v53 = vpop.f32.mrb[29].mxu1  ;;  %5371 = vmatprep.mubr.bf16.mxu0 %v4703_v1  ;;  %v4675_v8 = vcombine.low %v7157_v5, %v7164_v55  ;;  %v1853_v4 = vshrl.u32 %v7213_v24, 16  ;;  %v1856_v39 = vshll.u32 %v7213_v24, 16  ;;  %v4691_v46 = vcombine.low %v1841_v25, %v1851_v7 }
 0x13c   : > { %v4925_v13 = vpop.f32.mrb[28].mxu0  ;;  %v5016_v21 = vpop.f32.mrb[30].mxu1  ;;  %v2057_v58 = vsel %vm5892_vm5, %v2055_v30, %v2056_v23  ;;  %v7242_v9 = vadd.f32 %v5012_v28, %v7148_v44  ;;  %v1862_v17 = vshll.u32 %v7220_v0, 16  ;;  %v1866_v51 = vshrl.u32 %v7220_v0, 16  ;;  %v4546_v23 = vld [vmem:[%s5656_s14 + $0x9c] sm:$0xe] }
 0x13d   : > { %v4926_v60 = vpop.f32.mrb[29].mxu0  ;;  %v5017_v12 = vpop.f32.mrb[31].mxu1  ;;  %v4704_v5 = vcombine.low %v2054_v15, %v2057_v58  ;;  %v1855_v18 = vrot.slane %v1853_v4, 4  ;;  %v1858_v6 = vrot.slane %v1856_v39, 5  ;;  %3918 = vmatprep.mubr.bf16.mxu1 %v4691_v46  ;;  %v1872_v62 = vshll.u32 %v7228_v2, 16 }
 0x13e   : > { %v7237_v49 = vpop.f32.mrb[30].mxu0  ;;  %v1864_v26 = vrot.slane %v1862_v17, 5  ;;  %v4561_v25 = vrot.slane %v4545_v32, 9  ;;  %v2060_v1 = vrot.slane %v7062_v50, 5  ;;  %3919 = vmatmul.mubr.bf16.gmra.mrb[128].mxu1 %v4675_v8  ;;  %v1868_v30 = vrot.slane %v1866_v51, 4 }
 0x13f   : > { %v7245_v37 = vpop.f32.mrb[31].mxu0  ;;  %5372 = vmatmul.mubr.bf16.gmra.mrb[128].mxu0 %v4704_v5  ;;  %v1859_v44 = vor.u32 %v1858_v6, %v1855_v18  ;;  %v2063_v28 = vrot.slane %v7075_v10, 5  ;;  %v7254_v15 = vadd.f32 %v7193_v33, %v7189_v56  ;;  %v7258_v7 = vadd.f32 %v7111_v27, %v7055_v61  ;;  %v7277_v18 = vld [vmem:[%s5656_s14 + $0xc0] sm:$0xf] }
 0x140   : > { %v7262_v4 = vadd.f32 %v7140_v16, %v7055_v61  ;;  %v2061_v50 = vsel %vm5892_vm5, %v4561_v25, %v2060_v1  ;;  %v2062_v8 = vrot.slane %v2060_v1, 4  ;;  %v1869_v32 = vor.u32 %v1868_v30, %v1864_v26 }
 0x141   : > { %v1860_v10 = vrot.slane %v1859_v44, 4  ;;  %v1874_v56 = vrot.slane %v1872_v62, 5  ;;  %v4562_v33 = vrot.slane %v4546_v23, 9  ;;  %v2067_v16 = vrot.slane %v7114_v48, 5  ;;  %v7288_v44 = vld [vmem:[%s5656_s14 + $0xc4] sm:$0xf] }
 0x142   : > { %v7266_v39 = vpop.f32.mrb[32].mxu1  ;;  %v2064_v27 = vsel %vm5892_vm5, %v2062_v8, %v2063_v28  ;;  %v2070_v17 = vrot.slane %v7125_v40, 5  ;;  %v5015_v5 = vadd.f32 %v5014_v53, %v5013_v3  ;;  %v1870_v25 = vrot.slane %v1869_v32, 4  ;;  %v4547_v32 = vld [vmem:[%s5656_s14 + $0xa8] sm:$0xe] }
 0x143   : > { %v7268_v46 = vpop.f32.mrb[33].mxu1  ;;  %v1865_v62 = vsel %vm5698_vm2, %v1860_v10, %v1864_v26  ;;  %v4705_v1 = vcombine.low %v2061_v50, %v2064_v27  ;;  %v7285_v23 = vadd.f32 %v4926_v60, %v4925_v13  ;;  %v2068_v3 = vsel %vm5892_vm5, %v4562_v33, %v2067_v16  ;;  %v7306_v50 = vld [vmem:[%s5656_s14 + $0xc8] sm:$0x1] }
 0x144   : > { %v7270_v58 = vpop.f32.mrb[32].mxu0  ;;  %v7279_v6 = vpop.f32.mrb[34].mxu1  ;;  %v2069_v53 = vrot.slane %v2067_v16, 4  ;;  %v7297_v30 = vadd.f32 %v5015_v5, %v7200_v36  ;;  %v5018_v28 = vadd.f32 %v5017_v12, %v5016_v21  ;;  %v1875_v13 = vsel %vm5698_vm2, %v1870_v25, %v1874_v56  ;;  %v4548_v5 = vld [vmem:[%s5656_s14 + $0xb4] sm:$0xe] }
 0x145   : > { %v7281_v51 = vpop.f32.mrb[33].mxu0  ;;  %v7290_v48 = vpop.f32.mrb[35].mxu1  ;;  %5375 = vmatprep.mubr.bf16.mxu0 %v4705_v1  ;;  %v4676_v60 = vcombine.low %v7213_v24, %v7220_v0  ;;  %v1877_v8 = vshrl.u32 %v7277_v18, 16  ;;  %v1880_v10 = vshll.u32 %v7277_v18, 16  ;;  %v4692_v36 = vcombine.low %v1865_v62, %v1875_v13 }
 0x146   : > { %v7292_v40 = vpop.f32.mrb[34].mxu0  ;;  %v2071_v21 = vsel %vm5892_vm5, %v2069_v53, %v2070_v17  ;;  %v7314_v12 = vadd.f32 %v5018_v28, %v7204_v42  ;;  %v1886_v56 = vshll.u32 %v7288_v44, 16  ;;  %v1890_v24 = vshrl.u32 %v7288_v44, 16 }
 0x147   : > { %v7299_v26 = vpop.f32.mrb[35].mxu0  ;;  %v4706_v33 = vcombine.low %v2068_v3, %v2071_v21  ;;  %v1879_v27 = vrot.slane %v1877_v8, 4  ;;  %v1882_v16 = vrot.slane %v1880_v10, 5  ;;  %3926 = vmatprep.mubr.bf16.mxu1 %v4692_v36  ;;  %v1896_v1 = vshll.u32 %v7306_v50, 16 }
 0x148   : > { %v1888_v25 = vrot.slane %v1886_v56, 5  ;;  %v4563_v20 = vrot.slane %v4547_v32, 9  ;;  %v2074_v62 = vrot.slane %v7164_v55, 5  ;;  %3927 = vmatmul.mubr.bf16.gmra.mrb[132].mxu1 %v4676_v60  ;;  %v1892_v17 = vrot.slane %v1890_v24, 4  ;;  %v7357_v24 = vld [vmem:[%s5656_s14 + $0xcc] sm:$0xf] }
 0x149   : > { %5376 = vmatmul.mubr.bf16.gmra.mrb[132].mxu0 %v4706_v33  ;;  %v1883_v42 = vor.u32 %v1882_v16, %v1879_v27  ;;  %v2077_v3 = vrot.slane %v7172_v14, 5  ;;  %v7326_v53 = vadd.f32 %v7245_v37, %v7237_v49  ;;  %v7334_v10 = vadd.f32 %v7161_v45, %v7055_v61 }
 0x14a   : > { %v7321_v13 = vpop.f32.mrb[36].mxu1  ;;  %v7338_v55 = vadd.f32 %v7196_v31, %v7055_v61  ;;  %v2075_v14 = vsel %vm5892_vm5, %v4563_v20, %v2074_v62  ;;  %v2076_v60 = vrot.slane %v2074_v62, 4  ;;  %v1893_v36 = vor.u32 %v1892_v17, %v1888_v25 }
 0x14b   : > { %v7328_v28 = vpop.f32.mrb[37].mxu1  ;;  %v1884_v37 = vrot.slane %v1883_v42, 4  ;;  %v1898_v21 = vrot.slane %v1896_v1, 5  ;;  %v4564_v56 = vrot.slane %v4548_v5, 9  ;;  %v2081_v27 = vrot.slane %v7220_v0, 5 }
 0x14c   : > { %v7330_v8 = vpop.f32.mrb[36].mxu0  ;;  %v7342_v32 = vpop.f32.mrb[38].mxu1  ;;  %v2078_v31 = vsel %vm5892_vm5, %v2076_v60, %v2077_v3  ;;  %v2084_v20 = vrot.slane %v7228_v2, 5  ;;  %v5021_v16 = vadd.f32 %v7268_v46, %v7266_v39  ;;  %v1894_v1 = vrot.slane %v1893_v36, 4  ;;  %v7368_v0 = vld [vmem:[%s5656_s14 + $0xd0] sm:$0xf] }
 0x14d   : > { %v7344_v49 = vpop.f32.mrb[37].mxu0  ;;  %v7346_v45 = vpop.f32.mrb[39].mxu1  ;;  %v1889_v5 = vsel %vm5698_vm2, %v1884_v37, %v1888_v25  ;;  %v4707_v42 = vcombine.low %v2075_v14, %v2078_v31  ;;  %v7365_v17 = vadd.f32 %v7281_v51, %v7270_v58  ;;  %v2082_v2 = vsel %vm5892_vm5, %v4564_v56, %v2081_v27  ;;  %v7382_v51 = vld [vmem:[%s5656_s14 + $0xd4] sm:$0x1]  ;;  %v4549_v37 = vld [vmem:[%s5656_s14 + $0xc0] sm:$0xe] }
 0x14e   : > { %v7348_v33 = vpop.f32.mrb[38].mxu0  ;;  %v2083_v39 = vrot.slane %v2081_v27, 4  ;;  %v7373_v46 = vadd.f32 %v5021_v16, %v7258_v7  ;;  %v5024_v3 = vadd.f32 %v7290_v48, %v7279_v6  ;;  %v1899_v25 = vsel %vm5698_vm2, %v1894_v1, %v1898_v21  ;;  %v4550_v21 = vld [vmem:[%s5656_s14 + $0xcc] sm:$0xe] }
 0x14f   : > { %v7359_v62 = vpop.f32.mrb[39].mxu0  ;;  %5379 = vmatprep.mubr.bf16.mxu0 %v4707_v42  ;;  %v4677_v58 = vcombine.low %v7277_v18, %v7288_v44  ;;  %v1901_v14 = vshrl.u32 %v7357_v24, 16  ;;  %v1904_v60 = vshll.u32 %v7357_v24, 16  ;;  %v4693_v36 = vcombine.low %v1889_v5, %v1899_v25 }
 0x150   : > { %v2085_v7 = vsel %vm5892_vm5, %v2083_v39, %v2084_v20  ;;  %v7390_v6 = vadd.f32 %v5024_v3, %v7262_v4  ;;  %v1910_v48 = vshll.u32 %v7368_v0, 16  ;;  %v1914_v16 = vshrl.u32 %v7368_v0, 16 }
 0x151   : > { %v4708_v31 = vcombine.low %v2082_v2, %v2085_v7  ;;  %v1903_v18 = vrot.slane %v1901_v14, 4  ;;  %v1906_v27 = vrot.slane %v1904_v60, 5  ;;  %3934 = vmatprep.mubr.bf16.mxu1 %v4693_v36  ;;  %v1920_v5 = vshll.u32 %v7382_v51, 16 }
 0x152   : > { %v5031_v56 = vpop.f32.mrb[40].mxu1  ;;  %v1912_v29 = vrot.slane %v1910_v48, 5  ;;  %v4565_v25 = vrot.slane %v4549_v37, 9  ;;  %v2088_v20 = vrot.slane %v7288_v44, 5  ;;  %3935 = vmatmul.mubr.bf16.gmra.mrb[136].mxu1 %v4677_v58  ;;  %v1916_v63 = vrot.slane %v1914_v16, 4 }
 0x153   : > { %v5032_v1 = vpop.f32.mrb[41].mxu1  ;;  %5380 = vmatmul.mubr.bf16.gmra.mrb[136].mxu0 %v4708_v31  ;;  %v1907_v3 = vor.u32 %v1906_v27, %v1903_v18  ;;  %v2091_v2 = vrot.slane %v7306_v50, 5  ;;  %v7400_v14 = vadd.f32 %v7299_v26, %v7292_v40  ;;  %v3390_v7 = vadd.f32 %v7217_v52, %v7055_v61 }
 0x154   : > { %v4943_v42 = vpop.f32.mrb[40].mxu0  ;;  %v5034_v4 = vpop.f32.mrb[42].mxu1  ;;  %v3393_v44 = vadd.f32 %v7254_v15, %v7055_v61  ;;  %v2089_v58 = vsel %vm5892_vm5, %v4565_v25, %v2088_v20  ;;  %v2090_v37 = vrot.slane %v2088_v20, 4  ;;  %v1917_v18 = vor.u32 %v1916_v63, %v1912_v29 }
 0x155   : > { %v4944_v39 = vpop.f32.mrb[41].mxu0  ;;  %v5035_v60 = vpop.f32.mrb[43].mxu1  ;;  %v1908_v31 = vrot.slane %v1907_v3, 4  ;;  %v1922_v50 = vrot.slane %v1920_v5, 5  ;;  %v4566_v27 = vrot.slane %v4550_v21, 9  ;;  %v2095_v26 = vrot.slane %v7368_v0, 5 }
 0x156   : > { %v4946_v36 = vpop.f32.mrb[42].mxu0  ;;  %v2092_v40 = vsel %vm5892_vm5, %v2090_v37, %v2091_v2  ;;  %v2098_v16 = vrot.slane %v7382_v51, 5  ;;  %v5027_v52 = vadd.f32 %v7328_v28, %v7321_v13  ;;  %v1918_v25 = vrot.slane %v1917_v18, 4 }
 0x157   : > { %v4947_v48 = vpop.f32.mrb[43].mxu0  ;;  %v1913_v15 = vsel %vm5698_vm2, %v1908_v31, %v1912_v29  ;;  %v4709_v20 = vcombine.low %v2089_v58, %v2092_v40  ;;  %v4939_v63 = vadd.f32 %v7344_v49, %v7330_v8  ;;  %v2096_v21 = vsel %vm5892_vm5, %v4566_v27, %v2095_v26 }
 0x158   : > { %v2097_v5 = vrot.slane %v2095_v26, 4  ;;  %v7421_v3 = vadd.f32 %v5027_v52, %v7334_v10  ;;  %v5030_v51 = vadd.f32 %v7346_v45, %v7342_v32  ;;  %v1923_v13 = vsel %vm5698_vm2, %v1918_v25, %v1922_v50 }
 0x159   : > { %5383 = vmatprep.mubr.bf16.mxu0 %v4709_v20  ;;  %v4678_v29 = vcombine.low %v7357_v24, %v7368_v0  ;;  %v4942_v28 = vadd.f32 %v7359_v62, %v7348_v33  ;;  %v5033_v8 = vadd.f32 %v5032_v1, %v5031_v56  ;;  %v4694_v37 = vcombine.low %v1913_v15, %v1923_v13 }
 0x15a   : > { %v5037_v2 = vpop.f32.mrb[44].mxu1  ;;  %v2099_v10 = vsel %vm5892_vm5, %v2097_v5, %v2098_v16  ;;  %v7434_v32 = vadd.f32 %v5030_v51, %v7338_v55  ;;  %v4945_v45 = vadd.f32 %v4944_v39, %v4943_v42  ;;  %v3398_v18 = vadd.f32 %v7285_v23, %v7055_v61 }
 0x15b   : > { %v5038_v49 = vpop.f32.mrb[45].mxu1  ;;  %v4710_v24 = vcombine.low %v2096_v21, %v2099_v10  ;;  %v7438_v0 = vadd.f32 %v5033_v8, %v3390_v7  ;;  %v5036_v33 = vadd.f32 %v5035_v60, %v5034_v4  ;;  %v3401_v1 = vadd.f32 %v7326_v53, %v7055_v61  ;;  %3942 = vmatprep.mubr.bf16.mxu1 %v4694_v37 }
 0x15c   : > { %v4949_v58 = vpop.f32.mrb[44].mxu0  ;;  %v5040_v34 = vpop.f32.mrb[46].mxu1  ;;  %v4948_v22 = vadd.f32 %v4947_v48, %v4946_v36  ;;  %v5039_v50 = vadd.f32 %v5038_v49, %v5037_v2  ;;  %3943 = vmatmul.mubr.bf16.gmra.mrb[140].mxu1 %v4678_v29  ;;  %v3406_v36 = vadd.f32 %v7365_v17, %v7055_v61  ;;  %v3409_v25 = vadd.f32 %v7400_v14, %v7055_v61 }
 0x15d   : > { %v4950_v31 = vpop.f32.mrb[45].mxu0  ;;  %v5041_v62 = vpop.f32.mrb[47].mxu1  ;;  %5384 = vmatmul.mubr.bf16.gmra.mrb[140].mxu0 %v4710_v24  ;;  %v7444_v39 = vadd.f32 %v5036_v33, %v3393_v44 }
 0x15e   : > { %v4952_v56 = vpop.f32.mrb[46].mxu0  ;;  %v7442_v55 = vadd.f32 %v4950_v31, %v4949_v58  ;;  %v5042_v23 = vadd.f32 %v5041_v62, %v5040_v34  ;;  %v7448_v7 = vadd.f32 %v5039_v50, %v3398_v18  ;;  %v3414_v58 = vadd.f32 %v4939_v63, %v7055_v61 }
 0x15f   : > { %v4953_v42 = vpop.f32.mrb[47].mxu0 }
 0x160   : > { %v7446_v27 = vadd.f32 %v4953_v42, %v4952_v56  ;;  %v7450_v4 = vadd.f32 %v5042_v23, %v3401_v1 }
 0x162   : > { %v5043_v60 = vpop.f32.mrb[48].mxu1 }
 0x163   : > { %v5044_v53 = vpop.f32.mrb[49].mxu1 }
 0x164   : > { %v5107_v40 = vpop.f32.mrb[48].mxu0  ;;  %v5045_v48 = vadd.f32 %v5044_v53, %v5043_v60  ;;  %v5046_v16 = vpop.f32.mrb[50].mxu1  ;;  %v3422_v60 = vadd.f32 %v4945_v45, %v7055_v61 }
 0x165   : > { %v5108_v26 = vpop.f32.mrb[49].mxu0  ;;  %v5047_v44 = vpop.f32.mrb[51].mxu1 }
 0x166   : > { %v5109_v52 = vadd.f32 %v5108_v26, %v5107_v40  ;;  %v5110_v15 = vpop.f32.mrb[50].mxu0  ;;  %v7456_v20 = vadd.f32 %v5045_v48, %v3406_v36  ;;  %v5048_v21 = vadd.f32 %v5047_v44, %v5046_v16 }
 0x167   : > { %v5111_v5 = vpop.f32.mrb[51].mxu0 }
 0x168   : > { %v7459_v51 = vadd.f32 %v5109_v52, %v7118_v35  ;;  %v5112_v2 = vadd.f32 %v5111_v5, %v5110_v15  ;;  %v7461_v13 = vadd.f32 %v5048_v21, %v3409_v25  ;;  %v3417_v35 = vadd.f32 %v4942_v28, %v7055_v61 }
 0x16a   : > { %v7464_v17 = vadd.f32 %v5112_v2, %v7132_v47  ;;  %v5049_v29 = vpop.f32.mrb[52].mxu1 }
 0x16b   : > { %v5050_v49 = vpop.f32.mrb[53].mxu1 }
 0x16c   : > { %v5113_v8 = vpop.f32.mrb[52].mxu0  ;;  %v5051_v37 = vadd.f32 %v5050_v49, %v5049_v29  ;;  %v5052_v10 = vpop.f32.mrb[54].mxu1  ;;  %v3430_v29 = vadd.f32 %v7442_v55, %v7055_v61 }
 0x16d   : > { %v5114_v14 = vpop.f32.mrb[53].mxu0  ;;  %v5053_v18 = vpop.f32.mrb[55].mxu1 }
 0x16e   : > { %v5115_v34 = vadd.f32 %v5114_v14, %v5113_v8  ;;  %v5116_v31 = vpop.f32.mrb[54].mxu0  ;;  %v7468_v24 = vadd.f32 %v5051_v37, %v3414_v58  ;;  %v5054_v33 = vadd.f32 %v5053_v18, %v5052_v10 }
 0x16f   : > { %v5117_v62 = vpop.f32.mrb[55].mxu0 }
 0x170   : > { %v7471_v47 = vadd.f32 %v5115_v34, %v7169_v41  ;;  %v5118_v56 = vadd.f32 %v5117_v62, %v5116_v31  ;;  %v7473_v1 = vadd.f32 %v5054_v33, %v3417_v35  ;;  %v3425_v41 = vadd.f32 %v4948_v22, %v7055_v61 }
 0x172   : > { %v7476_v63 = vadd.f32 %v5118_v56, %v7184_v54  ;;  %v5055_v50 = vpop.f32.mrb[56].mxu1 }
 0x173   : > { %v5056_v23 = vpop.f32.mrb[57].mxu1 }
 0x174   : > { %v5119_v42 = vpop.f32.mrb[56].mxu0  ;;  %v5057_v40 = vadd.f32 %v5056_v23, %v5055_v50  ;;  %v5058_v53 = vpop.f32.mrb[58].mxu1  ;;  %v3438_v50 = vadd.f32 %v6919_v57, %v7055_v61 }
 0x175   : > { %v5120_v28 = vpop.f32.mrb[57].mxu0  ;;  %v5059_v26 = vpop.f32.mrb[59].mxu1 }
 0x176   : > { %v5121_v36 = vadd.f32 %v5120_v28, %v5119_v42  ;;  %v5122_v48 = vpop.f32.mrb[58].mxu0  ;;  %v7480_v16 = vadd.f32 %v5057_v40, %v3422_v60  ;;  %v5060_v52 = vadd.f32 %v5059_v26, %v5058_v53 }
 0x177   : > { %v5123_v15 = vpop.f32.mrb[59].mxu0 }
 0x178   : > { %v7483_v54 = vadd.f32 %v5121_v36, %v7225_v38  ;;  %v5124_v44 = vadd.f32 %v5123_v15, %v5122_v48  ;;  %v7485_v25 = vadd.f32 %v5060_v52, %v3425_v41  ;;  %v3433_v38 = vadd.f32 %v7446_v27, %v7055_v61 }
 0x17a   : > { %v7488_v45 = vadd.f32 %v5124_v44, %v7242_v9  ;;  %v5061_v21 = vpop.f32.mrb[60].mxu1 }
 0x17b   : > { %v5062_v2 = vpop.f32.mrb[61].mxu1 }
 0x17c   : > { %v5125_v5 = vpop.f32.mrb[60].mxu0  ;;  %v5063_v22 = vadd.f32 %v5062_v2, %v5061_v21  ;;  %v5064_v49 = vpop.f32.mrb[62].mxu1  ;;  %v3446_v21 = vadd.f32 %v6962_v43, %v7055_v61 }
 0x17d   : > { %v5126_v8 = vpop.f32.mrb[61].mxu0  ;;  %v5065_v14 = vpop.f32.mrb[63].mxu1 }
 0x17e   : > { %v5127_v58 = vadd.f32 %v5126_v8, %v5125_v5  ;;  %v5128_v37 = vpop.f32.mrb[62].mxu0  ;;  %v7494_v10 = vadd.f32 %v5063_v22, %v3430_v29  ;;  %v5066_v34 = vadd.f32 %v5065_v14, %v5064_v49 }
 0x17f   : > { %v5129_v9 = vpop.f32.mrb[63].mxu0 }
 0x180   : > { %v7497_v31 = vadd.f32 %v5127_v58, %v7297_v30  ;;  %v5130_v18 = vadd.f32 %v5129_v9, %v5128_v37  ;;  %v7499_v35 = vadd.f32 %v5066_v34, %v3433_v38  ;;  %v3441_v30 = vadd.f32 %v6925_v11, %v7055_v61 }
 0x182   : > { %v7502_v55 = vadd.f32 %v5130_v18, %v7314_v12  ;;  %v5067_v33 = vpop.f32.mrb[64].mxu1 }
 0x183   : > { %v5068_v56 = vpop.f32.mrb[65].mxu1 }
 0x184   : > { %v5131_v62 = vpop.f32.mrb[64].mxu0  ;;  %v5069_v27 = vadd.f32 %v5068_v56, %v5067_v33  ;;  %v5070_v23 = vpop.f32.mrb[66].mxu1  ;;  %v3454_v33 = vadd.f32 %v7005_v59, %v7055_v61 }
 0x185   : > { %v5132_v42 = vpop.f32.mrb[65].mxu0  ;;  %v5071_v28 = vpop.f32.mrb[67].mxu1 }
 0x186   : > { %v5133_v60 = vadd.f32 %v5132_v42, %v5131_v62  ;;  %v5134_v40 = vpop.f32.mrb[66].mxu0  ;;  %v7508_v53 = vadd.f32 %v5069_v27, %v3438_v50  ;;  %v5072_v36 = vadd.f32 %v5071_v28, %v5070_v23 }
 0x187   : > { %v5135_v12 = vpop.f32.mrb[67].mxu0 }
 0x188   : > { %v7511_v48 = vadd.f32 %v5133_v60, %v7373_v46  ;;  %v5136_v26 = vadd.f32 %v5135_v12, %v5134_v40  ;;  %v7513_v41 = vadd.f32 %v5072_v36, %v3441_v30  ;;  %v3449_v46 = vadd.f32 %v6969_v19, %v7055_v61 }
 0x18a   : > { %v7516_v57 = vadd.f32 %v5136_v26, %v7390_v6  ;;  %v5073_v52 = vpop.f32.mrb[68].mxu1 }
 0x18b   : > { %v5074_v44 = vpop.f32.mrb[69].mxu1 }
 0x18c   : > { %v5137_v15 = vpop.f32.mrb[68].mxu0  ;;  %v5075_v11 = vadd.f32 %v5074_v44, %v5073_v52  ;;  %v5076_v2 = vpop.f32.mrb[70].mxu1 }
 0x18d   : > { %v5138_v5 = vpop.f32.mrb[69].mxu0  ;;  %v5077_v8 = vpop.f32.mrb[71].mxu1 }
 0x18e   : > { %v5139_v29 = vadd.f32 %v5138_v5, %v5137_v15  ;;  %v5140_v22 = vpop.f32.mrb[70].mxu0  ;;  %v7522_v49 = vadd.f32 %v5075_v11, %v3446_v21  ;;  %v5078_v58 = vadd.f32 %v5077_v8, %v5076_v2  ;;  %v7801_v15 = vld [vmem:[#allocation3_spill] sm:$0xff] }
 0x18f   : > { %v5141_v6 = vpop.f32.mrb[71].mxu0 }
 0x190   : > { %v7525_v37 = vadd.f32 %v5139_v29, %v7421_v3  ;;  %v5142_v14 = vadd.f32 %v5141_v6, %v5140_v22  ;;  %v7527_v38 = vadd.f32 %v5078_v58, %v3449_v46  ;;  %v7800_v3 = vld [vmem:[#allocation2_spill] sm:$0xff]  ;;  %v7802_v22 = vld [vmem:[#allocation4_spill] sm:$0xff] }
 0x191   : > { %v3457_v23 = vadd.f32 %v7800_v3, %v7055_v61  ;;  %v5555_v61 = vld [vmem:[%s7778_s2] ss:$0 sm:$0xff] }
 0x192   : > { %v7530_v43 = vadd.f32 %v5142_v14, %v7434_v32  ;;  %v5079_v34 = vpop.f32.mrb[72].mxu1  ;;  %v3462_v44 = vadd.f32 %v5555_v61, %v7801_v15  ;;  %v3465_v8 = vadd.f32 %v5555_v61, %v7802_v22 }
 0x193   : > { %v5080_v18 = vpop.f32.mrb[73].mxu1 }
 0x194   : > { %v5143_v9 = vpop.f32.mrb[72].mxu0  ;;  %v5081_v19 = vadd.f32 %v5080_v18, %v5079_v34  ;;  %v5082_v56 = vpop.f32.mrb[74].mxu1 }
 0x195   : > { %v5144_v62 = vpop.f32.mrb[73].mxu0  ;;  %v5083_v42 = vpop.f32.mrb[75].mxu1 }
 0x196   : > { %v5145_v50 = vadd.f32 %v5144_v62, %v5143_v9  ;;  %v5146_v27 = vpop.f32.mrb[74].mxu0  ;;  %v7536_v60 = vadd.f32 %v5081_v19, %v3454_v33  ;;  %v5084_v40 = vadd.f32 %v5083_v42, %v5082_v56 }
 0x197   : > { %v5147_v32 = vpop.f32.mrb[75].mxu0 }
 0x198   : > { %v7539_v28 = vadd.f32 %v5145_v50, %v7438_v0  ;;  %v5148_v30 = vadd.f32 %v5147_v32, %v5146_v27  ;;  %v7541_v36 = vadd.f32 %v5084_v40, %v3457_v23 }
 0x19a   : > { %v7544_v59 = vadd.f32 %v5148_v30, %v7444_v39  ;;  %v5085_v12 = vpop.f32.mrb[76].mxu1 }
 0x19b   : > { %v5086_v52 = vpop.f32.mrb[77].mxu1 }
 0x19c   : > { %v5149_v26 = vpop.f32.mrb[76].mxu0  ;;  %v5087_v21 = vadd.f32 %v5086_v52, %v5085_v12  ;;  %v5088_v5 = vpop.f32.mrb[78].mxu1 }
 0x19d   : > { %v5150_v11 = vpop.f32.mrb[77].mxu0  ;;  %v5089_v29 = vpop.f32.mrb[79].mxu1 }
 0x19e   : > { %v5151_v0 = vadd.f32 %v5150_v11, %v5149_v26  ;;  %v5152_v2 = vpop.f32.mrb[78].mxu0  ;;  %v7551_v46 = vadd.f32 %v5087_v21, %v3462_v44  ;;  %v5090_v39 = vadd.f32 %v5089_v29, %v5088_v5 }
 0x19f   : > { %v5153_v58 = vpop.f32.mrb[79].mxu0 }
 0x1a0   : > { %v7554_v6 = vadd.f32 %v5151_v0, %v7448_v7  ;;  %v5154_v14 = vadd.f32 %v5153_v58, %v5152_v2  ;;  %v7556_v34 = vadd.f32 %v5090_v39, %v3465_v8 }
 0x1a2   : > { %v7559_v9 = vadd.f32 %v5154_v14, %v7450_v4  ;;  %v5219_v18 = vpop.f32.mrb[80].mxu1 }
 0x1a3   : > { %v5220_v19 = vpop.f32.mrb[81].mxu1 }
 0x1a4   : > { %v5155_v33 = vpop.f32.mrb[80].mxu0  ;;  %v5221_v56 = vadd.f32 %v5220_v19, %v5219_v18  ;;  %v5222_v50 = vpop.f32.mrb[82].mxu1 }
 0x1a5   : > { %v5156_v62 = vpop.f32.mrb[81].mxu0  ;;  %v5223_v3 = vpop.f32.mrb[83].mxu1 }
 0x1a6   : > { %v5157_v27 = vadd.f32 %v5156_v62, %v5155_v33  ;;  %v5158_v42 = vpop.f32.mrb[82].mxu0  ;;  %v5224_v40 = vadd.f32 %v5223_v3, %v5222_v50  ;;  %v7562_v7 = vadd.f32 %v5221_v56, %v7459_v51 }
 0x1a7   : > { %v5159_v23 = vpop.f32.mrb[83].mxu0 }
 0x1a8   : > { %v7565_v32 = vadd.f32 %v5157_v27, %v7456_v20  ;;  %v5160_v30 = vadd.f32 %v5159_v23, %v5158_v42  ;;  %v7568_v4 = vadd.f32 %v5224_v40, %v7464_v17 }
 0x1aa   : > { %v7571_v12 = vadd.f32 %v5160_v30, %v7461_v13  ;;  %v5225_v26 = vpop.f32.mrb[84].mxu1 }
 0x1ab   : > { %v5226_v61 = vpop.f32.mrb[85].mxu1 }
 0x1ac   : > { %v5161_v52 = vpop.f32.mrb[84].mxu0  ;;  %v5227_v44 = vadd.f32 %v5226_v61, %v5225_v26  ;;  %v5228_v21 = vpop.f32.mrb[86].mxu1 }
 0x1ad   : > { %v5162_v15 = vpop.f32.mrb[85].mxu0  ;;  %v5229_v51 = vpop.f32.mrb[87].mxu1 }
 0x1ae   : > { %v5163_v11 = vadd.f32 %v5162_v15, %v5161_v52  ;;  %v5164_v5 = vpop.f32.mrb[86].mxu0  ;;  %v5230_v2 = vadd.f32 %v5229_v51, %v5228_v21  ;;  %v7574_v20 = vadd.f32 %v5227_v44, %v7471_v47 }
 0x1af   : > { %v5165_v0 = vpop.f32.mrb[87].mxu0 }
 0x1b0   : > { %v7577_v17 = vadd.f32 %v5163_v11, %v7468_v24  ;;  %v5166_v29 = vadd.f32 %v5165_v0, %v5164_v5  ;;  %v7580_v13 = vadd.f32 %v5230_v2, %v7476_v63 }
 0x1b2   : > { %v7583_v22 = vadd.f32 %v5166_v29, %v7473_v1  ;;  %v5231_v8 = vpop.f32.mrb[88].mxu1 }
 0x1b3   : > { %v5232_v39 = vpop.f32.mrb[89].mxu1 }
 0x1b4   : > { %v5167_v58 = vpop.f32.mrb[88].mxu0  ;;  %v5233_v14 = vadd.f32 %v5232_v39, %v5231_v8  ;;  %v5234_v18 = vpop.f32.mrb[90].mxu1 }
 0x1b5   : > { %v5168_v33 = vpop.f32.mrb[89].mxu0  ;;  %v5235_v19 = vpop.f32.mrb[91].mxu1 }
 0x1b6   : > { %v5169_v62 = vadd.f32 %v5168_v33, %v5167_v58  ;;  %v5170_v47 = vpop.f32.mrb[90].mxu0  ;;  %v5236_v56 = vadd.f32 %v5235_v19, %v5234_v18  ;;  %v7586_v24 = vadd.f32 %v5233_v14, %v7483_v54 }
 0x1b7   : > { %v5171_v50 = vpop.f32.mrb[91].mxu0 }
 0x1b8   : > { %v7589_v63 = vadd.f32 %v5169_v62, %v7480_v16  ;;  %v5172_v27 = vadd.f32 %v5171_v50, %v5170_v47  ;;  %v7592_v1 = vadd.f32 %v5236_v56, %v7488_v45 }
 0x1ba   : > { %v7595_v42 = vadd.f32 %v5172_v27, %v7485_v25  ;;  %v5237_v3 = vpop.f32.mrb[92].mxu1 }
 0x1bb   : > { %v5238_v23 = vpop.f32.mrb[93].mxu1 }
 0x1bc   : > { %v5173_v40 = vpop.f32.mrb[92].mxu0  ;;  %v5239_v30 = vadd.f32 %v5238_v23, %v5237_v3  ;;  %v5240_v26 = vpop.f32.mrb[94].mxu1 }
 0x1bd   : > { %v5174_v52 = vpop.f32.mrb[93].mxu0  ;;  %v5241_v61 = vpop.f32.mrb[95].mxu1 }
 0x1be   : > { %v5175_v54 = vadd.f32 %v5174_v52, %v5173_v40  ;;  %v5176_v15 = vpop.f32.mrb[94].mxu0  ;;  %v5242_v44 = vadd.f32 %v5241_v61, %v5240_v26  ;;  %v7598_v16 = vadd.f32 %v5239_v30, %v7497_v31 }
 0x1bf   : > { %v5177_v21 = vpop.f32.mrb[95].mxu0 }
 0x1c0   : > { %v7601_v45 = vadd.f32 %v5175_v54, %v7494_v10  ;;  %v5178_v11 = vadd.f32 %v5177_v21, %v5176_v15  ;;  %v7604_v25 = vadd.f32 %v5242_v44, %v7502_v55 }
 0x1c2   : > { %v7607_v5 = vadd.f32 %v5178_v11, %v7499_v35  ;;  %v5243_v51 = vpop.f32.mrb[96].mxu1 }
 0x1c3   : > { %v5244_v0 = vpop.f32.mrb[97].mxu1 }
 0x1c4   : > { %v5179_v2 = vpop.f32.mrb[96].mxu0  ;;  %v5245_v29 = vadd.f32 %v5244_v0, %v5243_v51  ;;  %v5246_v8 = vpop.f32.mrb[98].mxu1 }
 0x1c5   : > { %v5180_v39 = vpop.f32.mrb[97].mxu0  ;;  %v5247_v58 = vpop.f32.mrb[99].mxu1 }
 0x1c6   : > { %v5181_v31 = vadd.f32 %v5180_v39, %v5179_v2  ;;  %v5182_v14 = vpop.f32.mrb[98].mxu0  ;;  %v5248_v18 = vadd.f32 %v5247_v58, %v5246_v8  ;;  %v7610_v10 = vadd.f32 %v5245_v29, %v7511_v48 }
 0x1c7   : > { %v5183_v33 = vpop.f32.mrb[99].mxu0 }
 0x1c8   : > { %v7613_v55 = vadd.f32 %v5181_v31, %v7508_v53  ;;  %v5184_v19 = vadd.f32 %v5183_v33, %v5182_v14  ;;  %v7616_v35 = vadd.f32 %v5248_v18, %v7516_v57 }
 0x1ca   : > { %v7619_v62 = vadd.f32 %v5184_v19, %v7513_v41 }
 0x1cc   : > { %v5249_v47 = vpop.f32.mrb[100].mxu1 }
 0x1cd   : > { %v5250_v56 = vpop.f32.mrb[101].mxu1 }
 0x1ce   : > { %v5185_v50 = vpop.f32.mrb[100].mxu0  ;;  %v5251_v27 = vadd.f32 %v5250_v56, %v5249_v47  ;;  %v5252_v3 = vpop.f32.mrb[102].mxu1 }
 0x1cf   : > { %v5186_v23 = vpop.f32.mrb[101].mxu0  ;;  %v5253_v40 = vpop.f32.mrb[103].mxu1 }
 0x1d0   : > { %v5187_v48 = vadd.f32 %v5186_v23, %v5185_v50  ;;  %v5188_v30 = vpop.f32.mrb[102].mxu0  ;;  %v5254_v26 = vadd.f32 %v5253_v40, %v5252_v3  ;;  %v7622_v53 = vadd.f32 %v5251_v27, %v7525_v37  ;;  %v4852_v40 = vld [vmem:[%s7649_s25 + $0x8] sm:$0xff]  }
 0x1d1   : > { %v5189_v52 = vpop.f32.mrb[103].mxu0 }
 0x1d2   : > { %v7625_v57 = vadd.f32 %v5187_v48, %v7522_v49  ;;  %v5190_v61 = vadd.f32 %v5189_v52, %v5188_v30  ;;  %v7628_v41 = vadd.f32 %v5254_v26, %v7530_v43  ;;  %v4789_v30 = vld [vmem:[%s7649_s25] sm:$0xff]   ;;  %v4794_v52 = vunpack.c.l.bf16 %v4852_v40 }
 0x1d4   : > { %v7631_v54 = vadd.f32 %v5190_v61, %v7527_v38 }
 0x1d6   : > { %v5255_v15 = vpop.f32.mrb[104].mxu1 }
 0x1d7   : > { %v5256_v44 = vpop.f32.mrb[105].mxu1 }
 0x1d8   : > { %v5257_v21 = vadd.f32 %v5256_v44, %v5255_v15  ;;  %v5258_v11 = vpop.f32.mrb[106].mxu1  ;;  %v5191_v51 = vpop.f32.mrb[104].mxu0  ;;  %v4790_v44 = vunpack.c.l.bf16 %v4789_v30 }
 0x1d9   : > { %v5259_v0 = vpop.f32.mrb[107].mxu1  ;;  %v5192_v37 = vpop.f32.mrb[105].mxu0 }
 0x1da   : > { %v5260_v2 = vadd.f32 %v5259_v0, %v5258_v11  ;;  %v7634_v29 = vadd.f32 %v5257_v21, %v7539_v28  ;;  %v5193_v49 = vadd.f32 %v5192_v37, %v5191_v51  ;;  %v5194_v8 = vpop.f32.mrb[106].mxu0 }
 0x1db   : > { %v5195_v39 = vpop.f32.mrb[107].mxu0 }
 0x1dc   : > { %v7637_v43 = vadd.f32 %v5260_v2, %v7544_v59  ;;  %v7640_v38 = vadd.f32 %v5193_v49, %v7536_v60  ;;  %v5196_v58 = vadd.f32 %v5195_v39, %v5194_v8  ;;  %v4791_v2 = vunpack.c.h.bf16 %v4789_v30 }
 0x1de   : > { %v7643_v31 = vadd.f32 %v5196_v58, %v7541_v36 }
 0x1e3   : > { %v5261_v14 = vpop.f32.mrb[108].mxu1 }
 0x1e4   : > { %v5262_v18 = vpop.f32.mrb[109].mxu1 }
 0x1e5   : > { %v5197_v33 = vpop.f32.mrb[108].mxu0  ;;  %v5263_v19 = vadd.f32 %v5262_v18, %v5261_v14  ;;  %v5264_v28 = vpop.f32.mrb[110].mxu1 }
 0x1e6   : > { %v5198_v47 = vpop.f32.mrb[109].mxu0  ;;  %v5265_v56 = vpop.f32.mrb[111].mxu1 }
 0x1e7   : > { %v5199_v60 = vadd.f32 %v5198_v47, %v5197_v33  ;;  %v5200_v59 = vpop.f32.mrb[110].mxu0  ;;  %v5266_v36 = vadd.f32 %v5265_v56, %v5264_v28  ;;  %v7652_v50 = vadd.f32 %v5263_v19, %v7554_v6  ;;  %v4854_v28 = vld [vmem:[%s7649_s25 + $0x18] sm:$0xff]  }
 0x1e8   : > { %v5201_v27 = vpop.f32.mrb[111].mxu0 }
 0x1e9   : > { %v7655_v3 = vadd.f32 %v5199_v60, %v7551_v46  ;;  %v5202_v23 = vadd.f32 %v5201_v27, %v5200_v59  ;;  %v7659_v48 = vadd.f32 %v5266_v36, %v7559_v9  ;;  %v4795_v46 = vunpack.c.h.bf16 %v4852_v40  ;;  %v4853_v60 = vld [vmem:[%s7649_s25 + $0x10] sm:$0xff]  }
 0x1ea   : > { %v4802_v36 = vunpack.c.l.bf16 %v4854_v28 }
 0x1eb   : > { %v7663_v26 = vadd.f32 %v5202_v23, %v7556_v34  ;;  %v5267_v61 = vpop.f32.mrb[112].mxu1 }
 0x1ec   : > { %v5268_v21 = vpop.f32.mrb[113].mxu1 }
 0x1ed   : > { %v5357_v15 = vpop.f32.mrb[112].mxu0  ;;  %v5269_v51 = vadd.f32 %v5268_v21, %v5267_v61  ;;  %v5270_v37 = vpop.f32.mrb[114].mxu1 }
 0x1ee   : > { %v3994_v6 = vadd.f32 %v5357_v15, %v7574_v20  ;;  %v3985_v11 = vpop.f32.mrb[113].mxu0  ;;  %v5271_v8 = vpop.f32.mrb[115].mxu1 }
 0x1ef   : > { %v3986_v0 = vadd.f32 %v3985_v11, %v7562_v7  ;;  %v5358_v9 = vpop.f32.mrb[114].mxu0  ;;  %v5272_v7 = vadd.f32 %v5271_v8, %v5270_v37  ;;  %v7676_v14 = vadd.f32 %v5269_v51, %v7565_v32  ;;  %v4798_v32 = vunpack.c.l.bf16 %v4853_v60  ;;  %v4856_v8 = vld [vmem:[%s7649_s25 + $0x28] sm:$0xff]  }
 0x1f0   : > { %v4178_v49 = vadd.f32 %v4794_v52, %v3994_v6  ;;  %v3997_v34 = vadd.f32 %v5358_v9, %v7580_v13  ;;  %v3988_v39 = vpop.f32.mrb[115].mxu0  ;;  %v4803_v52 = vunpack.c.h.bf16 %v4854_v28  ;;  %v4799_v6 = vunpack.c.h.bf16 %v4853_v60 }
 0x1f1   : > { %v4176_v20 = vadd.f32 %v4790_v44, %v3986_v0  ;;  %v3989_v58 = vadd.f32 %v3988_v39, %v7568_v4  ;;  %v7680_v47 = vadd.f32 %v5272_v7, %v7571_v12  ;;  %v4811_v28 = vunpack.c.h.bf16 %v4856_v8 }
 0x1f2   : > { %v4210_v13 = vmax.f32 %v4178_v49, 0.0  ;;  %v4179_v18 = vadd.f32 %v4795_v46, %v3997_v34 }
 0x1f3   : > { %v4208_v33 = vmax.f32 %v4176_v20, 0.0  ;;  %v4177_v19 = vadd.f32 %v4791_v2, %v3989_v58  ;;  %v4855_v20 = vld [vmem:[%s7649_s25 + $0x20] sm:$0xff]   ;;  %v4810_v58 = vunpack.c.l.bf16 %v4856_v8 }
 0x1f4   : > { %4242 = vst [vmem:[%s7672_s28 + $0x10] sm:$0xff] %v4210_v13  ;;  %v4211_v56 = vmax.f32 %v4179_v18, 0.0  ;;  %v5273_v4 = vpop.f32.mrb[116].mxu1 }
 0x1f5   : > { %4240 = vst [vmem:[%s7672_s28] sm:$0xff] %v4208_v33  ;;  %v4209_v59 = vmax.f32 %v4177_v19, 0.0  ;;  %v5361_v27 = vpop.f32.mrb[116].mxu0  ;;  %v5274_v40 = vpop.f32.mrb[117].mxu1 }
 0x1f6   : > { %4243 = vst [vmem:[%s7672_s28 + $0x18] sm:$0xff] %v4211_v56  ;;  %v4010_v23 = vadd.f32 %v5361_v27, %v7598_v16  ;;  %v4001_v30 = vpop.f32.mrb[117].mxu0  ;;  %v5275_v61 = vadd.f32 %v5274_v40, %v5273_v4  ;;  %v5276_v15 = vpop.f32.mrb[118].mxu1 }
 0x1f7   : > { %4241 = vst [vmem:[%s7672_s28 + $0x8] sm:$0xff] %v4209_v59  ;;  %v4002_v12 = vadd.f32 %v4001_v30, %v7586_v24  ;;  %v5362_v44 = vpop.f32.mrb[118].mxu0  ;;  %v5277_v46 = vpop.f32.mrb[119].mxu1 }
 0x1f8   : > { %v4182_v21 = vadd.f32 %v4802_v36, %v4010_v23  ;;  %v4013_v11 = vadd.f32 %v5362_v44, %v7604_v25  ;;  %v4004_v51 = vpop.f32.mrb[119].mxu0  ;;  %v5278_v0 = vadd.f32 %v5277_v46, %v5276_v15  ;;  %v7692_v24 = vadd.f32 %v5275_v61, %v7577_v17  ;;  %v4858_v44 = vld [vmem:[%s7649_s25 + $0x38] sm:$0xff]  }
 0x1f9   : > { %v4180_v16 = vadd.f32 %v4798_v32, %v4002_v12  ;;  %v4005_v37 = vadd.f32 %v4004_v51, %v7592_v1  ;;  %v4806_v17 = vunpack.c.l.bf16 %v4855_v20  ;;  %v4807_v36 = vunpack.c.h.bf16 %v4855_v20 }
 0x1fa   : > { %v4214_v9 = vmax.f32 %v4182_v21, 0.0  ;;  %v4183_v2 = vadd.f32 %v4803_v52, %v4013_v11  ;;  %v7696_v39 = vadd.f32 %v5278_v0, %v7583_v22  ;;  %v4857_v21 = vld [vmem:[%s7649_s25 + $0x30] sm:$0xff]   ;;  %v4818_v46 = vunpack.c.l.bf16 %v4858_v44 }
 0x1fb   : > { %v4212_v49 = vmax.f32 %v4180_v16, 0.0  ;;  %v4181_v34 = vadd.f32 %v4799_v6, %v4005_v37  ;;  %v4815_v8 = vunpack.c.h.bf16 %v4857_v21 }
 0x1fc   : > { %4246 = vst [vmem:[%s7672_s28 + $0x30] sm:$0xff] %v4214_v9  ;;  %v4215_v25 = vmax.f32 %v4183_v2, 0.0  ;;  %v4819_v9 = vunpack.c.h.bf16 %v4858_v44 }
 0x1fd   : > { %4244 = vst [vmem:[%s7672_s28 + $0x20] sm:$0xff] %v4212_v49  ;;  %v4213_v7 = vmax.f32 %v4181_v34, 0.0 }
 0x1fe   : > { %4247 = vst [vmem:[%s7672_s28 + $0x38] sm:$0xff] %v4215_v25  ;;  %v5279_v1 = vpop.f32.mrb[120].mxu1  ;;  %v5365_v13 = vpop.f32.mrb[120].mxu0 }
 0x1ff   : > { %4245 = vst [vmem:[%s7672_s28 + $0x28] sm:$0xff] %v4213_v7  ;;  %v4026_v18 = vadd.f32 %v5365_v13, %v7622_v53  ;;  %v5280_v33 = vpop.f32.mrb[121].mxu1  ;;  %v4017_v19 = vpop.f32.mrb[121].mxu0 }
 0x200   : > { %v5281_v56 = vadd.f32 %v5280_v33, %v5279_v1  ;;  %v4018_v22 = vadd.f32 %v4017_v19, %v7610_v10  ;;  %v5282_v60 = vpop.f32.mrb[122].mxu1  ;;  %v5366_v59 = vpop.f32.mrb[122].mxu0 }
 0x201   : > { %v4186_v4 = vadd.f32 %v4810_v58, %v4026_v18  ;;  %v4029_v27 = vadd.f32 %v5366_v59, %v7628_v41  ;;  %v5283_v32 = vpop.f32.mrb[123].mxu1  ;;  %v4020_v23 = vpop.f32.mrb[123].mxu0 }
 0x202   : > { %v4184_v53 = vadd.f32 %v4806_v17, %v4018_v22  ;;  %v5284_v40 = vadd.f32 %v5283_v32, %v5282_v60  ;;  %v4021_v30 = vadd.f32 %v4020_v23, %v7616_v35  ;;  %v7708_v10 = vadd.f32 %v5281_v56, %v7589_v63  ;;  %v4859_v22 = vld [vmem:[%s7649_s25 + $0x40] sm:$0xff]  }
 0x203   : > { %v4218_v52 = vmax.f32 %v4186_v4, 0.0  ;;  %v4187_v61 = vadd.f32 %v4811_v28, %v4029_v27  ;;  %v4814_v63 = vunpack.c.l.bf16 %v4857_v21  ;;  %v4860_v28 = vld [vmem:[%s7649_s25 + $0x48] sm:$0xff]  }
 0x204   : > { %v4216_v12 = vmax.f32 %v4184_v53, 0.0  ;;  %v4185_v15 = vadd.f32 %v4807_v36, %v4021_v30  ;;  %v7712_v6 = vadd.f32 %v5284_v40, %v7595_v42  ;;  %v4826_v59 = vunpack.c.l.bf16 %v4860_v28 }
 0x205   : > { %4250 = vst [vmem:[%s7672_s28 + $0x50] sm:$0xff] %v4218_v52  ;;  %v4219_v41 = vmax.f32 %v4187_v61, 0.0  ;;  %v4827_v23 = vunpack.c.h.bf16 %v4860_v28  ;;  %v4823_v52 = vunpack.c.h.bf16 %v4859_v22 }
 0x206   : > { %4248 = vst [vmem:[%s7672_s28 + $0x40] sm:$0xff] %v4216_v12  ;;  %v4217_v11 = vmax.f32 %v4185_v15, 0.0 }
 0x207   : > { %4251 = vst [vmem:[%s7672_s28 + $0x58] sm:$0xff] %v4219_v41 }
 0x208   : > { %4249 = vst [vmem:[%s7672_s28 + $0x48] sm:$0xff] %v4217_v11  ;;  %v5285_v35 = vpop.f32.mrb[124].mxu1  ;;  %v5369_v51 = vpop.f32.mrb[124].mxu0 }
 0x209   : > { %v4042_v16 = vadd.f32 %v5369_v51, %v7652_v50  ;;  %v5286_v0 = vpop.f32.mrb[125].mxu1  ;;  %v4033_v37 = vpop.f32.mrb[125].mxu0 }
 0x20a   : > { %v5287_v2 = vadd.f32 %v5286_v0, %v5285_v35  ;;  %v4034_v42 = vadd.f32 %v4033_v37, %v7634_v29  ;;  %v5288_v49 = vpop.f32.mrb[126].mxu1  ;;  %v5370_v34 = vpop.f32.mrb[126].mxu0  ;;  %v4861_v0 = vld [vmem:[%s7649_s25 + $0x50] sm:$0xff]  }
 0x20b   : > { %v4190_v25 = vadd.f32 %v4818_v46, %v4042_v16  ;;  %v4045_v20 = vadd.f32 %v5370_v34, %v7659_v48  ;;  %v5289_v7 = vpop.f32.mrb[127].mxu1  ;;  %v4036_v58 = vpop.f32.mrb[127].mxu0 }
 0x20c   : > { %v4188_v50 = vadd.f32 %v4814_v63, %v4034_v42  ;;  %v5290_v1 = vadd.f32 %v5289_v7, %v5288_v49  ;;  %v4037_v13 = vadd.f32 %v4036_v58, %v7637_v43  ;;  %v3913_v29 = vadd.f32 %v5287_v2, %v7601_v45  ;;  %v4862_v63 = vld [vmem:[%s7649_s25 + $0x58] sm:$0xff]  }
 0x20d   : > { %v4222_v17 = vmax.f32 %v4190_v25, 0.0  ;;  %v4191_v18 = vadd.f32 %v4819_v9, %v4045_v20  ;;  %v4822_v43 = vunpack.c.l.bf16 %v4859_v22  ;;  %v4834_v9 = vunpack.c.l.bf16 %v4862_v63 }
 0x20e   : > { %v4220_v33 = vmax.f32 %v4188_v50, 0.0  ;;  %v4189_v19 = vadd.f32 %v4815_v8, %v4037_v13  ;;  %v3916_v56 = vadd.f32 %v5290_v1, %v7607_v5  ;;  %v4835_v8 = vunpack.c.h.bf16 %v4862_v63 }
 0x20f   : > { %4254 = vst [vmem:[%s7672_s28 + $0x70] sm:$0xff] %v4222_v17  ;;  %v4223_v48 = vmax.f32 %v4191_v18, 0.0  ;;  %v4831_v58 = vunpack.c.h.bf16 %v4861_v0 }
 0x210   : > { %4252 = vst [vmem:[%s7672_s28 + $0x60] sm:$0xff] %v4220_v33  ;;  %v4221_v60 = vmax.f32 %v4189_v19, 0.0 }
 0x211   : > { %4255 = vst [vmem:[%s7672_s28 + $0x78] sm:$0xff] %v4223_v48  ;;  %v5291_v36 = vpop.f32.mrb[128].mxu1 }
 0x212   : > { %4253 = vst [vmem:[%s7672_s28 + $0x68] sm:$0xff] %v4221_v60  ;;  %v5373_v4 = vpop.f32.mrb[128].mxu0  ;;  %v5292_v27 = vpop.f32.mrb[129].mxu1  ;;  %v4864_v60 = vld [vmem:[%s7649_s25 + $0x68] sm:$0xff]  }
 0x213   : > { %v4058_v45 = vadd.f32 %v5373_v4, %v7692_v24  ;;  %v4049_v32 = vpop.f32.mrb[129].mxu0  ;;  %v5293_v53 = vadd.f32 %v5292_v27, %v5291_v36  ;;  %v5294_v5 = vpop.f32.mrb[130].mxu1  ;;  %v4863_v36 = vld [vmem:[%s7649_s25 + $0x60] sm:$0xff]  }
 0x214   : > { %v4050_v40 = vadd.f32 %v4049_v32, %v7676_v14  ;;  %v5374_v30 = vpop.f32.mrb[130].mxu0  ;;  %v5295_v15 = vpop.f32.mrb[131].mxu1 }
 0x215   : > { %v4194_v61 = vadd.f32 %v4826_v59, %v4058_v45  ;;  %v4061_v12 = vadd.f32 %v5374_v30, %v7696_v39  ;;  %v4052_v44 = vpop.f32.mrb[131].mxu0  ;;  %v5296_v41 = vadd.f32 %v5295_v15, %v5294_v5  ;;  %v3921_v14 = vadd.f32 %v5293_v53, %v7613_v55 }
 0x216   : > { %v4192_v24 = vadd.f32 %v4822_v43, %v4050_v40  ;;  %v4053_v21 = vadd.f32 %v4052_v44, %v7680_v47  ;;  %v4830_v47 = vunpack.c.l.bf16 %v4861_v0  ;;  %v4842_v43 = vunpack.c.l.bf16 %v4864_v60  ;;  %v4865_v0 = vld [vmem:[%s7649_s25 + $0x70] sm:$0xff]  }
 0x217   : > { %v4226_v11 = vmax.f32 %v4194_v61, 0.0  ;;  %v4195_v46 = vadd.f32 %v4827_v23, %v4061_v12  ;;  %v3924_v16 = vadd.f32 %v5296_v41, %v7619_v62  ;;  %v4843_v53 = vunpack.c.h.bf16 %v4864_v60 }
 0x218   : > { %v4224_v35 = vmax.f32 %v4192_v24, 0.0  ;;  %v4193_v51 = vadd.f32 %v4823_v52, %v4053_v21  ;;  %v4839_v52 = vunpack.c.h.bf16 %v4863_v36 }
 0x219   : > { %4258 = vst [vmem:[%s7672_s28 + $0x90] sm:$0xff] %v4226_v11  ;;  %v4227_v39 = vmax.f32 %v4195_v46, 0.0 }
 0x21a   : > { %4256 = vst [vmem:[%s7672_s28 + $0x80] sm:$0xff] %v4224_v35  ;;  %v4225_v37 = vmax.f32 %v4193_v51, 0.0 }
 0x21b   : > { %4259 = vst [vmem:[%s7672_s28 + $0x98] sm:$0xff] %v4227_v39  ;;  %v5297_v2 = vpop.f32.mrb[132].mxu1 }
 0x21c   : > { %4257 = vst [vmem:[%s7672_s28 + $0x88] sm:$0xff] %v4225_v37  ;;  %v5377_v42 = vpop.f32.mrb[132].mxu0  ;;  %v5298_v55 = vpop.f32.mrb[133].mxu1 }
 0x21d   : > { %v4074_v49 = vadd.f32 %v5377_v42, %v3913_v29  ;;  %v4065_v34 = vpop.f32.mrb[133].mxu0  ;;  %v5299_v25 = vadd.f32 %v5298_v55, %v5297_v2  ;;  %v5300_v62 = vpop.f32.mrb[134].mxu1  ;;  %v4866_v42 = vld [vmem:[%s7649_s25 + $0x78] sm:$0xff]  }
 0x21e   : > { %v4066_v20 = vadd.f32 %v4065_v34, %v7708_v10  ;;  %v5378_v7 = vpop.f32.mrb[134].mxu0  ;;  %v5301_v13 = vpop.f32.mrb[135].mxu1 }
 0x21f   : > { %v4198_v50 = vadd.f32 %v4834_v9, %v4074_v49  ;;  %v4077_v1 = vadd.f32 %v5378_v7, %v3916_v56  ;;  %v4068_v17 = vpop.f32.mrb[135].mxu0  ;;  %v5302_v29 = vadd.f32 %v5301_v13, %v5300_v62  ;;  %v3929_v19 = vadd.f32 %v5299_v25, %v7625_v57 }
 0x220   : > { %v4196_v18 = vadd.f32 %v4830_v47, %v4066_v20  ;;  %v4069_v33 = vadd.f32 %v4068_v17, %v7712_v6  ;;  %v4838_v6 = vunpack.c.l.bf16 %v4863_v36  ;;  %v4847_v25 = vunpack.c.h.bf16 %v4865_v0 }
 0x221   : > { %v4230_v10 = vmax.f32 %v4198_v50, 0.0  ;;  %v4199_v28 = vadd.f32 %v4835_v8, %v4077_v1  ;;  %v3932_v59 = vadd.f32 %v5302_v29, %v7631_v54  ;;  %v4851_v13 = vunpack.c.h.bf16 %v4866_v42 }
 0x222   : > { %v4228_v48 = vmax.f32 %v4196_v18, 0.0  ;;  %v4197_v22 = vadd.f32 %v4831_v58, %v4069_v33 }
 0x223   : > { %4262 = vst [vmem:[%s7672_s28 + $0xb0] sm:$0xff] %v4230_v10  ;;  %v4231_v56 = vmax.f32 %v4199_v28, 0.0 }
 0x224   : > { %4260 = vst [vmem:[%s7672_s28 + $0xa0] sm:$0xff] %v4228_v48  ;;  %v4229_v4 = vmax.f32 %v4197_v22, 0.0 }
 0x225   : > { %4263 = vst [vmem:[%s7672_s28 + $0xb8] sm:$0xff] %v4231_v56  ;;  %v5303_v45 = vpop.f32.mrb[136].mxu1 }
 0x226   : > { %4261 = vst [vmem:[%s7672_s28 + $0xa8] sm:$0xff] %v4229_v4  ;;  %v5381_v27 = vpop.f32.mrb[136].mxu0  ;;  %v5304_v57 = vpop.f32.mrb[137].mxu1 }
 0x227   : > { %v4090_v32 = vadd.f32 %v5381_v27, %v3929_v19  ;;  %v4081_v23 = vpop.f32.mrb[137].mxu0  ;;  %v5305_v40 = vadd.f32 %v5304_v57, %v5303_v45  ;;  %v5306_v30 = vpop.f32.mrb[138].mxu1 }
 0x228   : > { %v4082_v5 = vadd.f32 %v4081_v23, %v3921_v14  ;;  %v5382_v54 = vpop.f32.mrb[138].mxu0  ;;  %v5307_v15 = vpop.f32.mrb[139].mxu1 }
 0x229   : > { %v4202_v61 = vadd.f32 %v4842_v43, %v4090_v32  ;;  %v4093_v12 = vadd.f32 %v5382_v54, %v3932_v59  ;;  %v4084_v44 = vpop.f32.mrb[139].mxu0  ;;  %v5308_v41 = vadd.f32 %v5307_v15, %v5306_v30  ;;  %v3937_v11 = vadd.f32 %v5305_v40, %v7640_v38 }
 0x22a   : > { %v4200_v24 = vadd.f32 %v4838_v6, %v4082_v5  ;;  %v4085_v21 = vadd.f32 %v4084_v44, %v3924_v16  ;;  %v4846_v16 = vunpack.c.l.bf16 %v4865_v0 }
 0x22b   : > { %v4234_v46 = vmax.f32 %v4202_v61, 0.0  ;;  %v4203_v14 = vadd.f32 %v4843_v53, %v4093_v12  ;;  %v3940_v63 = vadd.f32 %v5308_v41, %v7643_v31  ;;  %v4850_v31 = vunpack.c.l.bf16 %v4866_v42 }
 0x22c   : > { %v4232_v35 = vmax.f32 %v4200_v24, 0.0  ;;  %v4201_v51 = vadd.f32 %v4839_v52, %v4085_v21 }
 0x22d   : > { %4266 = vst [vmem:[%s7672_s28 + $0xd0] sm:$0xff] %v4234_v46  ;;  %v4235_v39 = vmax.f32 %v4203_v14, 0.0 }
 0x22e   : > { %4264 = vst [vmem:[%s7672_s28 + $0xc0] sm:$0xff] %v4232_v35  ;;  %v4233_v37 = vmax.f32 %v4201_v51, 0.0 }
 0x22f   : > { %4267 = vst [vmem:[%s7672_s28 + $0xd8] sm:$0xff] %v4235_v39  ;;  %v5309_v9 = vpop.f32.mrb[140].mxu1 }
 0x230   : > { %4265 = vst [vmem:[%s7672_s28 + $0xc8] sm:$0xff] %v4233_v37  ;;  %v5385_v2 = vpop.f32.mrb[140].mxu0  ;;  %v5310_v47 = vpop.f32.mrb[141].mxu1 }
 0x231   : > { %v4097_v49 = vpop.f32.mrb[141].mxu0  ;;  %v5311_v38 = vadd.f32 %v5310_v47, %v5309_v9  ;;  %v5312_v34 = vpop.f32.mrb[142].mxu1 }
 0x232   : > { %v4098_v55 = vadd.f32 %v4097_v49, %v3937_v11  ;;  %v5386_v8 = vpop.f32.mrb[142].mxu0  ;;  %v5313_v20 = vpop.f32.mrb[143].mxu1 }
 0x233   : > { %v4100_v62 = vpop.f32.mrb[143].mxu0  ;;  %v3945_v7 = vadd.f32 %v5311_v38, %v7655_v3  ;;  %v5314_v50 = vadd.f32 %v5313_v20, %v5312_v34 }
 0x234   : > { %v4204_v58 = vadd.f32 %v4846_v16, %v4098_v55  ;;  %v4101_v1 = vadd.f32 %v4100_v62, %v3940_v63 }
 0x235   : > { %v4106_v17 = vadd.f32 %v5385_v2, %v3945_v7  ;;  %v3948_v29 = vadd.f32 %v5314_v50, %v7663_v26 }
 0x236   : > { %v4236_v18 = vmax.f32 %v4204_v58, 0.0  ;;  %v4205_v33 = vadd.f32 %v4847_v25, %v4101_v1 }
 0x237   : > { %v4206_v19 = vadd.f32 %v4850_v31, %v4106_v17  ;;  %v4109_v10 = vadd.f32 %v5386_v8, %v3948_v29 }
 0x238   : > { %4268 = vst [vmem:[%s7672_s28 + $0xe0] sm:$0xff] %v4236_v18  ;;  %v4237_v28 = vmax.f32 %v4205_v33, 0.0 }
 0x239   : > { %v4238_v48 = vmax.f32 %v4206_v19, 0.0  ;;  %v4207_v22 = vadd.f32 %v4851_v13, %v4109_v10 }
 0x23a   : > { %4269 = vst [vmem:[%s7672_s28 + $0xe8] sm:$0xff] %v4237_v28 }
 0x23b   : > { %4270 = vst [vmem:[%s7672_s28 + $0xf0] sm:$0xff] %v4238_v48  ;;  %v4239_v3 = vmax.f32 %v4207_v22, 0.0 }
 0x23d   : > { %4271 = vst [vmem:[%s7672_s28 + $0xf8] sm:$0xff] %v4239_v3 }
 0x23e PF: > { %s14_s17 = sadd.s32 1, %s5578_s17   ;;  %s7803_s15 = smov %s5574_s16 }
 0x23f   : > { %p11_p5 = scmp.ge.s32.totalorder %s14_s17, 4   ;;  %s7804_s16 = smov %s7806_s18 }
 0x241   :  { %13 = sbr.rel (!%p11_p5) target bundleno = 2 (0x2), region = 72 }

// kernel: _lambda_.2
= control target key start
LH: loop header
LB: loop body
LE: loop exit
PB: predicated region body
PF: predicated region fallthrough
CT: control target
= control target key end

     0   :  { %s5628_s12 = smov 0   ;;  %s5630_s13 = smov 0   ;;  %s7755_s0 = inlined_call_operand.vmem [shape: bf16[2,18,24,128], index: 0, kind: input, shape index: {}]   ;;  %s7756_s1 = inlined_call_operand.vmem [shape: bf16[1152,128], index: 1, kind: input, shape index: {}]   ;;  %s7757_s2 = inlined_call_operand.vmem [shape: f32[1,128], index: 2, kind: input, shape index: {}]   ;;  %s7758_s3 = inlined_call_operand.vmem [shape: bf16[2,256,128], index: 3, kind: output, shape index: {}]  }
   0x1   :  { %s5632_s14 = smov 0  }
   0x2 LB: > { %s25_s15 = sadd.s32 1, %s5602_s13  ;;  %p4336_p0 = scmp.ge.s32.totalorder %s5606_s14, 1  ;;  %s5606_s14 = sphi %s5632_s14, %s13_s14   ;;  %s5602_s13 = sphi %s5630_s13, %s7782_s13   ;;  %s5598_s12 = sphi %s5628_s12, %s7781_s12  }
   0x3   : > { %p27_p1 = scmp.ge.s32.totalorder %s25_s15, 2  ;;  %p151_p2 = scmp.lt.s32.totalorder %s5606_s14, 3 }
   0x5   : > { %s7784_s15 = smov (%p27_p1, %s25_s15), 0  ;;  %p152_p3 = pnand %p4336_p0, %p151_p2 }
   0x7   : > { %155 = sbr.rel (%p152_p3) target bundleno = 574 (0x23e), region = 32 }
   0xe   : > { %v5456_v0 = vld [vmem:[%s7756_s1 + $0x40] sm:$0xff]   ;;  %p179_p4 = scmp.lt.s32.totalorder %s5598_s12, 1  ;;  %v5458_v2 = vld [vmem:[%s7756_s1 + $0x48] sm:$0xff]   ;;  %v5460_v4 = vld [vmem:[%s7756_s1 + $0x50] sm:$0xff]   ;;  %vm247_vm0 = vsmask.f32 3328 }
   0xf   : > { %v5457_v1 = vld [vmem:[%s7756_s1] sm:$0xff]   ;;  %4895 = vmatprep.subr.bf16.mxu0 %v5456_v0  ;;  %5415 = vmatprep.subr.bf16.mxu1 %v5456_v0  ;;  %v5459_v3 = vld [vmem:[%s7756_s1 + $0x8] sm:$0xff]   ;;  %v5461_v5 = vld [vmem:[%s7756_s1 + $0x10] sm:$0xff]   ;;  %vm248_vm1 = vsmask.f32 7440  ;;  %vm698_vm3 = vcmask 1042432  }
  0x10   : > { %4896 = vmatpush3.bf16.msra.mxu0 %v5457_v1  ;;  %5423 = vmatpush3.bf16.msra.mxu1 %v5457_v1  ;;  %s7786_s12 = smov (!%p179_p4, %s5598_s12), 1  ;;  %v5462_v6 = vld [vmem:[%s7756_s1 + $0x58] sm:$0xff]   ;;  %v5464_v8 = vld [vmem:[%s7756_s1 + $0x60] sm:$0xff]   ;;  %v5466_v10 = vld [vmem:[%s7756_s1 + $0x68] sm:$0xff]   ;;  %vm699_vm4 = vcmask 1046532  }
  0x11   : > { %4897 = vmatprep.subr.bf16.mxu0 %v5458_v2  ;;  %5416 = vmatprep.subr.bf16.mxu1 %v5458_v2  ;;  %s5431_s30 = smul.u32 216, %s7786_s12  ;;  %v5463_v7 = vld [vmem:[%s7756_s1 + $0x18] sm:$0xff]   ;;  %v5465_v9 = vld [vmem:[%s7756_s1 + $0x20] sm:$0xff]   ;;  %v5467_v20 = vld [vmem:[%s7756_s1 + $0x28] sm:$0xff]   ;;  %s4767_s7 = sshll.u32 %s7786_s12, 7 }
  0x12   : > { %v5468_v25 = vld [vmem:[%s7756_s1 + $0x70] sm:$0xff]   ;;  %vm5721_vm2 = vmor %vm247_vm0, %vm248_vm1  ;;  %v5470_v42 = vld [vmem:[%s7756_s1 + $0x78] sm:$0xff]   ;;  %s7691_s11 = scalar_lea.vmem %s7758_s3, %s4767_s7 }
  0x13   : > { %s5679_s10 = scalar_lea.vmem %s7755_s0, %s5431_s30  ;;  %v5469_v38 = vld [vmem:[%s7756_s1 + $0x30] sm:$0xff]   ;;  %v5471_v45 = vld [vmem:[%s7756_s1 + $0x38] sm:$0xff]   ;;  %v5474_v55 = vld [vmem:[%s7756_s1 + $0xc0] sm:$0xff]  }
  0x14   : > { %4898 = vmatpush3.bf16.msra.mxu0 %v5459_v3  ;;  %5424 = vmatpush3.bf16.msra.mxu1 %v5459_v3  ;;  %v5688_v11 = vld [vmem:[%s5679_s10] sm:$0xf]  ;;  %v5691_v12 = vld [vmem:[%s5679_s10 + $0x4] sm:$0xf]  ;;  %v5694_v13 = vld [vmem:[%s5679_s10 + $0x8] sm:$0x1] }
  0x15   : > { %4899 = vmatprep.subr.bf16.mxu0 %v5460_v4  ;;  %5417 = vmatprep.subr.bf16.mxu1 %v5460_v4  ;;  %v251_v14 = vshrl.u32 %v5688_v11, 16  ;;  %v254_v15 = vshll.u32 %v5688_v11, 16  ;;  %v260_v16 = vshll.u32 %v5691_v12, 16  ;;  %v264_v17 = vshrl.u32 %v5691_v12, 16  ;;  %v5702_v19 = vld [vmem:[%s5679_s10 + $0x90] sm:$0xf]  ;;  %vm5915_vm5 = vmor %vm698_vm3, %vm699_vm4 }
  0x16   : > { %v270_v18 = vshll.u32 %v5694_v13, 16  ;;  %v5708_v23 = vld [vmem:[%s5679_s10 + $0x94] sm:$0xf]  ;;  %v539_v24 = vshrl.u32 %v5702_v19, 16  ;;  %v5715_v29 = vld [vmem:[%s5679_s10 + $0x98] sm:$0x1]  ;;  %v4516_v57 = vcombine.low %v5688_v11, %v5691_v12 }
  0x17   : > { %v253_v21 = vrot.slane %v251_v14, 4  ;;  %v256_v22 = vrot.slane %v254_v15, 5  ;;  %v262_v26 = vrot.slane %v260_v16, 5  ;;  %v266_v27 = vrot.slane %v264_v17, 4  ;;  %v5477_v58 = vld [vmem:[%s7756_s1 + $0x140] sm:$0xff]   ;;  %v5476_v4 = vld [vmem:[%s7756_s1 + $0xc8] sm:$0xff]  }
  0x18   : > { %4900 = vmatpush3.bf16.msra.mxu0 %v5461_v5  ;;  %5425 = vmatpush3.bf16.msra.mxu1 %v5461_v5  ;;  %v272_v28 = vrot.slane %v270_v18, 5  ;;  %v541_v31 = vrot.slane %v539_v24, 4  ;;  %v542_v32 = vshll.u32 %v5702_v19, 16  ;;  %v548_v33 = vshll.u32 %v5708_v23, 16  ;;  %v5751_v59 = vld [vmem:[%s5679_s10 + $0xc] sm:$0xf] }
  0x19   : > { %4901 = vmatprep.subr.bf16.mxu0 %v5462_v6  ;;  %5418 = vmatprep.subr.bf16.mxu1 %v5462_v6  ;;  %v257_v30 = vor.u32 %v256_v22, %v253_v21  ;;  %v267_v35 = vor.u32 %v266_v27, %v262_v26  ;;  %v552_v36 = vshrl.u32 %v5708_v23, 16  ;;  %v558_v37 = vshll.u32 %v5715_v29, 16  ;;  %v5475_v62 = vld [vmem:[%s7756_s1 + $0x80] sm:$0xff]   ;;  %v5761_v63 = vld [vmem:[%s5679_s10 + $0x10] sm:$0xf]  ;;  %v5478_v21 = vld [vmem:[%s7756_s1 + $0x88] sm:$0xff]  }
  0x1a   : > { %v544_v40 = vrot.slane %v542_v32, 5  ;;  %v550_v41 = vrot.slane %v548_v33, 5  ;;  %v703_v47 = vrot.slane %v5691_v12, 5  ;;  %v706_v50 = vrot.slane %v5694_v13, 5  ;;  %v5764_v0 = vld [vmem:[%s5679_s10 + $0x14] sm:$0x1] }
  0x1b   : > { %v258_v39 = vrot.slane %v257_v30, 4  ;;  %v268_v43 = vrot.slane %v267_v35, 4  ;;  %v554_v44 = vrot.slane %v552_v36, 4  ;;  %v560_v52 = vrot.slane %v558_v37, 5  ;;  %v5479_v5 = vld [vmem:[%s7756_s1 + $0x100] sm:$0xff]  }
  0x1c   : > { %4902 = vmatpush3.bf16.msra.mxu0 %v5463_v7  ;;  %5426 = vmatpush3.bf16.msra.mxu1 %v5463_v7  ;;  %v545_v48 = vor.u32 %v544_v40, %v541_v31  ;;  %v4528_v61 = vcombine.low %v5702_v19, %v5708_v23  ;;  %v275_v1 = vshrl.u32 %v5751_v59, 16  ;;  %v278_v2 = vshll.u32 %v5751_v59, 16  ;;  %v5783_v15 = vld [vmem:[%s5679_s10 + $0xa0] sm:$0xf]  ;;  %v244_v16 = vld [vmem:[%s5679_s10 + $0xa4] sm:$0x1] }
  0x1d   : > { %4903 = vmatprep.subr.bf16.mxu0 %v5464_v8  ;;  %5419 = vmatprep.subr.bf16.mxu1 %v5464_v8  ;;  %v263_v46 = vsel %vm5721_vm2, %v258_v39, %v262_v26  ;;  %v273_v49 = vsel %vm5721_vm2, %v268_v43, %v272_v28  ;;  %v555_v51 = vor.u32 %v554_v44, %v550_v41  ;;  %v284_v6 = vshll.u32 %v5761_v63, 16  ;;  %v5483_v43 = vld [vmem:[%s7756_s1 + $0x90] sm:$0xff]   ;;  %v5808_v44 = vld [vmem:[%s5679_s10 + $0x18] sm:$0xf] }
  0x1e   : > { %v4532_v53 = vcombine.low %v263_v46, %v273_v49  ;;  %v546_v54 = vrot.slane %v545_v48, 4  ;;  %v288_v7 = vshrl.u32 %v5761_v63, 16  ;;  %v294_v8 = vshll.u32 %v5764_v0, 16  ;;  %v5815_v48 = vld [vmem:[%s5679_s10 + $0x1c] sm:$0xf] }
  0x1f   : > { %v556_v56 = vrot.slane %v555_v51, 4  ;;  %v277_v11 = vrot.slane %v275_v1, 4  ;;  %v280_v14 = vrot.slane %v278_v2, 5  ;;  %v286_v17 = vrot.slane %v284_v6, 5  ;;  %v5818_v49 = vld [vmem:[%s5679_s10 + $0x20] sm:$0x1] }
  0x20   : > { %4904 = vmatpush3.bf16.msra.mxu0 %v5465_v9  ;;  %5427 = vmatpush3.bf16.msra.mxu1 %v5465_v9  ;;  %v551_v60 = vsel %vm5721_vm2, %v546_v54, %v550_v41  ;;  %v5780_v9 = vld [vmem:[%s5679_s10 + $0x9c] sm:$0xf]  ;;  %v290_v18 = vrot.slane %v288_v7, 4  ;;  %v296_v19 = vrot.slane %v294_v8, 5  ;;  %v572_v24 = vshll.u32 %v5783_v15, 16 }
  0x21   : > { %4905 = vmatprep.subr.bf16.mxu0 %v5466_v10  ;;  %5420 = vmatprep.subr.bf16.mxu1 %v5466_v10  ;;  %v561_v3 = vsel %vm5721_vm2, %v556_v56, %v560_v52  ;;  %v281_v22 = vor.u32 %v280_v14, %v277_v11  ;;  %v566_v23 = vshll.u32 %v5780_v9, 16  ;;  %v582_v28 = vshll.u32 %v244_v16, 16  ;;  %v5484_v56 = vld [vmem:[%s7756_s1 + $0xd8] sm:$0xff]   ;;  %v5832_v1 = vld [vmem:[%s5679_s10 + $0xac] sm:$0xf]  ;;  %v5488_v11 = vld [vmem:[%s7756_s1 + $0xe0] sm:$0xff]  }
  0x22   : > { %3276 = vmatprep.mubr.bf16.mxu0 %v4532_v53  ;;  %v4544_v10 = vcombine.low %v551_v60, %v561_v3  ;;  %v291_v26 = vor.u32 %v290_v18, %v286_v17  ;;  %v574_v32 = vrot.slane %v572_v24, 5  ;;  %v5795_v35 = vrot.slane %v703_v47, 4  ;;  %v245_v6 = vld [vmem:[%s5679_s10 + $0xb0] sm:$0x1]  ;;  %v5947_v13 = vld [vmem:[%s5679_s10 + $0x34] sm:$0xf] }
  0x23   : > { %v282_v30 = vrot.slane %v281_v22, 4  ;;  %v568_v31 = vrot.slane %v566_v23, 5  ;;  %v584_v37 = vrot.slane %v582_v28, 5  ;;  %v4529_v46 = vcombine.low %v5780_v9, %v5783_v15  ;;  %v5489_v22 = vld [vmem:[%s7756_s1 + $0x148] sm:$0xff]  }
  0x24   : > { %4906 = vmatpush3.bf16.msra.mxu0 %v5467_v20  ;;  %5428 = vmatpush3.bf16.msra.mxu1 %v5467_v20  ;;  %v563_v20 = vshrl.u32 %v5780_v9, 16  ;;  %v292_v36 = vrot.slane %v291_v26, 4  ;;  %v299_v51 = vshrl.u32 %v5808_v44, 16  ;;  %v302_v52 = vshll.u32 %v5808_v44, 16  ;;  %v5491_v26 = vld [vmem:[%s7756_s1 + $0x108] sm:$0xff]  }
  0x25   : > { %4907 = vmatprep.subr.bf16.mxu0 %v5468_v25  ;;  %5421 = vmatprep.subr.bf16.mxu1 %v5468_v25  ;;  %v576_v25 = vshrl.u32 %v5783_v15, 16  ;;  %v287_v39 = vsel %vm5721_vm2, %v282_v30, %v286_v17  ;;  %v596_v16 = vshll.u32 %v5832_v1, 16  ;;  %v600_v17 = vshrl.u32 %v5832_v1, 16 }
  0x26   : > { %3372 = vmatprep.mubr.bf16.mxu1 %v4544_v10  ;;  %v565_v27 = vrot.slane %v563_v20, 4  ;;  %v304_v60 = vrot.slane %v302_v52, 5  ;;  %v5881_v52 = vld [vmem:[%s5679_s10 + $0x2c] sm:$0x1] }
  0x27   : > { %v578_v33 = vrot.slane %v576_v25, 4  ;;  %v598_v24 = vrot.slane %v596_v16, 5  ;;  %v602_v25 = vrot.slane %v600_v17, 4  ;;  %v5497_v17 = vld [vmem:[%s7756_s1 + $0xb0] sm:$0xff]  }
  0x28   : > { %4908 = vmatpush3.bf16.msra.mxu0 %v5469_v38  ;;  %5429 = vmatpush3.bf16.msra.mxu1 %v5469_v38  ;;  %v5482_v38 = vld [vmem:[%s7756_s1 + $0xd0] sm:$0xff]   ;;  %v569_v40 = vor.u32 %v568_v31, %v565_v27  ;;  %v640_v27 = vld [vmem:[%s5679_s10 + $0x48] sm:$0xe] }
  0x29   : > { %4909 = vmatprep.subr.bf16.mxu0 %v5470_v42  ;;  %5422 = vmatprep.subr.bf16.mxu1 %v5470_v42  ;;  %v579_v41 = vor.u32 %v578_v33, %v574_v32  ;;  %v4517_v42 = vcombine.low %v5751_v59, %v5761_v63  ;;  %v301_v59 = vrot.slane %v299_v51, 4  ;;  %v5875_v51 = vld [vmem:[%s5679_s10 + $0x28] sm:$0xf] }
  0x2a   : > { %v570_v54 = vrot.slane %v569_v40, 4  ;;  %v710_v40 = vrot.slane %v5761_v63, 5 }
  0x2b   : > { %v305_v9 = vor.u32 %v304_v60, %v301_v59  ;;  %v342_v59 = vshll.u32 %v5881_v52, 16  ;;  %v5893_v60 = vld [vmem:[%s5679_s10 + $0xb4] sm:$0xf] }
  0x2c   : > { %4910 = vmatpush3.bf16.msra.mxu0 %v5471_v45  ;;  %5430 = vmatpush3.bf16.msra.mxu1 %v5471_v45  ;;  %v297_v45 = vsel %vm5721_vm2, %v292_v36, %v296_v19  ;;  %v575_v2 = vsel %vm5721_vm2, %v570_v54, %v574_v32  ;;  %v603_v32 = vor.u32 %v602_v25, %v598_v24  ;;  %v5490_v36 = vld [vmem:[%s7756_s1 + $0xa0] sm:$0xff]  }
  0x2d   : > { %5007 = vmatprep.subr.bf16.mxu1 %v5474_v55  ;;  %5119 = vmatprep.subr.bf16.mxu0 %v5477_v58  ;;  %v4533_v53 = vcombine.low %v287_v39, %v297_v45  ;;  %v580_v55 = vrot.slane %v579_v41, 4  ;;  %v5827_v58 = vld [vmem:[%s5679_s10 + $0xa8] sm:$0xf]  ;;  %v306_v18 = vrot.slane %v305_v9, 4  ;;  %v611_v9 = vshrl.u32 %v5893_v60, 16 }
  0x2e   : > { %v587_v7 = vshrl.u32 %v5827_v58, 16  ;;  %v590_v15 = vshll.u32 %v5827_v58, 16  ;;  %v5492_v39 = vld [vmem:[%s7756_s1 + $0xe8] sm:$0xff]   ;;  %v4530_v45 = vcombine.low %v5827_v58, %v5832_v1 }
  0x2f   : > { %3277 = vmatmul.mubr.bf16.vlgmr.msra.gmra.mrb[0].mxu0 %v4516_v57  ;;  %3373 = vmatmul.mubr.bf16.vlgmr.msra.gmra.mrb[0].mxu1 %v4528_v61  ;;  %v308_v57 = vshll.u32 %v5815_v48, 16  ;;  %v312_v61 = vshrl.u32 %v5815_v48, 16  ;;  %v585_v3 = vsel %vm5721_vm2, %v580_v55, %v584_v37  ;;  %v332_v55 = vshll.u32 %v5875_v51, 16 }
  0x30   : > { %5008 = vmatpush3.bf16.msra.mxu1 %v5475_v62  ;;  %5120 = vmatpush3.bf16.msra.mxu0 %v5479_v5  ;;  %v318_v62 = vshll.u32 %v5818_v49, 16  ;;  %v4545_v8 = vcombine.low %v575_v2, %v585_v3  ;;  %v589_v14 = vrot.slane %v587_v7, 4  ;;  %v592_v23 = vrot.slane %v590_v15, 5 }
  0x31   : > { %5009 = vmatprep.subr.bf16.mxu1 %v5476_v4  ;;  %3284 = vmatprep.mubr.bf16.mxu0 %v4533_v53  ;;  %v5485_v4 = vld [vmem:[%s7756_s1 + $0x98] sm:$0xff]   ;;  %v310_v5 = vrot.slane %v308_v57, 5  ;;  %v314_v10 = vrot.slane %v312_v61, 4 }
  0x32   : > { %3380 = vmatprep.mubr.bf16.mxu1 %v4545_v8  ;;  %v320_v20 = vrot.slane %v318_v62, 5  ;;  %5121 = vmatprep.subr.bf16.mxu0 %v5489_v22  ;;  %v593_v31 = vor.u32 %v592_v23, %v589_v14  ;;  %v5896_v61 = vld [vmem:[%s5679_s10 + $0xb8] sm:$0xf]  ;;  %v713_v62 = vrot.slane %v5764_v0, 5  ;;  %v344_v8 = vrot.slane %v342_v59, 5 }
  0x33   : > { %v315_v19 = vor.u32 %v314_v10, %v310_v5  ;;  %v311_v28 = vsel %vm5721_vm2, %v306_v18, %v310_v5  ;;  %v246_v5 = vld [vmem:[%s5679_s10 + $0xbc] sm:$0x1]  ;;  %v614_v10 = vshll.u32 %v5893_v60, 16  ;;  %v620_v14 = vshll.u32 %v5896_v61, 16 }
  0x34   : > { %5010 = vmatpush3.bf16.msra.mxu1 %v5478_v21  ;;  %v606_v21 = vshll.u32 %v245_v6, 16  ;;  %5122 = vmatpush3.bf16.msra.mxu0 %v5491_v26  ;;  %v5496_v6 = vld [vmem:[%s7756_s1 + $0xf0] sm:$0xff]   ;;  %v624_v15 = vshrl.u32 %v5896_v61, 16  ;;  %v630_v16 = vshll.u32 %v246_v5, 16 }
  0x35   : > { %5011 = vmatprep.subr.bf16.mxu1 %v5482_v38  ;;  %v316_v30 = vrot.slane %v315_v19, 4  ;;  %v4518_v38 = vcombine.low %v5808_v44, %v5815_v48  ;;  %v5493_v44 = vld [vmem:[%s7756_s1 + $0xa8] sm:$0xff]   ;;  %v613_v19 = vrot.slane %v611_v9, 4 }
  0x36   : > { %v608_v33 = vrot.slane %v606_v21, 5  ;;  %v5498_v21 = vld [vmem:[%s7756_s1 + $0xf8] sm:$0xff]   ;;  %v626_v25 = vrot.slane %v624_v15, 4  ;;  %v632_v26 = vrot.slane %v630_v16, 5 }
  0x37   : > { %3285 = vmatmul.mubr.bf16.gmra.mrb[4].mxu0 %v4517_v42  ;;  %3381 = vmatmul.mubr.bf16.gmra.mrb[4].mxu1 %v4529_v46  ;;  %v321_v37 = vsel %vm5721_vm2, %v316_v30, %v320_v20  ;;  %v594_v42 = vrot.slane %v593_v31, 4  ;;  %v5872_v46 = vld [vmem:[%s5679_s10 + $0x24] sm:$0xf]  ;;  %v616_v20 = vrot.slane %v614_v10, 5  ;;  %v5499_v31 = vld [vmem:[%s7756_s1 + $0x150] sm:$0xff]  }
  0x38   : > { %5012 = vmatpush3.bf16.msra.mxu1 %v5483_v43  ;;  %v4534_v41 = vcombine.low %v311_v28, %v321_v37  ;;  %v604_v43 = vrot.slane %v603_v32, 4  ;;  %v323_v53 = vshrl.u32 %v5872_v46, 16  ;;  %v326_v54 = vshll.u32 %v5872_v46, 16  ;;  %5123 = vmatprep.subr.bf16.mxu0 %v5499_v31 }
  0x39   : > { %5013 = vmatprep.subr.bf16.mxu1 %v5484_v56  ;;  %v336_v56 = vshrl.u32 %v5875_v51, 16  ;;  %v599_v57 = vsel %vm5721_vm2, %v594_v42, %v598_v24  ;;  %v622_v24 = vrot.slane %v620_v14, 5  ;;  %v617_v30 = vor.u32 %v616_v20, %v613_v19 }
  0x3a   : > { %3292 = vmatprep.mubr.bf16.mxu0 %v4534_v41  ;;  %v609_v58 = vsel %vm5721_vm2, %v604_v43, %v608_v33  ;;  %v325_v2 = vrot.slane %v323_v53, 4  ;;  %v328_v3 = vrot.slane %v326_v54, 5  ;;  %v5936_v41 = vsel %vm5915_vm5, %v5795_v35, %v706_v50  ;;  %v5952_v35 = vld [vmem:[%s5679_s10 + $0x38] sm:$0x1] }
  0x3b   : > { %v4546_v1 = vcombine.low %v599_v57, %v609_v58  ;;  %v338_v7 = vrot.slane %v336_v56, 4  ;;  %v627_v33 = vor.u32 %v626_v25, %v622_v24  ;;  %v618_v37 = vrot.slane %v617_v30, 4  ;;  %v5504_v56 = vld [vmem:[%s7756_s1 + $0x1c0] sm:$0xff]  }
  0x3c   : > { %5014 = vmatpush3.bf16.msra.mxu1 %v5485_v4  ;;  %v334_v4 = vrot.slane %v332_v55, 5  ;;  %v356_v55 = vshll.u32 %v5947_v13, 16  ;;  %v360_v58 = vshrl.u32 %v5947_v13, 16  ;;  %v366_v59 = vshll.u32 %v5952_v35, 16 }
  0x3d   : > { %5015 = vmatprep.subr.bf16.mxu1 %v5488_v11  ;;  %3388 = vmatprep.mubr.bf16.mxu1 %v4546_v1  ;;  %v329_v11 = vor.u32 %v328_v3, %v325_v2  ;;  %v628_v43 = vrot.slane %v627_v33, 4  ;;  %v623_v50 = vsel %vm5721_vm2, %v618_v37, %v622_v24  ;;  %v5989_v33 = vld [vmem:[%s5679_s10 + $0x40] sm:$0xf] }
  0x3e   : > { %v339_v18 = vor.u32 %v338_v7, %v334_v4  ;;  %v358_v5 = vrot.slane %v356_v55, 5  ;;  %v362_v7 = vrot.slane %v360_v58, 4  ;;  %v635_v55 = vld [vmem:[%s5679_s10 + $0xc] sm:$0xe] }
  0x3f   : > { %3293 = vmatmul.mubr.bf16.gmra.mrb[8].mxu0 %v4518_v38  ;;  %3389 = vmatmul.mubr.bf16.gmra.mrb[8].mxu1 %v4530_v45  ;;  %v330_v23 = vrot.slane %v329_v11, 4  ;;  %v4519_v38 = vcombine.low %v5872_v46, %v5875_v51  ;;  %v4531_v45 = vcombine.low %v5893_v60, %v5896_v61  ;;  %v5501_v46 = vld [vmem:[%s7756_s1 + $0x110] sm:$0xff]   ;;  %v633_v57 = vsel %vm5721_vm2, %v628_v43, %v632_v26  ;;  %v4356_v60 = vld [vmem:[%s5679_s10 + $0xc] sm:$0xf]  ;;  %v5980_v26 = vld [vmem:[%s5679_s10 + $0x3c] sm:$0xf] }
  0x40   : > { %5016 = vmatpush3.bf16.msra.mxu1 %v5490_v36  ;;  %v340_v28 = vrot.slane %v339_v18, 4  ;;  %5124 = vmatpush3.bf16.msra.mxu0 %v5501_v46  ;;  %v5966_v61 = vld [vmem:[%s5679_s10 + $0x10] sm:$0xf]  ;;  %v4547_v2 = vcombine.low %v623_v50, %v633_v57  ;;  %v866_v9 = vshrl.u32 %v4356_v60, 16  ;;  %v869_v10 = vshll.u32 %v4356_v60, 16 }
  0x41   : > { %5017 = vmatprep.subr.bf16.mxu1 %v5492_v39  ;;  %v335_v32 = vsel %vm5721_vm2, %v330_v23, %v334_v4  ;;  %v5500_v39 = vld [vmem:[%s7756_s1 + $0xb8] sm:$0xff]   ;;  %v875_v14 = vshll.u32 %v5966_v61, 16  ;;  %v879_v15 = vshrl.u32 %v5966_v61, 16  ;;  %v4564_v16 = vcombine.low %v4356_v60, %v5966_v61  ;;  %v5512_v60 = vld [vmem:[%s7756_s1 + $0x1c8] sm:$0xff]  }
  0x42   : > { %v345_v36 = vsel %vm5721_vm2, %v340_v28, %v344_v8  ;;  %v368_v8 = vrot.slane %v366_v59, 5  ;;  %3396 = vmatprep.mubr.bf16.mxu1 %v4547_v2  ;;  %v868_v18 = vrot.slane %v866_v9, 4  ;;  %v871_v19 = vrot.slane %v869_v10, 5  ;;  %v4358_v43 = vld [vmem:[%s5679_s10 + $0x18] sm:$0xf]  ;;  %v5513_v10 = vld [vmem:[%s7756_s1 + $0x188] sm:$0xff]  }
  0x43   : > { %v4535_v42 = vcombine.low %v335_v32, %v345_v36  ;;  %v5977_v24 = vrot.slane %v875_v14, 5  ;;  %v881_v25 = vrot.slane %v879_v15, 4  ;;  %v712_v28 = vrot.slane %v710_v40, 4  ;;  %v5992_v36 = vld [vmem:[%s5679_s10 + $0x44] sm:$0x1] }
  0x44   : > { %5018 = vmatpush3.bf16.msra.mxu1 %v5493_v44  ;;  %v5944_v44 = vld [vmem:[%s5679_s10 + $0x30] sm:$0xf]  ;;  %v872_v31 = vor.u32 %v871_v19, %v868_v18  ;;  %v371_v37 = vshrl.u32 %v5980_v26, 16  ;;  %v374_v12 = vshll.u32 %v5980_v26, 16  ;;  %v384_v59 = vshrl.u32 %v5989_v33, 16  ;;  %v5514_v18 = vld [vmem:[%s7756_s1 + $0x160] sm:$0xff]  }
  0x45   : > { %5019 = vmatprep.subr.bf16.mxu1 %v5496_v6  ;;  %v347_v53 = vshrl.u32 %v5944_v44, 16  ;;  %v350_v54 = vshll.u32 %v5944_v44, 16  ;;  %3300 = vmatprep.mubr.bf16.mxu0 %v4535_v42  ;;  %v4520_v1 = vcombine.low %v5944_v44, %v5947_v13  ;;  %v634_v6 = vld [vmem:[%s5679_s10] sm:$0xe] }
  0x46   : > { %v4340_v20 = vrot.slane %v634_v6, 9  ;;  %v6009_v50 = vrot.slane %v872_v31, 4  ;;  %v376_v58 = vrot.slane %v374_v12, 5 }
  0x47   : > { %3301 = vmatmul.mubr.bf16.gmra.mrb[12].mxu0 %v4519_v38  ;;  %v349_v3 = vrot.slane %v347_v53, 4  ;;  %v352_v4 = vrot.slane %v350_v54, 5  ;;  %3397 = vmatmul.mubr.bf16.gmra.mrb[12].mxu1 %v4531_v45  ;;  %v6002_v45 = vld [vmem:[%s5679_s10 + $0x1c] sm:$0xf]  ;;  %v5505_v53 = vld [vmem:[%s7756_s1 + $0x180] sm:$0xff]   ;;  %v373_v54 = vrot.slane %v371_v37, 4 }
  0x48   : > { %5020 = vmatpush3.bf16.msra.mxu1 %v5497_v17  ;;  %v363_v17 = vor.u32 %v362_v7, %v358_v5  ;;  %3437 = vmatprep.mubr.bf16.mxu1 %v4564_v16  ;;  %v704_v32 = vsel %vm5915_vm5, %v4340_v20, %v703_v47  ;;  %v5509_v47 = vld [vmem:[%s7756_s1 + $0x118] sm:$0xff]   ;;  %v386_v7 = vrot.slane %v384_v59, 4  ;;  %v4565_v9 = vcombine.low %v4358_v43, %v6002_v45 }
  0x49   : > { %5021 = vmatprep.subr.bf16.mxu1 %v5498_v21  ;;  %v353_v11 = vor.u32 %v352_v4, %v349_v3  ;;  %v5508_v21 = vld [vmem:[%s7756_s1 + $0x158] sm:$0xff]   ;;  %v4548_v42 = vcombine.low %v704_v32, %v5936_v41  ;;  %v380_v41 = vshll.u32 %v5989_v33, 16  ;;  %v390_v3 = vshll.u32 %v5992_v36, 16  ;;  %v4360_v32 = vld [vmem:[%s5679_s10 + $0x24] sm:$0xf] }
  0x4a   : > { %v364_v30 = vrot.slane %v363_v17, 4  ;;  %5125 = vmatprep.subr.bf16.mxu0 %v5508_v21  ;;  %v890_v4 = vshrl.u32 %v4358_v43, 16  ;;  %v377_v6 = vor.u32 %v376_v58, %v373_v54  ;;  %v4521_v16 = vcombine.low %v5980_v26, %v5989_v33  ;;  %v6038_v17 = vld [vmem:[%s5679_s10 + $0x48] sm:$0xf]  ;;  %v6048_v21 = vld [vmem:[%s5679_s10 + $0x4c] sm:$0xf] }
  0x4b   : > { %v354_v23 = vrot.slane %v353_v11, 4  ;;  %5126 = vmatpush3.bf16.msra.mxu0 %v5509_v47  ;;  %v382_v2 = vrot.slane %v380_v41, 5  ;;  %v392_v11 = vrot.slane %v390_v3, 5  ;;  %v714_v20 = vsel %vm5915_vm5, %v712_v28, %v713_v62 }
  0x4c   : > { %5022 = vmatpush3.bf16.msra.mxu1 %v5500_v39  ;;  %v882_v39 = vor.u32 %v881_v25, %v5977_v24  ;;  %v369_v46 = vsel %vm5721_vm2, %v364_v30, %v368_v8  ;;  %v6031_v14 = vrot.slane %v890_v4, 4  ;;  %v378_v44 = vrot.slane %v377_v6, 4  ;;  %5127 = vmatprep.subr.bf16.mxu0 %v5514_v18  ;;  %v6091_v18 = vld [vmem:[%s5679_s10 + $0x54] sm:$0xf] }
  0x4d   : > { %5231 = vmatprep.subr.bf16.mxu1 %v5504_v56  ;;  %v359_v38 = vsel %vm5721_vm2, %v354_v23, %v358_v5  ;;  %v893_v5 = vshll.u32 %v4358_v43, 16  ;;  %v387_v19 = vor.u32 %v386_v7, %v382_v2  ;;  %v6051_v23 = vld [vmem:[%s5679_s10 + $0x50] sm:$0x1]  ;;  %v395_v25 = vshrl.u32 %v6038_v17, 16 }
  0x4e   : > { %v4536_v56 = vcombine.low %v359_v38, %v369_v46  ;;  %v6016_v57 = vrot.slane %v882_v39, 4  ;;  %v398_v26 = vshll.u32 %v6038_v17, 16  ;;  %v404_v30 = vshll.u32 %v6048_v21, 16  ;;  %v6066_v38 = vld [vmem:[%s5679_s10 + $0x28] sm:$0xf]  ;;  %v5515_v46 = vld [vmem:[%s7756_s1 + $0x120] sm:$0xff]  }
  0x4f   : > { %3438 = vmatmul.mubr.bf16.vlgmr.msra.gmra.mrb[16].mxu1 %v4548_v42  ;;  %v6033_v15 = vrot.slane %v893_v5, 5  ;;  %v408_v31 = vshrl.u32 %v6048_v21, 16  ;;  %v383_v0 = vsel %vm5721_vm2, %v378_v44, %v382_v2  ;;  %v388_v37 = vrot.slane %v387_v19, 4  ;;  %v636_v39 = vld [vmem:[%s5679_s10 + $0x18] sm:$0xe]  ;;  %5128 = vmatpush3.bf16.msra.mxu0 %v5515_v46  ;;  %v5521_v5 = vld [vmem:[%s7756_s1 + $0x1d0] sm:$0xff]  }
  0x50   : > { %3308 = vmatprep.mubr.bf16.mxu0 %v4536_v56  ;;  %5232 = vmatpush3.bf16.msra.mxu1 %v5505_v53  ;;  %v414_v28 = vshll.u32 %v6051_v23, 16  ;;  %v397_v12 = vrot.slane %v395_v25, 4  ;;  %v400_v43 = vrot.slane %v398_v26, 5  ;;  %v406_v47 = vrot.slane %v404_v30, 5  ;;  %v4388_v19 = vld [vmem:[%s5679_s10 + $0x14] sm:$0x1] }
  0x51   : > { %3309 = vmatmul.mubr.bf16.gmra.mrb[16].mxu0 %v4520_v1  ;;  %3445 = vmatprep.mubr.bf16.mxu1 %v4565_v9  ;;  %v4341_v1 = vrot.slane %v635_v55, 9  ;;  %v393_v53 = vsel %vm5721_vm2, %v388_v37, %v392_v11  ;;  %v410_v63 = vrot.slane %v408_v31, 4  ;;  %v914_v41 = vshrl.u32 %v4360_v32, 16  ;;  %v4404_v44 = vld [vmem:[%s5679_s10 + $0xc] sm:$0xe] }
  0x52   : > { %5233 = vmatprep.subr.bf16.mxu1 %v5512_v60  ;;  %v416_v54 = vrot.slane %v414_v28, 5  ;;  %v4537_v55 = vcombine.low %v383_v0, %v393_v53  ;;  %v401_v56 = vor.u32 %v400_v43, %v397_v12  ;;  %v917_v58 = vshll.u32 %v4360_v32, 16  ;;  %v5522_v0 = vld [vmem:[%s7756_s1 + $0x128] sm:$0xff]   ;;  %v6123_v12 = vld [vmem:[%s5679_s10 + $0x34] sm:$0xf] }
  0x53   : > { %v711_v62 = vsel %vm5915_vm5, %v4341_v1, %v710_v40  ;;  %v5520_v40 = vld [vmem:[%s7756_s1 + $0x168] sm:$0xff]   ;;  %v411_v60 = vor.u32 %v410_v63, %v406_v47  ;;  %v6078_v2 = vrot.slane %v914_v41, 4  ;;  %v4566_v3 = vcombine.low %v4360_v32, %v6066_v38  ;;  %v637_v63 = vld [vmem:[%s5679_s10 + $0x24] sm:$0xe] }
  0x54   : > { %v4549_v42 = vcombine.low %v711_v62, %v714_v20  ;;  %5234 = vmatpush3.bf16.msra.mxu1 %v5513_v10  ;;  %v4522_v4 = vcombine.low %v6038_v17, %v6048_v21  ;;  %5129 = vmatprep.subr.bf16.mxu0 %v5520_v40  ;;  %v402_v6 = vrot.slane %v401_v56, 4  ;;  %v6086_v7 = vrot.slane %v917_v58, 5  ;;  %v6107_v20 = vld [vmem:[%s5679_s10 + $0x5c] sm:$0x1]  ;;  %v6131_v58 = vld [vmem:[%s5679_s10 + $0x60] sm:$0xf] }
  0x55   : > { %3316 = vmatprep.mubr.bf16.mxu0 %v4537_v55  ;;  %v4342_v9 = vrot.slane %v636_v39, 9  ;;  %v717_v10 = vrot.slane %v5815_v48, 5  ;;  %v412_v11 = vrot.slane %v411_v60, 4  ;;  %v720_v17 = vrot.slane %v5818_v49, 5  ;;  %v6104_v49 = vld [vmem:[%s5679_s10 + $0x58] sm:$0xf]  ;;  %5235 = vmatprep.subr.bf16.mxu1 %v5521_v5 }
  0x56   : > { %v407_v1 = vsel %vm5721_vm2, %v402_v6, %v406_v47  ;;  %v419_v25 = vshrl.u32 %v6091_v18, 16  ;;  %v422_v30 = vshll.u32 %v6091_v18, 16  ;;  %v428_v31 = vshll.u32 %v6104_v49, 16  ;;  %5130 = vmatpush3.bf16.msra.mxu0 %v5522_v0  ;;  %v6264_v56 = vld [vmem:[%s5679_s10 + $0x84] sm:$0xf] }
  0x57   : > { %3446 = vmatmul.mubr.bf16.gmra.mrb[20].mxu1 %v4549_v42  ;;  %v718_v48 = vsel %vm5915_vm5, %v4342_v9, %v717_v10  ;;  %v417_v26 = vsel %vm5721_vm2, %v412_v11, %v416_v54  ;;  %v432_v32 = vshrl.u32 %v6104_v49, 16  ;;  %v438_v39 = vshll.u32 %v6107_v20, 16  ;;  %v4362_v42 = vld [vmem:[%s5679_s10 + $0x30] sm:$0xf]  ;;  %v6137_v9 = vld [vmem:[%s5679_s10 + $0x64] sm:$0xf] }
  0x58   : > { %3453 = vmatprep.mubr.bf16.mxu1 %v4566_v3  ;;  %v4538_v37 = vcombine.low %v407_v1, %v417_v26  ;;  %v421_v28 = vrot.slane %v419_v25, 4  ;;  %v424_v47 = vrot.slane %v422_v30, 5  ;;  %v430_v46 = vrot.slane %v428_v31, 5  ;;  %v5523_v54 = vld [vmem:[%s7756_s1 + $0x190] sm:$0xff]   ;;  %v4364_v30 = vld [vmem:[%s5679_s10 + $0x3c] sm:$0xf] }
  0x59   : > { %3317 = vmatmul.mubr.bf16.gmra.mrb[20].mxu0 %v4521_v16  ;;  %v719_v16 = vrot.slane %v717_v10, 4  ;;  %v434_v53 = vrot.slane %v432_v32, 4  ;;  %v440_v41 = vrot.slane %v438_v39, 5  ;;  %v938_v40 = vshrl.u32 %v4362_v42, 16  ;;  %5236 = vmatpush3.bf16.msra.mxu1 %v5523_v54  ;;  %v6151_v31 = vld [vmem:[%s5679_s10 + $0x40] sm:$0xf] }
  0x5a   : > { %3324 = vmatprep.mubr.bf16.mxu0 %v4538_v37  ;;  %v941_v55 = vshll.u32 %v4362_v42, 16  ;;  %v425_v60 = vor.u32 %v424_v47, %v421_v28  ;;  %v4567_v5 = vcombine.low %v4362_v42, %v6123_v12  ;;  %v4523_v6 = vcombine.low %v6091_v18, %v6104_v49  ;;  %v638_v42 = vld [vmem:[%s5679_s10 + $0x30] sm:$0xe] }
  0x5b   : > { %v721_v62 = vsel %vm5915_vm5, %v719_v16, %v720_v17  ;;  %v435_v3 = vor.u32 %v434_v53, %v430_v46  ;;  %v6139_v10 = vrot.slane %v938_v40, 4  ;;  %v4343_v17 = vrot.slane %v637_v63, 9 }
  0x5c   : > { %v4550_v43 = vcombine.low %v718_v48, %v721_v62  ;;  %v6141_v11 = vrot.slane %v941_v55, 5  ;;  %v724_v1 = vrot.slane %v5875_v51, 5  ;;  %v6145_v48 = vld [vmem:[%s5679_s10 + $0x68] sm:$0x1]  ;;  %v426_v16 = vrot.slane %v425_v60, 4 }
  0x5d   : > { %v436_v25 = vrot.slane %v435_v3, 4  ;;  %v727_v18 = vrot.slane %v5881_v52, 5  ;;  %v443_v26 = vshrl.u32 %v6131_v58, 16  ;;  %v446_v51 = vshll.u32 %v6131_v58, 16 }
  0x5e   : > { %v725_v32 = vsel %vm5915_vm5, %v4343_v17, %v724_v1  ;;  %v726_v0 = vrot.slane %v724_v1, 4  ;;  %v452_v37 = vshll.u32 %v6137_v9, 16  ;;  %v431_v52 = vsel %vm5721_vm2, %v426_v16, %v430_v46  ;;  %v6175_v1 = vld [vmem:[%s5679_s10 + $0x6c] sm:$0xf] }
  0x5f   : > { %3454 = vmatmul.mubr.bf16.gmra.mrb[24].mxu1 %v4550_v43  ;;  %v441_v62 = vsel %vm5721_vm2, %v436_v25, %v440_v41  ;;  %v445_v28 = vrot.slane %v443_v26, 4  ;;  %v456_v39 = vshrl.u32 %v6137_v9, 16  ;;  %v448_v53 = vrot.slane %v446_v51, 5  ;;  %v5527_v41 = vld [vmem:[%s7756_s1 + $0x130] sm:$0xff]  }
  0x60   : > { %3461 = vmatprep.mubr.bf16.mxu1 %v4567_v5  ;;  %v4539_v43 = vcombine.low %v431_v52, %v441_v62  ;;  %v728_v47 = vsel %vm5915_vm5, %v726_v0, %v727_v18  ;;  %v454_v63 = vrot.slane %v452_v37, 5  ;;  %v462_v46 = vshll.u32 %v6145_v48, 16 }
  0x61   : > { %3325 = vmatmul.mubr.bf16.gmra.mrb[24].mxu0 %v4522_v4  ;;  %v5526_v4 = vld [vmem:[%s7756_s1 + $0x170] sm:$0xff]   ;;  %v4551_v54 = vcombine.low %v725_v32, %v728_v47  ;;  %v458_v40 = vrot.slane %v456_v39, 4  ;;  %v962_v55 = vshrl.u32 %v4364_v30, 16  ;;  %v449_v60 = vor.u32 %v448_v53, %v445_v28  ;;  %v4366_v39 = vld [vmem:[%s5679_s10 + $0x48] sm:$0xf] }
  0x62   : > { %5131 = vmatprep.subr.bf16.mxu0 %v5526_v4  ;;  %3332 = vmatprep.mubr.bf16.mxu0 %v4539_v43  ;;  %v965_v3 = vshll.u32 %v4364_v30, 16  ;;  %v4568_v17 = vcombine.low %v4364_v30, %v6151_v31  ;;  %v464_v25 = vrot.slane %v462_v46, 5  ;;  %v4524_v26 = vcombine.low %v6131_v58, %v6137_v9  ;;  %v6182_v32 = vld [vmem:[%s5679_s10 + $0x70] sm:$0xf]  ;;  %v6188_v4 = vld [vmem:[%s5679_s10 + $0x74] sm:$0x1] }
  0x63   : > { %v459_v16 = vor.u32 %v458_v40, %v454_v63  ;;  %v6177_v18 = vrot.slane %v962_v55, 4  ;;  %5132 = vmatpush3.bf16.msra.mxu0 %v5527_v41  ;;  %v450_v0 = vrot.slane %v449_v60, 4  ;;  %v4344_v37 = vrot.slane %v638_v42, 9 }
  0x64   : > { %v6184_v51 = vrot.slane %v965_v3, 5  ;;  %v731_v30 = vrot.slane %v5947_v13, 5  ;;  %v734_v62 = vrot.slane %v5952_v35, 5  ;;  %v467_v58 = vshrl.u32 %v6175_v1, 16 }
  0x65   : > { %v460_v52 = vrot.slane %v459_v16, 4  ;;  %v470_v28 = vshll.u32 %v6175_v1, 16  ;;  %v455_v43 = vsel %vm5721_vm2, %v450_v0, %v454_v63  ;;  %v476_v13 = vshll.u32 %v6182_v32, 16  ;;  %v5530_v63 = vld [vmem:[%s7756_s1 + $0x1d8] sm:$0xff]  }
  0x66   : > { %v732_v42 = vsel %vm5915_vm5, %v4344_v37, %v731_v30  ;;  %v733_v47 = vrot.slane %v731_v30, 4  ;;  %v469_v53 = vrot.slane %v467_v58, 4  ;;  %v480_v40 = vshrl.u32 %v6182_v32, 16  ;;  %v639_v0 = vld [vmem:[%s5679_s10 + $0x3c] sm:$0xe]  ;;  %5237 = vmatprep.subr.bf16.mxu1 %v5530_v63 }
  0x67   : > { %3462 = vmatmul.mubr.bf16.gmra.mrb[28].mxu1 %v4551_v54  ;;  %v465_v35 = vsel %vm5721_vm2, %v460_v52, %v464_v25  ;;  %v472_v54 = vrot.slane %v470_v28, 5  ;;  %v478_v41 = vrot.slane %v476_v13, 5  ;;  %v486_v60 = vshll.u32 %v6188_v4, 16  ;;  %v6215_v28 = vld [vmem:[%s5679_s10 + $0x78] sm:$0xf] }
  0x68   : > { %3469 = vmatprep.mubr.bf16.mxu1 %v4568_v17  ;;  %v4540_v46 = vcombine.low %v455_v43, %v465_v35  ;;  %v735_v55 = vsel %vm5915_vm5, %v733_v47, %v734_v62  ;;  %v482_v16 = vrot.slane %v480_v40, 4  ;;  %v986_v25 = vshrl.u32 %v4366_v39, 16  ;;  %v5531_v62 = vld [vmem:[%s7756_s1 + $0x198] sm:$0xff]   ;;  %v6232_v63 = vld [vmem:[%s5679_s10 + $0x80] sm:$0x1] }
  0x69   : > { %3333 = vmatmul.mubr.bf16.gmra.mrb[28].mxu0 %v4523_v6  ;;  %v6200_v6 = vld [vmem:[%s5679_s10 + $0x4c] sm:$0xf]  ;;  %v4552_v3 = vcombine.low %v732_v42, %v735_v55  ;;  %v473_v17 = vor.u32 %v472_v54, %v469_v53  ;;  %v488_v37 = vrot.slane %v486_v60, 5  ;;  %v989_v30 = vshll.u32 %v4366_v39, 16  ;;  %v6225_v35 = vld [vmem:[%s5679_s10 + $0x7c] sm:$0xf]  ;;  %5238 = vmatpush3.bf16.msra.mxu1 %v5531_v62 }
  0x6a   : > { %3340 = vmatprep.mubr.bf16.mxu0 %v4540_v46  ;;  %v4569_v58 = vcombine.low %v4366_v39, %v6200_v6  ;;  %v483_v42 = vor.u32 %v482_v16, %v478_v41  ;;  %v6220_v47 = vrot.slane %v986_v25, 4  ;;  %v4525_v13 = vcombine.low %v6175_v1, %v6182_v32  ;;  %v5535_v25 = vld [vmem:[%s7756_s1 + $0x138] sm:$0xff]  }
  0x6b   : > { %v474_v43 = vrot.slane %v473_v17, 4  ;;  %v6227_v53 = vrot.slane %v989_v30, 5  ;;  %v4345_v39 = vrot.slane %v639_v0, 9  ;;  %v738_v54 = vrot.slane %v5989_v33, 5  ;;  %v6240_v17 = vld [vmem:[%s5679_s10 + $0x58] sm:$0xf] }
  0x6c   : > { %v741_v40 = vrot.slane %v5992_v36, 5  ;;  %v484_v55 = vrot.slane %v483_v42, 4  ;;  %v491_v1 = vshrl.u32 %v6215_v28, 16  ;;  %v494_v60 = vshll.u32 %v6215_v28, 16  ;;  %v5534_v33 = vld [vmem:[%s7756_s1 + $0x178] sm:$0xff]   ;;  %v5537_v42 = vld [vmem:[%s7756_s1 + $0x1e0] sm:$0xff]  }
  0x6d   : > { %v479_v46 = vsel %vm5721_vm2, %v474_v43, %v478_v41  ;;  %v739_v36 = vsel %vm5915_vm5, %v4345_v39, %v738_v54  ;;  %v500_v41 = vshll.u32 %v6225_v35, 16  ;;  %v504_v16 = vshrl.u32 %v6225_v35, 16  ;;  %5133 = vmatprep.subr.bf16.mxu0 %v5534_v33  ;;  %5239 = vmatprep.subr.bf16.mxu1 %v5537_v42 }
  0x6e   : > { %v489_v0 = vsel %vm5721_vm2, %v484_v55, %v488_v37  ;;  %v493_v30 = vrot.slane %v491_v1, 4  ;;  %v510_v43 = vshll.u32 %v6232_v63, 16  ;;  %5134 = vmatpush3.bf16.msra.mxu0 %v5535_v25  ;;  %v6274_v25 = vld [vmem:[%s5679_s10 + $0x8c] sm:$0x1] }
  0x6f   : > { %3470 = vmatmul.mubr.bf16.gmra.mrb[32].mxu1 %v4552_v3  ;;  %v4368_v3 = vld [vmem:[%s5679_s10 + $0x54] sm:$0xf]  ;;  %v4541_v39 = vcombine.low %v479_v46, %v489_v0  ;;  %v506_v52 = vrot.slane %v504_v16, 4  ;;  %v4346_v16 = vrot.slane %v640_v27, 9  ;;  %v515_v27 = vshrl.u32 %v6264_v56, 16 }
  0x70   : > { %3477 = vmatprep.mubr.bf16.mxu1 %v4569_v58  ;;  %v496_v58 = vrot.slane %v494_v60, 5  ;;  %v512_v1 = vrot.slane %v510_v43, 5  ;;  %v1010_v60 = vshrl.u32 %v4368_v3, 16  ;;  %v1013_v5 = vshll.u32 %v4368_v3, 16  ;;  %v6315_v46 = vld [vmem:[%s5679_s10 + $0x6c] sm:$0xf] }
  0x71   : > { %3341 = vmatmul.mubr.bf16.gmra.mrb[32].mxu0 %v4524_v26  ;;  %v740_v26 = vrot.slane %v738_v54, 4  ;;  %v502_v54 = vrot.slane %v500_v41, 5  ;;  %v4570_v0 = vcombine.low %v4368_v3, %v6240_v17  ;;  %v748_v43 = vrot.slane %v6051_v23, 5 }
  0x72   : > { %v497_v55 = vor.u32 %v496_v58, %v493_v30  ;;  %3348 = vmatprep.mubr.bf16.mxu0 %v4541_v39  ;;  %v6269_v41 = vrot.slane %v1010_v60, 4  ;;  %v6279_v30 = vrot.slane %v1013_v5, 5  ;;  %v745_v58 = vrot.slane %v6048_v21, 5  ;;  %v6292_v5 = vld [vmem:[%s7756_s1 + $0x200] sm:$0xff]  }
  0x73   : > { %v742_v62 = vsel %vm5915_vm5, %v740_v26, %v741_v40  ;;  %v507_v33 = vor.u32 %v506_v52, %v502_v54  ;;  %v6267_v40 = vld [vmem:[%s5679_s10 + $0x88] sm:$0xf]  ;;  %v5538_v52 = vld [vmem:[%s7756_s1 + $0x1a0] sm:$0xff]   ;;  %5367 = vmatprep.subr.bf16.mxu0 %v6292_v5 }
  0x74   : > { %v4553_v37 = vcombine.low %v739_v36, %v742_v62  ;;  %v498_v26 = vrot.slane %v497_v55, 4  ;;  %v4526_v36 = vcombine.low %v6215_v28, %v6225_v35  ;;  %v518_v28 = vshll.u32 %v6264_v56, 16  ;;  %v4370_v62 = vld [vmem:[%s5679_s10 + $0x60] sm:$0xf]  ;;  %5240 = vmatpush3.bf16.msra.mxu1 %v5538_v52 }
  0x75   : > { %v508_v3 = vrot.slane %v507_v33, 4  ;;  %v524_v39 = vshll.u32 %v6267_v40, 16  ;;  %v746_v23 = vsel %vm5915_vm5, %v4346_v16, %v745_v58  ;;  %v517_v55 = vrot.slane %v515_v27, 4 }
  0x76   : > { %v503_v42 = vsel %vm5721_vm2, %v498_v26, %v502_v54  ;;  %v528_v54 = vshrl.u32 %v6267_v40, 16  ;;  %v520_v60 = vrot.slane %v518_v28, 5  ;;  %v534_v52 = vshll.u32 %v6274_v25, 16 }
  0x77   : > { %3478 = vmatmul.mubr.bf16.gmra.mrb[36].mxu1 %v4553_v37  ;;  %v513_v21 = vsel %vm5721_vm2, %v508_v3, %v512_v1  ;;  %v526_v33 = vrot.slane %v524_v39, 5  ;;  %v5542_v1 = vld [vmem:[%s7756_s1 + $0x1e8] sm:$0xff]   ;;  %v1034_v3 = vshrl.u32 %v4370_v62, 16  ;;  %v1037_v39 = vshll.u32 %v4370_v62, 16 }
  0x78   : > { %3485 = vmatprep.mubr.bf16.mxu1 %v4570_v0  ;;  %v4542_v37 = vcombine.low %v503_v42, %v513_v21  ;;  %v6300_v0 = vld [vmem:[%s5679_s10 + $0x64] sm:$0xf]  ;;  %v530_v16 = vrot.slane %v528_v54, 4  ;;  %v5543_v42 = vld [vmem:[%s7756_s1 + $0x1a8] sm:$0xff]   ;;  %v521_v28 = vor.u32 %v520_v60, %v517_v55  ;;  %5241 = vmatprep.subr.bf16.mxu1 %v5542_v1  ;;  %v536_v54 = vrot.slane %v534_v52, 5 }
  0x79   : > { %3349 = vmatmul.mubr.bf16.gmra.mrb[36].mxu0 %v4525_v13  ;;  %v747_v13 = vrot.slane %v745_v58, 4  ;;  %v641_v58 = vld [vmem:[%s5679_s10 + $0x54] sm:$0xe]  ;;  %v6320_v59 = vrot.slane %v1034_v3, 4  ;;  %v4571_v8 = vcombine.low %v4370_v62, %v6300_v0  ;;  %5242 = vmatpush3.bf16.msra.mxu1 %v5543_v42  ;;  %v4527_v55 = vcombine.low %v6264_v56, %v6267_v40 }
  0x7a   : > { %3356 = vmatprep.mubr.bf16.mxu0 %v4542_v37  ;;  %v6325_v37 = vrot.slane %v1037_v39, 5  ;;  %v4347_v60 = vrot.slane %v641_v58, 9  ;;  %v752_v1 = vrot.slane %v6104_v49, 5  ;;  %v1058_v52 = vshrl.u32 %v6315_v46, 16  ;;  %v5547_v39 = vld [vmem:[%s7756_s1 + $0x1f0] sm:$0xff]  }
  0x7b   : > { %v749_v26 = vsel %vm5915_vm5, %v747_v13, %v748_v43  ;;  %v6318_v43 = vld [vmem:[%s5679_s10 + $0x70] sm:$0xf]  ;;  %v531_v13 = vor.u32 %v530_v16, %v526_v33  ;;  %v755_v16 = vrot.slane %v6107_v20, 5  ;;  %v1061_v3 = vshll.u32 %v6315_v46, 16  ;;  %5243 = vmatprep.subr.bf16.mxu1 %v5547_v39 }
  0x7c   : > { %v4554_v27 = vcombine.low %v746_v23, %v749_v26  ;;  %v522_v23 = vrot.slane %v521_v28, 4  ;;  %v642_v26 = vld [vmem:[%s5679_s10 + $0x60] sm:$0xe]  ;;  %v1071_v56 = vshrl.u32 %v6318_v43, 16  ;;  %v4572_v58 = vcombine.low %v6315_v46, %v6318_v43 }
  0x7d   : > { %v532_v21 = vrot.slane %v531_v13, 4  ;;  %v753_v20 = vsel %vm5915_vm5, %v4347_v60, %v752_v1  ;;  %v754_v42 = vrot.slane %v752_v1, 4  ;;  %v4420_v28 = vrot.slane %v4404_v44, 9  ;;  %v5548_v60 = vld [vmem:[%s7756_s1 + $0x1b0] sm:$0xff]  }
  0x7e   : > { %v527_v62 = vsel %vm5721_vm2, %v522_v23, %v526_v33  ;;  %v885_v33 = vshll.u32 %v4388_v19, 16  ;;  %v1318_v13 = vrot.slane %v4388_v19, 5  ;;  %v6354_v23 = vld [vmem:[%s5679_s10 + $0x78] sm:$0xf]  ;;  %5244 = vmatpush3.bf16.msra.mxu1 %v5548_v60 }
  0x7f   : > { %3486 = vmatmul.mubr.bf16.gmra.mrb[40].mxu1 %v4554_v27  ;;  %v537_v49 = vsel %vm5721_vm2, %v532_v21, %v536_v54  ;;  %v756_v46 = vsel %vm5915_vm5, %v754_v42, %v755_v16  ;;  %v1315_v21 = vrot.slane %v5966_v61, 5  ;;  %v4348_v54 = vrot.slane %v642_v26, 9 }
  0x80   : > { %3493 = vmatprep.mubr.bf16.mxu1 %v4571_v8  ;;  %v4543_v27 = vcombine.low %v527_v62, %v537_v49  ;;  %v6345_v8 = vrot.slane %v1061_v3, 5  ;;  %v4555_v44 = vcombine.low %v753_v20, %v756_v46  ;;  %v887_v1 = vrot.slane %v885_v33, 5  ;;  %v6362_v62 = vld [vmem:[%s5679_s10 + $0x7c] sm:$0xf]  ;;  %v4405_v49 = vld [vmem:[%s5679_s10 + $0x18] sm:$0xe] }
  0x81   : > { %3357 = vmatmul.mubr.bf16.gmra.mrb[40].mxu0 %v4526_v36  ;;  %v6343_v36 = vrot.slane %v1058_v52, 4  ;;  %v759_v52 = vrot.slane %v6137_v9, 5  ;;  %v762_v16 = vrot.slane %v6145_v48, 5  ;;  %v1316_v61 = vsel %vm5915_vm5, %v4420_v28, %v1315_v21  ;;  %v5552_v9 = vld [vmem:[%s7756_s1 + $0x1f8] sm:$0xff]   ;;  %v4389_v33 = vld [vmem:[%s5679_s10 + $0x20] sm:$0x1] }
  0x82   : > { %3364 = vmatprep.mubr.bf16.mxu0 %v4543_v27  ;;  %v1317_v19 = vrot.slane %v1315_v21, 4  ;;  %v1082_v26 = vshrl.u32 %v6354_v23, 16  ;;  %v1085_v3 = vshll.u32 %v6354_v23, 16  ;;  %v888_v42 = vsel %vm5721_vm2, %v6016_v57, %v887_v1  ;;  %v643_v28 = vld [vmem:[%s5679_s10 + $0x6c] sm:$0xe]  ;;  %5245 = vmatprep.subr.bf16.mxu1 %v5552_v9 }
  0x83   : > { %v760_v48 = vsel %vm5915_vm5, %v4348_v54, %v759_v52  ;;  %v761_v20 = vrot.slane %v759_v52, 4  ;;  %v1095_v27 = vshrl.u32 %v6362_v62, 16  ;;  %v7763_v46 = vsel %vm5721_vm2, %v6009_v50, %v5977_v24  ;;  %v5553_v24 = vld [vmem:[%s7756_s1 + $0x1b8] sm:$0xff]  }
  0x84   : > { %v1319_v39 = vsel %vm5915_vm5, %v1317_v19, %v1318_v13  ;;  %v4580_v21 = vcombine.low %v7763_v46, %v888_v42  ;;  %v6387_v54 = vrot.slane %v1082_v26, 4  ;;  %v6389_v60 = vrot.slane %v1085_v3, 5  ;;  %5246 = vmatpush3.bf16.msra.mxu1 %v5553_v24 }
  0x85   : > { %v4596_v57 = vcombine.low %v1316_v61, %v1319_v39  ;;  %v4573_v13 = vcombine.low %v6354_v23, %v6362_v62  ;;  %v4421_v1 = vrot.slane %v4405_v49, 9  ;;  %v1322_v52 = vrot.slane %v6002_v45, 5  ;;  %v6409_v49 = vld [vmem:[%s5679_s10 + $0x88] sm:$0xf] }
  0x86   : > { %v1325_v19 = vrot.slane %v4389_v33, 5  ;;  %v766_v61 = vrot.slane %v6182_v32, 5  ;;  %v7764_v23 = vor.u32 %v6033_v15, %v6031_v14  ;;  %v899_v3 = vshll.u32 %v6002_v45, 16 }
  0x87   : > { %3494 = vmatmul.mubr.bf16.gmra.mrb[44].mxu1 %v4555_v44  ;;  %v763_v44 = vsel %vm5915_vm5, %v761_v20, %v762_v16  ;;  %v769_v16 = vrot.slane %v6188_v4, 5  ;;  %v1323_v9 = vsel %vm5915_vm5, %v4421_v1, %v1322_v52  ;;  %v7765_v20 = vshrl.u32 %v6002_v45, 16  ;;  %v4390_v4 = vld [vmem:[%s5679_s10 + $0x2c] sm:$0x1]  ;;  %v4406_v1 = vld [vmem:[%s5679_s10 + $0x24] sm:$0xe] }
  0x88   : > { %3501 = vmatprep.mubr.bf16.mxu1 %v4572_v58  ;;  %v4556_v50 = vcombine.low %v760_v48, %v763_v44  ;;  %v6400_v58 = vld [vmem:[%s5679_s10 + $0x84] sm:$0xf]  ;;  %v897_v26 = vrot.slane %v7764_v23, 4  ;;  %v1324_v48 = vrot.slane %v1322_v52, 4  ;;  %v909_v42 = vshll.u32 %v4389_v33, 16 }
  0x89   : > { %3365 = vmatmul.mubr.bf16.gmra.mrb[44].mxu0 %v4527_v55  ;;  %v4349_v55 = vrot.slane %v643_v28, 9  ;;  %v905_v32 = vrot.slane %v7765_v20, 4  ;;  %v768_v15 = vrot.slane %v766_v61, 4  ;;  %v901_v28 = vrot.slane %v899_v3, 5  ;;  %v644_v23 = vld [vmem:[%s5679_s10 + $0x78] sm:$0xe] }
  0x8a   : > { %3598 = vmatprep.mubr.bf16.mxu0 %v4596_v57  ;;  %v1106_v39 = vshrl.u32 %v6400_v58, 16  ;;  %v1326_v46 = vsel %vm5915_vm5, %v1324_v48, %v1325_v19  ;;  %v911_v57 = vrot.slane %v909_v42, 5  ;;  %v1109_v44 = vshll.u32 %v6400_v58, 16 }
  0x8b   : > { %v767_v14 = vsel %vm5915_vm5, %v4349_v55, %v766_v61  ;;  %v4597_v24 = vcombine.low %v1323_v9, %v1326_v46  ;;  %v770_v45 = vsel %vm5915_vm5, %v768_v15, %v769_v16  ;;  %v906_v33 = vor.u32 %v905_v32, %v901_v28  ;;  %v5544_v55 = vld [vmem:[%s7756_s1 + $0x208] sm:$0xff]   ;;  %v6451_v15 = vld [vmem:[%s5679_s10 + $0x90] sm:$0xf]  ;;  %v4391_v46 = vld [vmem:[%s5679_s10 + $0x38] sm:$0x1] }
  0x8c   : > { %v1119_v52 = vshrl.u32 %v6409_v49, 16  ;;  %v4557_v61 = vcombine.low %v767_v14, %v770_v45  ;;  %v902_v19 = vsel %vm5721_vm2, %v897_v26, %v901_v28  ;;  %v6432_v3 = vrot.slane %v1106_v39, 4 }
  0x8d   : > { %v4574_v9 = vcombine.low %v6400_v58, %v6409_v49  ;;  %v907_v16 = vrot.slane %v906_v33, 4  ;;  %v4422_v48 = vrot.slane %v4406_v1, 9  ;;  %v1329_v20 = vrot.slane %v6066_v38, 5 }
  0x8e   : > { %v1332_v32 = vrot.slane %v4390_v4, 5  ;;  %v773_v26 = vrot.slane %v6225_v35, 5  ;;  %v776_v42 = vrot.slane %v6232_v63, 5  ;;  %v923_v35 = vshll.u32 %v6066_v38, 16  ;;  %v6454_v63 = vld [vmem:[%s5679_s10 + $0x94] sm:$0xf] }
  0x8f   : > { %3502 = vmatmul.mubr.bf16.gmra.mrb[48].mxu1 %v4556_v50  ;;  %v4350_v50 = vrot.slane %v644_v23, 9  ;;  %v912_v58 = vsel %vm5721_vm2, %v907_v16, %v911_v57  ;;  %v1331_v14 = vrot.slane %v1329_v20, 4  ;;  %v4407_v57 = vld [vmem:[%s5679_s10 + $0x30] sm:$0xe]  ;;  %v7766_v45 = vshrl.u32 %v6066_v38, 16 }
  0x90   : > { %3509 = vmatprep.mubr.bf16.mxu1 %v4573_v13  ;;  %v5549_v13 = vld [vmem:[%s7756_s1 + $0x210] sm:$0xff]   ;;  %v775_v28 = vrot.slane %v773_v26, 4  ;;  %v933_v23 = vshll.u32 %v4390_v4, 16  ;;  %v645_v16 = vld [vmem:[%s5679_s10 + $0x84] sm:$0xe]  ;;  %v1133_v38 = vshll.u32 %v6451_v15, 16 }
  0x91   : > { %3599 = vmatmul.mubr.bf16.vlgmr.msra.gmra.mrb[48].mxu0 %v4580_v21  ;;  %v920_v21 = vor.u32 %v6086_v7, %v6078_v2  ;;  %v4581_v2 = vcombine.low %v902_v19, %v912_v58  ;;  %v6458_v7 = vsel %vm5915_vm5, %v4350_v50, %v773_v26  ;;  %v1333_v1 = vsel %vm5915_vm5, %v1331_v14, %v1332_v32  ;;  %v5554_v19 = vld [vmem:[%s7756_s1 + $0x218] sm:$0xff]  }
  0x92   : > { %5368 = vmatpush3.bf16.msra.mxu0 %v6292_v5  ;;  %3606 = vmatprep.mubr.bf16.mxu0 %v4597_v24  ;;  %v1330_v5 = vsel %vm5915_vm5, %v4422_v48, %v1329_v20  ;;  %v925_v24 = vrot.slane %v923_v35, 5  ;;  %v929_v33 = vrot.slane %v7766_v45, 4  ;;  %v6470_v48 = vrot.slane %v1109_v44, 5 }
  0x93   : > { %5369 = vmatprep.subr.bf16.mxu0 %v5544_v55  ;;  %v921_v39 = vrot.slane %v920_v21, 4  ;;  %v4598_v20 = vcombine.low %v1330_v5, %v1333_v1  ;;  %v777_v50 = vsel %vm5915_vm5, %v775_v28, %v776_v42  ;;  %v1130_v26 = vshrl.u32 %v6451_v15, 16  ;;  %v6501_v1 = vld [vmem:[%s5679_s10 + $0x9c] sm:$0xf] }
  0x94   : > { %v930_v32 = vor.u32 %v929_v33, %v925_v24  ;;  %v935_v21 = vrot.slane %v933_v23, 5  ;;  %v4558_v4 = vcombine.low %v6458_v7, %v777_v50  ;;  %v4575_v5 = vcombine.low %v6451_v15, %v6454_v63  ;;  %v5560_v50 = vld [vmem:[%s7756_s1 + $0x228] sm:$0xff]  }
  0x95   : > { %v926_v58 = vsel %vm5721_vm2, %v921_v39, %v925_v24  ;;  %v6479_v44 = vrot.slane %v1130_v26, 4  ;;  %v4423_v42 = vrot.slane %v4407_v57, 9  ;;  %v1336_v14 = vrot.slane %v6123_v12, 5 }
  0x96   : > { %5370 = vmatpush3.bf16.msra.mxu0 %v5544_v55  ;;  %v931_v55 = vrot.slane %v930_v32, 4  ;;  %v1339_v35 = vrot.slane %v4391_v46, 5  ;;  %v780_v7 = vrot.slane %v6267_v40, 5  ;;  %v783_v28 = vrot.slane %v6274_v25, 5  ;;  %v5557_v40 = vld [vmem:[%s7756_s1 + $0x220] sm:$0xff]  }
  0x97   : > { %5371 = vmatprep.subr.bf16.mxu0 %v5549_v13  ;;  %3510 = vmatmul.mubr.bf16.gmra.mrb[52].mxu1 %v4557_v61  ;;  %v4351_v61 = vrot.slane %v645_v16, 9  ;;  %v944_v39 = vor.u32 %v6141_v11, %v6139_v10  ;;  %v1337_v15 = vsel %vm5915_vm5, %v4423_v42, %v1336_v14  ;;  %v947_v57 = vshll.u32 %v6123_v12, 16  ;;  %v646_v42 = vld [vmem:[%s5679_s10 + $0x90] sm:$0xe] }
  0x98   : > { %3517 = vmatprep.mubr.bf16.mxu1 %v4574_v9  ;;  %v936_v9 = vsel %vm5721_vm2, %v931_v55, %v935_v21  ;;  %v782_v11 = vrot.slane %v780_v7, 4  ;;  %v7767_v33 = vshrl.u32 %v6123_v12, 16  ;;  %v957_v16 = vshll.u32 %v4391_v46, 16  ;;  %v4408_v55 = vld [vmem:[%s5679_s10 + $0x3c] sm:$0xe] }
  0x99   : > { %3607 = vmatmul.mubr.bf16.gmra.mrb[52].mxu0 %v4581_v2  ;;  %v1338_v2 = vrot.slane %v1336_v14, 4  ;;  %v4582_v25 = vcombine.low %v926_v58, %v936_v9  ;;  %v6498_v10 = vsel %vm5915_vm5, %v4351_v61, %v780_v7  ;;  %v949_v45 = vrot.slane %v947_v57, 5  ;;  %v6523_v61 = vld [vmem:[%s5679_s10 + $0xa0] sm:$0xf] }
  0x9a   : > { %3614 = vmatprep.mubr.bf16.mxu0 %v4598_v20  ;;  %5372 = vmatpush3.bf16.msra.mxu0 %v5549_v13  ;;  %v945_v13 = vrot.slane %v944_v39, 4  ;;  %v953_v23 = vrot.slane %v7767_v33, 4  ;;  %v4392_v20 = vld [vmem:[%s5679_s10 + $0x44] sm:$0x1]  ;;  %v6511_v26 = vrot.slane %v1133_v38, 5  ;;  %v784_v21 = vsel %vm5915_vm5, %v782_v11, %v783_v28 }
  0x9b   : > { %5373 = vmatprep.subr.bf16.mxu0 %v5554_v19  ;;  %v1340_v24 = vsel %vm5915_vm5, %v1338_v2, %v1339_v35  ;;  %v1154_v58 = vshrl.u32 %v6501_v1, 16  ;;  %v1143_v12 = vshrl.u32 %v6454_v63, 16  ;;  %v959_v14 = vrot.slane %v957_v16, 5  ;;  %v5576_v2 = vld [vmem:[%s5679_s10 + $0x94] sm:$0xf] }
  0x9c   : > { %v4599_v32 = vcombine.low %v1337_v15, %v1340_v24  ;;  %v954_v46 = vor.u32 %v953_v23, %v949_v45  ;;  %v4559_v35 = vcombine.low %v6498_v10, %v784_v21  ;;  %v950_v38 = vsel %vm5721_vm2, %v945_v13, %v949_v45 }
  0x9d   : > { %v6525_v7 = vrot.slane %v1154_v58, 4  ;;  %v1157_v28 = vshll.u32 %v6501_v1, 16  ;;  %v4424_v39 = vrot.slane %v4408_v55, 9  ;;  %v1343_v9 = vrot.slane %v6151_v31, 5  ;;  %v6551_v58 = vld [vmem:[%s5679_s10 + $0xa8] sm:$0xf] }
  0x9e   : > { %5374 = vmatpush3.bf16.msra.mxu0 %v5554_v19  ;;  %v955_v19 = vrot.slane %v954_v46, 4  ;;  %v1346_v15 = vrot.slane %v4392_v20, 5  ;;  %v787_v57 = vrot.slane %v5576_v2, 5  ;;  %v968_v10 = vor.u32 %v6184_v51, %v6177_v18  ;;  %v5563_v18 = vld [vmem:[%s7756_s1 + $0x230] sm:$0xff]   ;;  %v4409_v55 = vld [vmem:[%s5679_s10 + $0x48] sm:$0xe] }
  0x9f   : > { %5375 = vmatprep.subr.bf16.mxu0 %v5557_v40  ;;  %3518 = vmatmul.mubr.bf16.gmra.mrb[56].mxu1 %v4558_v4  ;;  %v4352_v4 = vrot.slane %v646_v42, 9  ;;  %v971_v11 = vshll.u32 %v6151_v31, 16  ;;  %v1345_v13 = vrot.slane %v1343_v9, 4  ;;  %v7768_v24 = vshrl.u32 %v6151_v31, 16 }
  0xa0   : > { %3525 = vmatprep.mubr.bf16.mxu1 %v4575_v5  ;;  %v960_v5 = vsel %vm5721_vm2, %v955_v19, %v959_v14  ;;  %v789_v33 = vrot.slane %v787_v57, 4  ;;  %v969_v23 = vrot.slane %v968_v10, 4  ;;  %v981_v21 = vshll.u32 %v4392_v20, 16  ;;  %v4393_v19 = vld [vmem:[%s5679_s10 + $0x50] sm:$0x1] }
  0xa1   : > { %3615 = vmatmul.mubr.bf16.gmra.mrb[56].mxu0 %v4582_v25  ;;  %v1344_v25 = vsel %vm5915_vm5, %v4424_v39, %v1343_v9  ;;  %v977_v45 = vrot.slane %v7768_v24, 4  ;;  %v4583_v51 = vcombine.low %v950_v38, %v960_v5  ;;  %v1347_v16 = vsel %vm5915_vm5, %v1345_v13, %v1346_v15  ;;  %v647_v39 = vld [vmem:[%s5679_s10 + $0x9c] sm:$0xe]  ;;  %v5577_v24 = vld [vmem:[%s5679_s10 + $0xa0] sm:$0xf] }
  0xa2   : > { %3622 = vmatprep.mubr.bf16.mxu0 %v4599_v32  ;;  %5376 = vmatpush3.bf16.msra.mxu0 %v5557_v40  ;;  %v4576_v40 = vcombine.low %v6501_v1, %v6523_v61  ;;  %v6548_v31 = vsel %vm5915_vm5, %v4352_v4, %v787_v57  ;;  %v973_v32 = vrot.slane %v971_v11, 5  ;;  %v6554_v42 = vrot.slane %v1157_v28, 5  ;;  %v6564_v4 = vld [vmem:[%s5679_s10 + $0xac] sm:$0xf] }
  0xa3   : > { %5377 = vmatprep.subr.bf16.mxu0 %v5560_v50  ;;  %v1167_v46 = vshrl.u32 %v6523_v61, 16  ;;  %v4600_v1 = vcombine.low %v1344_v25, %v1347_v16  ;;  %v7769_v14 = vrot.slane %v5715_v29, 5  ;;  %v983_v15 = vrot.slane %v981_v21, 5  ;;  %v5566_v29 = vld [vmem:[%s7756_s1 + $0x238] sm:$0xff]  }
  0xa4   : > { %v978_v9 = vor.u32 %v977_v45, %v973_v32  ;;  %v1178_v20 = vshrl.u32 %v6551_v58, 16  ;;  %v1181_v28 = vshll.u32 %v6551_v58, 16  ;;  %v1191_v57 = vshrl.u32 %v6564_v4, 16 }
  0xa5   : > { %v791_v38 = vsel %vm5915_vm5, %v789_v33, %v7769_v14  ;;  %v4425_v10 = vrot.slane %v4409_v55, 9  ;;  %v1350_v5 = vrot.slane %v6200_v6, 5  ;;  %v1353_v25 = vrot.slane %v4393_v19, 5  ;;  %v5578_v33 = vld [vmem:[%s5679_s10 + $0xa4] sm:$0x1] }
  0xa6   : > { %5378 = vmatpush3.bf16.msra.mxu0 %v5560_v50  ;;  %v4560_v2 = vcombine.low %v6548_v31, %v791_v38  ;;  %v974_v50 = vsel %vm5721_vm2, %v969_v23, %v973_v32  ;;  %v979_v11 = vrot.slane %v978_v9, 4  ;;  %v4353_v13 = vrot.slane %v647_v39, 9  ;;  %v4410_v9 = vld [vmem:[%s5679_s10 + $0x54] sm:$0xe] }
  0xa7   : > { %5379 = vmatprep.subr.bf16.mxu0 %v5563_v18  ;;  %3526 = vmatmul.mubr.bf16.gmra.mrb[60].mxu1 %v4559_v35  ;;  %v794_v45 = vrot.slane %v5577_v24, 5  ;;  %v797_v35 = vrot.slane %v5578_v33, 5  ;;  %v992_v16 = vor.u32 %v6227_v53, %v6220_v47  ;;  %v995_v23 = vshll.u32 %v6200_v6, 16 }
  0xa8   : > { %3533 = vmatprep.mubr.bf16.mxu1 %v4576_v40  ;;  %v1351_v40 = vsel %vm5915_vm5, %v4425_v10, %v1350_v5  ;;  %v1352_v31 = vrot.slane %v1350_v5, 4  ;;  %v7770_v32 = vshrl.u32 %v6200_v6, 16  ;;  %v4577_v47 = vcombine.low %v6551_v58, %v6564_v4  ;;  %v6594_v6 = vld [vmem:[%s5679_s10 + $0xb4] sm:$0xf]  ;;  %v648_v5 = vld [vmem:[%s5679_s10 + $0xa8] sm:$0xe] }
  0xa9   : > { %3623 = vmatmul.mubr.bf16.gmra.mrb[60].mxu0 %v4583_v51  ;;  %v984_v51 = vsel %vm5721_vm2, %v979_v11, %v983_v15  ;;  %v796_v53 = vrot.slane %v794_v45, 4  ;;  %v795_v14 = vsel %vm5915_vm5, %v4353_v13, %v794_v45  ;;  %v997_v38 = vrot.slane %v995_v23, 5  ;;  %v4394_v11 = vld [vmem:[%s5679_s10 + $0x5c] sm:$0x1]  ;;  %v6606_v13 = vld [vmem:[%s5679_s10 + $0xb8] sm:$0xf] }
  0xaa   : > { %3630 = vmatprep.mubr.bf16.mxu0 %v4600_v1  ;;  %5380 = vmatpush3.bf16.msra.mxu0 %v5563_v18  ;;  %v1001_v21 = vrot.slane %v7770_v32, 4  ;;  %v4584_v55 = vcombine.low %v974_v50, %v984_v51  ;;  %v993_v1 = vrot.slane %v992_v16, 4  ;;  %v1354_v18 = vsel %vm5915_vm5, %v1352_v31, %v1353_v25  ;;  %v5580_v32 = vld [vmem:[%s5679_s10 + $0xb0] sm:$0x1] }
  0xab   : > { %5381 = vmatprep.subr.bf16.mxu0 %v5566_v29  ;;  %v1005_v39 = vshll.u32 %v4393_v19, 16  ;;  %v6597_v15 = vrot.slane %v1178_v20, 4  ;;  %v6599_v50 = vrot.slane %v1181_v28, 5  ;;  %v4601_v10 = vcombine.low %v1351_v40, %v1354_v18  ;;  %v5579_v40 = vld [vmem:[%s5679_s10 + $0xac] sm:$0xf] }
  0xac   : > { %v798_v58 = vsel %vm5915_vm5, %v796_v53, %v797_v35  ;;  %v1002_v25 = vor.u32 %v1001_v21, %v997_v38  ;;  %v1202_v19 = vshrl.u32 %v6594_v6, 16  ;;  %v1205_v20 = vshll.u32 %v6594_v6, 16 }
  0xad   : > { %v1007_v24 = vrot.slane %v1005_v39, 5  ;;  %v4561_v28 = vcombine.low %v795_v14, %v798_v58  ;;  %v998_v45 = vsel %vm5721_vm2, %v993_v1, %v997_v38  ;;  %v1215_v33 = vshrl.u32 %v6606_v13, 16 }
  0xae   : > { %5382 = vmatpush3.bf16.msra.mxu0 %v5566_v29  ;;  %v4426_v35 = vrot.slane %v4410_v9, 9  ;;  %v1003_v29 = vrot.slane %v1002_v25, 4  ;;  %v1357_v16 = vrot.slane %v6240_v17, 5  ;;  %v1360_v23 = vrot.slane %v4394_v11, 5  ;;  %v6632_v25 = vld [vmem:[%s5679_s10 + $0xc0] sm:$0xf] }
  0xaf   : > { %3534 = vmatmul.mubr.bf16.gmra.mrb[64].mxu1 %v4560_v2  ;;  %v4354_v51 = vrot.slane %v648_v5, 9  ;;  %v801_v31 = vrot.slane %v5579_v40, 5  ;;  %v804_v2 = vrot.slane %v5580_v32, 5  ;;  %v1016_v21 = vor.u32 %v6279_v30, %v6269_v41  ;;  %v6644_v32 = vld [vmem:[%s5679_s10 + $0xc4] sm:$0xf] }
  0xb0   : > { %3541 = vmatprep.mubr.bf16.mxu1 %v4577_v47  ;;  %v1019_v53 = vshll.u32 %v6240_v17, 16  ;;  %v1358_v47 = vsel %vm5915_vm5, %v4426_v35, %v1357_v16  ;;  %v1359_v1 = vrot.slane %v1357_v16, 4  ;;  %v7771_v18 = vshrl.u32 %v6240_v17, 16  ;;  %v4411_v17 = vld [vmem:[%s5679_s10 + $0x60] sm:$0xe] }
  0xb1   : > { %3631 = vmatmul.mubr.bf16.gmra.mrb[64].mxu0 %v4584_v55  ;;  %v1008_v55 = vsel %vm5721_vm2, %v1003_v29, %v1007_v24  ;;  %v4578_v39 = vcombine.low %v6594_v6, %v6606_v13  ;;  %v803_v9 = vrot.slane %v801_v31, 4  ;;  %v1017_v41 = vrot.slane %v1016_v21, 4  ;;  %v4395_v29 = vld [vmem:[%s5679_s10 + $0x68] sm:$0x1]  ;;  %v649_v16 = vld [vmem:[%s5679_s10 + $0xb4] sm:$0xe] }
  0xb2   : > { %3638 = vmatprep.mubr.bf16.mxu0 %v4601_v10  ;;  %v1025_v14 = vrot.slane %v7771_v18, 4  ;;  %v4585_v38 = vcombine.low %v998_v45, %v1008_v55  ;;  %v1361_v30 = vsel %vm5915_vm5, %v1359_v1, %v1360_v23  ;;  %v802_v10 = vsel %vm5915_vm5, %v4354_v51, %v801_v31  ;;  %v4412_v1 = vld [vmem:[%s5679_s10 + $0x6c] sm:$0xe]  ;;  %v5581_v18 = vld [vmem:[%s5679_s10 + $0xb8] sm:$0xf] }
  0xb3   : > { %v1021_v58 = vrot.slane %v1019_v53, 5  ;;  %v1029_v5 = vshll.u32 %v4394_v11, 16  ;;  %v6635_v24 = vrot.slane %v1202_v19, 4  ;;  %v6637_v45 = vrot.slane %v1205_v20, 5  ;;  %v6703_v51 = vld [vmem:[%s5679_s10 + $0x80] sm:$0x1] }
  0xb4   : > { %v4602_v35 = vcombine.low %v1358_v47, %v1361_v30  ;;  %v805_v6 = vsel %vm5915_vm5, %v803_v9, %v804_v2  ;;  %v1226_v11 = vshrl.u32 %v6632_v25, 16  ;;  %v4427_v2 = vrot.slane %v4411_v17, 9  ;;  %v6665_v17 = vld [vmem:[%s5679_s10 + $0x74] sm:$0x1] }
  0xb5   : > { %v1026_v40 = vor.u32 %v1025_v14, %v1021_v58  ;;  %v1031_v23 = vrot.slane %v1029_v5, 5  ;;  %v4562_v19 = vcombine.low %v802_v10, %v805_v6  ;;  %v1022_v20 = vsel %vm5721_vm2, %v1017_v41, %v1021_v58 }
  0xb6   : > { %v1364_v53 = vrot.slane %v6300_v0, 5  ;;  %v1367_v55 = vrot.slane %v4395_v29, 5  ;;  %v4355_v47 = vrot.slane %v649_v16, 9  ;;  %v808_v14 = vrot.slane %v5581_v18, 5 }
  0xb7   : > { %3542 = vmatmul.mubr.bf16.gmra.mrb[68].mxu1 %v4561_v28  ;;  %v1027_v21 = vrot.slane %v1026_v40, 4  ;;  %v5582_v28 = vld [vmem:[%s5679_s10 + $0xbc] sm:$0x1]  ;;  %v1040_v41 = vor.u32 %v6325_v37, %v6320_v59  ;;  %v1043_v30 = vshll.u32 %v6300_v0, 16  ;;  %v7772_v58 = vshrl.u32 %v6300_v0, 16 }
  0xb8   : > { %3549 = vmatprep.mubr.bf16.mxu1 %v4578_v39  ;;  %v811_v9 = vrot.slane %v5582_v28, 5  ;;  %v1365_v39 = vsel %vm5915_vm5, %v4427_v2, %v1364_v53  ;;  %v1366_v10 = vrot.slane %v1364_v53, 4  ;;  %v4579_v59 = vcombine.low %v6632_v25, %v6644_v32  ;;  %v6679_v28 = vld [vmem:[%s5679_s10 + $0x1c] sm:$0xf] }
  0xb9   : > { %3639 = vmatmul.mubr.bf16.gmra.mrb[68].mxu0 %v4585_v38  ;;  %v1032_v38 = vsel %vm5721_vm2, %v1027_v21, %v1031_v23  ;;  %v1049_v5 = vrot.slane %v7772_v58, 4  ;;  %v810_v37 = vrot.slane %v808_v14, 4  ;;  %v1041_v6 = vrot.slane %v1040_v41, 4  ;;  %v6672_v21 = vld [vmem:[%s5679_s10 + $0x18] sm:$0xf] }
  0xba   : > { %3646 = vmatprep.mubr.bf16.mxu0 %v4602_v35  ;;  %v4586_v35 = vcombine.low %v1022_v20, %v1032_v38  ;;  %v1368_v16 = vsel %vm5915_vm5, %v1366_v10, %v1367_v55  ;;  %v1045_v40 = vrot.slane %v1043_v30, 5  ;;  %v1053_v23 = vshll.u32 %v4395_v29, 16  ;;  %v6682_v38 = vld [vmem:[%s5679_s10 + $0x20] sm:$0x1] }
  0xbb   : > { %v4428_v2 = vrot.slane %v4412_v1, 9  ;;  %v4603_v0 = vcombine.low %v1365_v39, %v1368_v16  ;;  %v809_v53 = vsel %vm5915_vm5, %v4355_v47, %v808_v14  ;;  %v1371_v18 = vrot.slane %v6318_v43, 5 }
  0xbc   : > { %v1374_v20 = vrot.slane %v6665_v17, 5  ;;  %v812_v55 = vsel %vm5915_vm5, %v810_v37, %v811_v9  ;;  %v1046_v29 = vsel %vm5721_vm2, %v1041_v6, %v1045_v40  ;;  %v1050_v1 = vor.u32 %v1049_v5, %v1045_v40 }
  0xbd   : > { %v1055_v41 = vrot.slane %v1053_v23, 5  ;;  %v1372_v47 = vsel %vm5915_vm5, %v4428_v2, %v1371_v18  ;;  %v1373_v14 = vrot.slane %v1371_v18, 4  ;;  %v1478_v30 = vshrl.u32 %v6672_v21, 16  ;;  %v4413_v2 = vld [vmem:[%s5679_s10 + $0x78] sm:$0xe] }
  0xbe   : > { %v1481_v39 = vshll.u32 %v6672_v21, 16  ;;  %v1051_v10 = vrot.slane %v1050_v1, 4  ;;  %v1487_v9 = vshll.u32 %v6679_v28, 16  ;;  %v1491_v58 = vshrl.u32 %v6679_v28, 16 }
  0xbf   : > { %3550 = vmatmul.mubr.bf16.gmra.mrb[72].mxu1 %v4562_v19  ;;  %v1497_v5 = vshll.u32 %v6682_v38, 16  ;;  %v1375_v19 = vsel %vm5915_vm5, %v1373_v14, %v1374_v20  ;;  %v1480_v37 = vrot.slane %v1478_v30, 4  ;;  %v1064_v16 = vor.u32 %v6345_v8, %v6343_v36 }
  0xc0   : > { %3557 = vmatprep.mubr.bf16.mxu1 %v4579_v59  ;;  %v1483_v6 = vrot.slane %v1481_v39, 5  ;;  %v1056_v59 = vsel %vm5721_vm2, %v1051_v10, %v1055_v41  ;;  %v1489_v40 = vrot.slane %v1487_v9, 5  ;;  %v1493_v23 = vrot.slane %v1491_v58, 4  ;;  %v6717_v58 = vld [vmem:[%s5679_s10 + $0x28] sm:$0xf] }
  0xc1   : > { %3647 = vmatmul.mubr.bf16.gmra.mrb[72].mxu0 %v4586_v35  ;;  %v4563_v35 = vcombine.low %v809_v53, %v812_v55  ;;  %v4587_v18 = vcombine.low %v1046_v29, %v1056_v59  ;;  %v4604_v1 = vcombine.low %v1372_v47, %v1375_v19  ;;  %v1067_v14 = vshll.u32 %v6318_v43, 16  ;;  %v6710_v53 = vld [vmem:[%s5679_s10 + $0x24] sm:$0xf] }
  0xc2   : > { %3654 = vmatprep.mubr.bf16.mxu0 %v4603_v0  ;;  %v1484_v31 = vor.u32 %v1483_v6, %v1480_v37  ;;  %v1499_v0 = vrot.slane %v1497_v5, 5  ;;  %v1494_v20 = vor.u32 %v1493_v23, %v1489_v40  ;;  %v1073_v36 = vrot.slane %v1071_v56, 4  ;;  %v6727_v37 = vld [vmem:[%s5679_s10 + $0x2c] sm:$0x1] }
  0xc3   : > { %v1077_v8 = vshll.u32 %v6665_v17, 16  ;;  %v1065_v41 = vrot.slane %v1064_v16, 4  ;;  %v4429_v30 = vrot.slane %v4413_v2, 9  ;;  %v1378_v29 = vrot.slane %v6362_v62, 5 }
  0xc4   : > { %v1485_v55 = vrot.slane %v1484_v31, 4  ;;  %v1495_v47 = vrot.slane %v1494_v20, 4  ;;  %v1069_v39 = vrot.slane %v1067_v14, 5  ;;  %v4612_v10 = vcombine.low %v6672_v21, %v6679_v28 }
  0xc5   : > { %v1381_v9 = vrot.slane %v6703_v51, 5  ;;  %v1079_v56 = vrot.slane %v1077_v8, 5  ;;  %v1380_v31 = vrot.slane %v1378_v29, 4  ;;  %v1502_v17 = vshrl.u32 %v6710_v53, 16 }
  0xc6   : > { %v1490_v43 = vsel %vm5721_vm2, %v1485_v55, %v1489_v40  ;;  %v1500_v5 = vsel %vm5721_vm2, %v1495_v47, %v1499_v0  ;;  %v1074_v19 = vor.u32 %v1073_v36, %v1069_v39  ;;  %v1379_v21 = vsel %vm5915_vm5, %v4429_v30, %v1378_v29  ;;  %v4398_v29 = vld [vmem:[%s5679_s10 + $0x8c] sm:$0x1]  ;;  %v4414_v47 = vld [vmem:[%s5679_s10 + $0x84] sm:$0xe] }
  0xc7   : > { %3558 = vmatmul.mubr.bf16.gmra.mrb[76].mxu1 %v4563_v35  ;;  %v1505_v6 = vshll.u32 %v6710_v53, 16  ;;  %v4628_v16 = vcombine.low %v1490_v43, %v1500_v5  ;;  %v1382_v35 = vsel %vm5915_vm5, %v1380_v31, %v1381_v9  ;;  %v1504_v59 = vrot.slane %v1502_v17, 4 }
  0xc8   : > { %v1511_v40 = vshll.u32 %v6717_v58, 16  ;;  %v1070_v23 = vsel %vm5721_vm2, %v1065_v41, %v1069_v39  ;;  %v1075_v2 = vrot.slane %v1074_v19, 4  ;;  %v1515_v0 = vshrl.u32 %v6717_v58, 16 }
  0xc9   : > { %3655 = vmatmul.mubr.bf16.gmra.mrb[76].mxu0 %v4587_v18  ;;  %v1507_v18 = vrot.slane %v1505_v6, 5  ;;  %3759 = vmatprep.mubr.bf16.mxu1 %v4628_v16  ;;  %v4605_v20 = vcombine.low %v1379_v21, %v1382_v35  ;;  %v1088_v36 = vor.u32 %v6389_v60, %v6387_v54  ;;  %v1091_v41 = vshll.u32 %v6362_v62, 16  ;;  %v6748_v60 = vld [vmem:[%s5679_s10 + $0x30] sm:$0xf]  ;;  %v6754_v35 = vld [vmem:[%s5679_s10 + $0x34] sm:$0xf] }
  0xca   : > { %3662 = vmatprep.mubr.bf16.mxu0 %v4604_v1  ;;  %v1513_v14 = vrot.slane %v1511_v40, 5  ;;  %v1521_v1 = vshll.u32 %v6727_v37, 16  ;;  %v1080_v8 = vsel %vm5721_vm2, %v1075_v2, %v1079_v56  ;;  %v1517_v30 = vrot.slane %v1515_v0, 4  ;;  %v6766_v0 = vld [vmem:[%s5679_s10 + $0x38] sm:$0x1] }
  0xcb   : > { %v1508_v55 = vor.u32 %v1507_v18, %v1504_v59  ;;  %v4588_v39 = vcombine.low %v1070_v23, %v1080_v8  ;;  %v1089_v43 = vrot.slane %v1088_v36, 4  ;;  %v1097_v31 = vrot.slane %v1095_v27, 4 }
  0xcc   : > { %v1523_v9 = vrot.slane %v1521_v1, 5  ;;  %v1518_v5 = vor.u32 %v1517_v30, %v1513_v14  ;;  %v1093_v19 = vrot.slane %v1091_v41, 5  ;;  %v1101_v54 = vshll.u32 %v6703_v51, 16 }
  0xcd   : > { %v1509_v17 = vrot.slane %v1508_v55, 4  ;;  %v4613_v56 = vcombine.low %v6710_v53, %v6717_v58  ;;  %v4430_v21 = vrot.slane %v4414_v47, 9  ;;  %v1385_v6 = vrot.slane %v6409_v49, 5 }
  0xce   : > { %v1388_v16 = vrot.slane %v4398_v29, 5  ;;  %v1519_v27 = vrot.slane %v1518_v5, 4  ;;  %v1094_v51 = vsel %vm5721_vm2, %v1089_v43, %v1093_v19  ;;  %v1098_v59 = vor.u32 %v1097_v31, %v1093_v19  ;;  %v6779_v5 = vld [vmem:[%s5679_s10 + $0x98] sm:$0x1]  ;;  %v4415_v19 = vld [vmem:[%s5679_s10 + $0x90] sm:$0xe] }
  0xcf   : > { %3760 = vmatmul.mubr.bf16.vlgmr.msra.gmra.mrb[80].mxu1 %v4612_v10  ;;  %v1514_v62 = vsel %vm5721_vm2, %v1509_v17, %v1513_v14  ;;  %v1103_v10 = vrot.slane %v1101_v54, 5  ;;  %v1386_v53 = vsel %vm5915_vm5, %v4430_v21, %v1385_v6  ;;  %v1387_v40 = vrot.slane %v1385_v6, 4 }
  0xd0   : > { %v1526_v23 = vshrl.u32 %v6748_v60, 16  ;;  %v1524_v2 = vsel %vm5721_vm2, %v1519_v27, %v1523_v9  ;;  %v1099_v18 = vrot.slane %v1098_v59, 4  ;;  %v1529_v14 = vshll.u32 %v6748_v60, 16 }
  0xd1   : > { %3663 = vmatmul.mubr.bf16.gmra.mrb[80].mxu0 %v4588_v39  ;;  %v1535_v1 = vshll.u32 %v6754_v35, 16  ;;  %v1389_v36 = vsel %vm5915_vm5, %v1387_v40, %v1388_v16  ;;  %v1539_v55 = vshrl.u32 %v6754_v35, 16  ;;  %v1545_v31 = vshll.u32 %v6766_v0, 16 }
  0xd2   : > { %3670 = vmatprep.mubr.bf16.mxu0 %v4605_v20  ;;  %v4629_v20 = vcombine.low %v1514_v62, %v1524_v2  ;;  %v1528_v8 = vrot.slane %v1526_v23, 4  ;;  %v1104_v30 = vsel %vm5721_vm2, %v1099_v18, %v1103_v10  ;;  %v4606_v41 = vcombine.low %v1386_v53, %v1389_v36  ;;  %v6786_v62 = vld [vmem:[%s5679_s10 + $0x3c] sm:$0xf]  ;;  %v6793_v23 = vld [vmem:[%s5679_s10 + $0x40] sm:$0xf] }
  0xd3   : > { %v1531_v47 = vrot.slane %v1529_v14, 5  ;;  %v1537_v39 = vrot.slane %v1535_v1, 5  ;;  %v4589_v9 = vcombine.low %v1094_v51, %v1104_v30  ;;  %v1541_v43 = vrot.slane %v1539_v55, 4  ;;  %v6801_v14 = vld [vmem:[%s5679_s10 + $0x44] sm:$0x1] }
  0xd4   : > { %3767 = vmatprep.mubr.bf16.mxu1 %v4629_v20  ;;  %v1112_v17 = vor.u32 %v6470_v48, %v6432_v3  ;;  %v1115_v21 = vshll.u32 %v6409_v49, 16  ;;  %v1121_v6 = vrot.slane %v1119_v52, 4  ;;  %v1125_v16 = vshll.u32 %v4398_v29, 16 }
  0xd5   : > { %v1532_v54 = vor.u32 %v1531_v47, %v1528_v8  ;;  %v1542_v27 = vor.u32 %v1541_v43, %v1537_v39  ;;  %v1547_v51 = vrot.slane %v1545_v31, 5  ;;  %v4614_v3 = vcombine.low %v6748_v60, %v6754_v35 }
  0xd6   : > { %v1113_v59 = vrot.slane %v1112_v17, 4  ;;  %v1117_v10 = vrot.slane %v1115_v21, 5  ;;  %v1127_v53 = vrot.slane %v1125_v16, 5  ;;  %v4431_v40 = vrot.slane %v4415_v19, 9  ;;  %v4416_v16 = vld [vmem:[%s5679_s10 + $0x9c] sm:$0xe] }
  0xd7   : > { %3768 = vmatmul.mubr.bf16.gmra.mrb[84].mxu1 %v4613_v56  ;;  %v1533_v48 = vrot.slane %v1532_v54, 4  ;;  %v1543_v49 = vrot.slane %v1542_v27, 4  ;;  %v1392_v52 = vrot.slane %v6454_v63, 5  ;;  %v1395_v29 = vrot.slane %v6779_v5, 5 }
  0xd8   : > { %v1550_v56 = vshrl.u32 %v6786_v62, 16  ;;  %v1118_v60 = vsel %vm5721_vm2, %v1113_v59, %v1117_v10  ;;  %v1122_v18 = vor.u32 %v1121_v6, %v1117_v10  ;;  %v1553_v1 = vshll.u32 %v6786_v62, 16  ;;  %v6819_v10 = vld [vmem:[%s5679_s10 + $0xa4] sm:$0x1] }
  0xd9   : > { %3671 = vmatmul.mubr.bf16.gmra.mrb[84].mxu0 %v4589_v9  ;;  %v1538_v2 = vsel %vm5721_vm2, %v1533_v48, %v1537_v39  ;;  %v1548_v20 = vsel %vm5721_vm2, %v1543_v49, %v1547_v51  ;;  %v1393_v36 = vsel %vm5915_vm5, %v4431_v40, %v1392_v52  ;;  %v1394_v8 = vrot.slane %v1392_v52, 4  ;;  %v6826_v49 = vld [vmem:[%s5679_s10 + $0x48] sm:$0xf] }
  0xda   : > { %3678 = vmatprep.mubr.bf16.mxu0 %v4606_v41  ;;  %v1552_v55 = vrot.slane %v1550_v56, 4  ;;  %v4630_v30 = vcombine.low %v1538_v2, %v1548_v20  ;;  %v1123_v41 = vrot.slane %v1122_v18, 4  ;;  %v1555_v47 = vrot.slane %v1553_v1, 5  ;;  %v6832_v2 = vld [vmem:[%s5679_s10 + $0x4c] sm:$0xf] }
  0xdb   : > { %v1559_v39 = vshll.u32 %v6793_v23, 16  ;;  %v1396_v9 = vsel %vm5915_vm5, %v1394_v8, %v1395_v29  ;;  %v1563_v43 = vshrl.u32 %v6793_v23, 16  ;;  %v1569_v31 = vshll.u32 %v6801_v14, 16 }
  0xdc   : > { %v1136_v17 = vor.u32 %v6511_v26, %v6479_v44  ;;  %3775 = vmatprep.mubr.bf16.mxu1 %v4630_v30  ;;  %v1128_v19 = vsel %vm5721_vm2, %v1123_v41, %v1127_v53  ;;  %v4607_v54 = vcombine.low %v1393_v36, %v1396_v9  ;;  %v1556_v21 = vor.u32 %v1555_v47, %v1552_v55  ;;  %v6843_v55 = vld [vmem:[%s5679_s10 + $0x50] sm:$0x1] }
  0xdd   : > { %v1561_v6 = vrot.slane %v1559_v39, 5  ;;  %v4590_v27 = vcombine.low %v1118_v60, %v1128_v19  ;;  %v1565_v51 = vrot.slane %v1563_v43, 4  ;;  %v1571_v59 = vrot.slane %v1569_v31, 5 }
  0xde   : > { %v1137_v48 = vrot.slane %v1136_v17, 4  ;;  %v1557_v40 = vrot.slane %v1556_v21, 4  ;;  %v1139_v44 = vshll.u32 %v6454_v63, 16  ;;  %v1145_v26 = vrot.slane %v1143_v12, 4 }
  0xdf   : > { %3776 = vmatmul.mubr.bf16.gmra.mrb[88].mxu1 %v4614_v3  ;;  %v1149_v53 = vshll.u32 %v6779_v5, 16  ;;  %v1566_v52 = vor.u32 %v1565_v51, %v1561_v6  ;;  %v4615_v3 = vcombine.low %v6786_v62, %v6793_v23  ;;  %v4432_v29 = vrot.slane %v4416_v16, 9 }
  0xe0   : > { %v1399_v56 = vrot.slane %v6523_v61, 5  ;;  %v1562_v63 = vsel %vm5721_vm2, %v1557_v40, %v1561_v6  ;;  %v1141_v12 = vrot.slane %v1139_v44, 5  ;;  %v1402_v5 = vrot.slane %v6819_v10, 5  ;;  %v4401_v44 = vld [vmem:[%s5679_s10 + $0xb0] sm:$0x1] }
  0xe1   : > { %3679 = vmatmul.mubr.bf16.gmra.mrb[88].mxu0 %v4590_v27  ;;  %v1151_v60 = vrot.slane %v1149_v53, 5  ;;  %v1567_v18 = vrot.slane %v1566_v52, 4  ;;  %v1574_v62 = vshrl.u32 %v6826_v49, 16  ;;  %v1577_v30 = vshll.u32 %v6826_v49, 16 }
  0xe2   : > { %3686 = vmatprep.mubr.bf16.mxu0 %v4607_v54  ;;  %v1400_v1 = vsel %vm5915_vm5, %v4432_v29, %v1399_v56  ;;  %v1401_v20 = vrot.slane %v1399_v56, 4  ;;  %v1142_v36 = vsel %vm5721_vm2, %v1137_v48, %v1141_v12  ;;  %v1146_v8 = vor.u32 %v1145_v26, %v1141_v12  ;;  %v4417_v26 = vld [vmem:[%s5679_s10 + $0xa8] sm:$0xe] }
  0xe3   : > { %v1583_v41 = vshll.u32 %v6832_v2, 16  ;;  %v1572_v47 = vsel %vm5721_vm2, %v1567_v18, %v1571_v59  ;;  %v1576_v9 = vrot.slane %v1574_v62, 4  ;;  %v1587_v43 = vshrl.u32 %v6832_v2, 16 }
  0xe4   : > { %v1403_v39 = vsel %vm5915_vm5, %v1401_v20, %v1402_v5  ;;  %v4631_v31 = vcombine.low %v1562_v63, %v1572_v47  ;;  %v1147_v17 = vrot.slane %v1146_v8, 4  ;;  %v1579_v54 = vrot.slane %v1577_v30, 5 }
  0xe5   : > { %v4608_v19 = vcombine.low %v1400_v1, %v1403_v39  ;;  %v1585_v21 = vrot.slane %v1583_v41, 5  ;;  %v1589_v6 = vrot.slane %v1587_v43, 4  ;;  %v1593_v16 = vshll.u32 %v6843_v55, 16 }
  0xe6   : > { %v1160_v27 = vor.u32 %v6554_v42, %v6525_v7  ;;  %3783 = vmatprep.mubr.bf16.mxu1 %v4631_v31  ;;  %v1152_v51 = vsel %vm5721_vm2, %v1147_v17, %v1151_v60  ;;  %v1580_v59 = vor.u32 %v1579_v54, %v1576_v9  ;;  %v1163_v48 = vshll.u32 %v6523_v61, 16  ;;  %v6866_v60 = vld [vmem:[%s5679_s10 + $0x54] sm:$0xf] }
  0xe7   : > { %v1169_v40 = vrot.slane %v1167_v46, 4  ;;  %v4591_v53 = vcombine.low %v1142_v36, %v1152_v51  ;;  %3784 = vmatmul.mubr.bf16.gmra.mrb[92].mxu1 %v4615_v3  ;;  %v1590_v52 = vor.u32 %v1589_v6, %v1585_v21  ;;  %v1595_v29 = vrot.slane %v1593_v16, 5  ;;  %v6870_v3 = vld [vmem:[%s5679_s10 + $0x58] sm:$0xf]  ;;  %v4418_v51 = vld [vmem:[%s5679_s10 + $0xb4] sm:$0xe] }
  0xe8   : > { %v1161_v56 = vrot.slane %v1160_v27, 4  ;;  %v1581_v7 = vrot.slane %v1580_v59, 4  ;;  %v1165_v42 = vrot.slane %v1163_v48, 5  ;;  %v1173_v63 = vshll.u32 %v6819_v10, 16 }
  0xe9   : > { %v4616_v12 = vcombine.low %v6826_v49, %v6832_v2  ;;  %3687 = vmatmul.mubr.bf16.gmra.mrb[92].mxu0 %v4591_v53  ;;  %v1591_v61 = vrot.slane %v1590_v52, 4  ;;  %v4433_v46 = vrot.slane %v4417_v26, 9  ;;  %v1406_v5 = vrot.slane %v6564_v4, 5  ;;  %v6877_v49 = vld [vmem:[%s5679_s10 + $0x5c] sm:$0x1] }
  0xea   : > { %v1409_v18 = vrot.slane %v4401_v44, 5  ;;  %3694 = vmatprep.mubr.bf16.mxu0 %v4608_v19  ;;  %v1586_v1 = vsel %vm5721_vm2, %v1581_v7, %v1585_v21  ;;  %v1166_v10 = vsel %vm5721_vm2, %v1161_v56, %v1165_v42  ;;  %v1170_v20 = vor.u32 %v1169_v40, %v1165_v42  ;;  %v6896_v53 = vld [vmem:[%s5679_s10 + $0xbc] sm:$0x1]  ;;  %v6902_v42 = vld [vmem:[%s5679_s10 + $0x60] sm:$0xf] }
  0xeb   : > { %v1175_v62 = vrot.slane %v1173_v63, 5  ;;  %v1596_v36 = vsel %vm5721_vm2, %v1591_v61, %v1595_v29  ;;  %v1407_v8 = vsel %vm5915_vm5, %v4433_v46, %v1406_v5  ;;  %v1408_v30 = vrot.slane %v1406_v5, 4 }
  0xec   : > { %v1598_v41 = vshrl.u32 %v6866_v60, 16  ;;  %v4632_v47 = vcombine.low %v1586_v1, %v1596_v36  ;;  %v1171_v39 = vrot.slane %v1170_v20, 4  ;;  %v1601_v9 = vshll.u32 %v6866_v60, 16 }
  0xed   : > { %v1607_v43 = vshll.u32 %v6870_v3, 16  ;;  %v1410_v31 = vsel %vm5915_vm5, %v1408_v30, %v1409_v18  ;;  %v1611_v19 = vshrl.u32 %v6870_v3, 16  ;;  %v1617_v54 = vshll.u32 %v6877_v49, 16 }
  0xee   : > { %v1600_v17 = vrot.slane %v1598_v41, 4  ;;  %3791 = vmatprep.mubr.bf16.mxu1 %v4632_v47  ;;  %v1176_v21 = vsel %vm5721_vm2, %v1171_v39, %v1175_v62  ;;  %v4609_v6 = vcombine.low %v1407_v8, %v1410_v31  ;;  %v1603_v16 = vrot.slane %v1601_v9, 5  ;;  %v6920_v8 = vld [vmem:[%s5679_s10 + $0x68] sm:$0x1] }
  0xef   : > { %v1609_v27 = vrot.slane %v1607_v43, 5  ;;  %v4592_v59 = vcombine.low %v1166_v10, %v1176_v21  ;;  %3792 = vmatmul.mubr.bf16.gmra.mrb[96].mxu1 %v4616_v12  ;;  %v1613_v48 = vrot.slane %v1611_v19, 4  ;;  %v1619_v40 = vrot.slane %v1617_v54, 5 }
  0xf0   : > { %v1184_v26 = vor.u32 %v6599_v50, %v6597_v15  ;;  %v1604_v52 = vor.u32 %v1603_v16, %v1600_v17  ;;  %v1187_v29 = vshll.u32 %v6564_v4, 16  ;;  %v1193_v56 = vrot.slane %v1191_v57, 4 }
  0xf1   : > { %v1197_v7 = vshll.u32 %v4401_v44, 16  ;;  %3695 = vmatmul.mubr.bf16.gmra.mrb[96].mxu0 %v4592_v59  ;;  %v1614_v63 = vor.u32 %v1613_v48, %v1609_v27  ;;  %v4617_v61 = vcombine.low %v6866_v60, %v6870_v3  ;;  %v4434_v15 = vrot.slane %v4418_v51, 9  ;;  %v6909_v44 = vld [vmem:[%s5679_s10 + $0x64] sm:$0xf] }
  0xf2   : > { %v1185_v12 = vrot.slane %v1184_v26, 4  ;;  %3702 = vmatprep.mubr.bf16.mxu0 %v4609_v6  ;;  %v1605_v50 = vrot.slane %v1604_v52, 4  ;;  %v1189_v46 = vrot.slane %v1187_v29, 5  ;;  %v1413_v18 = vrot.slane %v6606_v13, 5  ;;  %v4419_v26 = vld [vmem:[%s5679_s10 + $0xc0] sm:$0xe] }
  0xf3   : > { %v1199_v5 = vrot.slane %v1197_v7, 5  ;;  %v1615_v4 = vrot.slane %v1614_v63, 4  ;;  %v1416_v57 = vrot.slane %v6896_v53, 5  ;;  %v1622_v1 = vshrl.u32 %v6902_v42, 16 }
  0xf4   : > { %v1625_v10 = vshll.u32 %v6902_v42, 16  ;;  %v1610_v60 = vsel %vm5721_vm2, %v1605_v50, %v1609_v27  ;;  %v1190_v20 = vsel %vm5721_vm2, %v1185_v12, %v1189_v46  ;;  %v1194_v62 = vor.u32 %v1193_v56, %v1189_v46 }
  0xf5   : > { %v1414_v36 = vsel %vm5915_vm5, %v4434_v15, %v1413_v18  ;;  %v1620_v30 = vsel %vm5721_vm2, %v1615_v4, %v1619_v40  ;;  %v1415_v41 = vrot.slane %v1413_v18, 4  ;;  %v1624_v47 = vrot.slane %v1622_v1, 4 }
  0xf6   : > { %v1627_v39 = vrot.slane %v1625_v10, 5  ;;  %v4633_v9 = vcombine.low %v1610_v60, %v1620_v30  ;;  %v1195_v43 = vrot.slane %v1194_v62, 4  ;;  %v1631_v31 = vshll.u32 %v6909_v44, 16  ;;  %v6955_v30 = vld [vmem:[%s5679_s10 + $0x6c] sm:$0xf] }
  0xf7   : > { %v1635_v17 = vshrl.u32 %v6909_v44, 16  ;;  %v1417_v19 = vsel %vm5915_vm5, %v1415_v41, %v1416_v57  ;;  %v1641_v21 = vshll.u32 %v6920_v8, 16  ;;  %v1208_v6 = vor.u32 %v6637_v45, %v6635_v24  ;;  %v6958_v41 = vld [vmem:[%s5679_s10 + $0x70] sm:$0xf] }
  0xf8   : > { %v1628_v54 = vor.u32 %v1627_v39, %v1624_v47  ;;  %3799 = vmatprep.mubr.bf16.mxu1 %v4633_v9  ;;  %v1200_v16 = vsel %vm5721_vm2, %v1195_v43, %v1199_v5  ;;  %v4610_v27 = vcombine.low %v1414_v36, %v1417_v19  ;;  %v1633_v51 = vrot.slane %v1631_v31, 5  ;;  %v6965_v31 = vld [vmem:[%s5679_s10 + $0x74] sm:$0x1] }
  0xf9   : > { %v1637_v59 = vrot.slane %v1635_v17, 4  ;;  %v4593_v52 = vcombine.low %v1190_v20, %v1200_v16  ;;  %3800 = vmatmul.mubr.bf16.gmra.mrb[100].mxu1 %v4617_v61  ;;  %v1643_v56 = vrot.slane %v1641_v21, 5  ;;  %v1209_v7 = vrot.slane %v1208_v6, 4 }
  0xfa   : > { %v1629_v29 = vrot.slane %v1628_v54, 4  ;;  %v1211_v24 = vshll.u32 %v6606_v13, 16  ;;  %v1217_v45 = vrot.slane %v1215_v33, 4  ;;  %v1221_v50 = vshll.u32 %v6896_v53, 16 }
  0xfb   : > { %v1638_v15 = vor.u32 %v1637_v59, %v1633_v51  ;;  %v1228_v18 = vrot.slane %v1226_v11, 4  ;;  %v7773_v61 = vshll.u32 %v6632_v25, 16  ;;  %3703 = vmatmul.mubr.bf16.gmra.mrb[100].mxu0 %v4593_v52  ;;  %v4403_v25 = vld [vmem:[%s5679_s10 + $0xc8] sm:$0x1]  ;;  %v4618_v20 = vcombine.low %v6902_v42, %v6909_v44 }
  0xfc   : > { %3710 = vmatprep.mubr.bf16.mxu0 %v4610_v27  ;;  %v1634_v53 = vsel %vm5721_vm2, %v1629_v29, %v1633_v51  ;;  %v1213_v60 = vrot.slane %v1211_v24, 5  ;;  %v4435_v62 = vrot.slane %v4419_v26, 9  ;;  %v1420_v36 = vrot.slane %v6644_v32, 5 }
  0xfd   : > { %v1231_v4 = vrot.slane %v7773_v61, 5  ;;  %v1639_v10 = vrot.slane %v1638_v15, 4  ;;  %v1223_v43 = vrot.slane %v1221_v50, 5  ;;  %v1423_v54 = vrot.slane %v4403_v25, 5 }
  0xfe   : > { %v1214_v39 = vsel %vm5721_vm2, %v1209_v7, %v1213_v60  ;;  %v1218_v9 = vor.u32 %v1217_v45, %v1213_v60  ;;  %v1421_v42 = vsel %vm5915_vm5, %v4435_v62, %v1420_v36  ;;  %v1422_v19 = vrot.slane %v1420_v36, 4 }
  0xff   : > { %v1644_v47 = vsel %vm5721_vm2, %v1639_v10, %v1643_v56  ;;  %v1646_v6 = vshrl.u32 %v6955_v30, 16  ;;  %v1649_v16 = vshll.u32 %v6955_v30, 16  ;;  %v1655_v27 = vshll.u32 %v6958_v41, 16 }
 0x100   : > { %v4634_v17 = vcombine.low %v1634_v53, %v1644_v47  ;;  %v1219_v21 = vrot.slane %v1218_v9, 4  ;;  %v1424_v59 = vsel %vm5915_vm5, %v1422_v19, %v1423_v54  ;;  %v7774_v60 = vshrl.u32 %v6644_v32, 16 }
 0x101   : > { %v4611_v56 = vcombine.low %v1421_v42, %v1424_v59  ;;  %v1648_v7 = vrot.slane %v1646_v6, 4  ;;  %v1657_v24 = vrot.slane %v1655_v27, 5  ;;  %v1245_v62 = vshll.u32 %v4403_v25, 16  ;;  %v7000_v6 = vld [vmem:[%s5679_s10 + $0x80] sm:$0x1] }
 0x102   : > { %v4983_v48 = vpop.f32.mrb[0].mxu1  ;;  %v4911_v40 = vpop.f32.mrb[0].mxu0  ;;  %3807 = vmatprep.mubr.bf16.mxu1 %v4634_v17  ;;  %v1224_v29 = vsel %vm5721_vm2, %v1219_v21, %v1223_v43 }
 0x103   : > { %v4984_v63 = vpop.f32.mrb[1].mxu1  ;;  %v4912_v12 = vpop.f32.mrb[1].mxu0  ;;  %3808 = vmatmul.mubr.bf16.gmra.mrb[104].mxu1 %v4618_v20  ;;  %v4594_v15 = vcombine.low %v1214_v39, %v1224_v29  ;;  %v1241_v20 = vrot.slane %v7774_v60, 4  ;;  %v1247_v21 = vrot.slane %v1245_v62, 5  ;;  %v1930_v62 = vrot.slane %v6682_v38, 5 }
 0x104   : > { %v4986_v46 = vpop.f32.mrb[2].mxu1  ;;  %v4914_v5 = vpop.f32.mrb[2].mxu0  ;;  %v6942_v57 = vadd.f32 %v4984_v63, %v4983_v48  ;;  %v6944_v1 = vadd.f32 %v4912_v12, %v4911_v40  ;;  %v1659_v48 = vshrl.u32 %v6958_v41, 16  ;;  %v1665_v40 = vshll.u32 %v6965_v31, 16 }
 0x105   : > { %v4987_v13 = vpop.f32.mrb[3].mxu1  ;;  %v4915_v33 = vpop.f32.mrb[3].mxu0  ;;  %v1651_v63 = vrot.slane %v1649_v16, 5  ;;  %3711 = vmatmul.mubr.bf16.gmra.mrb[104].mxu0 %v4594_v15  ;;  %v4484_v16 = vld [vmem:[%s5679_s10 + $0x18] sm:$0xe] }
 0x106   : > { %v6948_v11 = vadd.f32 %v4987_v13, %v4986_v46  ;;  %v6976_v26 = vadd.f32 %v4915_v33, %v4914_v5  ;;  %v1661_v45 = vrot.slane %v1659_v48, 4  ;;  %v1232_v13 = vor.u32 %v1231_v4, %v1228_v18  ;;  %3718 = vmatprep.mubr.bf16.mxu0 %v4611_v56  ;;  %v6988_v4 = vld [vmem:[%s5679_s10 + $0x78] sm:$0xf] }
 0x107   : > { %v1652_v61 = vor.u32 %v1651_v63, %v1648_v7  ;;  %v1235_v5 = vshll.u32 %v6644_v32, 16  ;;  %v1667_v10 = vrot.slane %v1665_v40, 5  ;;  %v6995_v32 = vld [vmem:[%s5679_s10 + $0x7c] sm:$0xf]  ;;  %v1670_v48 = vshrl.u32 %v6988_v4, 16 }
 0x108   : > { %v1662_v53 = vor.u32 %v1661_v45, %v1657_v24  ;;  %v1233_v39 = vrot.slane %v1232_v13, 4  ;;  %v1673_v29 = vshll.u32 %v6988_v4, 16  ;;  %v1679_v56 = vshll.u32 %v6995_v32, 16 }
 0x109   : > { %v1653_v47 = vrot.slane %v1652_v61, 4  ;;  %v1237_v9 = vrot.slane %v1235_v5, 5  ;;  %v1672_v63 = vrot.slane %v1670_v48, 4  ;;  %v1683_v15 = vshrl.u32 %v6995_v32, 16  ;;  %v7031_v48 = vld [vmem:[%s5679_s10 + $0x84] sm:$0xf] }
 0x10a   : > { %v4917_v51 = vpop.f32.mrb[4].mxu0  ;;  %v4989_v50 = vpop.f32.mrb[4].mxu1  ;;  %v1663_v17 = vrot.slane %v1662_v53, 4  ;;  %v4500_v45 = vrot.slane %v4484_v16, 9  ;;  %v1675_v61 = vrot.slane %v1673_v29, 5  ;;  %v1681_v13 = vrot.slane %v1679_v56, 5 }
 0x10b   : > { %v4918_v52 = vpop.f32.mrb[5].mxu0  ;;  %v4990_v33 = vpop.f32.mrb[5].mxu1  ;;  %v1658_v25 = vsel %vm5721_vm2, %v1653_v47, %v1657_v24  ;;  %v1242_v54 = vor.u32 %v1241_v20, %v1237_v9  ;;  %v1238_v59 = vsel %vm5721_vm2, %v1233_v39, %v1237_v9  ;;  %v1689_v24 = vshll.u32 %v7000_v6, 16 }
 0x10c   : > { %v6980_v12 = vpop.f32.mrb[6].mxu0  ;;  %v4992_v36 = vpop.f32.mrb[6].mxu1  ;;  %v6985_v43 = vadd.f32 %v4990_v33, %v4989_v50  ;;  %v6990_v42 = vadd.f32 %v4918_v52, %v4917_v51  ;;  %v1668_v27 = vsel %vm5721_vm2, %v1663_v17, %v1667_v10  ;;  %v4619_v51 = vcombine.low %v6955_v30, %v6958_v41  ;;  %v4485_v33 = vld [vmem:[%s5679_s10 + $0x24] sm:$0xe] }
 0x10d   : > { %v4921_v46 = vpop.f32.mrb[7].mxu0  ;;  %v4993_v18 = vpop.f32.mrb[7].mxu1  ;;  %v4635_v40 = vcombine.low %v1658_v25, %v1668_v27  ;;  %v1243_v52 = vrot.slane %v1242_v54, 4  ;;  %v1927_v5 = vrot.slane %v6679_v28, 5  ;;  %v1937_v10 = vrot.slane %v6727_v37, 5 }
 0x10e   : > { %v6992_v19 = vadd.f32 %v4993_v18, %v4992_v36  ;;  %v1685_v20 = vrot.slane %v1683_v15, 4  ;;  %v1676_v39 = vor.u32 %v1675_v61, %v1672_v63  ;;  %v7023_v17 = vadd.f32 %v4921_v46, %v6980_v12  ;;  %v7044_v15 = vld [vmem:[%s5679_s10 + $0x88] sm:$0xf] }
 0x10f   : > { %3815 = vmatprep.mubr.bf16.mxu1 %v4635_v40  ;;  %v1248_v30 = vsel %vm5721_vm2, %v1243_v52, %v1247_v21  ;;  %v1928_v9 = vsel %vm5915_vm5, %v4500_v45, %v1927_v5  ;;  %v1929_v18 = vrot.slane %v1927_v5, 4  ;;  %v1691_v37 = vrot.slane %v1689_v24, 5  ;;  %v4487_v5 = vld [vmem:[%s5679_s10 + $0x3c] sm:$0xe] }
 0x110   : > { %v4595_v60 = vcombine.low %v1238_v59, %v1248_v30  ;;  %3816 = vmatmul.mubr.bf16.gmra.mrb[108].mxu1 %v4619_v51  ;;  %v1686_v25 = vor.u32 %v1685_v20, %v1681_v13  ;;  %v4501_v54 = vrot.slane %v4485_v33, 9  ;;  %v1934_v21 = vrot.slane %v6717_v58, 5  ;;  %v7051_v30 = vld [vmem:[%s5679_s10 + $0x8c] sm:$0x1] }
 0x111   : > { %v1677_v16 = vrot.slane %v1676_v39, 4  ;;  %v1931_v27 = vsel %vm5915_vm5, %v1929_v18, %v1930_v62  ;;  %v4620_v29 = vcombine.low %v6988_v4, %v6995_v32  ;;  %v1694_v61 = vshrl.u32 %v7031_v48, 16  ;;  %v4486_v4 = vld [vmem:[%s5679_s10 + $0x30] sm:$0xe] }
 0x112   : > { %v4923_v7 = vpop.f32.mrb[8].mxu0  ;;  %v4995_v36 = vpop.f32.mrb[8].mxu1  ;;  %3719 = vmatmul.mubr.bf16.gmra.mrb[108].mxu0 %v4595_v60  ;;  %v1687_v12 = vrot.slane %v1686_v25, 4  ;;  %v4644_v46 = vcombine.low %v1928_v9, %v1931_v27  ;;  %v1935_v40 = vsel %vm5915_vm5, %v4501_v54, %v1934_v21  ;;  %v1936_v52 = vrot.slane %v1934_v21, 4 }
 0x113   : > { %v4924_v50 = vpop.f32.mrb[9].mxu0  ;;  %v4996_v28 = vpop.f32.mrb[9].mxu1  ;;  %v1682_v58 = vsel %vm5721_vm2, %v1677_v16, %v1681_v13  ;;  %v1697_v13 = vshll.u32 %v7031_v48, 16  ;;  %v1696_v33 = vrot.slane %v1694_v61, 4  ;;  %v1703_v20 = vshll.u32 %v7044_v15, 16 }
 0x114   : > { %v4926_v53 = vpop.f32.mrb[10].mxu0  ;;  %v4998_v38 = vpop.f32.mrb[10].mxu1  ;;  %v7028_v59 = vadd.f32 %v4996_v28, %v4995_v36  ;;  %v7039_v56 = vadd.f32 %v4924_v50, %v4923_v7  ;;  %v1692_v24 = vsel %vm5721_vm2, %v1687_v12, %v1691_v37  ;;  %5383 = vmatprep.mubr.bf16.mxu0 %v4644_v46  ;;  %v1938_v45 = vsel %vm5915_vm5, %v1936_v52, %v1937_v10  ;;  %v7078_v61 = vld [vmem:[%s7757_s2] ss:$0 sm:$0xff] }
 0x115   : > { %v4927_v47 = vpop.f32.mrb[11].mxu0  ;;  %v4999_v51 = vpop.f32.mrb[11].mxu1  ;;  %v4636_v7 = vcombine.low %v1682_v58, %v1692_v24  ;;  %v4645_v50 = vcombine.low %v1935_v40, %v1938_v45  ;;  %v1699_v60 = vrot.slane %v1697_v13, 5  ;;  %v1707_v62 = vshrl.u32 %v7044_v15, 16  ;;  %v7073_v45 = vld [vmem:[%s5679_s10 + $0x90] sm:$0xf] }
 0x116   : > { %v7041_v63 = vadd.f32 %v4999_v51, %v4998_v38  ;;  %v1713_v10 = vshll.u32 %v7051_v30, 16  ;;  %v4502_v39 = vrot.slane %v4486_v4, 9  ;;  %v1941_v9 = vrot.slane %v6754_v35, 5 }
 0x117   : > { %3823 = vmatprep.mubr.bf16.mxu1 %v4636_v7  ;;  %v1944_v18 = vrot.slane %v6766_v0, 5  ;;  %v1700_v25 = vor.u32 %v1699_v60, %v1696_v33  ;;  %v1705_v37 = vrot.slane %v1703_v20, 5  ;;  %v1709_v54 = vrot.slane %v1707_v62, 4 }
 0x118   : > { %7775 = vst [vmem:[#allocation2_spill] sm:$0xff] %v7041_v63  ;;  %3824 = vmatmul.mubr.bf16.gmra.mrb[112].mxu1 %v4620_v29  ;;  %v7062_v21 = vadd.f32 %v4927_v47, %v4926_v53  ;;  %v1942_v16 = vsel %vm5915_vm5, %v4502_v39, %v1941_v9  ;;  %v1943_v27 = vrot.slane %v1941_v9, 4  ;;  %v1715_v0 = vrot.slane %v1713_v10, 5  ;;  %v7098_v10 = vld [vmem:[%s5679_s10 + $0x98] sm:$0x1] }
 0x119   : > { %v1701_v46 = vrot.slane %v1700_v25, 4  ;;  %v1710_v35 = vor.u32 %v1709_v54, %v1705_v37  ;;  %v4503_v40 = vrot.slane %v4487_v5, 9  ;;  %v1948_v53 = vrot.slane %v6793_v23, 5  ;;  %v4488_v9 = vld [vmem:[%s5679_s10 + $0x48] sm:$0xe] }
 0x11a   : > { %v4929_v36 = vpop.f32.mrb[12].mxu0  ;;  %5384 = vmatmul.mubr.bf16.vlgmr.msra.gmra.mrb[112].mxu0 %v4645_v50  ;;  %v5001_v51 = vpop.f32.mrb[12].mxu1  ;;  %v1945_v58 = vsel %vm5915_vm5, %v1943_v27, %v1944_v18  ;;  %v1951_v47 = vrot.slane %v6801_v14, 5  ;;  %v7085_v50 = vld [vmem:[%s5679_s10 + $0x94] sm:$0xf]  ;;  %v3279_v5 = vadd.f32 %v6944_v1, %v7078_v61  ;;  %v1718_v39 = vshrl.u32 %v7073_v45, 16 }
 0x11b   : > { %v4930_v28 = vpop.f32.mrb[13].mxu0  ;;  %v5002_v52 = vpop.f32.mrb[13].mxu1  ;;  %v1706_v13 = vsel %vm5721_vm2, %v1701_v46, %v1705_v37  ;;  %v1711_v4 = vrot.slane %v1710_v35, 4  ;;  %v4646_v7 = vcombine.low %v1942_v16, %v1945_v58  ;;  %v1949_v33 = vsel %vm5915_vm5, %v4503_v40, %v1948_v53 }
 0x11c   : > { %v4932_v38 = vpop.f32.mrb[14].mxu0  ;;  %v7070_v29 = vadd.f32 %v5002_v52, %v5001_v51  ;;  %v5004_v24 = vpop.f32.mrb[14].mxu1  ;;  %v7082_v23 = vadd.f32 %v4930_v28, %v4929_v36  ;;  %v1950_v60 = vrot.slane %v1948_v53, 4  ;;  %v4621_v36 = vcombine.low %v7031_v48, %v7044_v15  ;;  %v4489_v51 = vld [vmem:[%s5679_s10 + $0x54] sm:$0xe] }
 0x11d   : > { %v4933_v12 = vpop.f32.mrb[15].mxu0  ;;  %v5005_v14 = vpop.f32.mrb[15].mxu1  ;;  %v1716_v62 = vsel %vm5721_vm2, %v1711_v4, %v1715_v0  ;;  %5387 = vmatprep.mubr.bf16.mxu0 %v4646_v7  ;;  %v1721_v1 = vshll.u32 %v7073_v45, 16  ;;  %v3282_v18 = vadd.f32 %v6976_v26, %v7078_v61  ;;  %v1727_v37 = vshll.u32 %v7085_v50, 16 }
 0x11e   : > { %7776 = vst [vmem:[#allocation3_spill] sm:$0xff] %v7070_v29  ;;  %v7091_v20 = vadd.f32 %v5005_v14, %v5004_v24  ;;  %v4637_v28 = vcombine.low %v1706_v13, %v1716_v62  ;;  %v1952_v25 = vsel %vm5915_vm5, %v1950_v60, %v1951_v47  ;;  %v1720_v16 = vrot.slane %v1718_v39, 4 }
 0x11f   : > { %v4647_v54 = vcombine.low %v1949_v33, %v1952_v25  ;;  %v1723_v27 = vrot.slane %v1721_v1, 5  ;;  %v1731_v48 = vshrl.u32 %v7085_v50, 16  ;;  %v1729_v46 = vrot.slane %v1727_v37, 5  ;;  %v7130_v25 = vld [vmem:[%s5679_s10 + $0x9c] sm:$0xf] }
 0x120   : > { %7777 = vst [vmem:[#allocation4_spill] sm:$0xff] %v7091_v20  ;;  %3831 = vmatprep.mubr.bf16.mxu1 %v4637_v28  ;;  %v1737_v35 = vshll.u32 %v7098_v10, 16  ;;  %v4504_v0 = vrot.slane %v4488_v9, 9  ;;  %v1955_v40 = vrot.slane %v6832_v2, 5  ;;  %v1958_v47 = vrot.slane %v6843_v55, 5 }
 0x121   : > { %3832 = vmatmul.mubr.bf16.gmra.mrb[116].mxu1 %v4621_v36  ;;  %v1724_v58 = vor.u32 %v1723_v27, %v1720_v16  ;;  %v1733_v53 = vrot.slane %v1731_v48, 4  ;;  %v7113_v24 = vadd.f32 %v4933_v12, %v4932_v38  ;;  %v7117_v7 = vadd.f32 %v6990_v42, %v7078_v61  ;;  %v7137_v48 = vld [vmem:[%s5679_s10 + $0xa0] sm:$0xf] }
 0x122   : > { %v5023_v26 = vpop.f32.mrb[16].mxu1  ;;  %5388 = vmatmul.mubr.bf16.gmra.mrb[116].mxu0 %v4647_v54  ;;  %v7121_v2 = vadd.f32 %v7023_v17, %v7078_v61  ;;  %v1956_v14 = vsel %vm5915_vm5, %v4504_v0, %v1955_v40  ;;  %v1957_v33 = vrot.slane %v1955_v40, 4  ;;  %v1739_v12 = vrot.slane %v1737_v35, 5  ;;  %v7148_v40 = vld [vmem:[%s5679_s10 + $0xa4] sm:$0x1] }
 0x123   : > { %v5024_v13 = vpop.f32.mrb[17].mxu1  ;;  %v1725_v55 = vrot.slane %v1724_v58, 4  ;;  %v1734_v38 = vor.u32 %v1733_v53, %v1729_v46  ;;  %v4505_v36 = vrot.slane %v4489_v51, 9  ;;  %v1962_v9 = vrot.slane %v6870_v3, 5  ;;  %v4490_v58 = vld [vmem:[%s5679_s10 + $0x60] sm:$0xe] }
 0x124   : > { %v4935_v52 = vpop.f32.mrb[16].mxu0  ;;  %v5026_v60 = vpop.f32.mrb[18].mxu1  ;;  %v1959_v42 = vsel %vm5915_vm5, %v1957_v33, %v1958_v47  ;;  %v1965_v17 = vrot.slane %v6877_v49, 5  ;;  %v5025_v28 = vadd.f32 %v5024_v13, %v5023_v26  ;;  %v1742_v26 = vshrl.u32 %v7130_v25, 16 }
 0x125   : > { %v4936_v4 = vpop.f32.mrb[17].mxu0  ;;  %v5027_v39 = vpop.f32.mrb[19].mxu1  ;;  %v1730_v37 = vsel %vm5721_vm2, %v1725_v55, %v1729_v46  ;;  %v1735_v54 = vrot.slane %v1734_v38, 4  ;;  %v4648_v16 = vcombine.low %v1956_v14, %v1959_v42  ;;  %v1963_v3 = vsel %vm5915_vm5, %v4505_v36, %v1962_v9 }
 0x126   : > { %v4938_v62 = vpop.f32.mrb[18].mxu0  ;;  %v7134_v27 = vadd.f32 %v4936_v4, %v4935_v52  ;;  %v1964_v51 = vrot.slane %v1962_v9, 4  ;;  %v7141_v35 = vadd.f32 %v5025_v28, %v3279_v5  ;;  %v5028_v49 = vadd.f32 %v5027_v39, %v5026_v60  ;;  %v4491_v4 = vld [vmem:[%s5679_s10 + $0x6c] sm:$0xe] }
 0x127   : > { %v4939_v1 = vpop.f32.mrb[19].mxu0  ;;  %v1740_v0 = vsel %vm5721_vm2, %v1735_v54, %v1739_v12  ;;  %5391 = vmatprep.mubr.bf16.mxu0 %v4648_v16  ;;  %v4622_v46 = vcombine.low %v7073_v45, %v7085_v50  ;;  %v1745_v52 = vshll.u32 %v7130_v25, 16  ;;  %v1751_v13 = vshll.u32 %v7137_v48, 16 }
 0x128   : > { %v4638_v53 = vcombine.low %v1730_v37, %v1740_v0  ;;  %v1966_v5 = vsel %vm5915_vm5, %v1964_v51, %v1965_v17  ;;  %v7155_v47 = vadd.f32 %v5028_v49, %v3282_v18  ;;  %v1744_v60 = vrot.slane %v1742_v26, 4 }
 0x129   : > { %v4649_v33 = vcombine.low %v1963_v3, %v1966_v5  ;;  %v1747_v45 = vrot.slane %v1745_v52, 5  ;;  %v1755_v55 = vshrl.u32 %v7137_v48, 16  ;;  %v1753_v36 = vrot.slane %v1751_v13, 5  ;;  %v7180_v5 = vld [vmem:[%s5679_s10 + $0xa8] sm:$0xf] }
 0x12a   : > { %v5029_v14 = vpop.f32.mrb[20].mxu1  ;;  %3839 = vmatprep.mubr.bf16.mxu1 %v4638_v53  ;;  %v1761_v39 = vshll.u32 %v7148_v40, 16  ;;  %v4506_v42 = vrot.slane %v4490_v58, 9  ;;  %v1969_v9 = vrot.slane %v6909_v44, 5  ;;  %v1972_v54 = vrot.slane %v6920_v8, 5 }
 0x12b   : > { %v5030_v38 = vpop.f32.mrb[21].mxu1  ;;  %3840 = vmatmul.mubr.bf16.gmra.mrb[120].mxu1 %v4622_v46  ;;  %5392 = vmatmul.mubr.bf16.gmra.mrb[120].mxu0 %v4649_v33  ;;  %v1748_v28 = vor.u32 %v1747_v45, %v1744_v60  ;;  %v1757_v37 = vrot.slane %v1755_v55, 4  ;;  %v7163_v16 = vadd.f32 %v4939_v1, %v4938_v62  ;;  %v7167_v49 = vadd.f32 %v7039_v56, %v7078_v61  ;;  %v7187_v55 = vld [vmem:[%s5679_s10 + $0xac] sm:$0xf] }
 0x12c   : > { %v4941_v12 = vpop.f32.mrb[20].mxu0  ;;  %v5032_v18 = vpop.f32.mrb[22].mxu1  ;;  %v7171_v44 = vadd.f32 %v7062_v21, %v7078_v61  ;;  %v1970_v0 = vsel %vm5915_vm5, %v4506_v42, %v1969_v9  ;;  %v1971_v46 = vrot.slane %v1969_v9, 4  ;;  %v1763_v1 = vrot.slane %v1761_v39, 5 }
 0x12d   : > { %v4942_v17 = vpop.f32.mrb[21].mxu0  ;;  %v5033_v3 = vpop.f32.mrb[23].mxu1  ;;  %v1749_v8 = vrot.slane %v1748_v28, 4  ;;  %v1758_v62 = vor.u32 %v1757_v37, %v1753_v36  ;;  %v4507_v52 = vrot.slane %v4491_v4, 9  ;;  %v1976_v56 = vrot.slane %v6958_v41, 5 }
 0x12e   : > { %v4944_v51 = vpop.f32.mrb[22].mxu0  ;;  %v1973_v58 = vsel %vm5915_vm5, %v1971_v46, %v1972_v54  ;;  %v1979_v53 = vrot.slane %v6965_v31, 5  ;;  %v5031_v21 = vadd.f32 %v5030_v38, %v5029_v14  ;;  %v7184_v45 = vadd.f32 %v4942_v17, %v4941_v12  ;;  %v7195_v14 = vld [vmem:[%s5679_s10 + $0xb0] sm:$0x1]  ;;  %v4492_v17 = vld [vmem:[%s5679_s10 + $0x78] sm:$0xe] }
 0x12f   : > { %v4945_v26 = vpop.f32.mrb[23].mxu0  ;;  %v1754_v13 = vsel %vm5721_vm2, %v1749_v8, %v1753_v36  ;;  %v1759_v33 = vrot.slane %v1758_v62, 4  ;;  %v4650_v60 = vcombine.low %v1970_v0, %v1973_v58  ;;  %v1977_v4 = vsel %vm5915_vm5, %v4507_v52, %v1976_v56  ;;  %v4493_v0 = vld [vmem:[%s5679_s10 + $0x84] sm:$0xe] }
 0x130   : > { %v1978_v39 = vrot.slane %v1976_v56, 4  ;;  %v7192_v41 = vadd.f32 %v5031_v21, %v7117_v7  ;;  %v5034_v31 = vadd.f32 %v5033_v3, %v5032_v18  ;;  %v4623_v12 = vcombine.low %v7130_v25, %v7137_v48 }
 0x131   : > { %v1764_v36 = vsel %vm5721_vm2, %v1759_v33, %v1763_v1  ;;  %5395 = vmatprep.mubr.bf16.mxu0 %v4650_v60  ;;  %v1766_v42 = vshrl.u32 %v7180_v5, 16  ;;  %v1769_v9 = vshll.u32 %v7180_v5, 16  ;;  %v1775_v3 = vshll.u32 %v7187_v55, 16 }
 0x132   : > { %v5035_v38 = vpop.f32.mrb[24].mxu1  ;;  %v4639_v37 = vcombine.low %v1754_v13, %v1764_v36  ;;  %v1980_v18 = vsel %vm5915_vm5, %v1978_v39, %v1979_v53  ;;  %v7207_v54 = vadd.f32 %v5034_v31, %v7121_v2  ;;  %v1779_v52 = vshrl.u32 %v7187_v55, 16 }
 0x133   : > { %v5036_v28 = vpop.f32.mrb[25].mxu1  ;;  %v4651_v25 = vcombine.low %v1977_v4, %v1980_v18  ;;  %v1768_v62 = vrot.slane %v1766_v42, 4  ;;  %v1771_v1 = vrot.slane %v1769_v9, 5  ;;  %v1777_v21 = vrot.slane %v1775_v3, 5 }
 0x134   : > { %v4947_v7 = vpop.f32.mrb[24].mxu0  ;;  %v5038_v46 = vpop.f32.mrb[26].mxu1  ;;  %3847 = vmatprep.mubr.bf16.mxu1 %v4639_v37  ;;  %v1785_v53 = vshll.u32 %v7195_v14, 16  ;;  %v4508_v13 = vrot.slane %v4492_v17, 9  ;;  %v1983_v2 = vrot.slane %v6995_v32, 5  ;;  %v1781_v4 = vrot.slane %v1779_v52, 4 }
 0x135   : > { %v4948_v8 = vpop.f32.mrb[25].mxu0  ;;  %v5039_v58 = vpop.f32.mrb[27].mxu1  ;;  %3848 = vmatmul.mubr.bf16.gmra.mrb[124].mxu1 %v4623_v12  ;;  %5396 = vmatmul.mubr.bf16.gmra.mrb[124].mxu0 %v4651_v25  ;;  %v1772_v60 = vor.u32 %v1771_v1, %v1768_v62  ;;  %v1986_v39 = vrot.slane %v7000_v6, 5  ;;  %v7219_v31 = vadd.f32 %v4945_v26, %v4944_v51  ;;  %v7223_v36 = vadd.f32 %v7082_v23, %v7078_v61 }
 0x136   : > { %v7212_v56 = vpop.f32.mrb[26].mxu0  ;;  %v7227_v42 = vadd.f32 %v7113_v24, %v7078_v61  ;;  %v1984_v32 = vsel %vm5915_vm5, %v4508_v13, %v1983_v2  ;;  %v1985_v12 = vrot.slane %v1983_v2, 4  ;;  %v1782_v17 = vor.u32 %v1781_v4, %v1777_v21  ;;  %v7236_v24 = vld [vmem:[%s5679_s10 + $0xb4] sm:$0xf]  ;;  %v7251_v2 = vld [vmem:[%s5679_s10 + $0xbc] sm:$0x1] }
 0x137   : > { %v7216_v33 = vpop.f32.mrb[27].mxu0  ;;  %v1773_v9 = vrot.slane %v1772_v60, 4  ;;  %v1787_v37 = vrot.slane %v1785_v53, 5  ;;  %v4509_v18 = vrot.slane %v4493_v0, 9  ;;  %v1990_v51 = vrot.slane %v7044_v15, 5 }
 0x138   : > { %v1987_v6 = vsel %vm5915_vm5, %v1985_v12, %v1986_v39  ;;  %v1993_v23 = vrot.slane %v7051_v30, 5  ;;  %v5037_v26 = vadd.f32 %v5036_v28, %v5035_v38  ;;  %v1783_v62 = vrot.slane %v1782_v17, 4  ;;  %v7243_v0 = vld [vmem:[%s5679_s10 + $0xb8] sm:$0xf] }
 0x139   : > { %v1778_v25 = vsel %vm5721_vm2, %v1773_v9, %v1777_v21  ;;  %v4652_v1 = vcombine.low %v1984_v32, %v1987_v6  ;;  %v7240_v52 = vadd.f32 %v4948_v8, %v4947_v7  ;;  %v1991_v15 = vsel %vm5915_vm5, %v4509_v18, %v1990_v51  ;;  %v4494_v32 = vld [vmem:[%s5679_s10 + $0x90] sm:$0xe] }
 0x13a   : > { %v5041_v3 = vpop.f32.mrb[28].mxu1  ;;  %v1992_v30 = vrot.slane %v1990_v51, 4  ;;  %v7248_v38 = vadd.f32 %v5037_v26, %v7167_v49  ;;  %v5040_v28 = vadd.f32 %v5039_v58, %v5038_v46  ;;  %v1788_v7 = vsel %vm5721_vm2, %v1783_v62, %v1787_v37 }
 0x13b   : > { %v5042_v53 = vpop.f32.mrb[29].mxu1  ;;  %5399 = vmatprep.mubr.bf16.mxu0 %v4652_v1  ;;  %v4624_v8 = vcombine.low %v7180_v5, %v7187_v55  ;;  %v1790_v4 = vshrl.u32 %v7236_v24, 16  ;;  %v1793_v39 = vshll.u32 %v7236_v24, 16  ;;  %v4640_v46 = vcombine.low %v1778_v25, %v1788_v7 }
 0x13c   : > { %v4953_v13 = vpop.f32.mrb[28].mxu0  ;;  %v5044_v21 = vpop.f32.mrb[30].mxu1  ;;  %v1994_v58 = vsel %vm5915_vm5, %v1992_v30, %v1993_v23  ;;  %v7265_v9 = vadd.f32 %v5040_v28, %v7171_v44  ;;  %v1799_v17 = vshll.u32 %v7243_v0, 16  ;;  %v1803_v51 = vshrl.u32 %v7243_v0, 16  ;;  %v4495_v23 = vld [vmem:[%s5679_s10 + $0x9c] sm:$0xe] }
 0x13d   : > { %v4954_v60 = vpop.f32.mrb[29].mxu0  ;;  %v5045_v12 = vpop.f32.mrb[31].mxu1  ;;  %v4653_v5 = vcombine.low %v1991_v15, %v1994_v58  ;;  %v1792_v18 = vrot.slane %v1790_v4, 4  ;;  %v1795_v6 = vrot.slane %v1793_v39, 5  ;;  %3855 = vmatprep.mubr.bf16.mxu1 %v4640_v46  ;;  %v1809_v62 = vshll.u32 %v7251_v2, 16 }
 0x13e   : > { %v7260_v49 = vpop.f32.mrb[30].mxu0  ;;  %v1801_v26 = vrot.slane %v1799_v17, 5  ;;  %v4510_v25 = vrot.slane %v4494_v32, 9  ;;  %v1997_v1 = vrot.slane %v7085_v50, 5  ;;  %3856 = vmatmul.mubr.bf16.gmra.mrb[128].mxu1 %v4624_v8  ;;  %v1805_v30 = vrot.slane %v1803_v51, 4 }
 0x13f   : > { %v7268_v37 = vpop.f32.mrb[31].mxu0  ;;  %5400 = vmatmul.mubr.bf16.gmra.mrb[128].mxu0 %v4653_v5  ;;  %v1796_v44 = vor.u32 %v1795_v6, %v1792_v18  ;;  %v2000_v28 = vrot.slane %v7098_v10, 5  ;;  %v7277_v15 = vadd.f32 %v7216_v33, %v7212_v56  ;;  %v7281_v7 = vadd.f32 %v7134_v27, %v7078_v61  ;;  %v7300_v18 = vld [vmem:[%s5679_s10 + $0xc0] sm:$0xf] }
 0x140   : > { %v7285_v4 = vadd.f32 %v7163_v16, %v7078_v61  ;;  %v1998_v50 = vsel %vm5915_vm5, %v4510_v25, %v1997_v1  ;;  %v1999_v8 = vrot.slane %v1997_v1, 4  ;;  %v1806_v32 = vor.u32 %v1805_v30, %v1801_v26 }
 0x141   : > { %v1797_v10 = vrot.slane %v1796_v44, 4  ;;  %v1811_v56 = vrot.slane %v1809_v62, 5  ;;  %v4511_v33 = vrot.slane %v4495_v23, 9  ;;  %v2004_v16 = vrot.slane %v7137_v48, 5  ;;  %v7311_v44 = vld [vmem:[%s5679_s10 + $0xc4] sm:$0xf] }
 0x142   : > { %v7289_v39 = vpop.f32.mrb[32].mxu1  ;;  %v2001_v27 = vsel %vm5915_vm5, %v1999_v8, %v2000_v28  ;;  %v2007_v17 = vrot.slane %v7148_v40, 5  ;;  %v5043_v5 = vadd.f32 %v5042_v53, %v5041_v3  ;;  %v1807_v25 = vrot.slane %v1806_v32, 4  ;;  %v4496_v32 = vld [vmem:[%s5679_s10 + $0xa8] sm:$0xe] }
 0x143   : > { %v7291_v46 = vpop.f32.mrb[33].mxu1  ;;  %v1802_v62 = vsel %vm5721_vm2, %v1797_v10, %v1801_v26  ;;  %v4654_v1 = vcombine.low %v1998_v50, %v2001_v27  ;;  %v7308_v23 = vadd.f32 %v4954_v60, %v4953_v13  ;;  %v2005_v3 = vsel %vm5915_vm5, %v4511_v33, %v2004_v16  ;;  %v7329_v50 = vld [vmem:[%s5679_s10 + $0xc8] sm:$0x1] }
 0x144   : > { %v7293_v58 = vpop.f32.mrb[32].mxu0  ;;  %v7302_v6 = vpop.f32.mrb[34].mxu1  ;;  %v2006_v53 = vrot.slane %v2004_v16, 4  ;;  %v7320_v30 = vadd.f32 %v5043_v5, %v7223_v36  ;;  %v5046_v28 = vadd.f32 %v5045_v12, %v5044_v21  ;;  %v1812_v13 = vsel %vm5721_vm2, %v1807_v25, %v1811_v56  ;;  %v4497_v5 = vld [vmem:[%s5679_s10 + $0xb4] sm:$0xe] }
 0x145   : > { %v7304_v51 = vpop.f32.mrb[33].mxu0  ;;  %v7313_v48 = vpop.f32.mrb[35].mxu1  ;;  %5403 = vmatprep.mubr.bf16.mxu0 %v4654_v1  ;;  %v4625_v60 = vcombine.low %v7236_v24, %v7243_v0  ;;  %v1814_v8 = vshrl.u32 %v7300_v18, 16  ;;  %v1817_v10 = vshll.u32 %v7300_v18, 16  ;;  %v4641_v36 = vcombine.low %v1802_v62, %v1812_v13 }
 0x146   : > { %v7315_v40 = vpop.f32.mrb[34].mxu0  ;;  %v2008_v21 = vsel %vm5915_vm5, %v2006_v53, %v2007_v17  ;;  %v7337_v12 = vadd.f32 %v5046_v28, %v7227_v42  ;;  %v1823_v56 = vshll.u32 %v7311_v44, 16  ;;  %v1827_v24 = vshrl.u32 %v7311_v44, 16 }
 0x147   : > { %v7322_v26 = vpop.f32.mrb[35].mxu0  ;;  %v4655_v33 = vcombine.low %v2005_v3, %v2008_v21  ;;  %v1816_v27 = vrot.slane %v1814_v8, 4  ;;  %v1819_v16 = vrot.slane %v1817_v10, 5  ;;  %3863 = vmatprep.mubr.bf16.mxu1 %v4641_v36  ;;  %v1833_v1 = vshll.u32 %v7329_v50, 16 }
 0x148   : > { %v1825_v25 = vrot.slane %v1823_v56, 5  ;;  %v4512_v20 = vrot.slane %v4496_v32, 9  ;;  %v2011_v62 = vrot.slane %v7187_v55, 5  ;;  %3864 = vmatmul.mubr.bf16.gmra.mrb[132].mxu1 %v4625_v60  ;;  %v1829_v17 = vrot.slane %v1827_v24, 4  ;;  %v7380_v24 = vld [vmem:[%s5679_s10 + $0xcc] sm:$0xf] }
 0x149   : > { %5404 = vmatmul.mubr.bf16.gmra.mrb[132].mxu0 %v4655_v33  ;;  %v1820_v42 = vor.u32 %v1819_v16, %v1816_v27  ;;  %v2014_v3 = vrot.slane %v7195_v14, 5  ;;  %v7349_v53 = vadd.f32 %v7268_v37, %v7260_v49  ;;  %v7357_v10 = vadd.f32 %v7184_v45, %v7078_v61 }
 0x14a   : > { %v7344_v13 = vpop.f32.mrb[36].mxu1  ;;  %v7361_v55 = vadd.f32 %v7219_v31, %v7078_v61  ;;  %v2012_v14 = vsel %vm5915_vm5, %v4512_v20, %v2011_v62  ;;  %v2013_v60 = vrot.slane %v2011_v62, 4  ;;  %v1830_v36 = vor.u32 %v1829_v17, %v1825_v25 }
 0x14b   : > { %v7351_v28 = vpop.f32.mrb[37].mxu1  ;;  %v1821_v37 = vrot.slane %v1820_v42, 4  ;;  %v1835_v21 = vrot.slane %v1833_v1, 5  ;;  %v4513_v56 = vrot.slane %v4497_v5, 9  ;;  %v2018_v27 = vrot.slane %v7243_v0, 5 }
 0x14c   : > { %v7353_v8 = vpop.f32.mrb[36].mxu0  ;;  %v7365_v32 = vpop.f32.mrb[38].mxu1  ;;  %v2015_v31 = vsel %vm5915_vm5, %v2013_v60, %v2014_v3  ;;  %v2021_v20 = vrot.slane %v7251_v2, 5  ;;  %v5049_v16 = vadd.f32 %v7291_v46, %v7289_v39  ;;  %v1831_v1 = vrot.slane %v1830_v36, 4  ;;  %v7391_v0 = vld [vmem:[%s5679_s10 + $0xd0] sm:$0xf] }
 0x14d   : > { %v7367_v49 = vpop.f32.mrb[37].mxu0  ;;  %v7369_v45 = vpop.f32.mrb[39].mxu1  ;;  %v1826_v5 = vsel %vm5721_vm2, %v1821_v37, %v1825_v25  ;;  %v4656_v42 = vcombine.low %v2012_v14, %v2015_v31  ;;  %v7388_v17 = vadd.f32 %v7304_v51, %v7293_v58  ;;  %v2019_v2 = vsel %vm5915_vm5, %v4513_v56, %v2018_v27  ;;  %v7405_v51 = vld [vmem:[%s5679_s10 + $0xd4] sm:$0x1]  ;;  %v4498_v37 = vld [vmem:[%s5679_s10 + $0xc0] sm:$0xe] }
 0x14e   : > { %v7371_v33 = vpop.f32.mrb[38].mxu0  ;;  %v2020_v39 = vrot.slane %v2018_v27, 4  ;;  %v7396_v46 = vadd.f32 %v5049_v16, %v7281_v7  ;;  %v5052_v3 = vadd.f32 %v7313_v48, %v7302_v6  ;;  %v1836_v25 = vsel %vm5721_vm2, %v1831_v1, %v1835_v21  ;;  %v4499_v21 = vld [vmem:[%s5679_s10 + $0xcc] sm:$0xe] }
 0x14f   : > { %v7382_v62 = vpop.f32.mrb[39].mxu0  ;;  %5407 = vmatprep.mubr.bf16.mxu0 %v4656_v42  ;;  %v4626_v58 = vcombine.low %v7300_v18, %v7311_v44  ;;  %v1838_v14 = vshrl.u32 %v7380_v24, 16  ;;  %v1841_v60 = vshll.u32 %v7380_v24, 16  ;;  %v4642_v36 = vcombine.low %v1826_v5, %v1836_v25 }
 0x150   : > { %v2022_v7 = vsel %vm5915_vm5, %v2020_v39, %v2021_v20  ;;  %v7413_v6 = vadd.f32 %v5052_v3, %v7285_v4  ;;  %v1847_v48 = vshll.u32 %v7391_v0, 16  ;;  %v1851_v16 = vshrl.u32 %v7391_v0, 16 }
 0x151   : > { %v4657_v31 = vcombine.low %v2019_v2, %v2022_v7  ;;  %v1840_v18 = vrot.slane %v1838_v14, 4  ;;  %v1843_v27 = vrot.slane %v1841_v60, 5  ;;  %3871 = vmatprep.mubr.bf16.mxu1 %v4642_v36  ;;  %v1857_v5 = vshll.u32 %v7405_v51, 16 }
 0x152   : > { %v5059_v56 = vpop.f32.mrb[40].mxu1  ;;  %v1849_v29 = vrot.slane %v1847_v48, 5  ;;  %v4514_v25 = vrot.slane %v4498_v37, 9  ;;  %v2025_v20 = vrot.slane %v7311_v44, 5  ;;  %3872 = vmatmul.mubr.bf16.gmra.mrb[136].mxu1 %v4626_v58  ;;  %v1853_v63 = vrot.slane %v1851_v16, 4 }
 0x153   : > { %v5060_v1 = vpop.f32.mrb[41].mxu1  ;;  %5408 = vmatmul.mubr.bf16.gmra.mrb[136].mxu0 %v4657_v31  ;;  %v1844_v3 = vor.u32 %v1843_v27, %v1840_v18  ;;  %v2028_v2 = vrot.slane %v7329_v50, 5  ;;  %v7423_v14 = vadd.f32 %v7322_v26, %v7315_v40  ;;  %v3327_v7 = vadd.f32 %v7240_v52, %v7078_v61 }
 0x154   : > { %v4971_v42 = vpop.f32.mrb[40].mxu0  ;;  %v5062_v4 = vpop.f32.mrb[42].mxu1  ;;  %v3330_v44 = vadd.f32 %v7277_v15, %v7078_v61  ;;  %v2026_v58 = vsel %vm5915_vm5, %v4514_v25, %v2025_v20  ;;  %v2027_v37 = vrot.slane %v2025_v20, 4  ;;  %v1854_v18 = vor.u32 %v1853_v63, %v1849_v29 }
 0x155   : > { %v4972_v39 = vpop.f32.mrb[41].mxu0  ;;  %v5063_v60 = vpop.f32.mrb[43].mxu1  ;;  %v1845_v31 = vrot.slane %v1844_v3, 4  ;;  %v1859_v50 = vrot.slane %v1857_v5, 5  ;;  %v4515_v27 = vrot.slane %v4499_v21, 9  ;;  %v2032_v26 = vrot.slane %v7391_v0, 5 }
 0x156   : > { %v4974_v36 = vpop.f32.mrb[42].mxu0  ;;  %v2029_v40 = vsel %vm5915_vm5, %v2027_v37, %v2028_v2  ;;  %v2035_v16 = vrot.slane %v7405_v51, 5  ;;  %v5055_v52 = vadd.f32 %v7351_v28, %v7344_v13  ;;  %v1855_v25 = vrot.slane %v1854_v18, 4 }
 0x157   : > { %v4975_v48 = vpop.f32.mrb[43].mxu0  ;;  %v1850_v15 = vsel %vm5721_vm2, %v1845_v31, %v1849_v29  ;;  %v4658_v20 = vcombine.low %v2026_v58, %v2029_v40  ;;  %v4967_v63 = vadd.f32 %v7367_v49, %v7353_v8  ;;  %v2033_v21 = vsel %vm5915_vm5, %v4515_v27, %v2032_v26 }
 0x158   : > { %v2034_v5 = vrot.slane %v2032_v26, 4  ;;  %v7444_v3 = vadd.f32 %v5055_v52, %v7357_v10  ;;  %v5058_v51 = vadd.f32 %v7369_v45, %v7365_v32  ;;  %v1860_v13 = vsel %vm5721_vm2, %v1855_v25, %v1859_v50 }
 0x159   : > { %5411 = vmatprep.mubr.bf16.mxu0 %v4658_v20  ;;  %v4627_v29 = vcombine.low %v7380_v24, %v7391_v0  ;;  %v4970_v28 = vadd.f32 %v7382_v62, %v7371_v33  ;;  %v5061_v8 = vadd.f32 %v5060_v1, %v5059_v56  ;;  %v4643_v37 = vcombine.low %v1850_v15, %v1860_v13 }
 0x15a   : > { %v5065_v2 = vpop.f32.mrb[44].mxu1  ;;  %v2036_v10 = vsel %vm5915_vm5, %v2034_v5, %v2035_v16  ;;  %v7457_v32 = vadd.f32 %v5058_v51, %v7361_v55  ;;  %v4973_v45 = vadd.f32 %v4972_v39, %v4971_v42  ;;  %v3335_v18 = vadd.f32 %v7308_v23, %v7078_v61 }
 0x15b   : > { %v5066_v49 = vpop.f32.mrb[45].mxu1  ;;  %v4659_v24 = vcombine.low %v2033_v21, %v2036_v10  ;;  %v7461_v0 = vadd.f32 %v5061_v8, %v3327_v7  ;;  %v5064_v33 = vadd.f32 %v5063_v60, %v5062_v4  ;;  %v3338_v1 = vadd.f32 %v7349_v53, %v7078_v61  ;;  %3879 = vmatprep.mubr.bf16.mxu1 %v4643_v37 }
 0x15c   : > { %v4977_v58 = vpop.f32.mrb[44].mxu0  ;;  %v5068_v34 = vpop.f32.mrb[46].mxu1  ;;  %v4976_v22 = vadd.f32 %v4975_v48, %v4974_v36  ;;  %v5067_v50 = vadd.f32 %v5066_v49, %v5065_v2  ;;  %3880 = vmatmul.mubr.bf16.gmra.mrb[140].mxu1 %v4627_v29  ;;  %v3343_v36 = vadd.f32 %v7388_v17, %v7078_v61  ;;  %v3346_v25 = vadd.f32 %v7423_v14, %v7078_v61 }
 0x15d   : > { %v4978_v31 = vpop.f32.mrb[45].mxu0  ;;  %v5069_v62 = vpop.f32.mrb[47].mxu1  ;;  %5412 = vmatmul.mubr.bf16.gmra.mrb[140].mxu0 %v4659_v24  ;;  %v7467_v39 = vadd.f32 %v5064_v33, %v3330_v44 }
 0x15e   : > { %v4980_v56 = vpop.f32.mrb[46].mxu0  ;;  %v7465_v55 = vadd.f32 %v4978_v31, %v4977_v58  ;;  %v5070_v23 = vadd.f32 %v5069_v62, %v5068_v34  ;;  %v7471_v7 = vadd.f32 %v5067_v50, %v3335_v18  ;;  %v3351_v58 = vadd.f32 %v4967_v63, %v7078_v61 }
 0x15f   : > { %v4981_v42 = vpop.f32.mrb[47].mxu0 }
 0x160   : > { %v7469_v27 = vadd.f32 %v4981_v42, %v4980_v56  ;;  %v7473_v4 = vadd.f32 %v5070_v23, %v3338_v1 }
 0x162   : > { %v5071_v60 = vpop.f32.mrb[48].mxu1 }
 0x163   : > { %v5072_v53 = vpop.f32.mrb[49].mxu1 }
 0x164   : > { %v5135_v40 = vpop.f32.mrb[48].mxu0  ;;  %v5073_v48 = vadd.f32 %v5072_v53, %v5071_v60  ;;  %v5074_v16 = vpop.f32.mrb[50].mxu1  ;;  %v3359_v60 = vadd.f32 %v4973_v45, %v7078_v61 }
 0x165   : > { %v5136_v26 = vpop.f32.mrb[49].mxu0  ;;  %v5075_v44 = vpop.f32.mrb[51].mxu1 }
 0x166   : > { %v5137_v52 = vadd.f32 %v5136_v26, %v5135_v40  ;;  %v5138_v15 = vpop.f32.mrb[50].mxu0  ;;  %v7479_v20 = vadd.f32 %v5073_v48, %v3343_v36  ;;  %v5076_v21 = vadd.f32 %v5075_v44, %v5074_v16 }
 0x167   : > { %v5139_v5 = vpop.f32.mrb[51].mxu0 }
 0x168   : > { %v7482_v51 = vadd.f32 %v5137_v52, %v7141_v35  ;;  %v5140_v2 = vadd.f32 %v5139_v5, %v5138_v15  ;;  %v7484_v13 = vadd.f32 %v5076_v21, %v3346_v25  ;;  %v3354_v35 = vadd.f32 %v4970_v28, %v7078_v61 }
 0x16a   : > { %v7487_v17 = vadd.f32 %v5140_v2, %v7155_v47  ;;  %v5077_v29 = vpop.f32.mrb[52].mxu1 }
 0x16b   : > { %v5078_v49 = vpop.f32.mrb[53].mxu1 }
 0x16c   : > { %v5141_v8 = vpop.f32.mrb[52].mxu0  ;;  %v5079_v37 = vadd.f32 %v5078_v49, %v5077_v29  ;;  %v5080_v10 = vpop.f32.mrb[54].mxu1  ;;  %v3367_v29 = vadd.f32 %v7465_v55, %v7078_v61 }
 0x16d   : > { %v5142_v14 = vpop.f32.mrb[53].mxu0  ;;  %v5081_v18 = vpop.f32.mrb[55].mxu1 }
 0x16e   : > { %v5143_v34 = vadd.f32 %v5142_v14, %v5141_v8  ;;  %v5144_v31 = vpop.f32.mrb[54].mxu0  ;;  %v7491_v24 = vadd.f32 %v5079_v37, %v3351_v58  ;;  %v5082_v33 = vadd.f32 %v5081_v18, %v5080_v10 }
 0x16f   : > { %v5145_v62 = vpop.f32.mrb[55].mxu0 }
 0x170   : > { %v7494_v47 = vadd.f32 %v5143_v34, %v7192_v41  ;;  %v5146_v56 = vadd.f32 %v5145_v62, %v5144_v31  ;;  %v7496_v1 = vadd.f32 %v5082_v33, %v3354_v35  ;;  %v3362_v41 = vadd.f32 %v4976_v22, %v7078_v61 }
 0x172   : > { %v7499_v63 = vadd.f32 %v5146_v56, %v7207_v54  ;;  %v5083_v50 = vpop.f32.mrb[56].mxu1 }
 0x173   : > { %v5084_v23 = vpop.f32.mrb[57].mxu1 }
 0x174   : > { %v5147_v42 = vpop.f32.mrb[56].mxu0  ;;  %v5085_v40 = vadd.f32 %v5084_v23, %v5083_v50  ;;  %v5086_v53 = vpop.f32.mrb[58].mxu1  ;;  %v3375_v50 = vadd.f32 %v6942_v57, %v7078_v61 }
 0x175   : > { %v5148_v28 = vpop.f32.mrb[57].mxu0  ;;  %v5087_v26 = vpop.f32.mrb[59].mxu1 }
 0x176   : > { %v5149_v36 = vadd.f32 %v5148_v28, %v5147_v42  ;;  %v5150_v48 = vpop.f32.mrb[58].mxu0  ;;  %v7503_v16 = vadd.f32 %v5085_v40, %v3359_v60  ;;  %v5088_v52 = vadd.f32 %v5087_v26, %v5086_v53 }
 0x177   : > { %v5151_v15 = vpop.f32.mrb[59].mxu0 }
 0x178   : > { %v7506_v54 = vadd.f32 %v5149_v36, %v7248_v38  ;;  %v5152_v44 = vadd.f32 %v5151_v15, %v5150_v48  ;;  %v7508_v25 = vadd.f32 %v5088_v52, %v3362_v41  ;;  %v3370_v38 = vadd.f32 %v7469_v27, %v7078_v61 }
 0x17a   : > { %v7511_v45 = vadd.f32 %v5152_v44, %v7265_v9  ;;  %v5089_v21 = vpop.f32.mrb[60].mxu1 }
 0x17b   : > { %v5090_v2 = vpop.f32.mrb[61].mxu1 }
 0x17c   : > { %v5153_v5 = vpop.f32.mrb[60].mxu0  ;;  %v5091_v22 = vadd.f32 %v5090_v2, %v5089_v21  ;;  %v5092_v49 = vpop.f32.mrb[62].mxu1  ;;  %v3383_v21 = vadd.f32 %v6985_v43, %v7078_v61 }
 0x17d   : > { %v5154_v8 = vpop.f32.mrb[61].mxu0  ;;  %v5093_v14 = vpop.f32.mrb[63].mxu1 }
 0x17e   : > { %v5155_v58 = vadd.f32 %v5154_v8, %v5153_v5  ;;  %v5156_v37 = vpop.f32.mrb[62].mxu0  ;;  %v7517_v10 = vadd.f32 %v5091_v22, %v3367_v29  ;;  %v5094_v34 = vadd.f32 %v5093_v14, %v5092_v49 }
 0x17f   : > { %v5157_v9 = vpop.f32.mrb[63].mxu0 }
 0x180   : > { %v7520_v31 = vadd.f32 %v5155_v58, %v7320_v30  ;;  %v5158_v18 = vadd.f32 %v5157_v9, %v5156_v37  ;;  %v7522_v35 = vadd.f32 %v5094_v34, %v3370_v38  ;;  %v3378_v30 = vadd.f32 %v6948_v11, %v7078_v61 }
 0x182   : > { %v7525_v55 = vadd.f32 %v5158_v18, %v7337_v12  ;;  %v5095_v33 = vpop.f32.mrb[64].mxu1 }
 0x183   : > { %v5096_v56 = vpop.f32.mrb[65].mxu1 }
 0x184   : > { %v5159_v62 = vpop.f32.mrb[64].mxu0  ;;  %v5097_v27 = vadd.f32 %v5096_v56, %v5095_v33  ;;  %v5098_v23 = vpop.f32.mrb[66].mxu1  ;;  %v3391_v33 = vadd.f32 %v7028_v59, %v7078_v61 }
 0x185   : > { %v5160_v42 = vpop.f32.mrb[65].mxu0  ;;  %v5099_v28 = vpop.f32.mrb[67].mxu1 }
 0x186   : > { %v5161_v60 = vadd.f32 %v5160_v42, %v5159_v62  ;;  %v5162_v40 = vpop.f32.mrb[66].mxu0  ;;  %v7531_v53 = vadd.f32 %v5097_v27, %v3375_v50  ;;  %v5100_v36 = vadd.f32 %v5099_v28, %v5098_v23 }
 0x187   : > { %v5163_v12 = vpop.f32.mrb[67].mxu0 }
 0x188   : > { %v7534_v48 = vadd.f32 %v5161_v60, %v7396_v46  ;;  %v5164_v26 = vadd.f32 %v5163_v12, %v5162_v40  ;;  %v7536_v41 = vadd.f32 %v5100_v36, %v3378_v30  ;;  %v3386_v46 = vadd.f32 %v6992_v19, %v7078_v61 }
 0x18a   : > { %v7539_v57 = vadd.f32 %v5164_v26, %v7413_v6  ;;  %v5101_v52 = vpop.f32.mrb[68].mxu1 }
 0x18b   : > { %v5102_v44 = vpop.f32.mrb[69].mxu1 }
 0x18c   : > { %v5165_v15 = vpop.f32.mrb[68].mxu0  ;;  %v5103_v11 = vadd.f32 %v5102_v44, %v5101_v52  ;;  %v5104_v2 = vpop.f32.mrb[70].mxu1 }
 0x18d   : > { %v5166_v5 = vpop.f32.mrb[69].mxu0  ;;  %v5105_v8 = vpop.f32.mrb[71].mxu1 }
 0x18e   : > { %v5167_v29 = vadd.f32 %v5166_v5, %v5165_v15  ;;  %v5168_v22 = vpop.f32.mrb[70].mxu0  ;;  %v7545_v49 = vadd.f32 %v5103_v11, %v3383_v21  ;;  %v5106_v58 = vadd.f32 %v5105_v8, %v5104_v2  ;;  %v7779_v15 = vld [vmem:[#allocation3_spill] sm:$0xff] }
 0x18f   : > { %v5169_v6 = vpop.f32.mrb[71].mxu0 }
 0x190   : > { %v7548_v37 = vadd.f32 %v5167_v29, %v7444_v3  ;;  %v5170_v14 = vadd.f32 %v5169_v6, %v5168_v22  ;;  %v7550_v38 = vadd.f32 %v5106_v58, %v3386_v46  ;;  %v7778_v3 = vld [vmem:[#allocation2_spill] sm:$0xff]  ;;  %v7780_v22 = vld [vmem:[#allocation4_spill] sm:$0xff] }
 0x191   : > { %v3394_v23 = vadd.f32 %v7778_v3, %v7078_v61  ;;  %v5583_v61 = vld [vmem:[%s7757_s2] ss:$0 sm:$0xff] }
 0x192   : > { %v7553_v43 = vadd.f32 %v5170_v14, %v7457_v32  ;;  %v5107_v34 = vpop.f32.mrb[72].mxu1  ;;  %v3399_v44 = vadd.f32 %v5583_v61, %v7779_v15  ;;  %v3402_v8 = vadd.f32 %v5583_v61, %v7780_v22 }
 0x193   : > { %v5108_v18 = vpop.f32.mrb[73].mxu1 }
 0x194   : > { %v5171_v9 = vpop.f32.mrb[72].mxu0  ;;  %v5109_v19 = vadd.f32 %v5108_v18, %v5107_v34  ;;  %v5110_v56 = vpop.f32.mrb[74].mxu1 }
 0x195   : > { %v5172_v62 = vpop.f32.mrb[73].mxu0  ;;  %v5111_v42 = vpop.f32.mrb[75].mxu1 }
 0x196   : > { %v5173_v50 = vadd.f32 %v5172_v62, %v5171_v9  ;;  %v5174_v27 = vpop.f32.mrb[74].mxu0  ;;  %v7559_v60 = vadd.f32 %v5109_v19, %v3391_v33  ;;  %v5112_v40 = vadd.f32 %v5111_v42, %v5110_v56 }
 0x197   : > { %v5175_v32 = vpop.f32.mrb[75].mxu0 }
 0x198   : > { %v7562_v28 = vadd.f32 %v5173_v50, %v7461_v0  ;;  %v5176_v30 = vadd.f32 %v5175_v32, %v5174_v27  ;;  %v7564_v36 = vadd.f32 %v5112_v40, %v3394_v23 }
 0x19a   : > { %v7567_v59 = vadd.f32 %v5176_v30, %v7467_v39  ;;  %v5113_v12 = vpop.f32.mrb[76].mxu1 }
 0x19b   : > { %v5114_v52 = vpop.f32.mrb[77].mxu1 }
 0x19c   : > { %v5177_v26 = vpop.f32.mrb[76].mxu0  ;;  %v5115_v21 = vadd.f32 %v5114_v52, %v5113_v12  ;;  %v5116_v5 = vpop.f32.mrb[78].mxu1 }
 0x19d   : > { %v5178_v11 = vpop.f32.mrb[77].mxu0  ;;  %v5117_v29 = vpop.f32.mrb[79].mxu1 }
 0x19e   : > { %v5179_v0 = vadd.f32 %v5178_v11, %v5177_v26  ;;  %v5180_v2 = vpop.f32.mrb[78].mxu0  ;;  %v7574_v46 = vadd.f32 %v5115_v21, %v3399_v44  ;;  %v5118_v39 = vadd.f32 %v5117_v29, %v5116_v5 }
 0x19f   : > { %v5181_v58 = vpop.f32.mrb[79].mxu0 }
 0x1a0   : > { %v7577_v6 = vadd.f32 %v5179_v0, %v7471_v7  ;;  %v5182_v14 = vadd.f32 %v5181_v58, %v5180_v2  ;;  %v7579_v34 = vadd.f32 %v5118_v39, %v3402_v8 }
 0x1a2   : > { %v7582_v9 = vadd.f32 %v5182_v14, %v7473_v4  ;;  %v5247_v18 = vpop.f32.mrb[80].mxu1 }
 0x1a3   : > { %v5248_v19 = vpop.f32.mrb[81].mxu1 }
 0x1a4   : > { %v5183_v33 = vpop.f32.mrb[80].mxu0  ;;  %v5249_v56 = vadd.f32 %v5248_v19, %v5247_v18  ;;  %v5250_v50 = vpop.f32.mrb[82].mxu1 }
 0x1a5   : > { %v5184_v62 = vpop.f32.mrb[81].mxu0  ;;  %v5251_v3 = vpop.f32.mrb[83].mxu1 }
 0x1a6   : > { %v5185_v27 = vadd.f32 %v5184_v62, %v5183_v33  ;;  %v5186_v42 = vpop.f32.mrb[82].mxu0  ;;  %v5252_v40 = vadd.f32 %v5251_v3, %v5250_v50  ;;  %v7585_v7 = vadd.f32 %v5249_v56, %v7482_v51 }
 0x1a7   : > { %v5187_v23 = vpop.f32.mrb[83].mxu0 }
 0x1a8   : > { %v7588_v32 = vadd.f32 %v5185_v27, %v7479_v20  ;;  %v5188_v30 = vadd.f32 %v5187_v23, %v5186_v42  ;;  %v7591_v4 = vadd.f32 %v5252_v40, %v7487_v17 }
 0x1aa   : > { %v7594_v12 = vadd.f32 %v5188_v30, %v7484_v13  ;;  %v5253_v26 = vpop.f32.mrb[84].mxu1 }
 0x1ab   : > { %v5254_v61 = vpop.f32.mrb[85].mxu1 }
 0x1ac   : > { %v5189_v52 = vpop.f32.mrb[84].mxu0  ;;  %v5255_v44 = vadd.f32 %v5254_v61, %v5253_v26  ;;  %v5256_v21 = vpop.f32.mrb[86].mxu1 }
 0x1ad   : > { %v5190_v15 = vpop.f32.mrb[85].mxu0  ;;  %v5257_v51 = vpop.f32.mrb[87].mxu1 }
 0x1ae   : > { %v5191_v11 = vadd.f32 %v5190_v15, %v5189_v52  ;;  %v5192_v5 = vpop.f32.mrb[86].mxu0  ;;  %v5258_v2 = vadd.f32 %v5257_v51, %v5256_v21  ;;  %v7597_v20 = vadd.f32 %v5255_v44, %v7494_v47 }
 0x1af   : > { %v5193_v0 = vpop.f32.mrb[87].mxu0 }
 0x1b0   : > { %v7600_v17 = vadd.f32 %v5191_v11, %v7491_v24  ;;  %v5194_v29 = vadd.f32 %v5193_v0, %v5192_v5  ;;  %v7603_v13 = vadd.f32 %v5258_v2, %v7499_v63 }
 0x1b2   : > { %v7606_v22 = vadd.f32 %v5194_v29, %v7496_v1  ;;  %v5259_v8 = vpop.f32.mrb[88].mxu1 }
 0x1b3   : > { %v5260_v39 = vpop.f32.mrb[89].mxu1 }
 0x1b4   : > { %v5195_v58 = vpop.f32.mrb[88].mxu0  ;;  %v5261_v14 = vadd.f32 %v5260_v39, %v5259_v8  ;;  %v5262_v18 = vpop.f32.mrb[90].mxu1 }
 0x1b5   : > { %v5196_v33 = vpop.f32.mrb[89].mxu0  ;;  %v5263_v19 = vpop.f32.mrb[91].mxu1 }
 0x1b6   : > { %v5197_v62 = vadd.f32 %v5196_v33, %v5195_v58  ;;  %v5198_v47 = vpop.f32.mrb[90].mxu0  ;;  %v5264_v56 = vadd.f32 %v5263_v19, %v5262_v18  ;;  %v7609_v24 = vadd.f32 %v5261_v14, %v7506_v54 }
 0x1b7   : > { %v5199_v50 = vpop.f32.mrb[91].mxu0 }
 0x1b8   : > { %v7612_v63 = vadd.f32 %v5197_v62, %v7503_v16  ;;  %v5200_v27 = vadd.f32 %v5199_v50, %v5198_v47  ;;  %v7615_v1 = vadd.f32 %v5264_v56, %v7511_v45 }
 0x1ba   : > { %v7618_v42 = vadd.f32 %v5200_v27, %v7508_v25  ;;  %v5265_v3 = vpop.f32.mrb[92].mxu1 }
 0x1bb   : > { %v5266_v23 = vpop.f32.mrb[93].mxu1 }
 0x1bc   : > { %v5201_v40 = vpop.f32.mrb[92].mxu0  ;;  %v5267_v30 = vadd.f32 %v5266_v23, %v5265_v3  ;;  %v5268_v26 = vpop.f32.mrb[94].mxu1 }
 0x1bd   : > { %v5202_v52 = vpop.f32.mrb[93].mxu0  ;;  %v5269_v61 = vpop.f32.mrb[95].mxu1 }
 0x1be   : > { %v5203_v54 = vadd.f32 %v5202_v52, %v5201_v40  ;;  %v5204_v15 = vpop.f32.mrb[94].mxu0  ;;  %v5270_v44 = vadd.f32 %v5269_v61, %v5268_v26  ;;  %v7621_v16 = vadd.f32 %v5267_v30, %v7520_v31 }
 0x1bf   : > { %v5205_v21 = vpop.f32.mrb[95].mxu0 }
 0x1c0   : > { %v7624_v45 = vadd.f32 %v5203_v54, %v7517_v10  ;;  %v5206_v11 = vadd.f32 %v5205_v21, %v5204_v15  ;;  %v7627_v25 = vadd.f32 %v5270_v44, %v7525_v55 }
 0x1c2   : > { %v7630_v5 = vadd.f32 %v5206_v11, %v7522_v35  ;;  %v5271_v51 = vpop.f32.mrb[96].mxu1 }
 0x1c3   : > { %v5272_v0 = vpop.f32.mrb[97].mxu1 }
 0x1c4   : > { %v5207_v2 = vpop.f32.mrb[96].mxu0  ;;  %v5273_v29 = vadd.f32 %v5272_v0, %v5271_v51  ;;  %v5274_v8 = vpop.f32.mrb[98].mxu1 }
 0x1c5   : > { %v5208_v39 = vpop.f32.mrb[97].mxu0  ;;  %v5275_v58 = vpop.f32.mrb[99].mxu1 }
 0x1c6   : > { %v5209_v31 = vadd.f32 %v5208_v39, %v5207_v2  ;;  %v5210_v14 = vpop.f32.mrb[98].mxu0  ;;  %v5276_v18 = vadd.f32 %v5275_v58, %v5274_v8  ;;  %v7633_v10 = vadd.f32 %v5273_v29, %v7534_v48 }
 0x1c7   : > { %v5211_v33 = vpop.f32.mrb[99].mxu0 }
 0x1c8   : > { %v7636_v55 = vadd.f32 %v5209_v31, %v7531_v53  ;;  %v5212_v19 = vadd.f32 %v5211_v33, %v5210_v14  ;;  %v7639_v35 = vadd.f32 %v5276_v18, %v7539_v57 }
 0x1ca   : > { %v7642_v62 = vadd.f32 %v5212_v19, %v7536_v41 }
 0x1cc   : > { %v5277_v47 = vpop.f32.mrb[100].mxu1 }
 0x1cd   : > { %v5278_v56 = vpop.f32.mrb[101].mxu1 }
 0x1ce   : > { %v5213_v50 = vpop.f32.mrb[100].mxu0  ;;  %v5279_v27 = vadd.f32 %v5278_v56, %v5277_v47  ;;  %v5280_v3 = vpop.f32.mrb[102].mxu1 }
 0x1cf   : > { %v5214_v23 = vpop.f32.mrb[101].mxu0  ;;  %v5281_v40 = vpop.f32.mrb[103].mxu1 }
 0x1d0   : > { %v5215_v48 = vadd.f32 %v5214_v23, %v5213_v50  ;;  %v5216_v30 = vpop.f32.mrb[102].mxu0  ;;  %v5282_v26 = vadd.f32 %v5281_v40, %v5280_v3  ;;  %v7645_v53 = vadd.f32 %v5279_v27, %v7548_v37 }
 0x1d1   : > { %v5217_v52 = vpop.f32.mrb[103].mxu0 }
 0x1d2   : > { %v7648_v57 = vadd.f32 %v5215_v48, %v7545_v49  ;;  %v5218_v61 = vadd.f32 %v5217_v52, %v5216_v30  ;;  %v7651_v41 = vadd.f32 %v5282_v26, %v7553_v43 }
 0x1d4   : > { %v7654_v54 = vadd.f32 %v5218_v61, %v7550_v38 }
 0x1d6   : > { %v5283_v15 = vpop.f32.mrb[104].mxu1 }
 0x1d7   : > { %v5284_v44 = vpop.f32.mrb[105].mxu1 }
 0x1d8   : > { %v5285_v21 = vadd.f32 %v5284_v44, %v5283_v15  ;;  %v5286_v11 = vpop.f32.mrb[106].mxu1  ;;  %v5219_v51 = vpop.f32.mrb[104].mxu0 }
 0x1d9   : > { %v5287_v0 = vpop.f32.mrb[107].mxu1  ;;  %v5220_v2 = vpop.f32.mrb[105].mxu0 }
 0x1da   : > { %v5288_v37 = vadd.f32 %v5287_v0, %v5286_v11  ;;  %v7657_v29 = vadd.f32 %v5285_v21, %v7562_v28  ;;  %v5221_v49 = vadd.f32 %v5220_v2, %v5219_v51  ;;  %v5222_v8 = vpop.f32.mrb[106].mxu0 }
 0x1db   : > { %v5223_v39 = vpop.f32.mrb[107].mxu0 }
 0x1dc   : > { %v7660_v43 = vadd.f32 %v5288_v37, %v7567_v59  ;;  %v7663_v38 = vadd.f32 %v5221_v49, %v7559_v60  ;;  %v5224_v58 = vadd.f32 %v5223_v39, %v5222_v8 }
 0x1de   : > { %v7666_v31 = vadd.f32 %v5224_v58, %v7564_v36 }
 0x1e3   : > { %v5289_v14 = vpop.f32.mrb[108].mxu1 }
 0x1e4   : > { %v5290_v18 = vpop.f32.mrb[109].mxu1 }
 0x1e5   : > { %v5225_v33 = vpop.f32.mrb[108].mxu0  ;;  %v5291_v19 = vadd.f32 %v5290_v18, %v5289_v14  ;;  %v5292_v47 = vpop.f32.mrb[110].mxu1 }
 0x1e6   : > { %v5226_v28 = vpop.f32.mrb[109].mxu0  ;;  %v5293_v56 = vpop.f32.mrb[111].mxu1 }
 0x1e7   : > { %v5227_v50 = vadd.f32 %v5226_v28, %v5225_v33  ;;  %v5228_v27 = vpop.f32.mrb[110].mxu0  ;;  %v5294_v3 = vadd.f32 %v5293_v56, %v5292_v47  ;;  %v7669_v59 = vadd.f32 %v5291_v19, %v7577_v6 }
 0x1e8   : > { %v5229_v60 = vpop.f32.mrb[111].mxu0 }
 0x1e9   : > { %v7672_v23 = vadd.f32 %v5227_v50, %v7574_v46  ;;  %v5230_v36 = vadd.f32 %v5229_v60, %v5228_v27  ;;  %v7675_v40 = vadd.f32 %v5294_v3, %v7582_v9 }
 0x1eb   : > { %v7678_v48 = vadd.f32 %v5230_v36, %v7579_v34  ;;  %v5295_v30 = vpop.f32.mrb[112].mxu1 }
 0x1ec   : > { %v5296_v61 = vpop.f32.mrb[113].mxu1 }
 0x1ed   : > { %v5385_v26 = vpop.f32.mrb[112].mxu0  ;;  %v5297_v44 = vadd.f32 %v5296_v61, %v5295_v30  ;;  %v5298_v21 = vpop.f32.mrb[114].mxu1 }
 0x1ee   : > { %v3931_v52 = vadd.f32 %v5385_v26, %v7597_v20  ;;  %v3922_v15 = vpop.f32.mrb[113].mxu0  ;;  %v5299_v51 = vpop.f32.mrb[115].mxu1 }
 0x1ef   : > { %v3923_v6 = vadd.f32 %v3922_v15, %v7585_v7  ;;  %v5386_v11 = vpop.f32.mrb[114].mxu0  ;;  %v5300_v0 = vadd.f32 %v5299_v51, %v5298_v21  ;;  %v7686_v2 = vadd.f32 %v5297_v44, %v7588_v32 }
 0x1f0   : > { %v3934_v46 = vadd.f32 %v5386_v11, %v7603_v13  ;;  %v3925_v9 = vpop.f32.mrb[115].mxu0  ;;  %v4051_v37 = vmax.f32 %v3931_v52, 0.0 }
 0x1f1   : > { %v3926_v34 = vadd.f32 %v3925_v9, %v7591_v4  ;;  %v4049_v49 = vmax.f32 %v3923_v6, 0.0  ;;  %v7694_v13 = vadd.f32 %v5300_v0, %v7594_v12 }
 0x1f2   : > { %v4052_v20 = vmax.f32 %v3934_v46, 0.0 }
 0x1f3   : > { %v4050_v7 = vmax.f32 %v3926_v34, 0.0 }
 0x1f4   : > { %v4808_v8 = vpack.c.bf16 %v4052_v20, %v4051_v37  ;;  %v5301_v32 = vpop.f32.mrb[116].mxu1 }
 0x1f5   : > { %v4803_v39 = vpack.c.bf16 %v4050_v7, %v4049_v49  ;;  %v5389_v4 = vpop.f32.mrb[116].mxu0  ;;  %v5302_v14 = vpop.f32.mrb[117].mxu1 }
 0x1f6   : > { %4880 = vst [vmem:[%s7691_s11 + $0x8] sm:$0xff] %v4808_v8   ;;  %v3947_v58 = vadd.f32 %v5389_v4, %v7621_v16  ;;  %v3938_v18 = vpop.f32.mrb[117].mxu0  ;;  %v5303_v33 = vadd.f32 %v5302_v14, %v5301_v32  ;;  %v5304_v47 = vpop.f32.mrb[118].mxu1 }
 0x1f7   : > { %4804 = vst [vmem:[%s7691_s11] sm:$0xff] %v4803_v39   ;;  %v3939_v19 = vadd.f32 %v3938_v18, %v7609_v24  ;;  %v5390_v28 = vpop.f32.mrb[118].mxu0  ;;  %v5305_v56 = vpop.f32.mrb[119].mxu1 }
 0x1f8   : > { %v3950_v12 = vadd.f32 %v5390_v28, %v7627_v25  ;;  %v3941_v50 = vpop.f32.mrb[119].mxu0  ;;  %v5306_v27 = vadd.f32 %v5305_v56, %v5304_v47  ;;  %v3834_v60 = vadd.f32 %v5303_v33, %v7600_v17  ;;  %v4055_v36 = vmax.f32 %v3947_v58, 0.0 }
 0x1f9   : > { %v3942_v3 = vadd.f32 %v3941_v50, %v7615_v1  ;;  %v4053_v30 = vmax.f32 %v3939_v19, 0.0 }
 0x1fa   : > { %v4056_v16 = vmax.f32 %v3950_v12, 0.0  ;;  %v3837_v52 = vadd.f32 %v5306_v27, %v7606_v22 }
 0x1fb   : > { %v4054_v26 = vmax.f32 %v3942_v3, 0.0 }
 0x1fc   : > { %v4818_v24 = vpack.c.bf16 %v4056_v16, %v4055_v36 }
 0x1fd   : > { %v4813_v61 = vpack.c.bf16 %v4054_v26, %v4053_v30 }
 0x1fe   : > { %4882 = vst [vmem:[%s7691_s11 + $0x18] sm:$0xff] %v4818_v24   ;;  %v5307_v15 = vpop.f32.mrb[120].mxu1  ;;  %v5393_v44 = vpop.f32.mrb[120].mxu0 }
 0x1ff   : > { %4881 = vst [vmem:[%s7691_s11 + $0x10] sm:$0xff] %v4813_v61   ;;  %v3963_v25 = vadd.f32 %v5393_v44, %v7645_v53  ;;  %v5308_v6 = vpop.f32.mrb[121].mxu1  ;;  %v3954_v21 = vpop.f32.mrb[121].mxu0 }
 0x200   : > { %v5309_v11 = vadd.f32 %v5308_v6, %v5307_v15  ;;  %v3955_v1 = vadd.f32 %v3954_v21, %v7633_v10  ;;  %v5310_v17 = vpop.f32.mrb[122].mxu1  ;;  %v5394_v46 = vpop.f32.mrb[122].mxu0 }
 0x201   : > { %v3966_v51 = vadd.f32 %v5394_v46, %v7651_v41  ;;  %v5311_v22 = vpop.f32.mrb[123].mxu1  ;;  %v3957_v9 = vpop.f32.mrb[123].mxu0  ;;  %v4059_v53 = vmax.f32 %v3963_v25, 0.0 }
 0x202   : > { %v5312_v0 = vadd.f32 %v5311_v22, %v5310_v17  ;;  %v3958_v34 = vadd.f32 %v3957_v9, %v7639_v35  ;;  %v7711_v37 = vadd.f32 %v5309_v11, %v7612_v63  ;;  %v4057_v49 = vmax.f32 %v3955_v1, 0.0 }
 0x203   : > { %v4060_v20 = vmax.f32 %v3966_v51, 0.0 }
 0x204   : > { %v4058_v7 = vmax.f32 %v3958_v34, 0.0  ;;  %v7714_v10 = vadd.f32 %v5312_v0, %v7618_v42 }
 0x205   : > { %v4828_v8 = vpack.c.bf16 %v4060_v20, %v4059_v53 }
 0x206   : > { %v4823_v39 = vpack.c.bf16 %v4058_v7, %v4057_v49 }
 0x207   : > { %4884 = vst [vmem:[%s7691_s11 + $0x28] sm:$0xff] %v4828_v8  }
 0x208   : > { %4883 = vst [vmem:[%s7691_s11 + $0x20] sm:$0xff] %v4823_v39   ;;  %v5313_v41 = vpop.f32.mrb[124].mxu1  ;;  %v5397_v32 = vpop.f32.mrb[124].mxu0 }
 0x209   : > { %v3979_v4 = vadd.f32 %v5397_v32, %v7669_v59  ;;  %v5314_v58 = vpop.f32.mrb[125].mxu1  ;;  %v3970_v35 = vpop.f32.mrb[125].mxu0 }
 0x20a   : > { %v5315_v14 = vadd.f32 %v5314_v58, %v5313_v41  ;;  %v3971_v63 = vadd.f32 %v3970_v35, %v7657_v29  ;;  %v5316_v18 = vpop.f32.mrb[126].mxu1  ;;  %v5398_v33 = vpop.f32.mrb[126].mxu0 }
 0x20b   : > { %v3982_v42 = vadd.f32 %v5398_v33, %v7675_v40  ;;  %v5317_v19 = vpop.f32.mrb[127].mxu1  ;;  %v3973_v47 = vpop.f32.mrb[127].mxu0  ;;  %v4063_v50 = vmax.f32 %v3979_v4, 0.0 }
 0x20c   : > { %v5318_v28 = vadd.f32 %v5317_v19, %v5316_v18  ;;  %v3974_v12 = vadd.f32 %v3973_v47, %v7660_v43  ;;  %v3850_v56 = vadd.f32 %v5315_v14, %v7624_v45  ;;  %v4061_v27 = vmax.f32 %v3971_v63, 0.0 }
 0x20d   : > { %v4064_v59 = vmax.f32 %v3982_v42, 0.0 }
 0x20e   : > { %v4062_v3 = vmax.f32 %v3974_v12, 0.0  ;;  %v3853_v36 = vadd.f32 %v5318_v28, %v7630_v5 }
 0x20f   : > { %v4838_v29 = vpack.c.bf16 %v4064_v59, %v4063_v50 }
 0x210   : > { %v4833_v16 = vpack.c.bf16 %v4062_v3, %v4061_v27 }
 0x211   : > { %4886 = vst [vmem:[%s7691_s11 + $0x38] sm:$0xff] %v4838_v29   ;;  %v5319_v30 = vpop.f32.mrb[128].mxu1 }
 0x212   : > { %4885 = vst [vmem:[%s7691_s11 + $0x30] sm:$0xff] %v4833_v16   ;;  %v5401_v26 = vpop.f32.mrb[128].mxu0  ;;  %v5320_v24 = vpop.f32.mrb[129].mxu1 }
 0x213   : > { %v3995_v40 = vadd.f32 %v5401_v26, %v3834_v60  ;;  %v3986_v61 = vpop.f32.mrb[129].mxu0  ;;  %v5321_v15 = vadd.f32 %v5320_v24, %v5319_v30  ;;  %v5322_v45 = vpop.f32.mrb[130].mxu1 }
 0x214   : > { %v3987_v43 = vadd.f32 %v3986_v61, %v7686_v2  ;;  %v5402_v44 = vpop.f32.mrb[130].mxu0  ;;  %v5323_v6 = vpop.f32.mrb[131].mxu1 }
 0x215   : > { %v3998_v25 = vadd.f32 %v5402_v44, %v3837_v52  ;;  %v3989_v21 = vpop.f32.mrb[131].mxu0  ;;  %v5324_v5 = vadd.f32 %v5323_v6, %v5322_v45  ;;  %v3858_v1 = vadd.f32 %v5321_v15, %v7636_v55  ;;  %v4067_v17 = vmax.f32 %v3995_v40, 0.0 }
 0x216   : > { %v3990_v11 = vadd.f32 %v3989_v21, %v7694_v13  ;;  %v4065_v60 = vmax.f32 %v3987_v43, 0.0 }
 0x217   : > { %v4068_v46 = vmax.f32 %v3998_v25, 0.0  ;;  %v3861_v22 = vadd.f32 %v5324_v5, %v7642_v62 }
 0x218   : > { %v4066_v51 = vmax.f32 %v3990_v11, 0.0 }
 0x219   : > { %v4848_v9 = vpack.c.bf16 %v4068_v46, %v4067_v17 }
 0x21a   : > { %v4843_v2 = vpack.c.bf16 %v4066_v51, %v4065_v60 }
 0x21b   : > { %4888 = vst [vmem:[%s7691_s11 + $0x48] sm:$0xff] %v4848_v9   ;;  %v5325_v0 = vpop.f32.mrb[132].mxu1 }
 0x21c   : > { %4887 = vst [vmem:[%s7691_s11 + $0x40] sm:$0xff] %v4843_v2   ;;  %v5405_v34 = vpop.f32.mrb[132].mxu0  ;;  %v5326_v53 = vpop.f32.mrb[133].mxu1 }
 0x21d   : > { %v4011_v52 = vadd.f32 %v5405_v34, %v3850_v56  ;;  %v4002_v20 = vpop.f32.mrb[133].mxu0  ;;  %v5327_v49 = vadd.f32 %v5326_v53, %v5325_v0  ;;  %v5328_v55 = vpop.f32.mrb[134].mxu1 }
 0x21e   : > { %v4003_v13 = vadd.f32 %v4002_v20, %v7711_v37  ;;  %v5406_v7 = vpop.f32.mrb[134].mxu0  ;;  %v5329_v39 = vpop.f32.mrb[135].mxu1 }
 0x21f   : > { %v4014_v8 = vadd.f32 %v5406_v7, %v3853_v36  ;;  %v4005_v41 = vpop.f32.mrb[135].mxu0  ;;  %v5330_v62 = vadd.f32 %v5329_v39, %v5328_v55  ;;  %v3866_v4 = vadd.f32 %v5327_v49, %v7648_v57  ;;  %v4071_v58 = vmax.f32 %v4011_v52, 0.0 }
 0x220   : > { %v4006_v32 = vadd.f32 %v4005_v41, %v7714_v10  ;;  %v4069_v14 = vmax.f32 %v4003_v13, 0.0 }
 0x221   : > { %v4072_v35 = vmax.f32 %v4014_v8, 0.0  ;;  %v3869_v18 = vadd.f32 %v5330_v62, %v7654_v54 }
 0x222   : > { %v4070_v63 = vmax.f32 %v4006_v32, 0.0 }
 0x223   : > { %v4858_v33 = vpack.c.bf16 %v4072_v35, %v4071_v58 }
 0x224   : > { %v4853_v37 = vpack.c.bf16 %v4070_v63, %v4069_v14 }
 0x225   : > { %4890 = vst [vmem:[%s7691_s11 + $0x58] sm:$0xff] %v4858_v33   ;;  %v5331_v42 = vpop.f32.mrb[136].mxu1 }
 0x226   : > { %4889 = vst [vmem:[%s7691_s11 + $0x50] sm:$0xff] %v4853_v37   ;;  %v5409_v19 = vpop.f32.mrb[136].mxu0  ;;  %v5332_v28 = vpop.f32.mrb[137].mxu1 }
 0x227   : > { %v4027_v47 = vadd.f32 %v5409_v19, %v3866_v4  ;;  %v4018_v12 = vpop.f32.mrb[137].mxu0  ;;  %v5333_v56 = vadd.f32 %v5332_v28, %v5331_v42  ;;  %v5334_v10 = vpop.f32.mrb[138].mxu1 }
 0x228   : > { %v4019_v50 = vadd.f32 %v4018_v12, %v3858_v1  ;;  %v5410_v57 = vpop.f32.mrb[138].mxu0  ;;  %v5335_v27 = vpop.f32.mrb[139].mxu1 }
 0x229   : > { %v4030_v59 = vadd.f32 %v5410_v57, %v3869_v18  ;;  %v4021_v3 = vpop.f32.mrb[139].mxu0  ;;  %v5336_v36 = vadd.f32 %v5335_v27, %v5334_v10  ;;  %v3874_v29 = vadd.f32 %v5333_v56, %v7663_v38  ;;  %v4075_v16 = vmax.f32 %v4027_v47, 0.0 }
 0x22a   : > { %v4022_v54 = vadd.f32 %v4021_v3, %v3861_v22  ;;  %v4073_v26 = vmax.f32 %v4019_v50, 0.0 }
 0x22b   : > { %v4076_v30 = vmax.f32 %v4030_v59, 0.0  ;;  %v3877_v24 = vadd.f32 %v5336_v36, %v7666_v31 }
 0x22c   : > { %v4074_v40 = vmax.f32 %v4022_v54, 0.0 }
 0x22d   : > { %v4868_v61 = vpack.c.bf16 %v4076_v30, %v4075_v16 }
 0x22e   : > { %v4863_v15 = vpack.c.bf16 %v4074_v40, %v4073_v26 }
 0x22f   : > { %4892 = vst [vmem:[%s7691_s11 + $0x68] sm:$0xff] %v4868_v61   ;;  %v5337_v43 = vpop.f32.mrb[140].mxu1 }
 0x230   : > { %4891 = vst [vmem:[%s7691_s11 + $0x60] sm:$0xff] %v4863_v15   ;;  %v5413_v45 = vpop.f32.mrb[140].mxu0  ;;  %v5338_v44 = vpop.f32.mrb[141].mxu1 }
 0x231   : > { %v4034_v25 = vpop.f32.mrb[141].mxu0  ;;  %v5339_v6 = vadd.f32 %v5338_v44, %v5337_v43  ;;  %v5340_v5 = vpop.f32.mrb[142].mxu1 }
 0x232   : > { %v4035_v21 = vadd.f32 %v4034_v25, %v3874_v29  ;;  %v5414_v11 = vpop.f32.mrb[142].mxu0  ;;  %v5341_v38 = vpop.f32.mrb[143].mxu1 }
 0x233   : > { %v4037_v1 = vpop.f32.mrb[143].mxu0  ;;  %v3882_v17 = vadd.f32 %v5339_v6, %v7672_v23  ;;  %v5342_v46 = vadd.f32 %v5341_v38, %v5340_v5 }
 0x234   : > { %v4038_v31 = vadd.f32 %v4037_v1, %v3877_v24  ;;  %v4077_v51 = vmax.f32 %v4035_v21, 0.0 }
 0x235   : > { %v4043_v60 = vadd.f32 %v5413_v45, %v3882_v17  ;;  %v3885_v22 = vadd.f32 %v5342_v46, %v7678_v48 }
 0x236   : > { %v4078_v9 = vmax.f32 %v4038_v31, 0.0 }
 0x237   : > { %v4046_v2 = vadd.f32 %v5414_v11, %v3885_v22  ;;  %v4079_v34 = vmax.f32 %v4043_v60, 0.0 }
 0x238   : > { %v4873_v0 = vpack.c.bf16 %v4078_v9, %v4077_v51 }
 0x239   : > { %v4080_v52 = vmax.f32 %v4046_v2, 0.0 }
 0x23a   : > { %4893 = vst [vmem:[%s7691_s11 + $0x70] sm:$0xff] %v4873_v0  }
 0x23b   : > { %v4878_v53 = vpack.c.bf16 %v4080_v52, %v4079_v34 }
 0x23d   : > { %4894 = vst [vmem:[%s7691_s11 + $0x78] sm:$0xff] %v4878_v53  }
 0x23e PF: > { %s13_s14 = sadd.s32 1, %s5606_s14   ;;  %s7781_s12 = smov %s5602_s13 }
 0x23f   : > { %p10_p5 = scmp.ge.s32.totalorder %s13_s14, 4   ;;  %s7782_s13 = smov %s7784_s15 }
 0x241   :  { %12 = sbr.rel (!%p10_p5) target bundleno = 2 (0x2), region = 65 }

</bundles_post_ra>
